<compile_context>
chip_gen: v6e
topology: v6e:2x2x1
jax: 0.10.0
libtpu: 0.0.40
codegen_flags: <defaults>
</compile_context>

<pallas_src>
from functools import partial

import jax
import jax.numpy as jnp
from jax import lax
from jax.experimental import pallas as pl
from jax.experimental.pallas import tpu as pltpu

NEG_SLOPE = 0.05  # LeakyReLU slope used by activation('lrelu', neg_slope=0.05)


def _irb_minus_kernel(B, H, W, C, DC,
                      x_ref, w1_ref, b1_ref, w2_ref, b2_ref,
                      w4a_ref, w34_ref, b34_ref,
                      w5_ref, b5_ref, w6_ref, b6_ref,
                      o_ref, xpad_ref, d1pad_ref):
    """One block of B images per grid step.

    x_ref     : (B, H, W, C)        unpadded input (f32)
    o_ref     : (B, H*W, C)         output
    xpad_ref  : (B, H+2, W+2, C)    VMEM scratch, zero-padded input
    d1pad_ref : (B, H+2, W+2, DC)   VMEM scratch, zero-padded dist1
    """
    HW = H * W
    BHW = B * HW
    f32 = jnp.float32
    bf16 = jnp.bfloat16

    def lrelu(v):
        return jnp.where(v >= 0, v, NEG_SLOPE * v)

    # ---- in-kernel zero padding of the input (replaces the wrapper jnp.pad).
    #      Border is zeroed every step (megacore-safe); interior is fully
    #      overwritten every step.
    x = x_ref[...]                                            # (B, H, W, C) f32
    zrow = jnp.zeros((B, 1, W + 2, C), f32)
    zcol = jnp.zeros((B, H + 2, 1, C), f32)
    xpad_ref[:, 0:1, :, :] = zrow
    xpad_ref[:, H + 1:H + 2, :, :] = zrow
    xpad_ref[:, :, 0:1, :] = zcol
    xpad_ref[:, :, W + 1:W + 2, :] = zcol
    xpad_ref[:, 1:H + 1, 1:W + 1, :] = x

    # Cast the padded block to bf16 once; all nine taps slice this copy
    # (~5.8x fewer cast elements than casting per-tap im2col patches).
    xpad_b = xpad_ref[...].astype(bf16)                       # (B, H+2, W+2, C)

    # ---- distill_1 : 3x3 conv (C -> DC) + LeakyReLU(0.05), per-tap dots ----
    acc1 = None
    t = 0
    for ky in range(3):
        for kx in range(3):
            tap = xpad_b[:, ky:ky + H, kx:kx + W, :].reshape(BHW, C)
            p = jnp.dot(tap, w1_ref[t * C:(t + 1) * C, :],
                        preferred_element_type=f32)
            acc1 = p if acc1 is None else acc1 + p
            t += 1
    dist1 = lrelu(acc1 + b1_ref[...])                         # (BHW, DC) f32

    # ---- zero-pad dist1 into VMEM scratch (border only; interior is fully
    #      overwritten every grid step) ----
    zrow_d = jnp.zeros((B, 1, W + 2, DC), f32)
    zcol_d = jnp.zeros((B, H + 2, 1, DC), f32)
    d1pad_ref[:, 0:1, :, :] = zrow_d
    d1pad_ref[:, H + 1:H + 2, :, :] = zrow_d
    d1pad_ref[:, :, 0:1, :] = zcol_d
    d1pad_ref[:, :, W + 1:W + 2, :] = zcol_d
    d1pad_ref[:, 1:H + 1, 1:W + 1, :] = dist1.reshape(B, H, W, DC)

    d1pad_b = d1pad_ref[...].astype(bf16)                     # cast once (bf16)

    # ---- mid_1 : 3x3 conv (DC -> C), per-tap dots; reuse the center tap as
    #      the bf16 copy of dist1 for the fused `conv` matmul below ----
    acc2 = None
    dist1_b = None
    t = 0
    for ky in range(3):
        for kx in range(3):
            tap = d1pad_b[:, ky:ky + H, kx:kx + W, :].reshape(BHW, DC)
            if ky == 1 and kx == 1:
                dist1_b = tap                                 # == dist1 (bf16)
            p = jnp.dot(tap, w2_ref[t * DC:(t + 1) * DC, :],
                        preferred_element_type=f32)
            acc2 = p if acc2 is None else acc2 + p
            t += 1
    mid1 = acc2 + b2_ref[...]                                 # (BHW, C) f32

    x_flat = x.reshape(BHW, C)
    rem1 = x_flat - mid1                                      # (BHW, C) f32

    # ---- conv with distill_2 folded in:
    #      z = dist1 @ w4a + rem1 @ (w3 @ w4b) + (b3 @ w4b + b4) ----
    z = (jnp.dot(dist1_b, w4a_ref[...], preferred_element_type=f32)
         + jnp.dot(rem1.astype(bf16), w34_ref[...], preferred_element_type=f32)
         + b34_ref[...])                                      # (BHW, C)

    # ---- esa = CCALayer1 : per-image (stdv + mean), squeeze/excite, gate ----
    # Cross-sublane reductions go through the MXU via a per-image selector
    # matrix; two-pass variance (mean first, then centered sum of squares).
    inv_hw = 1.0 / float(HW)
    row_idx = lax.broadcasted_iota(jnp.int32, (B, BHW), 1)    # 0..BHW-1
    img_id = lax.broadcasted_iota(jnp.int32, (B, BHW), 0)     # 0..B-1
    lo = img_id * HW
    sel = jnp.where((row_idx >= lo) & (row_idx < lo + HW), 1.0, 0.0).astype(f32)

    mean = jnp.dot(sel, z, preferred_element_type=f32) * inv_hw        # (B, C)
    centered = z.reshape(B, HW, C) - mean[:, None, :]
    var = jnp.dot(sel, (centered * centered).reshape(BHW, C),
                  preferred_element_type=f32) * inv_hw                 # (B, C)
    y = jnp.sqrt(var) + mean                                           # (B, C)
    y = jnp.maximum(
        jnp.dot(y, w5_ref[...], preferred_element_type=f32) + b5_ref[...], 0.0)
    y = jnp.dot(y, w6_ref[...], preferred_element_type=f32) + b6_ref[...]
    gate = jax.nn.sigmoid(y)                                           # (B, C)

    out = x.reshape(B, HW, C) + z.reshape(B, HW, C) * gate[:, None, :]
    o_ref[...] = out.astype(o_ref.dtype)


def _tensorcores_per_chip():
    """Best-effort TensorCores-per-device (1 on v5e/v6e 'lite'; 2 otherwise)."""
    try:
        kind = jax.devices()[0].device_kind.lower()
    except Exception:
        return 2
    if any(tag in kind for tag in ("lite", "v5e", "v6e")):
        return 1
    return 2


def _pick_b_tile(n, tc_per_chip):
    """Largest batch tile dividing N.

    Single-TC chips: one grid step (drops the ~0.35us/step pipeline overhead
    and doubles the matmul M dim).  Multi-TC chips: keep the step count a
    multiple of the core count so 'parallel' grid sharding stays balanced.
    """
    if tc_per_chip <= 1:
        return n
    best = 1
    for cand in range(1, n + 1):
        if n % cand == 0 and (n // cand) % tc_per_chip == 0:
            best = cand
    return best


def irb_minus_forward(x_nhwc, params, *, b_tile=None):
    """x_nhwc: (N, H, W, C) float32."""
    N, H, W, C = x_nhwc.shape
    DC = C // 2
    RED = params["w5"].shape[1]
    if b_tile is None:
        b_tile = _pick_b_tile(N, _tensorcores_per_chip())
    assert N % b_tile == 0, "batch must be divisible by b_tile"

    f32 = jnp.float32
    bf16 = jnp.bfloat16

    w1 = params["w1"].astype(bf16).reshape(9 * C, DC)     # (ky,kx,cin) -> K
    w2 = params["w2"].astype(bf16).reshape(9 * DC, C)
    w4a = params["w4a"].astype(bf16)
    # Fold distill_2 into conv: compose in f32, cast to bf16 once (single
    # extra rounding step vs the two-matmul path).
    w3_f = params["w3"].astype(f32)
    w4b_f = params["w4b"].astype(f32)
    w34 = jnp.dot(w3_f, w4b_f).astype(bf16)               # (C, C)
    b34 = jnp.dot(params["b3"].astype(f32), w4b_f) + params["b4"].astype(f32)
    w5 = params["w5"].astype(f32)                         # tiny SE matmuls: f32
    w6 = params["w6"].astype(f32)

    kernel = partial(_irb_minus_kernel, b_tile, H, W, C, DC)

    def full(shape):
        zeros = (0,) * len(shape)
        # NOTE: constant-index weight blocks could be single-buffered with
        # pipeline_mode=pl.Buffered(1); negligible at these shapes, left at
        # the default for lowering safety.
        return pl.BlockSpec(shape, lambda n: zeros)

    grid_spec = pltpu.PrefetchScalarGridSpec(
        num_scalar_prefetch=0,
        grid=(N // b_tile,),
        in_specs=[
            pl.BlockSpec((b_tile, H, W, C), lambda n: (n, 0, 0, 0)),  # x
            full((9 * C, DC)), full((1, DC)),        # distill_1 (per-tap)
            full((9 * DC, C)), full((1, C)),         # mid_1 (per-tap)
            full((DC, C)), full((C, C)), full((1, C)),  # conv (w4a, w34, b34)
            full((C, RED)), full((1, RED)),          # conv_du[0]
            full((RED, C)), full((1, C)),            # conv_du[2]
        ],
        out_specs=pl.BlockSpec((b_tile, H * W, C), lambda n: (n, 0, 0)),
        scratch_shapes=[
            pltpu.VMEM((b_tile, H + 2, W + 2, C), jnp.float32),   # xpad
            pltpu.VMEM((b_tile, H + 2, W + 2, DC), jnp.float32),  # d1pad
        ],
    )

    out = pl.pallas_call(
        kernel,
        out_shape=jax.ShapeDtypeStruct((N, H * W, C), x_nhwc.dtype),
        grid_spec=grid_spec,
        compiler_params=pltpu.CompilerParams(
            dimension_semantics=("parallel",)),
    )(x_nhwc,
      w1, params["b1"], w2, params["b2"],
      w4a, w34, b34,
      w5, params["b5"], w6, params["b6"])

    return out.reshape(N, H, W, C)


def _reference(x, p):
    """Pure-JAX NHWC reference of IRB_minus.forward (f32 math, for validation)."""
    f32 = jnp.float32

    def conv(v, w, b, pad):
        out = jax.lax.conv_general_dilated(
            v, w.astype(f32), window_strides=(1, 1),
            padding=[(pad, pad), (pad, pad)],
            dimension_numbers=("NHWC", "HWIO", "NHWC"))
        return out + b

    def lrelu(v):
        return jnp.where(v >= 0, v, NEG_SLOPE * v)

    C = x.shape[-1]
    dist1 = lrelu(conv(x, p["w1"], p["b1"], 1))
    mid1 = conv(dist1, p["w2"], p["b2"], 1)
    rem1 = x - mid1
    dist2 = conv(rem1, p["w3"].reshape(1, 1, C, -1), p["b3"], 0)
    out = jnp.concatenate([dist1, dist2], axis=-1)
    w4 = jnp.concatenate([p["w4a"].astype(f32), p["w4b"].astype(f32)], axis=0)
    z = conv(out, w4.reshape(1, 1, C, C), p["b4"], 0)
    mean = jnp.mean(z, axis=(1, 2), keepdims=True)
    var = jnp.mean((z - mean) ** 2, axis=(1, 2), keepdims=True)
    y = jnp.sqrt(var) + mean
    y = jnp.maximum(conv(y, p["w5"].reshape(1, 1, C, -1), p["b5"], 0), 0.0)
    y = conv(y, p["w6"].reshape(1, 1, -1, C), p["b6"], 0)
    y = jax.nn.sigmoid(y)
    return x + z * y


if __name__ == "__main__":
    key = jax.random.PRNGKey(0)
    N, C, H, W = 8, 32, 8, 8           # in_channels=32 so reduction=16 divides
    DC, LASTC, RED = C // 2, C - C // 2, C // 16
    keys = jax.random.split(key, 14)
    s = 0.1
    f32, bf16 = jnp.float32, jnp.bfloat16

    params = {
        # matmul weights stored bf16 (native MXU input); biases and the tiny
        # squeeze/excite weights stay f32.
        "w1": (s * jax.random.normal(keys[0], (3, 3, C, DC), f32)).astype(bf16),
        "b1": s * jax.random.normal(keys[1], (1, DC), f32),
        "w2": (s * jax.random.normal(keys[2], (3, 3, DC, C), f32)).astype(bf16),
        "b2": s * jax.random.normal(keys[3], (1, C), f32),
        "w3": (s * jax.random.normal(keys[4], (C, LASTC), f32)).astype(bf16),
        "b3": s * jax.random.normal(keys[5], (1, LASTC), f32),
        "w4a": (s * jax.random.normal(keys[6], (DC, C), f32)).astype(bf16),
        "w4b": (s * jax.random.normal(keys[7], (LASTC, C), f32)).astype(bf16),
        "b4": s * jax.random.normal(keys[8], (1, C), f32),
        "w5": s * jax.random.normal(keys[9], (C, RED), f32),
        "b5": s * jax.random.normal(keys[10], (1, RED), f32),
        "w6": s * jax.random.normal(keys[11], (RED, C), f32),
        "b6": s * jax.random.normal(keys[12], (1, C), f32),
    }
    x = jax.random.normal(keys[13], (N, H, W, C), f32)

    out = jax.block_until_ready(irb_minus_forward(x, params))

    ref = _reference(x, params)
    assert out.shape == (N, H, W, C)
    err = float(jnp.max(jnp.abs(out - ref)))
    # bf16 MXU operands (f32 accumulation) and the f32-composed/bf16-cast
    # distill_2 fold vs an all-f32 XLA conv reference on the same weights.
    if err > 5e-2:
        raise AssertionError(f"kernel mismatch vs reference: max abs err={err}")

    print("KERNEL_OK")
</pallas_src>

<mosaic_0001>
module attributes {stable_mosaic.version = 11 : i64} {
  func.func @_irb_minus_kernel(%arg0: i32, %arg1: memref<4x8x8x32xf32, #tpu.memory_space<vmem>>, %arg2: memref<288x16xbf16, #tpu.memory_space<vmem>>, %arg3: memref<1x16xf32, #tpu.memory_space<vmem>>, %arg4: memref<144x32xbf16, #tpu.memory_space<vmem>>, %arg5: memref<1x32xf32, #tpu.memory_space<vmem>>, %arg6: memref<16x32xbf16, #tpu.memory_space<vmem>>, %arg7: memref<32x32xbf16, #tpu.memory_space<vmem>>, %arg8: memref<1x32xf32, #tpu.memory_space<vmem>>, %arg9: memref<32x2xf32, #tpu.memory_space<vmem>>, %arg10: memref<1x2xf32, #tpu.memory_space<vmem>>, %arg11: memref<2x32xf32, #tpu.memory_space<vmem>>, %arg12: memref<1x32xf32, #tpu.memory_space<vmem>>, %arg13: memref<4x64x32xf32, #tpu.memory_space<vmem>>, %arg14: memref<4x10x10x32xf32, #tpu.memory_space<vmem>>, %arg15: memref<4x10x10x16xf32, #tpu.memory_space<vmem>>) attributes {dimension_semantics = [#tpu.dimension_semantics<parallel>], iteration_bounds = array<i64: 2>, scalar_prefetch = 0 : i64, scratch_operands = 2 : i64, tpu.core_type = #tpu.core_type<tc>, window_params = [{transform_indices = @transform_0, window_bounds = array<i64: 4, 8, 8, 32>}, {pipeline_mode = #tpu.pipeline_mode<synchronous>, transform_indices = @transform_1, window_bounds = array<i64: 288, 16>}, {pipeline_mode = #tpu.pipeline_mode<synchronous>, transform_indices = @transform_2, window_bounds = array<i64: 1, 16>}, {pipeline_mode = #tpu.pipeline_mode<synchronous>, transform_indices = @transform_3, window_bounds = array<i64: 144, 32>}, {pipeline_mode = #tpu.pipeline_mode<synchronous>, transform_indices = @transform_4, window_bounds = array<i64: 1, 32>}, {pipeline_mode = #tpu.pipeline_mode<synchronous>, transform_indices = @transform_5, window_bounds = array<i64: 16, 32>}, {pipeline_mode = #tpu.pipeline_mode<synchronous>, transform_indices = @transform_6, window_bounds = array<i64: 32, 32>}, {pipeline_mode = #tpu.pipeline_mode<synchronous>, transform_indices = @transform_7, window_bounds = array<i64: 1, 32>}, {pipeline_mode = #tpu.pipeline_mode<synchronous>, transform_indices = @transform_8, window_bounds = array<i64: 32, 2>}, {pipeline_mode = #tpu.pipeline_mode<synchronous>, transform_indices = @transform_9, window_bounds = array<i64: 1, 2>}, {pipeline_mode = #tpu.pipeline_mode<synchronous>, transform_indices = @transform_10, window_bounds = array<i64: 2, 32>}, {pipeline_mode = #tpu.pipeline_mode<synchronous>, transform_indices = @transform_11, window_bounds = array<i64: 1, 32>}, {transform_indices = @transform_12, window_bounds = array<i64: 4, 64, 32>}]} {
    %c0 = arith.constant 0 : index
    %c0_0 = arith.constant 0 : index
    %c0_1 = arith.constant 0 : index
    %c0_2 = arith.constant 0 : index
    %0 = vector.load %arg1[%c0, %c0_0, %c0_1, %c0_2] : memref<4x8x8x32xf32, #tpu.memory_space<vmem>>, vector<4x8x8x32xf32>
    %cst = arith.constant 0.000000e+00 : f32
    %1 = vector.broadcast %cst : f32 to vector<4x1x10x32xf32>
    %cst_3 = arith.constant 0.000000e+00 : f32
    %2 = vector.broadcast %cst_3 : f32 to vector<4x10x1x32xf32>
    %c0_4 = arith.constant 0 : index
    %c0_5 = arith.constant 0 : index
    %c0_6 = arith.constant 0 : index
    %c0_7 = arith.constant 0 : index
    %3 = vector.load %arg14[%c0_4, %c0_5, %c0_6, %c0_7] : memref<4x10x10x32xf32, #tpu.memory_space<vmem>>, vector<4x1x10x32xf32>
    tpu.vector_store %arg14[%c0_4, %c0_5, %c0_6, %c0_7], %1 {strides = array<i32>} : memref<4x10x10x32xf32, #tpu.memory_space<vmem>>, vector<4x1x10x32xf32>,
    %c0_8 = arith.constant 0 : index
    %c9 = arith.constant 9 : index
    %c0_9 = arith.constant 0 : index
    %c0_10 = arith.constant 0 : index
    %4 = vector.load %arg14[%c0_8, %c9, %c0_9, %c0_10] : memref<4x10x10x32xf32, #tpu.memory_space<vmem>>, vector<4x1x10x32xf32>
    tpu.vector_store %arg14[%c0_8, %c9, %c0_9, %c0_10], %1 {strides = array<i32>} : memref<4x10x10x32xf32, #tpu.memory_space<vmem>>, vector<4x1x10x32xf32>,
    %c0_11 = arith.constant 0 : index
    %c0_12 = arith.constant 0 : index
    %c0_13 = arith.constant 0 : index
    %c0_14 = arith.constant 0 : index
    %5 = vector.load %arg14[%c0_11, %c0_12, %c0_13, %c0_14] : memref<4x10x10x32xf32, #tpu.memory_space<vmem>>, vector<4x10x1x32xf32>
    tpu.vector_store %arg14[%c0_11, %c0_12, %c0_13, %c0_14], %2 {strides = array<i32>} : memref<4x10x10x32xf32, #tpu.memory_space<vmem>>, vector<4x10x1x32xf32>,
    %c0_15 = arith.constant 0 : index
    %c0_16 = arith.constant 0 : index
    %c9_17 = arith.constant 9 : index
    %c0_18 = arith.constant 0 : index
    %6 = vector.load %arg14[%c0_15, %c0_16, %c9_17, %c0_18] : memref<4x10x10x32xf32, #tpu.memory_space<vmem>>, vector<4x10x1x32xf32>
    tpu.vector_store %arg14[%c0_15, %c0_16, %c9_17, %c0_18], %2 {strides = array<i32>} : memref<4x10x10x32xf32, #tpu.memory_space<vmem>>, vector<4x10x1x32xf32>,
    %c0_19 = arith.constant 0 : index
    %c1 = arith.constant 1 : index
    %c1_20 = arith.constant 1 : index
    %c0_21 = arith.constant 0 : index
    %7 = vector.load %arg14[%c0_19, %c1, %c1_20, %c0_21] : memref<4x10x10x32xf32, #tpu.memory_space<vmem>>, vector<4x8x8x32xf32>
    tpu.vector_store %arg14[%c0_19, %c1, %c1_20, %c0_21], %0 {strides = array<i32>} : memref<4x10x10x32xf32, #tpu.memory_space<vmem>>, vector<4x8x8x32xf32>,
    %c0_22 = arith.constant 0 : index
    %c0_23 = arith.constant 0 : index
    %c0_24 = arith.constant 0 : index
    %c0_25 = arith.constant 0 : index
    %8 = vector.load %arg14[%c0_22, %c0_23, %c0_24, %c0_25] : memref<4x10x10x32xf32, #tpu.memory_space<vmem>>, vector<4x10x10x32xf32>
    %9 = arith.truncf %8 : vector<4x10x10x32xf32> to vector<4x10x10x32xbf16>
    %10 = vector.extract_strided_slice %9 {offsets = [0, 0, 0, 0], sizes = [4, 8, 8, 32], strides = [1, 1, 1, 1]} : vector<4x10x10x32xbf16> to vector<4x8x8x32xbf16>
    %11 = vector.shape_cast %10 : vector<4x8x8x32xbf16> to vector<256x32xbf16>
    %c0_26 = arith.constant 0 : index
    %c0_27 = arith.constant 0 : index
    %12 = vector.load %arg2[%c0_26, %c0_27] : memref<288x16xbf16, #tpu.memory_space<vmem>>, vector<32x16xbf16>
    %cst_28 = arith.constant dense<0.000000e+00> : vector<256x16xf32>
    %13 = tpu.matmul %11, %12, %cst_28 {dimension_numbers = #tpu.dot_dimension_numbers<[1], [0], [0], [1], [0, 0, 1, 1], [], []>} : vector<256x32xbf16>, vector<32x16xbf16>, vector<256x16xf32> -> vector<256x16xf32>
    %14 = vector.extract_strided_slice %9 {offsets = [0, 0, 1, 0], sizes = [4, 8, 8, 32], strides = [1, 1, 1, 1]} : vector<4x10x10x32xbf16> to vector<4x8x8x32xbf16>
    %15 = vector.shape_cast %14 : vector<4x8x8x32xbf16> to vector<256x32xbf16>
    %c32 = arith.constant 32 : index
    %c0_29 = arith.constant 0 : index
    %16 = vector.load %arg2[%c32, %c0_29] : memref<288x16xbf16, #tpu.memory_space<vmem>>, vector<32x16xbf16>
    %cst_30 = arith.constant dense<0.000000e+00> : vector<256x16xf32>
    %17 = tpu.matmul %15, %16, %cst_30 {dimension_numbers = #tpu.dot_dimension_numbers<[1], [0], [0], [1], [0, 0, 1, 1], [], []>} : vector<256x32xbf16>, vector<32x16xbf16>, vector<256x16xf32> -> vector<256x16xf32>
    %18 = arith.addf %13, %17 : vector<256x16xf32>
    %19 = vector.extract_strided_slice %9 {offsets = [0, 0, 2, 0], sizes = [4, 8, 8, 32], strides = [1, 1, 1, 1]} : vector<4x10x10x32xbf16> to vector<4x8x8x32xbf16>
    %20 = vector.shape_cast %19 : vector<4x8x8x32xbf16> to vector<256x32xbf16>
    %c64 = arith.constant 64 : index
    %c0_31 = arith.constant 0 : index
    %21 = vector.load %arg2[%c64, %c0_31] : memref<288x16xbf16, #tpu.memory_space<vmem>>, vector<32x16xbf16>
    %cst_32 = arith.constant dense<0.000000e+00> : vector<256x16xf32>
    %22 = tpu.matmul %20, %21, %cst_32 {dimension_numbers = #tpu.dot_dimension_numbers<[1], [0], [0], [1], [0, 0, 1, 1], [], []>} : vector<256x32xbf16>, vector<32x16xbf16>, vector<256x16xf32> -> vector<256x16xf32>
    %23 = arith.addf %18, %22 : vector<256x16xf32>
    %24 = vector.extract_strided_slice %9 {offsets = [0, 1, 0, 0], sizes = [4, 8, 8, 32], strides = [1, 1, 1, 1]} : vector<4x10x10x32xbf16> to vector<4x8x8x32xbf16>
    %25 = vector.shape_cast %24 : vector<4x8x8x32xbf16> to vector<256x32xbf16>
    %c96 = arith.constant 96 : index
    %c0_33 = arith.constant 0 : index
    %26 = vector.load %arg2[%c96, %c0_33] : memref<288x16xbf16, #tpu.memory_space<vmem>>, vector<32x16xbf16>
    %cst_34 = arith.constant dense<0.000000e+00> : vector<256x16xf32>
    %27 = tpu.matmul %25, %26, %cst_34 {dimension_numbers = #tpu.dot_dimension_numbers<[1], [0], [0], [1], [0, 0, 1, 1], [], []>} : vector<256x32xbf16>, vector<32x16xbf16>, vector<256x16xf32> -> vector<256x16xf32>
    %28 = arith.addf %23, %27 : vector<256x16xf32>
    %29 = vector.extract_strided_slice %9 {offsets = [0, 1, 1, 0], sizes = [4, 8, 8, 32], strides = [1, 1, 1, 1]} : vector<4x10x10x32xbf16> to vector<4x8x8x32xbf16>
    %30 = vector.shape_cast %29 : vector<4x8x8x32xbf16> to vector<256x32xbf16>
    %c128 = arith.constant 128 : index
    %c0_35 = arith.constant 0 : index
    %31 = vector.load %arg2[%c128, %c0_35] : memref<288x16xbf16, #tpu.memory_space<vmem>>, vector<32x16xbf16>
    %cst_36 = arith.constant dense<0.000000e+00> : vector<256x16xf32>
    %32 = tpu.matmul %30, %31, %cst_36 {dimension_numbers = #tpu.dot_dimension_numbers<[1], [0], [0], [1], [0, 0, 1, 1], [], []>} : vector<256x32xbf16>, vector<32x16xbf16>, vector<256x16xf32> -> vector<256x16xf32>
    %33 = arith.addf %28, %32 : vector<256x16xf32>
    %34 = vector.extract_strided_slice %9 {offsets = [0, 1, 2, 0], sizes = [4, 8, 8, 32], strides = [1, 1, 1, 1]} : vector<4x10x10x32xbf16> to vector<4x8x8x32xbf16>
    %35 = vector.shape_cast %34 : vector<4x8x8x32xbf16> to vector<256x32xbf16>
    %c160 = arith.constant 160 : index
    %c0_37 = arith.constant 0 : index
    %36 = vector.load %arg2[%c160, %c0_37] : memref<288x16xbf16, #tpu.memory_space<vmem>>, vector<32x16xbf16>
    %cst_38 = arith.constant dense<0.000000e+00> : vector<256x16xf32>
    %37 = tpu.matmul %35, %36, %cst_38 {dimension_numbers = #tpu.dot_dimension_numbers<[1], [0], [0], [1], [0, 0, 1, 1], [], []>} : vector<256x32xbf16>, vector<32x16xbf16>, vector<256x16xf32> -> vector<256x16xf32>
    %38 = arith.addf %33, %37 : vector<256x16xf32>
    %39 = vector.extract_strided_slice %9 {offsets = [0, 2, 0, 0], sizes = [4, 8, 8, 32], strides = [1, 1, 1, 1]} : vector<4x10x10x32xbf16> to vector<4x8x8x32xbf16>
    %40 = vector.shape_cast %39 : vector<4x8x8x32xbf16> to vector<256x32xbf16>
    %c192 = arith.constant 192 : index
    %c0_39 = arith.constant 0 : index
    %41 = vector.load %arg2[%c192, %c0_39] : memref<288x16xbf16, #tpu.memory_space<vmem>>, vector<32x16xbf16>
    %cst_40 = arith.constant dense<0.000000e+00> : vector<256x16xf32>
    %42 = tpu.matmul %40, %41, %cst_40 {dimension_numbers = #tpu.dot_dimension_numbers<[1], [0], [0], [1], [0, 0, 1, 1], [], []>} : vector<256x32xbf16>, vector<32x16xbf16>, vector<256x16xf32> -> vector<256x16xf32>
    %43 = arith.addf %38, %42 : vector<256x16xf32>
    %44 = vector.extract_strided_slice %9 {offsets = [0, 2, 1, 0], sizes = [4, 8, 8, 32], strides = [1, 1, 1, 1]} : vector<4x10x10x32xbf16> to vector<4x8x8x32xbf16>
    %45 = vector.shape_cast %44 : vector<4x8x8x32xbf16> to vector<256x32xbf16>
    %c224 = arith.constant 224 : index
    %c0_41 = arith.constant 0 : index
    %46 = vector.load %arg2[%c224, %c0_41] : memref<288x16xbf16, #tpu.memory_space<vmem>>, vector<32x16xbf16>
    %cst_42 = arith.constant dense<0.000000e+00> : vector<256x16xf32>
    %47 = tpu.matmul %45, %46, %cst_42 {dimension_numbers = #tpu.dot_dimension_numbers<[1], [0], [0], [1], [0, 0, 1, 1], [], []>} : vector<256x32xbf16>, vector<32x16xbf16>, vector<256x16xf32> -> vector<256x16xf32>
    %48 = arith.addf %43, %47 : vector<256x16xf32>
    %49 = vector.extract_strided_slice %9 {offsets = [0, 2, 2, 0], sizes = [4, 8, 8, 32], strides = [1, 1, 1, 1]} : vector<4x10x10x32xbf16> to vector<4x8x8x32xbf16>
    %50 = vector.shape_cast %49 : vector<4x8x8x32xbf16> to vector<256x32xbf16>
    %c256 = arith.constant 256 : index
    %c0_43 = arith.constant 0 : index
    %51 = vector.load %arg2[%c256, %c0_43] : memref<288x16xbf16, #tpu.memory_space<vmem>>, vector<32x16xbf16>
    %cst_44 = arith.constant dense<0.000000e+00> : vector<256x16xf32>
    %52 = tpu.matmul %50, %51, %cst_44 {dimension_numbers = #tpu.dot_dimension_numbers<[1], [0], [0], [1], [0, 0, 1, 1], [], []>} : vector<256x32xbf16>, vector<32x16xbf16>, vector<256x16xf32> -> vector<256x16xf32>
    %53 = arith.addf %48, %52 : vector<256x16xf32>
    %c0_45 = arith.constant 0 : index
    %c0_46 = arith.constant 0 : index
    %54 = vector.load %arg3[%c0_45, %c0_46] : memref<1x16xf32, #tpu.memory_space<vmem>>, vector<1x16xf32>
    %55 = vector.broadcast %54 : vector<1x16xf32> to vector<256x16xf32>
    %56 = arith.addf %53, %55 : vector<256x16xf32>
    %cst_47 = arith.constant 0.000000e+00 : f32
    %57 = vector.broadcast %cst_47 : f32 to vector<256x16xf32>
    %58 = arith.cmpf oge, %56, %57 : vector<256x16xf32>
    %cst_48 = arith.constant 5.000000e-02 : f32
    %59 = vector.broadcast %cst_48 : f32 to vector<256x16xf32>
    %60 = arith.mulf %59, %56 : vector<256x16xf32>
    %61 = arith.select %58, %56, %60 : vector<256x16xi1>, vector<256x16xf32>
    %cst_49 = arith.constant 0.000000e+00 : f32
    %62 = vector.broadcast %cst_49 : f32 to vector<4x1x10x16xf32>
    %cst_50 = arith.constant 0.000000e+00 : f32
    %63 = vector.broadcast %cst_50 : f32 to vector<4x10x1x16xf32>
    %c0_51 = arith.constant 0 : index
    %c0_52 = arith.constant 0 : index
    %c0_53 = arith.constant 0 : index
    %c0_54 = arith.constant 0 : index
    %64 = vector.load %arg15[%c0_51, %c0_52, %c0_53, %c0_54] : memref<4x10x10x16xf32, #tpu.memory_space<vmem>>, vector<4x1x10x16xf32>
    tpu.vector_store %arg15[%c0_51, %c0_52, %c0_53, %c0_54], %62 {strides = array<i32>} : memref<4x10x10x16xf32, #tpu.memory_space<vmem>>, vector<4x1x10x16xf32>,
    %c0_55 = arith.constant 0 : index
    %c9_56 = arith.constant 9 : index
    %c0_57 = arith.constant 0 : index
    %c0_58 = arith.constant 0 : index
    %65 = vector.load %arg15[%c0_55, %c9_56, %c0_57, %c0_58] : memref<4x10x10x16xf32, #tpu.memory_space<vmem>>, vector<4x1x10x16xf32>
    tpu.vector_store %arg15[%c0_55, %c9_56, %c0_57, %c0_58], %62 {strides = array<i32>} : memref<4x10x10x16xf32, #tpu.memory_space<vmem>>, vector<4x1x10x16xf32>,
    %c0_59 = arith.constant 0 : index
    %c0_60 = arith.constant 0 : index
    %c0_61 = arith.constant 0 : index
    %c0_62 = arith.constant 0 : index
    %66 = vector.load %arg15[%c0_59, %c0_60, %c0_61, %c0_62] : memref<4x10x10x16xf32, #tpu.memory_space<vmem>>, vector<4x10x1x16xf32>
    tpu.vector_store %arg15[%c0_59, %c0_60, %c0_61, %c0_62], %63 {strides = array<i32>} : memref<4x10x10x16xf32, #tpu.memory_space<vmem>>, vector<4x10x1x16xf32>,
    %c0_63 = arith.constant 0 : index
    %c0_64 = arith.constant 0 : index
    %c9_65 = arith.constant 9 : index
    %c0_66 = arith.constant 0 : index
    %67 = vector.load %arg15[%c0_63, %c0_64, %c9_65, %c0_66] : memref<4x10x10x16xf32, #tpu.memory_space<vmem>>, vector<4x10x1x16xf32>
    tpu.vector_store %arg15[%c0_63, %c0_64, %c9_65, %c0_66], %63 {strides = array<i32>} : memref<4x10x10x16xf32, #tpu.memory_space<vmem>>, vector<4x10x1x16xf32>,
    %68 = vector.shape_cast %61 : vector<256x16xf32> to vector<4x8x8x16xf32>
    %c0_67 = arith.constant 0 : index
    %c1_68 = arith.constant 1 : index
    %c1_69 = arith.constant 1 : index
    %c0_70 = arith.constant 0 : index
    %69 = vector.load %arg15[%c0_67, %c1_68, %c1_69, %c0_70] : memref<4x10x10x16xf32, #tpu.memory_space<vmem>>, vector<4x8x8x16xf32>
    tpu.vector_store %arg15[%c0_67, %c1_68, %c1_69, %c0_70], %68 {strides = array<i32>} : memref<4x10x10x16xf32, #tpu.memory_space<vmem>>, vector<4x8x8x16xf32>,
    %c0_71 = arith.constant 0 : index
    %c0_72 = arith.constant 0 : index
    %c0_73 = arith.constant 0 : index
    %c0_74 = arith.constant 0 : index
    %70 = vector.load %arg15[%c0_71, %c0_72, %c0_73, %c0_74] : memref<4x10x10x16xf32, #tpu.memory_space<vmem>>, vector<4x10x10x16xf32>
    %71 = arith.truncf %70 : vector<4x10x10x16xf32> to vector<4x10x10x16xbf16>
    %72 = vector.extract_strided_slice %71 {offsets = [0, 0, 0, 0], sizes = [4, 8, 8, 16], strides = [1, 1, 1, 1]} : vector<4x10x10x16xbf16> to vector<4x8x8x16xbf16>
    %73 = vector.shape_cast %72 : vector<4x8x8x16xbf16> to vector<256x16xbf16>
    %c0_75 = arith.constant 0 : index
    %c0_76 = arith.constant 0 : index
    %74 = vector.load %arg4[%c0_75, %c0_76] : memref<144x32xbf16, #tpu.memory_space<vmem>>, vector<16x32xbf16>
    %cst_77 = arith.constant dense<0.000000e+00> : vector<256x32xf32>
    %75 = tpu.matmul %73, %74, %cst_77 {dimension_numbers = #tpu.dot_dimension_numbers<[1], [0], [0], [1], [0, 0, 1, 1], [], []>} : vector<256x16xbf16>, vector<16x32xbf16>, vector<256x32xf32> -> vector<256x32xf32>
    %76 = vector.extract_strided_slice %71 {offsets = [0, 0, 1, 0], sizes = [4, 8, 8, 16], strides = [1, 1, 1, 1]} : vector<4x10x10x16xbf16> to vector<4x8x8x16xbf16>
    %77 = vector.shape_cast %76 : vector<4x8x8x16xbf16> to vector<256x16xbf16>
    %c16 = arith.constant 16 : index
    %c0_78 = arith.constant 0 : index
    %78 = vector.load %arg4[%c16, %c0_78] : memref<144x32xbf16, #tpu.memory_space<vmem>>, vector<16x32xbf16>
    %cst_79 = arith.constant dense<0.000000e+00> : vector<256x32xf32>
    %79 = tpu.matmul %77, %78, %cst_79 {dimension_numbers = #tpu.dot_dimension_numbers<[1], [0], [0], [1], [0, 0, 1, 1], [], []>} : vector<256x16xbf16>, vector<16x32xbf16>, vector<256x32xf32> -> vector<256x32xf32>
    %80 = arith.addf %75, %79 : vector<256x32xf32>
    %81 = vector.extract_strided_slice %71 {offsets = [0, 0, 2, 0], sizes = [4, 8, 8, 16], strides = [1, 1, 1, 1]} : vector<4x10x10x16xbf16> to vector<4x8x8x16xbf16>
    %82 = vector.shape_cast %81 : vector<4x8x8x16xbf16> to vector<256x16xbf16>
    %c32_80 = arith.constant 32 : index
    %c0_81 = arith.constant 0 : index
    %83 = vector.load %arg4[%c32_80, %c0_81] : memref<144x32xbf16, #tpu.memory_space<vmem>>, vector<16x32xbf16>
    %cst_82 = arith.constant dense<0.000000e+00> : vector<256x32xf32>
    %84 = tpu.matmul %82, %83, %cst_82 {dimension_numbers = #tpu.dot_dimension_numbers<[1], [0], [0], [1], [0, 0, 1, 1], [], []>} : vector<256x16xbf16>, vector<16x32xbf16>, vector<256x32xf32> -> vector<256x32xf32>
    %85 = arith.addf %80, %84 : vector<256x32xf32>
    %86 = vector.extract_strided_slice %71 {offsets = [0, 1, 0, 0], sizes = [4, 8, 8, 16], strides = [1, 1, 1, 1]} : vector<4x10x10x16xbf16> to vector<4x8x8x16xbf16>
    %87 = vector.shape_cast %86 : vector<4x8x8x16xbf16> to vector<256x16xbf16>
    %c48 = arith.constant 48 : index
    %c0_83 = arith.constant 0 : index
    %88 = vector.load %arg4[%c48, %c0_83] : memref<144x32xbf16, #tpu.memory_space<vmem>>, vector<16x32xbf16>
    %cst_84 = arith.constant dense<0.000000e+00> : vector<256x32xf32>
    %89 = tpu.matmul %87, %88, %cst_84 {dimension_numbers = #tpu.dot_dimension_numbers<[1], [0], [0], [1], [0, 0, 1, 1], [], []>} : vector<256x16xbf16>, vector<16x32xbf16>, vector<256x32xf32> -> vector<256x32xf32>
    %90 = arith.addf %85, %89 : vector<256x32xf32>
    %91 = vector.extract_strided_slice %71 {offsets = [0, 1, 1, 0], sizes = [4, 8, 8, 16], strides = [1, 1, 1, 1]} : vector<4x10x10x16xbf16> to vector<4x8x8x16xbf16>
    %92 = vector.shape_cast %91 : vector<4x8x8x16xbf16> to vector<256x16xbf16>
    %c64_85 = arith.constant 64 : index
    %c0_86 = arith.constant 0 : index
    %93 = vector.load %arg4[%c64_85, %c0_86] : memref<144x32xbf16, #tpu.memory_space<vmem>>, vector<16x32xbf16>
    %cst_87 = arith.constant dense<0.000000e+00> : vector<256x32xf32>
    %94 = tpu.matmul %92, %93, %cst_87 {dimension_numbers = #tpu.dot_dimension_numbers<[1], [0], [0], [1], [0, 0, 1, 1], [], []>} : vector<256x16xbf16>, vector<16x32xbf16>, vector<256x32xf32> -> vector<256x32xf32>
    %95 = arith.addf %90, %94 : vector<256x32xf32>
    %96 = vector.extract_strided_slice %71 {offsets = [0, 1, 2, 0], sizes = [4, 8, 8, 16], strides = [1, 1, 1, 1]} : vector<4x10x10x16xbf16> to vector<4x8x8x16xbf16>
    %97 = vector.shape_cast %96 : vector<4x8x8x16xbf16> to vector<256x16xbf16>
    %c80 = arith.constant 80 : index
    %c0_88 = arith.constant 0 : index
    %98 = vector.load %arg4[%c80, %c0_88] : memref<144x32xbf16, #tpu.memory_space<vmem>>, vector<16x32xbf16>
    %cst_89 = arith.constant dense<0.000000e+00> : vector<256x32xf32>
    %99 = tpu.matmul %97, %98, %cst_89 {dimension_numbers = #tpu.dot_dimension_numbers<[1], [0], [0], [1], [0, 0, 1, 1], [], []>} : vector<256x16xbf16>, vector<16x32xbf16>, vector<256x32xf32> -> vector<256x32xf32>
    %100 = arith.addf %95, %99 : vector<256x32xf32>
    %101 = vector.extract_strided_slice %71 {offsets = [0, 2, 0, 0], sizes = [4, 8, 8, 16], strides = [1, 1, 1, 1]} : vector<4x10x10x16xbf16> to vector<4x8x8x16xbf16>
    %102 = vector.shape_cast %101 : vector<4x8x8x16xbf16> to vector<256x16xbf16>
    %c96_90 = arith.constant 96 : index
    %c0_91 = arith.constant 0 : index
    %103 = vector.load %arg4[%c96_90, %c0_91] : memref<144x32xbf16, #tpu.memory_space<vmem>>, vector<16x32xbf16>
    %cst_92 = arith.constant dense<0.000000e+00> : vector<256x32xf32>
    %104 = tpu.matmul %102, %103, %cst_92 {dimension_numbers = #tpu.dot_dimension_numbers<[1], [0], [0], [1], [0, 0, 1, 1], [], []>} : vector<256x16xbf16>, vector<16x32xbf16>, vector<256x32xf32> -> vector<256x32xf32>
    %105 = arith.addf %100, %104 : vector<256x32xf32>
    %106 = vector.extract_strided_slice %71 {offsets = [0, 2, 1, 0], sizes = [4, 8, 8, 16], strides = [1, 1, 1, 1]} : vector<4x10x10x16xbf16> to vector<4x8x8x16xbf16>
    %107 = vector.shape_cast %106 : vector<4x8x8x16xbf16> to vector<256x16xbf16>
    %c112 = arith.constant 112 : index
    %c0_93 = arith.constant 0 : index
    %108 = vector.load %arg4[%c112, %c0_93] : memref<144x32xbf16, #tpu.memory_space<vmem>>, vector<16x32xbf16>
    %cst_94 = arith.constant dense<0.000000e+00> : vector<256x32xf32>
    %109 = tpu.matmul %107, %108, %cst_94 {dimension_numbers = #tpu.dot_dimension_numbers<[1], [0], [0], [1], [0, 0, 1, 1], [], []>} : vector<256x16xbf16>, vector<16x32xbf16>, vector<256x32xf32> -> vector<256x32xf32>
    %110 = arith.addf %105, %109 : vector<256x32xf32>
    %111 = vector.extract_strided_slice %71 {offsets = [0, 2, 2, 0], sizes = [4, 8, 8, 16], strides = [1, 1, 1, 1]} : vector<4x10x10x16xbf16> to vector<4x8x8x16xbf16>
    %112 = vector.shape_cast %111 : vector<4x8x8x16xbf16> to vector<256x16xbf16>
    %c128_95 = arith.constant 128 : index
    %c0_96 = arith.constant 0 : index
    %113 = vector.load %arg4[%c128_95, %c0_96] : memref<144x32xbf16, #tpu.memory_space<vmem>>, vector<16x32xbf16>
    %cst_97 = arith.constant dense<0.000000e+00> : vector<256x32xf32>
    %114 = tpu.matmul %112, %113, %cst_97 {dimension_numbers = #tpu.dot_dimension_numbers<[1], [0], [0], [1], [0, 0, 1, 1], [], []>} : vector<256x16xbf16>, vector<16x32xbf16>, vector<256x32xf32> -> vector<256x32xf32>
    %115 = arith.addf %110, %114 : vector<256x32xf32>
    %c0_98 = arith.constant 0 : index
    %c0_99 = arith.constant 0 : index
    %116 = vector.load %arg5[%c0_98, %c0_99] : memref<1x32xf32, #tpu.memory_space<vmem>>, vector<1x32xf32>
    %117 = vector.broadcast %116 : vector<1x32xf32> to vector<256x32xf32>
    %118 = arith.addf %115, %117 : vector<256x32xf32>
    %119 = vector.shape_cast %0 : vector<4x8x8x32xf32> to vector<256x32xf32>
    %120 = arith.subf %119, %118 : vector<256x32xf32>
    %c0_100 = arith.constant 0 : index
    %c0_101 = arith.constant 0 : index
    %121 = vector.load %arg6[%c0_100, %c0_101] : memref<16x32xbf16, #tpu.memory_space<vmem>>, vector<16x32xbf16>
    %cst_102 = arith.constant dense<0.000000e+00> : vector<256x32xf32>
    %122 = tpu.matmul %92, %121, %cst_102 {dimension_numbers = #tpu.dot_dimension_numbers<[1], [0], [0], [1], [0, 0, 1, 1], [], []>} : vector<256x16xbf16>, vector<16x32xbf16>, vector<256x32xf32> -> vector<256x32xf32>
    %123 = arith.truncf %120 : vector<256x32xf32> to vector<256x32xbf16>
    %c0_103 = arith.constant 0 : index
    %c0_104 = arith.constant 0 : index
    %124 = vector.load %arg7[%c0_103, %c0_104] : memref<32x32xbf16, #tpu.memory_space<vmem>>, vector<32x32xbf16>
    %cst_105 = arith.constant dense<0.000000e+00> : vector<256x32xf32>
    %125 = tpu.matmul %123, %124, %cst_105 {dimension_numbers = #tpu.dot_dimension_numbers<[1], [0], [0], [1], [0, 0, 1, 1], [], []>} : vector<256x32xbf16>, vector<32x32xbf16>, vector<256x32xf32> -> vector<256x32xf32>
    %126 = arith.addf %122, %125 : vector<256x32xf32>
    %c0_106 = arith.constant 0 : index
    %c0_107 = arith.constant 0 : index
    %127 = vector.load %arg8[%c0_106, %c0_107] : memref<1x32xf32, #tpu.memory_space<vmem>>, vector<1x32xf32>
    %128 = vector.broadcast %127 : vector<1x32xf32> to vector<256x32xf32>
    %129 = arith.addf %126, %128 : vector<256x32xf32>
    %130 = tpu.iota {dimensions = array<i32: 1>} : vector<4x256xi32>
    %131 = tpu.iota {dimensions = array<i32: 0>} : vector<4x256xi32>
    %c64_i32 = arith.constant 64 : i32
    %132 = vector.broadcast %c64_i32 : i32 to vector<4x256xi32>
    %133 = arith.muli %131, %132 : vector<4x256xi32>
    %134 = arith.cmpi sge, %130, %133 : vector<4x256xi32>
    %c64_i32_108 = arith.constant 64 : i32
    %135 = vector.broadcast %c64_i32_108 : i32 to vector<4x256xi32>
    %136 = arith.addi %133, %135 : vector<4x256xi32>
    %137 = arith.cmpi slt, %130, %136 : vector<4x256xi32>
    %138 = arith.andi %134, %137 : vector<4x256xi1>
    %cst_109 = arith.constant 1.000000e+00 : f32
    %cst_110 = arith.constant 0.000000e+00 : f32
    %139 = vector.broadcast %cst_109 : f32 to vector<4x256xf32>
    %140 = vector.broadcast %cst_110 : f32 to vector<4x256xf32>
    %141 = arith.select %138, %139, %140 : vector<4x256xi1>, vector<4x256xf32>
    %cst_111 = arith.constant dense<0.000000e+00> : vector<4x32xf32>
    %142 = tpu.matmul %141, %129, %cst_111 {dimension_numbers = #tpu.dot_dimension_numbers<[1], [0], [0], [1], [0, 0, 1, 1], [], []>} : vector<4x256xf32>, vector<256x32xf32>, vector<4x32xf32> -> vector<4x32xf32>
    %cst_112 = arith.constant 1.562500e-02 : f32
    %143 = vector.broadcast %cst_112 : f32 to vector<4x32xf32>
    %144 = arith.mulf %142, %143 : vector<4x32xf32>
    %145 = vector.shape_cast %129 : vector<256x32xf32> to vector<4x64x32xf32>
    %146 = vector.shape_cast %144 : vector<4x32xf32> to vector<4x1x32xf32>
    %147 = vector.broadcast %146 : vector<4x1x32xf32> to vector<4x64x32xf32>
    %148 = arith.subf %145, %147 : vector<4x64x32xf32>
    %149 = arith.mulf %148, %148 : vector<4x64x32xf32>
    %150 = vector.shape_cast %149 : vector<4x64x32xf32> to vector<256x32xf32>
    %cst_113 = arith.constant dense<0.000000e+00> : vector<4x32xf32>
    %151 = tpu.matmul %141, %150, %cst_113 {dimension_numbers = #tpu.dot_dimension_numbers<[1], [0], [0], [1], [0, 0, 1, 1], [], []>} : vector<4x256xf32>, vector<256x32xf32>, vector<4x32xf32> -> vector<4x32xf32>
    %cst_114 = arith.constant 1.562500e-02 : f32
    %152 = vector.broadcast %cst_114 : f32 to vector<4x32xf32>
    %153 = arith.mulf %151, %152 : vector<4x32xf32>
    %154 = math.sqrt %153 : vector<4x32xf32>
    %155 = arith.addf %154, %144 : vector<4x32xf32>
    %c0_115 = arith.constant 0 : index
    %c0_116 = arith.constant 0 : index
    %156 = vector.load %arg9[%c0_115, %c0_116] : memref<32x2xf32, #tpu.memory_space<vmem>>, vector<32x2xf32>
    %cst_117 = arith.constant dense<0.000000e+00> : vector<4x2xf32>
    %157 = tpu.matmul %155, %156, %cst_117 {dimension_numbers = #tpu.dot_dimension_numbers<[1], [0], [0], [1], [0, 0, 1, 1], [], []>} : vector<4x32xf32>, vector<32x2xf32>, vector<4x2xf32> -> vector<4x2xf32>
    %c0_118 = arith.constant 0 : index
    %c0_119 = arith.constant 0 : index
    %158 = vector.load %arg10[%c0_118, %c0_119] : memref<1x2xf32, #tpu.memory_space<vmem>>, vector<1x2xf32>
    %159 = vector.broadcast %158 : vector<1x2xf32> to vector<4x2xf32>
    %160 = arith.addf %157, %159 : vector<4x2xf32>
    %cst_120 = arith.constant 0.000000e+00 : f32
    %161 = vector.broadcast %cst_120 : f32 to vector<4x2xf32>
    %162 = arith.maximumf %160, %161 : vector<4x2xf32>
    %c0_121 = arith.constant 0 : index
    %c0_122 = arith.constant 0 : index
    %163 = vector.load %arg11[%c0_121, %c0_122] : memref<2x32xf32, #tpu.memory_space<vmem>>, vector<2x32xf32>
    %cst_123 = arith.constant dense<0.000000e+00> : vector<4x32xf32>
    %164 = tpu.matmul %162, %163, %cst_123 {dimension_numbers = #tpu.dot_dimension_numbers<[1], [0], [0], [1], [0, 0, 1, 1], [], []>} : vector<4x2xf32>, vector<2x32xf32>, vector<4x32xf32> -> vector<4x32xf32>
    %c0_124 = arith.constant 0 : index
    %c0_125 = arith.constant 0 : index
    %165 = vector.load %arg12[%c0_124, %c0_125] : memref<1x32xf32, #tpu.memory_space<vmem>>, vector<1x32xf32>
    %166 = vector.broadcast %165 : vector<1x32xf32> to vector<4x32xf32>
    %167 = arith.addf %164, %166 : vector<4x32xf32>
    %168 = arith.negf %167 : vector<4x32xf32>
    %169 = math.exp %168 : vector<4x32xf32>
    %cst_126 = arith.constant 1.000000e+00 : f32
    %170 = vector.broadcast %cst_126 : f32 to vector<4x32xf32>
    %171 = arith.addf %170, %169 : vector<4x32xf32>
    %172 = arith.divf %170, %171 : vector<4x32xf32>
    %173 = vector.shape_cast %0 : vector<4x8x8x32xf32> to vector<4x64x32xf32>
    %174 = vector.shape_cast %129 : vector<256x32xf32> to vector<4x64x32xf32>
    %175 = vector.shape_cast %172 : vector<4x32xf32> to vector<4x1x32xf32>
    %176 = vector.broadcast %175 : vector<4x1x32xf32> to vector<4x64x32xf32>
    %177 = arith.mulf %174, %176 : vector<4x64x32xf32>
    %178 = arith.addf %173, %177 : vector<4x64x32xf32>
    %c0_127 = arith.constant 0 : index
    %c0_128 = arith.constant 0 : index
    %c0_129 = arith.constant 0 : index
    %179 = vector.load %arg13[%c0_127, %c0_128, %c0_129] : memref<4x64x32xf32, #tpu.memory_space<vmem>>, vector<4x64x32xf32>
    tpu.vector_store %arg13[%c0_127, %c0_128, %c0_129], %178 {strides = array<i32>} : memref<4x64x32xf32, #tpu.memory_space<vmem>>, vector<4x64x32xf32>,
    return
  }
  func.func @transform_0(%arg0: i32) -> (i32, i32, i32, i32) {
    %c0_i32 = arith.constant 0 : i32
    %c0_i32_0 = arith.constant 0 : i32
    %c0_i32_1 = arith.constant 0 : i32
    %c0_i32_2 = arith.constant 0 : i32
    return %arg0, %c0_i32, %c0_i32_0, %c0_i32_1 : i32, i32, i32, i32
  }
  func.func @transform_1(%arg0: i32) -> (i32, i32) {
    %c0_i32 = arith.constant 0 : i32
    %c0_i32_0 = arith.constant 0 : i32
    %c0_i32_1 = arith.constant 0 : i32
    return %c0_i32, %c0_i32_0 : i32, i32
  }
  func.func @transform_2(%arg0: i32) -> (i32, i32) {
    %c0_i32 = arith.constant 0 : i32
    %c0_i32_0 = arith.constant 0 : i32
    %c0_i32_1 = arith.constant 0 : i32
    return %c0_i32, %c0_i32_0 : i32, i32
  }
  func.func @transform_3(%arg0: i32) -> (i32, i32) {
    %c0_i32 = arith.constant 0 : i32
    %c0_i32_0 = arith.constant 0 : i32
    %c0_i32_1 = arith.constant 0 : i32
    return %c0_i32, %c0_i32_0 : i32, i32
  }
  func.func @transform_4(%arg0: i32) -> (i32, i32) {
    %c0_i32 = arith.constant 0 : i32
    %c0_i32_0 = arith.constant 0 : i32
    %c0_i32_1 = arith.constant 0 : i32
    return %c0_i32, %c0_i32_0 : i32, i32
  }
  func.func @transform_5(%arg0: i32) -> (i32, i32) {
    %c0_i32 = arith.constant 0 : i32
    %c0_i32_0 = arith.constant 0 : i32
    %c0_i32_1 = arith.constant 0 : i32
    return %c0_i32, %c0_i32_0 : i32, i32
  }
  func.func @transform_6(%arg0: i32) -> (i32, i32) {
    %c0_i32 = arith.constant 0 : i32
    %c0_i32_0 = arith.constant 0 : i32
    %c0_i32_1 = arith.constant 0 : i32
    return %c0_i32, %c0_i32_0 : i32, i32
  }
  func.func @transform_7(%arg0: i32) -> (i32, i32) {
    %c0_i32 = arith.constant 0 : i32
    %c0_i32_0 = arith.constant 0 : i32
    %c0_i32_1 = arith.constant 0 : i32
    return %c0_i32, %c0_i32_0 : i32, i32
  }
  func.func @transform_8(%arg0: i32) -> (i32, i32) {
    %c0_i32 = arith.constant 0 : i32
    %c0_i32_0 = arith.constant 0 : i32
    %c0_i32_1 = arith.constant 0 : i32
    return %c0_i32, %c0_i32_0 : i32, i32
  }
  func.func @transform_9(%arg0: i32) -> (i32, i32) {
    %c0_i32 = arith.constant 0 : i32
    %c0_i32_0 = arith.constant 0 : i32
    %c0_i32_1 = arith.constant 0 : i32
    return %c0_i32, %c0_i32_0 : i32, i32
  }
  func.func @transform_10(%arg0: i32) -> (i32, i32) {
    %c0_i32 = arith.constant 0 : i32
    %c0_i32_0 = arith.constant 0 : i32
    %c0_i32_1 = arith.constant 0 : i32
    return %c0_i32, %c0_i32_0 : i32, i32
  }
  func.func @transform_11(%arg0: i32) -> (i32, i32) {
    %c0_i32 = arith.constant 0 : i32
    %c0_i32_0 = arith.constant 0 : i32
    %c0_i32_1 = arith.constant 0 : i32
    return %c0_i32, %c0_i32_0 : i32, i32
  }
  func.func @transform_12(%arg0: i32) -> (i32, i32, i32) {
    %c0_i32 = arith.constant 0 : i32
    %c0_i32_0 = arith.constant 0 : i32
    %c0_i32_1 = arith.constant 0 : i32
    return %arg0, %c0_i32, %c0_i32_0 : i32, i32, i32
  }
}

</mosaic_0001>

<bundles_post_ra>
// kernel: tpu_custom_call.1
= control target key start
LH: loop header
LB: loop body
LE: loop exit
PB: predicated region body
PF: predicated region fallthrough
CT: control target
= control target key end

     0   :  { %17 = vsyncpa [#allocation5], 0  ;;  %s16571_s0 = inlined_call_operand.hbm [shape: f32[8,8,8,32], index: 0, kind: input, shape index: {}]   ;;  %s16572_s1 = inlined_call_operand.vmem [shape: bf16[288,16], index: 1, kind: input, shape index: {}]   ;;  %s16573_s2 = inlined_call_operand.vmem [shape: f32[1,16], index: 2, kind: input, shape index: {}]   ;;  %s16574_s3 = inlined_call_operand.vmem [shape: bf16[144,32], index: 3, kind: input, shape index: {}]   ;;  %s16575_s4 = inlined_call_operand.vmem [shape: f32[1,32], index: 4, kind: input, shape index: {}]   ;;  %s16576_s5 = inlined_call_operand.vmem [shape: bf16[16,32], index: 5, kind: input, shape index: {}]   ;;  %s16577_s6 = inlined_call_operand.vmem [shape: bf16[32,32], index: 6, kind: input, shape index: {}]   ;;  %s16578_s7 = inlined_call_operand.vmem [shape: f32[1,32], index: 7, kind: input, shape index: {}]   ;;  %s16579_s8 = inlined_call_operand.vmem [shape: f32[32,2], index: 8, kind: input, shape index: {}]   ;;  %s16580_s9 = inlined_call_operand.vmem [shape: f32[1,2], index: 9, kind: input, shape index: {}]   ;;  %s16581_s10 = inlined_call_operand.vmem [shape: f32[2,32], index: 10, kind: input, shape index: {}]   ;;  %s16582_s11 = inlined_call_operand.vmem [shape: f32[1,32], index: 11, kind: input, shape index: {}]   ;;  %s16583_s12 = inlined_call_operand.vmem [shape: f32[8,64,32], index: 12, kind: output, shape index: {}]  }
   0x1   :  { %19 = vsyncpa [#allocation5 + $0x1], 0  ;;  %s11166_s21 = smov 0   ;;  %s11168_s22 = smov 0  }
   0x2   :  { %s11170_s23 = smov 0   ;;  %s11172_s24 = smov 0  }
   0x3 LB: > { %s16584_s25 = sadd.s32 4294967295, %s11092_s24   ;;  %s11186_s26 = sadd.s32 1, %s11092_s24   ;;  %s11092_s24 = sphi %s11172_s24, %s17755_s24   ;;  %s11088_s23 = sphi %s11170_s23, %s17754_s23   ;;  %s11084_s22 = sphi %s11168_s22, %s17753_s22   ;;  %s11080_s21 = sphi %s11166_s21, %s17752_s21  }
   0x4   : > { %s29_s27 = ssub.s32 %s11092_s24, %s11186_s26  ;;  %s32_s28 = sadd.s32 1, %s11088_s23 }
   0x5   : > { %p30_p0 = scmp.eq.s32.totalorder %s29_s27, 0  ;;  %p39_p1 = scmp.ne.s32.totalorder %s11088_s23, %s11084_s22 }
   0x6   : > { %p40_p2 = scmp.eq.s32.totalorder %s11092_s24, 0  ;;  %p45_p3 = scmp.ne.s32.totalorder %s11084_s22, %s11080_s21 }
   0x7   : > { %s11196_s29 = scalar_select %p30_p0, %s11088_s23, %s32_s28  }
   0x8   : > { %p41_p4 = por %p40_p2, %p39_p1  ;;  %p46_p5 = scmp.eq.s32.totalorder %s16584_s25, 0 }
   0x9   : > { %16906 = sst [smem:[#allocation7_spill]] %s11196_s29  ;;  %p10944_p6 = scmp.lt.s32.totalorder %s11092_s24, 2 }
   0xa   : > { %p11201_p7 = por %p46_p5, %p45_p3  ;;  %s359_s13 = sand.u32 1, %s11088_s23  }
   0xb   : > { %s8730_s14 = sshll.u32 %s359_s13, 8  ;;  %s9561_s15 = sshll.u32 %s11092_s24, 12 }
   0xc   : > { %s16907_s30 = scalar_select %p11201_p7, 1, 0 }
   0xd   : > { %s11210_s18 = scalar_lea.hbm %s16571_s0, %s9561_s15  ;;  %s363_s19 = scalar_lea.vmem [#allocation4], %s8730_s14 }
   0xe   : > { %s371_s20 = sshll.u32 %s363_s19, 4  ;;  %p11214_p8 = pnand %p10944_p6, %p41_p4  ;;  %s11212_s20 = int_to_ptr.vmem [resolvable:$true] %s371_s20 }
   0xf   : > { %s11219_s27 = scalar_lea.sflag [#allocation5], %s359_s13  ;;  %s11030_s28 = scalar_lea.hbm %s11210_s18, 4096 }
  0x10   : > { %p11031_p10 = scmp.ne.s32.totalorder %s11210_s18, %s11030_s28  ;;  %p11032_p11 = pneg %p11214_p8 }
  0x11   : > { %s11035_s14 = scalar_lea.hbm %s16571_s0, 8192  ;;  %p11036_p0 = scmp.lt.s32.totalorder %s11210_s18, %s16571_s0 }
  0x12   : > { %p11033_p12 = pnand %p11032_p11, %p11031_p10  ;;  %p11037_p1 = scmp.lt.s32.totalorder %s11035_s14, %s11030_s28 }
  0x14   : > { %p11034_p13 = pneg %p11033_p12  ;;  %p11038_p2 = por %p11037_p1, %p11036_p0 }
  0x16   : > { %p11039_p3 = pnand %p11038_p2, %p11034_p13 }
  0x18   : > { %11042 = shalt.err (!%p11039_p3)
}
  0x19   : > { %s11043_s13 = scalar_lea.vmem %s11212_s20, 4096  ;;  %s11094_s25 = smov [#allocation4]  }
  0x1a   : > { %p11044_p4 = scmp.ne.s32.totalorder %s11212_s20, %s11043_s13  ;;  %s11048_s29 = sshll.u32 %s11094_s25, 4  ;;  %s11049_s29 = int_to_ptr.vmem [resolvable:$false] %s11048_s29 }
  0x1b   : > { %s11050_s15 = scalar_lea.vmem %s11049_s29, 8192  ;;  %p11051_p10 = scmp.lt.s32.totalorder %s11212_s20, %s11049_s29 }
  0x1c   : > { %p11046_p5 = pnand %p11044_p4, %p11032_p11  ;;  %p11052_p12 = scmp.lt.s32.totalorder %s11050_s15, %s11043_s13 }
  0x1e   : > { %p11047_p6 = pneg %p11046_p5  ;;  %p11053_p9 = por %p11052_p12, %p11051_p10 }
  0x20   : > { %p11054_p7 = pnand %p11053_p9, %p11047_p6 }
  0x22   : > { %11057 = shalt.err (!%p11054_p7)
}
  0x23   : > { %s11095_s28 = smov 128   ;;  %s11096_s16 = smov 8  }
  0x24   : > { %10943 = dma.hbm_to_vmem [thread:$0]  (!%p11214_p8), %s11210_s18, 4096, %s11212_s20, %s11219_s27, %s11095_s28, %s11095_s28, %s11096_s16  }
  0x25   : > { %p379_p11 = scmp.lt.s32.totalorder %s11092_s24, 3  ;;  %p16909_p13 = scmp.ge.s32.totalorder %s11092_s24, 1 }
  0x27   : > { %p380_p0 = pnand %p16909_p13, %p379_p11 }
  0x29   : > { %383 = sbr.rel (%p380_p0) target bundleno = 2398 (0x95e), region = 68 }
  0x2e   : > { %s385_s25 = sand.u32 1, %s11084_s22   ;;  %p16910_p7 = scmp.ne.s32.totalorder %s16907_s30, 0 }
  0x2f   : > { %s8735_s29 = sshll.u32 %s385_s25, 8  ;;  %s386_s14 = scalar_lea.sflag [#allocation5], %s385_s25 }
  0x30   : > { %s11244_s17 = scalar_lea.vmem [#allocation4], %s8735_s29 }
  0x31   : > { %11075 = dma.done.wait (%p16910_p7), %s386_s14, 4096  }
  0x32   : > { %11077 = vsyncadd (%p16910_p7), %s386_s14, 4294963200  ;;  %vm472_vm0 = vcmask 261120   ;;  %vm474_vm1 = vcmask 254976   ;;  %vm491_vm2 = vcmask 253952   ;;  %v16586_v0 = vmov 0.0   ;;  %v10983_v1 = vld [vmem:[%s16572_s1 + $0x18] sm:$0xff]  }
  0x33   : > { %473 = vst.msk [vmem:[#allocation2] sm:$0xff] %vm472_vm0, %v16586_v0  ;;  %476 = vst.msk [vmem:[#allocation2 + $0xa0] sm:$0xff] %vm472_vm0, %v16586_v0  ;;  %v10984_v2 = vld [vmem:[%s16572_s1 + $0x8] sm:$0xff]   ;;  %10222 = vmatprep.subr.bf16.mxu0 %v10983_v1  ;;  %v10985_v3 = vld [vmem:[%s16572_s1 + $0x10] sm:$0xff]   ;;  %vm1850_vm3 = vcmask 1042432   ;;  %vm1851_vm4 = vcmask 1046532  }
  0x34   : > { %475 = vst.msk [vmem:[#allocation2 + $0x8] sm:$0x3] %vm474_vm1, %v16586_v0  ;;  %477 = vst.msk [vmem:[#allocation2 + $0xa8] sm:$0x3] %vm474_vm1, %v16586_v0  ;;  %10258 = vmatprep.subr.bf16.mxu1 %v10984_v2  ;;  %10223 = vmatpush3.bf16.msra.mxu0 %v10983_v1  ;;  %v10986_v4 = vld [vmem:[%s16572_s1] sm:$0xff]   ;;  %v11458_v6 = vld [vmem:[%s11244_s17 + $0x8] sm:$0xff] }
  0x35   : > { %493 = vst.msk [vmem:[#allocation2 + $0x10] sm:$0x1] %vm491_vm2, %v16586_v0  ;;  %494 = vst.msk [vmem:[#allocation2 + $0x20] sm:$0x1] %vm491_vm2, %v16586_v0  ;;  %10259 = vmatpush3.bf16.msra.mxu1 %v10984_v2  ;;  %10224 = vmatprep.subr.bf16.mxu0 %v10985_v3  ;;  %v11455_v5 = vld [vmem:[%s11244_s17] sm:$0xff]  ;;  %v11461_v7 = vld [vmem:[%s11244_s17 + $0x10] sm:$0xff] }
  0x36   : > { %495 = vst.msk [vmem:[#allocation2 + $0x30] sm:$0x1] %vm491_vm2, %v16586_v0  ;;  %496 = vst.msk [vmem:[#allocation2 + $0x40] sm:$0x1] %vm491_vm2, %v16586_v0  ;;  %10260 = vmatprep.subr.bf16.mxu1 %v10986_v4  ;;  %v11464_v8 = vld [vmem:[%s11244_s17 + $0x18] sm:$0xff]  ;;  %v11479_v13 = vld [vmem:[%s11244_s17 + $0x20] sm:$0xff] }
  0x37   : > { %533 = vst.msk [vmem:[#allocation2 + $0x19] sm:$0x1] %vm491_vm2, %v16586_v0  ;;  %534 = vst.msk [vmem:[#allocation2 + $0x29] sm:$0x1] %vm491_vm2, %v16586_v0  ;;  %v11482_v14 = vld [vmem:[%s11244_s17 + $0x28] sm:$0xff]  ;;  %v11485_v15 = vld [vmem:[%s11244_s17 + $0x30] sm:$0xff] }
  0x38   : > { %535 = vst.msk [vmem:[#allocation2 + $0x39] sm:$0x1] %vm491_vm2, %v16586_v0  ;;  %536 = vst.msk [vmem:[#allocation2 + $0x49] sm:$0x1] %vm491_vm2, %v16586_v0  ;;  %10225 = vmatpush3.bf16.msra.mxu0 %v10985_v3  ;;  %vm889_vm5 = vsmask.f32 3328 }
  0x39   : > { %478 = vst.msk [vmem:[#allocation2 + $0x140] sm:$0xff] %vm472_vm0, %v16586_v0  ;;  %480 = vst.msk [vmem:[#allocation2 + $0x1e0] sm:$0xff] %vm472_vm0, %v16586_v0  ;;  %v11494_v16 = vld [vmem:[%s11244_s17 + $0x40] sm:$0xff]  ;;  %10261 = vmatpush3.bf16.msra.mxu1 %v10986_v4  ;;  %v16919_v22 = vmov 0  ;;  %v11507_v24 = vld [vmem:[%s11244_s17 + $0x48] sm:$0xff]  ;;  %vm4115_vm9 = vcmask 130048  }
  0x3a   : > { %479 = vst.msk [vmem:[#allocation2 + $0x148] sm:$0x3] %vm474_vm1, %v16586_v0  ;;  %481 = vst.msk [vmem:[#allocation2 + $0x1e8] sm:$0x3] %vm474_vm1, %v16586_v0  ;;  %v11510_v25 = vld [vmem:[%s11244_s17 + $0x50] sm:$0xff]  ;;  %v11523_v28 = vld [vmem:[%s11244_s17 + $0x58] sm:$0xff] }
  0x3b   : > { %483 = vst.msk [vmem:[#allocation2 + $0x90] sm:$0xff] %vm472_vm0, %v16586_v0  ;;  %485 = vst.msk [vmem:[#allocation2 + $0x130] sm:$0xff] %vm472_vm0, %v16586_v0  ;;  %vm890_vm7 = vsmask.f32 7440  ;;  %v11526_v29 = vld [vmem:[%s11244_s17 + $0x60] sm:$0xff]  ;;  %v11529_v30 = vld [vmem:[%s11244_s17 + $0x68] sm:$0xff] }
  0x3c   : > { %484 = vst.msk [vmem:[#allocation2 + $0x98] sm:$0x3] %vm474_vm1, %v16586_v0  ;;  %486 = vst.msk [vmem:[#allocation2 + $0x138] sm:$0x3] %vm474_vm1, %v16586_v0  ;;  %v11536_v34 = vld [vmem:[%s11244_s17 + $0x70] sm:$0xff]  ;;  %v11541_v35 = vld [vmem:[%s11244_s17 + $0x80] sm:$0xff] }
  0x3d   : > { %487 = vst.msk [vmem:[#allocation2 + $0x1d0] sm:$0xff] %vm472_vm0, %v16586_v0  ;;  %489 = vst.msk [vmem:[#allocation2 + $0x270] sm:$0xff] %vm472_vm0, %v16586_v0  ;;  %v11554_v41 = vld [vmem:[%s11244_s17 + $0x88] sm:$0xff]  ;;  %vm4134_vm10 = vcmask 122880   ;;  %vm4117_vm11 = vcmask 123904   ;;  %s17718_s25 = sadd.s32 4294967295, %s11092_s24  }
  0x3e   : > { %488 = vst.msk [vmem:[#allocation2 + $0x1d8] sm:$0x3] %vm474_vm1, %v16586_v0  ;;  %490 = vst.msk [vmem:[#allocation2 + $0x278] sm:$0x3] %vm474_vm1, %v16586_v0  ;;  %s8736_s29 = sshll.u32 %s17718_s25, 2 }
  0x3f   : > { %497 = vst.msk [vmem:[#allocation2 + $0x50] sm:$0x1] %vm491_vm2, %v16586_v0  ;;  %498 = vst.msk [vmem:[#allocation2 + $0x60] sm:$0x1] %vm491_vm2, %v16586_v0  ;;  %p433_p8 = scmp.lt.s32.totalorder %s8736_s29, 7 }
  0x40   : > { %499 = vst.msk [vmem:[#allocation2 + $0x70] sm:$0x1] %vm491_vm2, %v16586_v0  ;;  %500 = vst.msk [vmem:[#allocation2 + $0x80] sm:$0x1] %vm491_vm2, %v16586_v0 }
  0x41   : > { %503 = vst.msk [vmem:[#allocation2 + $0xb0] sm:$0x1] %vm491_vm2, %v16586_v0  ;;  %504 = vst.msk [vmem:[#allocation2 + $0xc0] sm:$0x1] %vm491_vm2, %v16586_v0  ;;  %s17757_s29 = smov (!%p433_p8, %s8736_s29), 7 }
  0x42   : > { %505 = vst.msk [vmem:[#allocation2 + $0xd0] sm:$0x1] %vm491_vm2, %v16586_v0  ;;  %506 = vst.msk [vmem:[#allocation2 + $0xe0] sm:$0x1] %vm491_vm2, %v16586_v0  ;;  %s9562_s24 = sshll.u32 %s17757_s29, 6 }
  0x43   : > { %507 = vst.msk [vmem:[#allocation2 + $0xf0] sm:$0x1] %vm491_vm2, %v16586_v0  ;;  %508 = vst.msk [vmem:[#allocation2 + $0x100] sm:$0x1] %vm491_vm2, %v16586_v0  ;;  %s16456_s18 = scalar_lea.vmem %s16583_s12, %s9562_s24 }
  0x44   : > { %509 = vst.msk [vmem:[#allocation2 + $0x110] sm:$0x1] %vm491_vm2, %v16586_v0  ;;  %510 = vst.msk [vmem:[#allocation2 + $0x120] sm:$0x1] %vm491_vm2, %v16586_v0 }
  0x45   : > { %513 = vst.msk [vmem:[#allocation2 + $0x150] sm:$0x1] %vm491_vm2, %v16586_v0  ;;  %514 = vst.msk [vmem:[#allocation2 + $0x160] sm:$0x1] %vm491_vm2, %v16586_v0 }
  0x46   : > { %515 = vst.msk [vmem:[#allocation2 + $0x170] sm:$0x1] %vm491_vm2, %v16586_v0  ;;  %516 = vst.msk [vmem:[#allocation2 + $0x180] sm:$0x1] %vm491_vm2, %v16586_v0 }
  0x47   : > { %517 = vst.msk [vmem:[#allocation2 + $0x190] sm:$0x1] %vm491_vm2, %v16586_v0  ;;  %518 = vst.msk [vmem:[#allocation2 + $0x1a0] sm:$0x1] %vm491_vm2, %v16586_v0 }
  0x48   : > { %519 = vst.msk [vmem:[#allocation2 + $0x1b0] sm:$0x1] %vm491_vm2, %v16586_v0  ;;  %520 = vst.msk [vmem:[#allocation2 + $0x1c0] sm:$0x1] %vm491_vm2, %v16586_v0 }
  0x49   : > { %523 = vst.msk [vmem:[#allocation2 + $0x1f0] sm:$0x1] %vm491_vm2, %v16586_v0  ;;  %524 = vst.msk [vmem:[#allocation2 + $0x200] sm:$0x1] %vm491_vm2, %v16586_v0 }
  0x4a   : > { %525 = vst.msk [vmem:[#allocation2 + $0x210] sm:$0x1] %vm491_vm2, %v16586_v0  ;;  %526 = vst.msk [vmem:[#allocation2 + $0x220] sm:$0x1] %vm491_vm2, %v16586_v0 }
  0x4b   : > { %527 = vst.msk [vmem:[#allocation2 + $0x230] sm:$0x1] %vm491_vm2, %v16586_v0  ;;  %528 = vst.msk [vmem:[#allocation2 + $0x240] sm:$0x1] %vm491_vm2, %v16586_v0 }
  0x4c   : > { %529 = vst.msk [vmem:[#allocation2 + $0x250] sm:$0x1] %vm491_vm2, %v16586_v0  ;;  %530 = vst.msk [vmem:[#allocation2 + $0x260] sm:$0x1] %vm491_vm2, %v16586_v0 }
  0x4d   : > { %537 = vst.msk [vmem:[#allocation2 + $0x59] sm:$0x1] %vm491_vm2, %v16586_v0  ;;  %538 = vst.msk [vmem:[#allocation2 + $0x69] sm:$0x1] %vm491_vm2, %v16586_v0 }
  0x4e   : > { %539 = vst.msk [vmem:[#allocation2 + $0x79] sm:$0x1] %vm491_vm2, %v16586_v0  ;;  %540 = vst.msk [vmem:[#allocation2 + $0x89] sm:$0x1] %vm491_vm2, %v16586_v0 }
  0x4f   : > { %543 = vst.msk [vmem:[#allocation2 + $0xb9] sm:$0x1] %vm491_vm2, %v16586_v0  ;;  %544 = vst.msk [vmem:[#allocation2 + $0xc9] sm:$0x1] %vm491_vm2, %v16586_v0 }
  0x50   : > { %545 = vst.msk [vmem:[#allocation2 + $0xd9] sm:$0x1] %vm491_vm2, %v16586_v0  ;;  %546 = vst.msk [vmem:[#allocation2 + $0xe9] sm:$0x1] %vm491_vm2, %v16586_v0 }
  0x51   : > { %547 = vst.msk [vmem:[#allocation2 + $0xf9] sm:$0x1] %vm491_vm2, %v16586_v0  ;;  %548 = vst.msk [vmem:[#allocation2 + $0x109] sm:$0x1] %vm491_vm2, %v16586_v0 }
  0x52   : > { %549 = vst.msk [vmem:[#allocation2 + $0x119] sm:$0x1] %vm491_vm2, %v16586_v0  ;;  %550 = vst.msk [vmem:[#allocation2 + $0x129] sm:$0x1] %vm491_vm2, %v16586_v0 }
  0x53   : > { %553 = vst.msk [vmem:[#allocation2 + $0x159] sm:$0x1] %vm491_vm2, %v16586_v0  ;;  %554 = vst.msk [vmem:[#allocation2 + $0x169] sm:$0x1] %vm491_vm2, %v16586_v0 }
  0x54   : > { %555 = vst.msk [vmem:[#allocation2 + $0x179] sm:$0x1] %vm491_vm2, %v16586_v0  ;;  %556 = vst.msk [vmem:[#allocation2 + $0x189] sm:$0x1] %vm491_vm2, %v16586_v0 }
  0x55   : > { %557 = vst.msk [vmem:[#allocation2 + $0x199] sm:$0x1] %vm491_vm2, %v16586_v0  ;;  %558 = vst.msk [vmem:[#allocation2 + $0x1a9] sm:$0x1] %vm491_vm2, %v16586_v0 }
  0x56   : > { %559 = vst.msk [vmem:[#allocation2 + $0x1b9] sm:$0x1] %vm491_vm2, %v16586_v0  ;;  %560 = vst.msk [vmem:[#allocation2 + $0x1c9] sm:$0x1] %vm491_vm2, %v16586_v0 }
  0x57   : > { %563 = vst.msk [vmem:[#allocation2 + $0x1f9] sm:$0x1] %vm491_vm2, %v16586_v0  ;;  %564 = vst.msk [vmem:[#allocation2 + $0x209] sm:$0x1] %vm491_vm2, %v16586_v0 }
  0x58   : > { %565 = vst.msk [vmem:[#allocation2 + $0x219] sm:$0x1] %vm491_vm2, %v16586_v0  ;;  %566 = vst.msk [vmem:[#allocation2 + $0x229] sm:$0x1] %vm491_vm2, %v16586_v0 }
  0x59   : > { %567 = vst.msk [vmem:[#allocation2 + $0x239] sm:$0x1] %vm491_vm2, %v16586_v0  ;;  %568 = vst.msk [vmem:[#allocation2 + $0x249] sm:$0x1] %vm491_vm2, %v16586_v0 }
  0x5a   : > { %569 = vst.msk [vmem:[#allocation2 + $0x259] sm:$0x1] %vm491_vm2, %v16586_v0  ;;  %570 = vst.msk [vmem:[#allocation2 + $0x269] sm:$0x1] %vm491_vm2, %v16586_v0 }
  0x5b   : > { %492 = vst.msk [vmem:[#allocation2] sm:$0x1] %vm491_vm2, %v16586_v0  ;;  %532 = vst.msk [vmem:[#allocation2 + $0x9] sm:$0x1] %vm491_vm2, %v16586_v0 }
  0x5c   : > { %501 = vst.msk [vmem:[#allocation2 + $0x90] sm:$0x1] %vm491_vm2, %v16586_v0  ;;  %502 = vst.msk [vmem:[#allocation2 + $0xa0] sm:$0x1] %vm491_vm2, %v16586_v0 }
  0x5d   : > { %511 = vst.msk [vmem:[#allocation2 + $0x130] sm:$0x1] %vm491_vm2, %v16586_v0  ;;  %512 = vst.msk [vmem:[#allocation2 + $0x140] sm:$0x1] %vm491_vm2, %v16586_v0 }
  0x5e   : > { %521 = vst.msk [vmem:[#allocation2 + $0x1d0] sm:$0x1] %vm491_vm2, %v16586_v0  ;;  %522 = vst.msk [vmem:[#allocation2 + $0x1e0] sm:$0x1] %vm491_vm2, %v16586_v0 }
  0x5f   : > { %531 = vst.msk [vmem:[#allocation2 + $0x270] sm:$0x1] %vm491_vm2, %v16586_v0  ;;  %541 = vst.msk [vmem:[#allocation2 + $0x99] sm:$0x1] %vm491_vm2, %v16586_v0 }
  0x60   : > { %542 = vst.msk [vmem:[#allocation2 + $0xa9] sm:$0x1] %vm491_vm2, %v16586_v0  ;;  %551 = vst.msk [vmem:[#allocation2 + $0x139] sm:$0x1] %vm491_vm2, %v16586_v0 }
  0x61   : > { %552 = vst.msk [vmem:[#allocation2 + $0x149] sm:$0x1] %vm491_vm2, %v16586_v0  ;;  %561 = vst.msk [vmem:[#allocation2 + $0x1d9] sm:$0x1] %vm491_vm2, %v16586_v0 }
  0x62   : > { %562 = vst.msk [vmem:[#allocation2 + $0x1e9] sm:$0x1] %vm491_vm2, %v16586_v0  ;;  %571 = vst.msk [vmem:[#allocation2 + $0x279] sm:$0x1] %vm491_vm2, %v16586_v0  ;;  %v11472_v9 = vld [vmem:[#allocation2] sm:$0xff] }
  0x63   : > { %16911 = vst [vmem:[#allocation8_spill] sm:$0xff] %v11455_v5  ;;  %16912 = vst [vmem:[#allocation9_spill] sm:$0xff] %v11458_v6  ;;  %v606_v10 = vld [vmem:[#allocation2 + $0x8] sm:$0x3]  ;;  %v9563_v11 = vpack.c.bf16 %v11472_v9, %v11472_v9  ;;  %v11496_v17 = vld [vmem:[#allocation2 + $0xa0] sm:$0xff] }
  0x64   : > { %16913 = vst [vmem:[#allocation10_spill] sm:$0xff] %v11461_v7  ;;  %16914 = vst [vmem:[#allocation11_spill] sm:$0xff] %v11464_v8  ;;  %v9564_v12 = vpack.c.bf16 %v606_v10, %v606_v10  ;;  %v11514_v26 = vpack.c.bf16 %v11496_v17, %v11496_v17  ;;  %v11543_v36 = vld [vmem:[#allocation2 + $0x140] sm:$0xff] }
  0x65   : > { %573 = vst.msk [vmem:[#allocation2 + $0x11] sm:$0xff] %vm472_vm0, %v11455_v5  ;;  %574 = vst.msk [vmem:[#allocation2 + $0x21] sm:$0xff] %vm472_vm0, %v11458_v6  ;;  %v893_v19 = vshrl.u32 %v9563_v11, 16  ;;  %v896_v20 = vshll.u32 %v9563_v11, 16  ;;  %v8871_v31 = vrot.slane %v9563_v11, 9  ;;  %v11561_v47 = vpack.c.bf16 %v11543_v36, %v11543_v36 }
  0x66   : > { %575 = vst.msk [vmem:[#allocation2 + $0x31] sm:$0xff] %vm472_vm0, %v11461_v7  ;;  %576 = vst.msk [vmem:[#allocation2 + $0x41] sm:$0xff] %vm472_vm0, %v11464_v8  ;;  %v902_v21 = vshll.u32 %v9564_v12, 16  ;;  %v1855_v23 = vrot.slane %v9564_v12, 5 }
  0x67   : > { %16915 = vst [vmem:[#allocation12_spill] sm:$0xff] %v11479_v13  ;;  %16916 = vst [vmem:[#allocation13_spill] sm:$0xff] %v11482_v14  ;;  %v626_v18 = vld [vmem:[#allocation2 + $0xa8] sm:$0x3]  ;;  %v895_v32 = vrot.slane %v893_v19, 4  ;;  %v898_v33 = vrot.slane %v896_v20, 5 }
  0x68   : > { %16917 = vst [vmem:[#allocation14_spill] sm:$0xff] %v11485_v15  ;;  %577 = vst.msk [vmem:[#allocation2 + $0x51] sm:$0xff] %vm472_vm0, %v11479_v13  ;;  %v11516_v27 = vpack.c.bf16 %v626_v18, %v626_v18  ;;  %v11545_v37 = vrot.slane %v902_v21, 5  ;;  %v646_v40 = vld [vmem:[#allocation2 + $0x148] sm:$0x3]  ;;  %v16932_v20 = vmov 0 }
  0x69   : > { %578 = vst.msk [vmem:[#allocation2 + $0x61] sm:$0xff] %vm472_vm0, %v11482_v14  ;;  %579 = vst.msk [vmem:[#allocation2 + $0x71] sm:$0xff] %vm472_vm0, %v11485_v15  ;;  %v899_v45 = vor.u32 %v898_v33, %v895_v32  ;;  %v11582_v61 = vpack.c.bf16 %v646_v40, %v646_v40 }
  0x6a   : > { %16918 = vst [vmem:[#allocation15_spill] sm:$0xff] %v11494_v16  ;;  %vm11500_vm6 = vmor %vm1850_vm3, %vm1851_vm4 }
  0x6b   : > { %v16920_v22 = vsel %vm11500_vm6, 4294967295, %v16919_v22  ;;  %581 = vst.msk [vmem:[#allocation2 + $0xb1] sm:$0xff] %vm472_vm0, %v11494_v16  ;;  %16922 = vst [vmem:[#allocation17_spill] sm:$0xff] %v11507_v24  ;;  %v11567_v48 = vsel %vm11500_vm6, %v8871_v31, %v1855_v23  ;;  %v900_v63 = vrot.slane %v899_v45, 4 }
  0x6c   : > { %16921 = vst [vmem:[#allocation16_spill] sm:$0xff] %v16920_v22  ;;  %16923 = vst [vmem:[#allocation18_spill] sm:$0xff] %v11510_v25  ;;  %v607_v42 = vld [vmem:[#allocation2 + $0x10] sm:$0xff]  ;;  %v608_v43 = vld [vmem:[#allocation2 + $0x18] sm:$0x3] }
  0x6d   : > { %582 = vst.msk [vmem:[#allocation2 + $0xc1] sm:$0xff] %vm472_vm0, %v11507_v24  ;;  %583 = vst.msk [vmem:[#allocation2 + $0xd1] sm:$0xff] %vm472_vm0, %v11510_v25  ;;  %v11556_v44 = vld [vmem:[#allocation2 + $0x20] sm:$0xff]  ;;  %v610_v49 = vld [vmem:[#allocation2 + $0x28] sm:$0x3]  ;;  %v11569_v52 = vpack.c.bf16 %v607_v42, %v607_v42  ;;  %v11571_v53 = vpack.c.bf16 %v608_v43, %v608_v43  ;;  %v9627_v55 = vpack.c.bf16 %v607_v42, %v11472_v9 }
  0x6e   : > { %16924 = vst [vmem:[#allocation19_spill] sm:$0xff] %v11523_v28  ;;  %16925 = vst [vmem:[#allocation20_spill] sm:$0xff] %v11526_v29  ;;  %v611_v50 = vld [vmem:[#allocation2 + $0x30] sm:$0xff]  ;;  %v612_v51 = vld [vmem:[#allocation2 + $0x38] sm:$0x3]  ;;  %v9567_v54 = vpack.c.bf16 %v11556_v44, %v11556_v44  ;;  %v9568_v58 = vpack.c.bf16 %v610_v49, %v610_v49 }
  0x6f   : > { %16926 = vst [vmem:[#allocation21_spill] sm:$0xff] %v11529_v30  ;;  %584 = vst.msk [vmem:[#allocation2 + $0xe1] sm:$0xff] %vm472_vm0, %v11523_v28  ;;  %v11576_v56 = vld [vmem:[#allocation2 + $0x40] sm:$0xff]  ;;  %v614_v57 = vld [vmem:[#allocation2 + $0x48] sm:$0x3]  ;;  %v11578_v59 = vpack.c.bf16 %v611_v50, %v611_v50  ;;  %v11580_v60 = vpack.c.bf16 %v612_v51, %v612_v51  ;;  %v907_v1 = vshrl.u32 %v11569_v52, 16  ;;  %10262 = vmatprep.mubr.msk.bf16.mxu1 %vm472_vm0, %v9627_v55 }
  0x70   : > { %585 = vst.msk [vmem:[#allocation2 + $0xf1] sm:$0xff] %vm472_vm0, %v11526_v29  ;;  %16927 = vst [vmem:[#allocation22_spill] sm:$0xff] %v11536_v34  ;;  %v11586_v62 = vpack.c.bf16 %v11576_v56, %v11576_v56  ;;  %v910_v2 = vshll.u32 %v11569_v52, 16  ;;  %v11591_v3 = vpack.c.bf16 %v614_v57, %v614_v57  ;;  %v916_v4 = vshll.u32 %v11571_v53, 16  ;;  %v616_v0 = vld [vmem:[#allocation2 + $0x58] sm:$0x3] }
  0x71   : > { %586 = vst.msk [vmem:[#allocation2 + $0x101] sm:$0xff] %vm472_vm0, %v11529_v30  ;;  %16928 = vst [vmem:[#allocation23_spill] sm:$0xff] %v11541_v35  ;;  %v921_v9 = vshrl.u32 %v9567_v54, 16  ;;  %v924_v10 = vshll.u32 %v9567_v54, 16  ;;  %v909_v11 = vrot.slane %v907_v1, 4  ;;  %v930_v18 = vshll.u32 %v9568_v58, 16 }
  0x72   : > { %587 = vst.msk [vmem:[#allocation2 + $0x111] sm:$0xff] %vm472_vm0, %v11536_v34  ;;  %589 = vst.msk [vmem:[#allocation2 + $0x151] sm:$0xff] %vm472_vm0, %v11541_v35  ;;  %v912_v12 = vrot.slane %v910_v2, 5  ;;  %v935_v19 = vshrl.u32 %v11578_v59, 16  ;;  %v918_v21 = vrot.slane %v916_v4, 5  ;;  %v938_v32 = vshll.u32 %v11578_v59, 16 }
  0x73   : > { %16929 = vst [vmem:[#allocation24_spill] sm:$0xff] %v11554_v41  ;;  %16930 = vst [vmem:[#allocation25_spill] sm:$0xff] %v11561_v47  ;;  %v923_v23 = vrot.slane %v921_v9, 4  ;;  %v926_v31 = vrot.slane %v924_v10, 5  ;;  %v932_v40 = vrot.slane %v930_v18, 5  ;;  %v944_v43 = vshll.u32 %v11580_v60, 16 }
  0x74   : > { %590 = vst.msk [vmem:[#allocation2 + $0x161] sm:$0xff] %vm472_vm0, %v11554_v41  ;;  %16931 = vst [vmem:[#allocation26_spill] sm:$0xff] %v11582_v61  ;;  %v913_v33 = vor.u32 %v912_v12, %v909_v11  ;;  %v937_v42 = vrot.slane %v935_v19, 4  ;;  %v940_v49 = vrot.slane %v938_v32, 5  ;;  %v949_v51 = vshrl.u32 %v11586_v62, 16  ;;  %v615_v32 = vld [vmem:[#allocation2 + $0x50] sm:$0xff] }
  0x75   : > { %vm11597_vm8 = vmor %vm889_vm5, %vm890_vm7  ;;  %v927_v45 = vor.u32 %v926_v31, %v923_v23  ;;  %v952_v55 = vshll.u32 %v11586_v62, 16  ;;  %v946_v2 = vrot.slane %v944_v43, 5  ;;  %v958_v4 = vshll.u32 %v11591_v3, 16  ;;  %v11618_v43 = vld [vmem:[#allocation2 + $0x60] sm:$0xff]  ;;  %v628_v46 = vld [vmem:[#allocation2 + $0xb8] sm:$0x3] }
  0x76   : > { %v16933_v20 = vsel %vm11597_vm8, 4294967295, %v16932_v20  ;;  %v905_v57 = vsel %vm11597_vm8, %v900_v63, %v11545_v37  ;;  %v914_v1 = vrot.slane %v913_v33, 4  ;;  %v941_v10 = vor.u32 %v940_v49, %v937_v42  ;;  %v11712_v41 = vld [vmem:[%s11244_s17 + $0xd0] sm:$0xff]  ;;  %v632_v16 = vld [vmem:[#allocation2 + $0xd8] sm:$0x3] }
  0x77   : > { %16934 = vst [vmem:[#allocation27_spill] sm:$0xff] %v16933_v20  ;;  %v928_v9 = vrot.slane %v927_v45, 4  ;;  %v951_v11 = vrot.slane %v949_v51, 4  ;;  %v954_v12 = vrot.slane %v952_v55, 5  ;;  %v960_v19 = vrot.slane %v958_v4, 5  ;;  %v11631_v51 = vld [vmem:[%s11244_s17 + $0x90] sm:$0xff] }
  0x78   : > { %v11611_v18 = vsel %vm11597_vm8, %v914_v1, %v918_v21  ;;  %v8873_v23 = vrot.slane %v9567_v54, 9  ;;  %v1863_v31 = vrot.slane %v9568_v58, 5  ;;  %v942_v63 = vrot.slane %v941_v10, 4  ;;  %v618_v45 = vld [vmem:[#allocation2 + $0x68] sm:$0x3]  ;;  %16938 = vst [vmem:[#allocation31_spill] sm:$0xff] %v11631_v51 }
  0x79   : > { %16935 = vst [vmem:[#allocation28_spill] sm:$0xff] %v11611_v18  ;;  %v11615_v37 = vsel %vm11597_vm8, %v928_v9, %v932_v40  ;;  %v955_v33 = vor.u32 %v954_v12, %v951_v11  ;;  %v8803_v42 = vcombine.low %v905_v57, %v11611_v18  ;;  %v11628_v58 = vpack.c.bf16 %v611_v50, %v11556_v44  ;;  %v619_v40 = vld [vmem:[#allocation2 + $0x70] sm:$0xff]  ;;  %v620_v9 = vld [vmem:[#allocation2 + $0x78] sm:$0x3]  ;;  %v10987_v44 = vld [vmem:[%s16572_s1 + $0x28] sm:$0xff]  }
  0x7a   : > { %16936 = vst [vmem:[#allocation29_spill] sm:$0xff] %v11615_v37  ;;  %v11623_v49 = vsel %vm11500_vm6, %v8873_v23, %v1863_v31  ;;  %v11635_v55 = vsel %vm11597_vm8, %v942_v63, %v946_v2  ;;  %v11638_v1 = vpack.c.bf16 %v615_v32, %v615_v32  ;;  %v11640_v4 = vpack.c.bf16 %v616_v0, %v616_v0  ;;  %v11663_v11 = vld [vmem:[%s11244_s17 + $0x98] sm:$0xff]  ;;  %v11666_v12 = vld [vmem:[%s11244_s17 + $0xa0] sm:$0xff]  ;;  %v11699_v21 = vld [vmem:[#allocation2 + $0xb0] sm:$0xff] }
  0x7b   : > { %16937 = vst [vmem:[#allocation30_spill] sm:$0xff] %v11628_v58  ;;  %16939 = vst [vmem:[#allocation32_spill] sm:$0xff] %v11635_v55  ;;  %v956_v57 = vrot.slane %v955_v33, 4  ;;  %10226 = vmatprep.mubr.msk.bf16.mxu0 %vm472_vm0, %v8803_v42  ;;  %v11649_v50 = vcombine.low %v11615_v37, %v11635_v55  ;;  %10263 = vmatmul.mubr.msk.bf16.vlgmr.msra.gmra.mxu1 %vm472_vm0, %v11628_v58  ;;  %v11654_v0 = vpack.c.bf16 %v615_v32, %v11576_v56  ;;  %v11680_v32 = vld [vmem:[%s11244_s17 + $0xa8] sm:$0xff]  ;;  %v11683_v33 = vld [vmem:[%s11244_s17 + $0xb0] sm:$0xff] }
  0x7c   : > { %591 = vst.msk [vmem:[#allocation2 + $0x171] sm:$0xff] %vm472_vm0, %v11631_v51  ;;  %v11658_v2 = vpack.c.bf16 %v11618_v43, %v11618_v43  ;;  %v11660_v10 = vpack.c.bf16 %v618_v45, %v618_v45  ;;  %16942 = vst [vmem:[#allocation35_spill] sm:$0xff] %v11663_v11  ;;  %v963_v31 = vshrl.u32 %v11638_v1, 16  ;;  %v966_v63 = vshll.u32 %v11638_v1, 16  ;;  %10294 = vmatprep.subr.bf16.mxu0 %v10987_v44  ;;  %v11708_v42 = vld [vmem:[%s11244_s17 + $0xc8] sm:$0xff]  ;;  %v11739_v51 = vld [vmem:[%s11244_s17 + $0xf0] sm:$0xff] }
  0x7d   : > { %16940 = vst [vmem:[#allocation33_spill] sm:$0xff] %v11649_v50  ;;  %16941 = vst [vmem:[#allocation34_spill] sm:$0xff] %v11654_v0  ;;  %v11670_v23 = vsel %vm11597_vm8, %v956_v57, %v960_v19  ;;  %v972_v56 = vshll.u32 %v11640_v4, 16  ;;  %v11686_v19 = vld [vmem:[%s11244_s17 + $0xc0] sm:$0xff]  ;;  %10227 = vmatmul.mubr.msk.bf16.vlgmr.msra.gmra.mxu0 %vm472_vm0, %v11649_v50  ;;  %10266 = vmatprep.mubr.msk.bf16.mxu1 %vm472_vm0, %v11654_v0  ;;  %v11694_v45 = vpack.c.bf16 %v619_v40, %v619_v40  ;;  %v634_v25 = vld [vmem:[#allocation2 + $0xe8] sm:$0x3] }
  0x7e   : > { %16943 = vst [vmem:[#allocation36_spill] sm:$0xff] %v11666_v12  ;;  %16944 = vst [vmem:[#allocation37_spill] sm:$0xff] %v11670_v23  ;;  %v11696_v57 = vpack.c.bf16 %v620_v9, %v620_v9  ;;  %v977_v54 = vshrl.u32 %v11658_v2, 16  ;;  %v965_v9 = vrot.slane %v963_v31, 4  ;;  %v968_v39 = vrot.slane %v966_v63, 5  ;;  %10295 = vmatpush3.bf16.msra.mxu0 %v10987_v44  ;;  %v11725_v63 = vld [vmem:[%s11244_s17 + $0xe0] sm:$0xff] }
  0x7f   : > { %592 = vst.msk [vmem:[#allocation2 + $0x181] sm:$0xff] %vm472_vm0, %v11663_v11  ;;  %593 = vst.msk [vmem:[#allocation2 + $0x191] sm:$0xff] %vm472_vm0, %v11666_v12  ;;  %v974_v38 = vrot.slane %v972_v56, 5  ;;  %v980_v12 = vshll.u32 %v11658_v2, 16  ;;  %v991_v35 = vshrl.u32 %v11694_v45, 16  ;;  %v994_v31 = vshll.u32 %v11694_v45, 16 }
  0x80   : > { %16945 = vst [vmem:[#allocation38_spill] sm:$0xff] %v11680_v32  ;;  %16946 = vst [vmem:[#allocation39_spill] sm:$0xff] %v11683_v33  ;;  %v11730_v44 = vld [vmem:[%s11244_s17 + $0xe8] sm:$0xff]  ;;  %v969_v56 = vor.u32 %v968_v39, %v965_v9  ;;  %v11734_v11 = vpack.c.bf16 %v619_v40, %v11618_v43  ;;  %v11748_v9 = vpack.c.bf16 %v11699_v21, %v11699_v21  ;;  %v16957_v34 = vshll.u32 %v11516_v27, 16  ;;  %v11822_v13 = vld [vmem:[#allocation2 + $0xf0] sm:$0xff] }
  0x81   : > { %16947 = vst [vmem:[#allocation40_spill] sm:$0xff] %v11686_v19  ;;  %594 = vst.msk [vmem:[#allocation2 + $0x1a1] sm:$0xff] %vm472_vm0, %v11680_v32  ;;  %v11717_v32 = vld [vmem:[%s11244_s17 + $0xd8] sm:$0xff]  ;;  %v993_v39 = vrot.slane %v991_v35, 4  ;;  %v11752_v30 = vpack.c.bf16 %v628_v46, %v628_v46  ;;  %v16955_v35 = vshrl.u32 %v11514_v26, 16  ;;  %v11864_v0 = vld [vmem:[#allocation2 + $0x110] sm:$0xff] }
  0x82   : > { %595 = vst.msk [vmem:[#allocation2 + $0x1b1] sm:$0xff] %vm472_vm0, %v11683_v33  ;;  %597 = vst.msk [vmem:[#allocation2 + $0x1f1] sm:$0xff] %vm472_vm0, %v11686_v19  ;;  %v979_v33 = vrot.slane %v977_v54, 4  ;;  %v986_v19 = vshll.u32 %v11660_v10, 16  ;;  %v1000_v54 = vshll.u32 %v11696_v57, 16  ;;  %v970_v43 = vrot.slane %v969_v56, 4 }
  0x83   : > { %16948 = vst [vmem:[#allocation41_spill] sm:$0xff] %v11708_v42  ;;  %16949 = vst [vmem:[#allocation42_spill] sm:$0xff] %v11712_v41  ;;  %10267 = vmatmul.mubr.msk.bf16.gmra.mxu1 %vm472_vm0, %v11734_v11  ;;  %v1016_v24 = vrot.slane %v16957_v34, 5  ;;  %v1022_v56 = vshll.u32 %v11748_v9, 16  ;;  %v1028_v34 = vshll.u32 %v11752_v30, 16 }
  0x84   : > { %598 = vst.msk [vmem:[#allocation2 + $0x201] sm:$0xff] %vm472_vm0, %v11708_v42  ;;  %16950 = vst [vmem:[#allocation43_spill] sm:$0xff] %v11717_v32  ;;  %v982_v42 = vrot.slane %v980_v12, 5  ;;  %v996_v12 = vrot.slane %v994_v31, 5  ;;  %v16956_v31 = vshll.u32 %v11514_v26, 16 }
  0x85   : > { %599 = vst.msk [vmem:[#allocation2 + $0x211] sm:$0xff] %vm472_vm0, %v11712_v41  ;;  %16951 = vst [vmem:[#allocation44_spill] sm:$0xff] %v11725_v63  ;;  %v988_v41 = vrot.slane %v986_v19, 5  ;;  %v1007_v19 = vrot.slane %v16955_v35, 4  ;;  %v636_v15 = vld [vmem:[#allocation2 + $0xf8] sm:$0x3] }
  0x86   : > { %600 = vst.msk [vmem:[#allocation2 + $0x221] sm:$0xff] %vm472_vm0, %v11717_v32  ;;  %16952 = vst [vmem:[#allocation45_spill] sm:$0xff] %v11730_v44  ;;  %v10988_v32 = vld [vmem:[%s16572_s1 + $0x38] sm:$0xff]   ;;  %v983_v40 = vor.u32 %v982_v42, %v979_v33  ;;  %v1010_v29 = vrot.slane %v16956_v31, 5  ;;  %v11764_v33 = vsel %vm11597_vm8, %v970_v43, %v974_v38  ;;  %v1019_v42 = vshrl.u32 %v11748_v9, 16 }
  0x87   : > { %16953 = vst [vmem:[#allocation46_spill] sm:$0xff] %v11734_v11  ;;  %601 = vst.msk [vmem:[#allocation2 + $0x231] sm:$0xff] %vm472_vm0, %v11725_v63  ;;  %v1002_v63 = vrot.slane %v1000_v54, 5  ;;  %10330 = vmatprep.subr.bf16.mxu1 %v10988_v32  ;;  %v11768_v54 = vld [vmem:[#allocation2 + $0xc0] sm:$0xff]  ;;  %v630_v31 = vld [vmem:[#allocation2 + $0xc8] sm:$0x3] }
  0x88   : > { %16954 = vst [vmem:[#allocation47_spill] sm:$0xff] %v11739_v51  ;;  %602 = vst.msk [vmem:[#allocation2 + $0x241] sm:$0xff] %vm472_vm0, %v11730_v44  ;;  %v997_v44 = vor.u32 %v996_v12, %v993_v39  ;;  %v984_v46 = vrot.slane %v983_v40, 4  ;;  %10331 = vmatpush3.bf16.msra.mxu1 %v10988_v32  ;;  %v11772_v39 = vcombine.low %v11670_v23, %v11764_v33  ;;  %v1021_v43 = vrot.slane %v1019_v42, 4  ;;  %v640_v58 = vld [vmem:[#allocation2 + $0x118] sm:$0x3] }
  0x89   : > { %603 = vst.msk [vmem:[#allocation2 + $0x251] sm:$0xff] %vm472_vm0, %v11739_v51  ;;  %16958 = vst [vmem:[#allocation48_spill] sm:$0xff] %v11764_v33  ;;  %v1011_v35 = vor.u32 %v1010_v29, %v1007_v19  ;;  %v11775_v51 = vld [vmem:[#allocation2 + $0xd0] sm:$0xff]  ;;  %v1024_v40 = vrot.slane %v1022_v56, 5  ;;  %v9631_v32 = vpack.c.bf16 %v11699_v21, %v11496_v17  ;;  %v1030_v19 = vrot.slane %v1028_v34, 5  ;;  %v11810_v34 = vld [vmem:[#allocation2 + $0xe0] sm:$0xff] }
  0x8a   : > { %16959 = vst [vmem:[#allocation49_spill] sm:$0xff] %v11772_v39  ;;  %v998_v12 = vrot.slane %v997_v44, 4  ;;  %v11779_v38 = vsel %vm11597_vm8, %v984_v46, %v988_v41  ;;  %10230 = vmatprep.mubr.msk.bf16.mxu0 %vm472_vm0, %v11772_v39  ;;  %v11791_v28 = vpack.c.bf16 %v11768_v54, %v11768_v54  ;;  %v11798_v17 = vpack.c.bf16 %v630_v31, %v630_v31  ;;  %v11894_v23 = vld [vmem:[%s16572_s1 + $0x58] sm:$0xff]  }
  0x8b   : > { %16960 = vst [vmem:[#allocation50_spill] sm:$0xff] %v11779_v38  ;;  %v1012_v44 = vrot.slane %v1011_v35, 4  ;;  %v1025_v46 = vor.u32 %v1024_v40, %v1021_v43  ;;  %10270 = vmatprep.mubr.msk.bf16.mxu1 %vm472_vm0, %v9631_v32  ;;  %v11802_v42 = vpack.c.bf16 %v11775_v51, %v11775_v51  ;;  %v11806_v56 = vpack.c.bf16 %v632_v16, %v632_v16 }
  0x8c   : > { %v11787_v29 = vsel %vm11597_vm8, %v998_v12, %v1002_v63  ;;  %v1033_v12 = vshrl.u32 %v11791_v28, 16  ;;  %v1036_v35 = vshll.u32 %v11791_v28, 16  ;;  %v1042_v43 = vshll.u32 %v11798_v17, 16  ;;  %16964 = vst [vmem:[#allocation54_spill] sm:$0xff] %v11822_v13  ;;  %16970 = vst [vmem:[#allocation60_spill] sm:$0xff] %v11864_v0 }
  0x8d   : > { %16961 = vst [vmem:[#allocation51_spill] sm:$0xff] %v11787_v29  ;;  %v11795_v41 = vcombine.low %v11779_v38, %v11787_v29  ;;  %v1017_v63 = vsel %vm11597_vm8, %v1012_v44, %v1016_v24  ;;  %v1026_v31 = vrot.slane %v1025_v46, 4  ;;  %v1047_v40 = vshrl.u32 %v11802_v42, 16  ;;  %v11889_v29 = vld [vmem:[%s11244_s17 + $0xf8] sm:$0xff] }
  0x8e   : > { %v1050_v32 = vshll.u32 %v11802_v42, 16  ;;  %v1035_v24 = vrot.slane %v1033_v12, 4  ;;  %v1038_v16 = vrot.slane %v1036_v35, 5  ;;  %v1056_v44 = vshll.u32 %v11806_v56, 16  ;;  %v10989_v12 = vld [vmem:[%s16572_s1 + $0x20] sm:$0xff]   ;;  %16974 = vst [vmem:[#allocation64_spill] sm:$0xff] %v11889_v29 }
  0x8f   : > { %16962 = vst [vmem:[#allocation52_spill] sm:$0xff] %v11795_v41  ;;  %10231 = vmatmul.mubr.msk.bf16.gmra.mxu0 %vm472_vm0, %v11795_v41  ;;  %v11820_v14 = vpack.c.bf16 %v11775_v51, %v11768_v54  ;;  %v11826_v46 = vsel %vm11597_vm8, %v1026_v31, %v1030_v19  ;;  %v1044_v6 = vrot.slane %v1042_v43, 5  ;;  %v1049_v5 = vrot.slane %v1047_v40, 4  ;;  %v10990_v31 = vld [vmem:[%s16572_s1 + $0x30] sm:$0xff]   ;;  %10296 = vmatprep.subr.bf16.mxu0 %v10989_v12 }
  0x90   : > { %16965 = vst [vmem:[#allocation55_spill] sm:$0xff] %v11826_v46  ;;  %v1052_v8 = vrot.slane %v1050_v32, 5  ;;  %v8807_v35 = vcombine.low %v1017_v63, %v11826_v46  ;;  %v1039_v7 = vor.u32 %v1038_v16, %v1035_v24  ;;  %v1058_v11 = vrot.slane %v1056_v44, 5  ;;  %v11849_v24 = vld [vmem:[#allocation2 + $0x100] sm:$0xff]  ;;  %v11852_v16 = vld [vmem:[%s11244_s17 + $0x38] sm:$0xff]  ;;  %10297 = vmatpush3.bf16.msra.mxu0 %v10989_v12  ;;  %10332 = vmatprep.subr.bf16.mxu1 %v10990_v31 }
  0x91   : > { %16963 = vst [vmem:[#allocation53_spill] sm:$0xff] %v11820_v14  ;;  %10271 = vmatmul.mubr.msk.bf16.gmra.mxu1 %vm472_vm0, %v11820_v14  ;;  %v11836_v19 = vpack.c.bf16 %v11810_v34, %v11810_v34  ;;  %v11841_v40 = vpack.c.bf16 %v634_v25, %v634_v25  ;;  %v11845_v32 = vpack.c.bf16 %v11822_v13, %v11822_v13  ;;  %16966 = vst [vmem:[#allocation56_spill] sm:$0xff] %v11849_v24  ;;  %v11855_v44 = vld [vmem:[%s11244_s17 + $0x78] sm:$0xff] }
  0x92   : > { %v1053_v43 = vor.u32 %v1052_v8, %v1049_v5  ;;  %v11847_v63 = vpack.c.bf16 %v636_v15, %v636_v15  ;;  %16967 = vst [vmem:[#allocation57_spill] sm:$0xff] %v11852_v16  ;;  %16968 = vst [vmem:[#allocation58_spill] sm:$0xff] %v11855_v44  ;;  %10234 = vmatprep.mubr.msk.bf16.mxu0 %vm472_vm0, %v8807_v35  ;;  %v1040_v14 = vrot.slane %v1039_v7, 4  ;;  %v638_v15 = vld [vmem:[#allocation2 + $0x108] sm:$0x3]  ;;  %10333 = vmatpush3.bf16.msra.mxu1 %v10990_v31 }
  0x93   : > { %v1061_v5 = vshrl.u32 %v11836_v19, 16  ;;  %v1064_v8 = vshll.u32 %v11836_v19, 16  ;;  %v11862_v25 = vpack.c.bf16 %v11822_v13, %v11810_v34  ;;  %580 = vst.msk [vmem:[#allocation2 + $0x81] sm:$0xff] %vm472_vm0, %v11852_v16  ;;  %588 = vst.msk [vmem:[#allocation2 + $0x121] sm:$0xff] %vm472_vm0, %v11855_v44  ;;  %v11873_v7 = vld [vmem:[%s16572_s1 + $0x48] sm:$0xff]   ;;  %v1070_v41 = vshll.u32 %v11841_v40, 16  ;;  %10402 = vmatprep.subr.bf16.mxu1 %v11894_v23 }
  0x94   : > { %16971 = vst [vmem:[#allocation61_spill] sm:$0xff] %v11873_v7  ;;  %v1054_v35 = vrot.slane %v1053_v43, 4  ;;  %v1075_v39 = vshrl.u32 %v11845_v32, 16  ;;  %v1078_v50 = vshll.u32 %v11845_v32, 16  ;;  %v11880_v12 = vsel %vm11597_vm8, %v1040_v14, %v1044_v6  ;;  %v11886_v43 = vld [vmem:[%s11244_s17 + $0xb8] sm:$0xff]  ;;  %10366 = vmatprep.subr.bf16.mxu0 %v11873_v7  ;;  %604 = vst.msk [vmem:[#allocation2 + $0x261] sm:$0xff] %vm472_vm0, %v11889_v29 }
  0x95   : > { %16969 = vst [vmem:[#allocation59_spill] sm:$0xff] %v11862_v25  ;;  %16972 = vst [vmem:[#allocation62_spill] sm:$0xff] %v11880_v12  ;;  %v1063_v16 = vrot.slane %v1061_v5, 4  ;;  %v1066_v46 = vrot.slane %v1064_v8, 5  ;;  %v1084_v44 = vshll.u32 %v11847_v63, 16  ;;  %10274 = vmatprep.mubr.msk.bf16.mxu1 %vm472_vm0, %v11862_v25  ;;  %v1072_v14 = vrot.slane %v1070_v41, 5 }
  0x96   : > { %16973 = vst [vmem:[#allocation63_spill] sm:$0xff] %v11886_v43  ;;  %v11898_v6 = vsel %vm11597_vm8, %v1054_v35, %v1058_v11  ;;  %v1077_v5 = vrot.slane %v1075_v39, 4  ;;  %v1080_v8 = vrot.slane %v1078_v50, 5  ;;  %596 = vst.msk [vmem:[#allocation2 + $0x1c1] sm:$0xff] %vm472_vm0, %v11886_v43  ;;  %v11911_v11 = vpack.c.bf16 %v11849_v24, %v11849_v24  ;;  %v11933_v43 = vld [vmem:[#allocation2 + $0x150] sm:$0xff] }
  0x97   : > { %16975 = vst [vmem:[#allocation65_spill] sm:$0xff] %v11898_v6  ;;  %v11907_v31 = vcombine.low %v11880_v12, %v11898_v6  ;;  %v1067_v25 = vor.u32 %v1066_v46, %v1063_v16  ;;  %v1086_v55 = vrot.slane %v1084_v44, 5  ;;  %v11914_v39 = vpack.c.bf16 %v638_v15, %v638_v15  ;;  %16978 = vst [vmem:[#allocation68_spill] sm:$0xff] %v11933_v43 }
  0x98   : > { %v1081_v50 = vor.u32 %v1080_v8, %v1077_v5  ;;  %v11918_v41 = vpack.c.bf16 %v11864_v0, %v11864_v0  ;;  %v11920_v35 = vpack.c.bf16 %v640_v58, %v640_v58  ;;  %v1089_v16 = vshrl.u32 %v11911_v11, 16 }
  0x99   : > { %16976 = vst [vmem:[#allocation66_spill] sm:$0xff] %v11907_v31  ;;  %10235 = vmatmul.mubr.msk.bf16.gmra.mxu0 %vm472_vm0, %v11907_v31  ;;  %v1068_v46 = vrot.slane %v1067_v25, 4  ;;  %v1092_v44 = vshll.u32 %v11911_v11, 16  ;;  %v11928_v29 = vpack.c.bf16 %v11864_v0, %v11849_v24  ;;  %v1098_v5 = vshll.u32 %v11914_v39, 16 }
  0x9a   : > { %v1082_v15 = vrot.slane %v1081_v50, 4  ;;  %v1103_v8 = vshrl.u32 %v11918_v41, 16  ;;  %v1106_v58 = vshll.u32 %v11918_v41, 16  ;;  %v1091_v31 = vrot.slane %v1089_v16, 4  ;;  %v648_v50 = vld [vmem:[#allocation2 + $0x158] sm:$0x3] }
  0x9b   : > { %16977 = vst [vmem:[#allocation67_spill] sm:$0xff] %v11928_v29  ;;  %v11937_v25 = vsel %vm11597_vm8, %v1068_v46, %v1072_v14  ;;  %v1094_v6 = vrot.slane %v1092_v44, 5  ;;  %v1112_v12 = vshll.u32 %v11920_v35, 16  ;;  %10275 = vmatmul.mubr.msk.bf16.gmra.mxu1 %vm472_vm0, %v11928_v29  ;;  %v1100_v38 = vrot.slane %v1098_v5, 5  ;;  %v650_v5 = vld [vmem:[#allocation2 + $0x168] sm:$0x3] }
  0x9c   : > { %16979 = vst [vmem:[#allocation69_spill] sm:$0xff] %v11937_v25  ;;  %v11944_v33 = vsel %vm11597_vm8, %v1082_v15, %v1086_v55  ;;  %v1105_v37 = vrot.slane %v1103_v8, 4  ;;  %v1108_v18 = vrot.slane %v1106_v58, 5  ;;  %v11952_v16 = vpack.c.bf16 %v11933_v43, %v11933_v43  ;;  %v11958_v15 = vld [vmem:[#allocation2 + $0x160] sm:$0xff] }
  0x9d   : > { %16980 = vst [vmem:[#allocation70_spill] sm:$0xff] %v11944_v33  ;;  %v11948_v0 = vcombine.low %v11937_v25, %v11944_v33  ;;  %v1095_v14 = vor.u32 %v1094_v6, %v1091_v31  ;;  %v1114_v46 = vrot.slane %v1112_v12, 5  ;;  %v11954_v29 = vpack.c.bf16 %v648_v50, %v648_v50  ;;  %16984 = vst [vmem:[#allocation74_spill] sm:$0xff] %v11958_v15 }
  0x9e   : > { %16982 = vst [vmem:[#allocation72_spill] sm:$0xff] %v11952_v16  ;;  %v1109_v44 = vor.u32 %v1108_v18, %v1105_v37  ;;  %v1117_v24 = vshrl.u32 %v11561_v47, 16  ;;  %v1120_v55 = vshll.u32 %v11561_v47, 16  ;;  %v1126_v12 = vshll.u32 %v11582_v61, 16  ;;  %v652_v18 = vld [vmem:[#allocation2 + $0x178] sm:$0x3] }
  0x9f   : > { %16981 = vst [vmem:[#allocation71_spill] sm:$0xff] %v11948_v0  ;;  %16983 = vst [vmem:[#allocation73_spill] sm:$0xff] %v11954_v29  ;;  %10238 = vmatprep.mubr.msk.bf16.mxu0 %vm472_vm0, %v11948_v0  ;;  %v1096_v8 = vrot.slane %v1095_v14, 4  ;;  %v1131_v6 = vshrl.u32 %v11952_v16, 16  ;;  %v1134_v31 = vshll.u32 %v11952_v16, 16  ;;  %v1140_v33 = vshll.u32 %v11954_v29, 16 }
  0xa0   : > { %v1110_v37 = vrot.slane %v1109_v44, 4  ;;  %v1119_v58 = vrot.slane %v1117_v24, 4  ;;  %v1122_v50 = vrot.slane %v1120_v55, 5  ;;  %v1128_v13 = vrot.slane %v1126_v12, 5  ;;  %v11970_v14 = vld [vmem:[#allocation2 + $0x170] sm:$0xff] }
  0xa1   : > { %v11968_v25 = vsel %vm11597_vm8, %v1096_v8, %v1100_v38  ;;  %v1133_v7 = vrot.slane %v1131_v6, 4  ;;  %v1136_v0 = vrot.slane %v1134_v31, 5  ;;  %16986 = vst [vmem:[#allocation76_spill] sm:$0xff] %v11970_v14  ;;  %v1142_v47 = vrot.slane %v1140_v33, 5 }
  0xa2   : > { %16985 = vst [vmem:[#allocation75_spill] sm:$0xff] %v11968_v25  ;;  %v11974_v61 = vsel %vm11597_vm8, %v1110_v37, %v1114_v46  ;;  %v1123_v16 = vor.u32 %v1122_v50, %v1119_v58  ;;  %v9635_v24 = vpack.c.bf16 %v11933_v43, %v11543_v36  ;;  %v11984_v55 = vpack.c.bf16 %v11958_v15, %v11958_v15  ;;  %v656_v37 = vld [vmem:[#allocation2 + $0x198] sm:$0x3]  ;;  %v12019_v43 = vld [vmem:[#allocation2 + $0x1a0] sm:$0xff] }
  0xa3   : > { %16987 = vst [vmem:[#allocation77_spill] sm:$0xff] %v11974_v61  ;;  %v11980_v44 = vcombine.low %v11968_v25, %v11974_v61  ;;  %v1137_v38 = vor.u32 %v1136_v0, %v1133_v7  ;;  %v11986_v8 = vpack.c.bf16 %v650_v5, %v650_v5  ;;  %v11991_v33 = vpack.c.bf16 %v11970_v14, %v11970_v14  ;;  %v11999_v0 = vld [vmem:[#allocation2 + $0x180] sm:$0xff]  ;;  %v654_v7 = vld [vmem:[#allocation2 + $0x188] sm:$0x3] }
  0xa4   : > { %16989 = vst [vmem:[#allocation79_spill] sm:$0xff] %v11984_v55  ;;  %v1124_v12 = vrot.slane %v1123_v16, 4  ;;  %10278 = vmatprep.mubr.msk.bf16.mxu1 %vm472_vm0, %v9635_v24  ;;  %v11993_v46 = vpack.c.bf16 %v652_v18, %v652_v18  ;;  %v11997_v36 = vpack.c.bf16 %v11970_v14, %v11958_v15  ;;  %16994 = vst [vmem:[#allocation84_spill] sm:$0xff] %v11999_v0  ;;  %v1145_v16 = vshrl.u32 %v11984_v55, 16 }
  0xa5   : > { %16988 = vst [vmem:[#allocation78_spill] sm:$0xff] %v11980_v44  ;;  %16990 = vst [vmem:[#allocation80_spill] sm:$0xff] %v11986_v8  ;;  %10239 = vmatmul.mubr.msk.bf16.gmra.mxu0 %vm472_vm0, %v11980_v44  ;;  %v1138_v5 = vrot.slane %v1137_v38, 4  ;;  %v1148_v6 = vshll.u32 %v11984_v55, 16  ;;  %v1154_v31 = vshll.u32 %v11986_v8, 16  ;;  %v1159_v58 = vshrl.u32 %v11991_v33, 16 }
  0xa6   : > { %16991 = vst [vmem:[#allocation81_spill] sm:$0xff] %v11991_v33  ;;  %16992 = vst [vmem:[#allocation82_spill] sm:$0xff] %v11993_v46  ;;  %v1129_v18 = vsel %vm11597_vm8, %v1124_v12, %v1128_v13  ;;  %v1162_v50 = vshll.u32 %v11991_v33, 16  ;;  %v1168_v24 = vshll.u32 %v11993_v46, 16  ;;  %10279 = vmatmul.mubr.msk.bf16.gmra.mxu1 %vm472_vm0, %v11997_v36  ;;  %v12013_v38 = vld [vmem:[#allocation2 + $0x190] sm:$0xff]  ;;  %v1147_v61 = vrot.slane %v1145_v16, 4 }
  0xa7   : > { %16993 = vst [vmem:[#allocation83_spill] sm:$0xff] %v11997_v36  ;;  %16995 = vst [vmem:[#allocation85_spill] sm:$0xff] %v12013_v38  ;;  %v12017_v44 = vsel %vm11597_vm8, %v1138_v5, %v1142_v47  ;;  %v1150_v25 = vrot.slane %v1148_v6, 5  ;;  %v1156_v15 = vrot.slane %v1154_v31, 5  ;;  %v1161_v12 = vrot.slane %v1159_v58, 4 }
  0xa8   : > { %16996 = vst [vmem:[#allocation86_spill] sm:$0xff] %v12017_v44  ;;  %16997 = vst [vmem:[#allocation87_spill] sm:$0xff] %v12019_v43  ;;  %v8811_v13 = vcombine.low %v1129_v18, %v12017_v44  ;;  %v1164_v14 = vrot.slane %v1162_v50, 5  ;;  %v1170_v33 = vrot.slane %v1168_v24, 5  ;;  %v12024_v36 = vpack.c.bf16 %v11999_v0, %v11999_v0 }
  0xa9   : > { %v1151_v46 = vor.u32 %v1150_v25, %v1147_v61  ;;  %v12026_v8 = vpack.c.bf16 %v654_v7, %v654_v7  ;;  %v12030_v47 = vpack.c.bf16 %v12013_v38, %v12013_v38  ;;  %v12033_v16 = vpack.c.bf16 %v656_v37, %v656_v37  ;;  %v658_v61 = vld [vmem:[#allocation2 + $0x1a8] sm:$0x3]  ;;  %v12039_v25 = vld [vmem:[#allocation2 + $0x1b0] sm:$0xff]  ;;  %v660_v37 = vld [vmem:[#allocation2 + $0x1b8] sm:$0x3] }
  0xaa   : > { %16998 = vst [vmem:[#allocation88_spill] sm:$0xff] %v12024_v36  ;;  %10242 = vmatprep.mubr.msk.bf16.mxu0 %vm472_vm0, %v8811_v13  ;;  %v1165_v5 = vor.u32 %v1164_v14, %v1161_v12  ;;  %v12037_v6 = vpack.c.bf16 %v12013_v38, %v11999_v0  ;;  %17003 = vst [vmem:[#allocation93_spill] sm:$0xff] %v12039_v25  ;;  %v12043_v7 = vpack.c.bf16 %v12019_v43, %v12019_v43 }
  0xab   : > { %16999 = vst [vmem:[#allocation89_spill] sm:$0xff] %v12026_v8  ;;  %17000 = vst [vmem:[#allocation90_spill] sm:$0xff] %v12030_v47  ;;  %v1152_v31 = vrot.slane %v1151_v46, 4  ;;  %v1173_v18 = vshrl.u32 %v12024_v36, 16  ;;  %v1176_v58 = vshll.u32 %v12024_v36, 16  ;;  %v1182_v14 = vshll.u32 %v12026_v8, 16 }
  0xac   : > { %17001 = vst [vmem:[#allocation91_spill] sm:$0xff] %v12033_v16  ;;  %17002 = vst [vmem:[#allocation92_spill] sm:$0xff] %v12037_v6  ;;  %v1166_v50 = vrot.slane %v1165_v5, 4  ;;  %v1187_v24 = vshrl.u32 %v12030_v47, 16  ;;  %v1190_v13 = vshll.u32 %v12030_v47, 16  ;;  %v1196_v12 = vshll.u32 %v12033_v16, 16  ;;  %10282 = vmatprep.mubr.msk.bf16.mxu1 %vm472_vm0, %v12037_v6 }
  0xad   : > { %17004 = vst [vmem:[#allocation94_spill] sm:$0xff] %v12043_v7  ;;  %v12055_v46 = vsel %vm11597_vm8, %v1152_v31, %v1156_v15  ;;  %v1175_v44 = vrot.slane %v1173_v18, 4  ;;  %v1178_v38 = vrot.slane %v1176_v58, 5  ;;  %v1184_v36 = vrot.slane %v1182_v14, 5  ;;  %v665_v14 = vld [vmem:[#allocation2 + $0x1e0] sm:$0xff] }
  0xae   : > { %17005 = vst [vmem:[#allocation95_spill] sm:$0xff] %v12055_v46  ;;  %v12059_v8 = vsel %vm11597_vm8, %v1166_v50, %v1170_v33  ;;  %v1189_v5 = vrot.slane %v1187_v24, 4  ;;  %v1192_v0 = vrot.slane %v1190_v13, 5  ;;  %v1198_v55 = vrot.slane %v1196_v12, 5  ;;  %v666_v50 = vld [vmem:[#allocation2 + $0x1e8] sm:$0x3] }
  0xaf   : > { %17006 = vst [vmem:[#allocation96_spill] sm:$0xff] %v12059_v8  ;;  %v12063_v16 = vcombine.low %v12055_v46, %v12059_v8  ;;  %v1179_v47 = vor.u32 %v1178_v38, %v1175_v44  ;;  %v12065_v6 = vpack.c.bf16 %v658_v61, %v658_v61  ;;  %v12069_v15 = vpack.c.bf16 %v12039_v25, %v12039_v25  ;;  %v668_v13 = vld [vmem:[#allocation2 + $0x1f8] sm:$0x3] }
  0xb0   : > { %v1193_v31 = vor.u32 %v1192_v0, %v1189_v5  ;;  %v12071_v18 = vpack.c.bf16 %v660_v37, %v660_v37  ;;  %v1201_v33 = vshrl.u32 %v12043_v7, 16  ;;  %v1204_v58 = vshll.u32 %v12043_v7, 16 }
  0xb1   : > { %17007 = vst [vmem:[#allocation97_spill] sm:$0xff] %v12063_v16  ;;  %17008 = vst [vmem:[#allocation98_spill] sm:$0xff] %v12065_v6  ;;  %10243 = vmatmul.mubr.msk.bf16.gmra.mxu0 %vm472_vm0, %v12063_v16  ;;  %v1180_v24 = vrot.slane %v1179_v47, 4  ;;  %v1210_v44 = vshll.u32 %v12065_v6, 16  ;;  %v1215_v38 = vshrl.u32 %v12069_v15, 16  ;;  %v1218_v61 = vshll.u32 %v12069_v15, 16 }
  0xb2   : > { %17009 = vst [vmem:[#allocation99_spill] sm:$0xff] %v12069_v15  ;;  %17010 = vst [vmem:[#allocation100_spill] sm:$0xff] %v12071_v18  ;;  %v1194_v0 = vrot.slane %v1193_v31, 4  ;;  %v1203_v37 = vrot.slane %v1201_v33, 4  ;;  %v1206_v12 = vrot.slane %v1204_v58, 5  ;;  %v1224_v5 = vshll.u32 %v12071_v18, 16 }
  0xb3   : > { %v12083_v8 = vsel %vm11597_vm8, %v1180_v24, %v1184_v36  ;;  %v1212_v46 = vrot.slane %v1210_v44, 5  ;;  %v1217_v7 = vrot.slane %v1215_v38, 4  ;;  %v1220_v16 = vrot.slane %v1218_v61, 5  ;;  %v12085_v47 = vld [vmem:[#allocation2 + $0x1f0] sm:$0xff] }
  0xb4   : > { %17011 = vst [vmem:[#allocation101_spill] sm:$0xff] %v12083_v8  ;;  %17012 = vst [vmem:[#allocation102_spill] sm:$0xff] %v12085_v47  ;;  %v12089_v6 = vsel %vm11597_vm8, %v1194_v0, %v1198_v55  ;;  %v1207_v15 = vor.u32 %v1206_v12, %v1203_v37  ;;  %v1226_v29 = vrot.slane %v1224_v5, 5  ;;  %v12093_v31 = vpack.c.bf16 %v12039_v25, %v12019_v43  ;;  %v12117_v0 = vld [vmem:[#allocation2 + $0x200] sm:$0xff]  ;;  %v670_v5 = vld [vmem:[#allocation2 + $0x208] sm:$0x3] }
  0xb5   : > { %17013 = vst [vmem:[#allocation103_spill] sm:$0xff] %v12089_v6  ;;  %v12097_v33 = vcombine.low %v12083_v8, %v12089_v6  ;;  %v1221_v36 = vor.u32 %v1220_v16, %v1217_v7  ;;  %v12099_v58 = vpack.c.bf16 %v665_v14, %v665_v14  ;;  %v12101_v24 = vpack.c.bf16 %v666_v50, %v666_v50 }
  0xb6   : > { %17014 = vst [vmem:[#allocation104_spill] sm:$0xff] %v12093_v31  ;;  %v1208_v44 = vrot.slane %v1207_v15, 4  ;;  %10283 = vmatmul.mubr.msk.bf16.gmra.mxu1 %vm472_vm0, %v12093_v31  ;;  %v12107_v55 = vpack.c.bf16 %v12085_v47, %v12085_v47  ;;  %v12109_v38 = vpack.c.bf16 %v668_v13, %v668_v13  ;;  %v9639_v61 = vpack.c.bf16 %v12085_v47, %v665_v14 }
  0xb7   : > { %17015 = vst [vmem:[#allocation105_spill] sm:$0xff] %v12097_v33  ;;  %17016 = vst [vmem:[#allocation106_spill] sm:$0xff] %v12099_v58  ;;  %10246 = vmatprep.mubr.msk.bf16.mxu0 %vm472_vm0, %v12097_v33  ;;  %v1222_v16 = vrot.slane %v1221_v36, 4  ;;  %v1229_v7 = vshrl.u32 %v12099_v58, 16  ;;  %v1232_v50 = vshll.u32 %v12099_v58, 16  ;;  %v1238_v15 = vshll.u32 %v12101_v24, 16 }
  0xb8   : > { %17017 = vst [vmem:[#allocation107_spill] sm:$0xff] %v12101_v24  ;;  %17018 = vst [vmem:[#allocation108_spill] sm:$0xff] %v12107_v55  ;;  %v12121_v37 = vsel %vm11597_vm8, %v1208_v44, %v1212_v46  ;;  %v1243_v13 = vshrl.u32 %v12107_v55, 16  ;;  %v1246_v14 = vshll.u32 %v12107_v55, 16  ;;  %v1252_v12 = vshll.u32 %v12109_v38, 16  ;;  %10286 = vmatprep.mubr.msk.bf16.mxu1 %vm472_vm0, %v9639_v61  ;;  %v12127_v36 = vld [vmem:[#allocation2 + $0x210] sm:$0xff] }
  0xb9   : > { %17019 = vst [vmem:[#allocation109_spill] sm:$0xff] %v12109_v38  ;;  %17020 = vst [vmem:[#allocation110_spill] sm:$0xff] %v12117_v0  ;;  %v12131_v31 = vsel %vm11597_vm8, %v1222_v16, %v1226_v29  ;;  %v1231_v33 = vrot.slane %v1229_v7, 4  ;;  %v1234_v6 = vrot.slane %v1232_v50, 5  ;;  %v1240_v8 = vrot.slane %v1238_v15, 5  ;;  %v12133_v44 = vld [vmem:[#allocation2 + $0x220] sm:$0xff] }
  0xba   : > { %17021 = vst [vmem:[#allocation111_spill] sm:$0xff] %v12121_v37  ;;  %17022 = vst [vmem:[#allocation112_spill] sm:$0xff] %v12127_v36  ;;  %v672_v46 = vld [vmem:[#allocation2 + $0x218] sm:$0x3]  ;;  %v12137_v47 = vcombine.low %v12121_v37, %v12131_v31  ;;  %v1245_v25 = vrot.slane %v1243_v13, 4  ;;  %v1248_v38 = vrot.slane %v1246_v14, 5  ;;  %v12141_v24 = vpack.c.bf16 %v12117_v0, %v12117_v0 }
  0xbb   : > { %17023 = vst [vmem:[#allocation113_spill] sm:$0xff] %v12131_v31  ;;  %17024 = vst [vmem:[#allocation114_spill] sm:$0xff] %v12133_v44  ;;  %v1254_v61 = vrot.slane %v1252_v12, 5  ;;  %v1235_v55 = vor.u32 %v1234_v6, %v1231_v33  ;;  %v12143_v29 = vpack.c.bf16 %v670_v5, %v670_v5  ;;  %v12147_v16 = vpack.c.bf16 %v12127_v36, %v12127_v36  ;;  %v674_v5 = vld [vmem:[#allocation2 + $0x228] sm:$0x3]  ;;  %v12169_v31 = vld [vmem:[#allocation2 + $0x230] sm:$0xff] }
  0xbc   : > { %17025 = vst [vmem:[#allocation115_spill] sm:$0xff] %v12137_v47  ;;  %17026 = vst [vmem:[#allocation116_spill] sm:$0xff] %v12141_v24  ;;  %10247 = vmatmul.mubr.msk.bf16.gmra.mxu0 %vm472_vm0, %v12137_v47  ;;  %v1249_v7 = vor.u32 %v1248_v38, %v1245_v25  ;;  %v12151_v50 = vpack.c.bf16 %v672_v46, %v672_v46  ;;  %v12155_v15 = vpack.c.bf16 %v12127_v36, %v12117_v0 }
  0xbd   : > { %17027 = vst [vmem:[#allocation117_spill] sm:$0xff] %v12143_v29  ;;  %17028 = vst [vmem:[#allocation118_spill] sm:$0xff] %v12147_v16  ;;  %v12159_v6 = vpack.c.bf16 %v12133_v44, %v12133_v44  ;;  %v1236_v33 = vrot.slane %v1235_v55, 4  ;;  %v1257_v13 = vshrl.u32 %v12141_v24, 16  ;;  %v1260_v14 = vshll.u32 %v12141_v24, 16 }
  0xbe   : > { %17029 = vst [vmem:[#allocation119_spill] sm:$0xff] %v12151_v50  ;;  %17030 = vst [vmem:[#allocation120_spill] sm:$0xff] %v12155_v15  ;;  %v1266_v12 = vshll.u32 %v12143_v29, 16  ;;  %v1250_v47 = vrot.slane %v1249_v7, 4  ;;  %v1271_v25 = vshrl.u32 %v12147_v16, 16  ;;  %v1274_v38 = vshll.u32 %v12147_v16, 16  ;;  %10287 = vmatmul.mubr.msk.bf16.gmra.mxu1 %vm472_vm0, %v12155_v15 }
  0xbf   : > { %v1280_v46 = vshll.u32 %v12151_v50, 16  ;;  %17031 = vst [vmem:[#allocation121_spill] sm:$0xff] %v12169_v31  ;;  %v1241_v55 = vsel %vm11597_vm8, %v1236_v33, %v1240_v8  ;;  %v1259_v37 = vrot.slane %v1257_v13, 4  ;;  %v1262_v36 = vrot.slane %v1260_v14, 5  ;;  %v676_v29 = vld [vmem:[#allocation2 + $0x238] sm:$0x3] }
  0xc0   : > { %v1268_v0 = vrot.slane %v1266_v12, 5  ;;  %v12175_v7 = vsel %vm11597_vm8, %v1250_v47, %v1254_v61  ;;  %v1273_v24 = vrot.slane %v1271_v25, 4  ;;  %v1276_v16 = vrot.slane %v1274_v38, 5  ;;  %v12192_v12 = vld [vmem:[#allocation2 + $0x240] sm:$0xff] }
  0xc1   : > { %17032 = vst [vmem:[#allocation122_spill] sm:$0xff] %v12175_v7  ;;  %v1282_v58 = vrot.slane %v1280_v46, 5  ;;  %v8815_v50 = vcombine.low %v1241_v55, %v12175_v7  ;;  %v1263_v43 = vor.u32 %v1262_v36, %v1259_v37  ;;  %v12178_v15 = vpack.c.bf16 %v674_v5, %v674_v5  ;;  %17034 = vst [vmem:[#allocation124_spill] sm:$0xff] %v12192_v12  ;;  %v12199_v55 = vld [vmem:[#allocation2 + $0x250] sm:$0xff]  ;;  %v680_v7 = vld [vmem:[#allocation2 + $0x258] sm:$0x3] }
  0xc2   : > { %v12182_v18 = vpack.c.bf16 %v12169_v31, %v12169_v31  ;;  %v1277_v8 = vor.u32 %v1276_v16, %v1273_v24  ;;  %v12184_v33 = vpack.c.bf16 %v676_v29, %v676_v29  ;;  %v1285_v13 = vshrl.u32 %v12159_v6, 16  ;;  %v678_v16 = vld [vmem:[#allocation2 + $0x248] sm:$0x3]  ;;  %17036 = vst [vmem:[#allocation126_spill] sm:$0xff] %v12199_v55 }
  0xc3   : > { %v1288_v47 = vshll.u32 %v12159_v6, 16  ;;  %10250 = vmatprep.mubr.msk.bf16.mxu0 %vm472_vm0, %v8815_v50  ;;  %v1264_v61 = vrot.slane %v1263_v43, 4  ;;  %v1294_v14 = vshll.u32 %v12178_v15, 16 }
  0xc4   : > { %17033 = vst [vmem:[#allocation123_spill] sm:$0xff] %v12182_v18  ;;  %v1299_v37 = vshrl.u32 %v12182_v18, 16  ;;  %v1302_v36 = vshll.u32 %v12182_v18, 16  ;;  %v1278_v5 = vrot.slane %v1277_v8, 4  ;;  %v1287_v25 = vrot.slane %v1285_v13, 4 }
  0xc5   : > { %v1290_v24 = vrot.slane %v1288_v47, 5  ;;  %v1308_v29 = vshll.u32 %v12184_v33, 16  ;;  %v12197_v38 = vsel %vm11597_vm8, %v1264_v61, %v1268_v0  ;;  %v1296_v50 = vrot.slane %v1294_v14, 5 }
  0xc6   : > { %17035 = vst [vmem:[#allocation125_spill] sm:$0xff] %v12197_v38  ;;  %v1301_v43 = vrot.slane %v1299_v37, 4  ;;  %v1304_v46 = vrot.slane %v1302_v36, 5  ;;  %v12203_v18 = vsel %vm11597_vm8, %v1278_v5, %v1282_v58  ;;  %v12207_v47 = vpack.c.bf16 %v12169_v31, %v12133_v44 }
  0xc7   : > { %17037 = vst [vmem:[#allocation127_spill] sm:$0xff] %v12203_v18  ;;  %v1291_v8 = vor.u32 %v1290_v24, %v1287_v25  ;;  %v1310_v13 = vrot.slane %v1308_v29, 5  ;;  %v12211_v0 = vcombine.low %v12197_v38, %v12203_v18  ;;  %v12215_v14 = vpack.c.bf16 %v12192_v12, %v12192_v12 }
  0xc8   : > { %17038 = vst [vmem:[#allocation128_spill] sm:$0xff] %v12207_v47  ;;  %v1305_v61 = vor.u32 %v1304_v46, %v1301_v43  ;;  %v12217_v37 = vpack.c.bf16 %v678_v16, %v678_v16  ;;  %10290 = vmatprep.mubr.msk.bf16.mxu1 %vm472_vm0, %v12207_v47  ;;  %v12223_v58 = vpack.c.bf16 %v12199_v55, %v12199_v55  ;;  %v8872_v44 = vrot.slane %v11569_v52, 9 }
  0xc9   : > { %17039 = vst [vmem:[#allocation129_spill] sm:$0xff] %v12211_v0  ;;  %v1292_v36 = vrot.slane %v1291_v8, 4  ;;  %v12225_v5 = vpack.c.bf16 %v680_v7, %v680_v7  ;;  %v12229_v25 = vpack.c.bf16 %v12199_v55, %v12192_v12  ;;  %10251 = vmatmul.mubr.msk.bf16.gmra.mxu0 %vm472_vm0, %v12211_v0  ;;  %v1313_v29 = vshrl.u32 %v12215_v14, 16 }
  0xca   : > { %17040 = vst [vmem:[#allocation130_spill] sm:$0xff] %v12223_v58  ;;  %v1306_v24 = vrot.slane %v1305_v61, 4  ;;  %v1316_v16 = vshll.u32 %v12215_v14, 16  ;;  %v1322_v43 = vshll.u32 %v12217_v37, 16  ;;  %v1327_v7 = vshrl.u32 %v12223_v58, 16 }
  0xcb   : > { %17041 = vst [vmem:[#allocation131_spill] sm:$0xff] %v12225_v5  ;;  %17042 = vst [vmem:[#allocation132_spill] sm:$0xff] %v12229_v25  ;;  %v12238_v46 = vsel %vm11597_vm8, %v1292_v36, %v1296_v50  ;;  %v1330_v8 = vshll.u32 %v12223_v58, 16  ;;  %v1336_v47 = vshll.u32 %v12225_v5, 16  ;;  %10291 = vmatmul.mubr.msk.bf16.gmra.mxu1 %vm472_vm0, %v12229_v25  ;;  %v1867_v61 = vrot.slane %v11580_v60, 5  ;;  %v11019_v5 = vld [vmem:[#allocation2 + $0x10] sm:$0xff] }
  0xcc   : > { %v12248_v0 = vsel %vm11597_vm8, %v1306_v24, %v1310_v13  ;;  %v1315_v55 = vrot.slane %v1313_v29, 4  ;;  %v1318_v18 = vrot.slane %v1316_v16, 5  ;;  %v1324_v36 = vrot.slane %v1322_v43, 5  ;;  %v11020_v60 = vld [vmem:[#allocation2 + $0x20] sm:$0xff]  ;;  %v11021_v29 = vld [vmem:[#allocation2 + $0x30] sm:$0xff] }
  0xcd   : > { %17043 = vst [vmem:[#allocation133_spill] sm:$0xff] %v12248_v0  ;;  %v12252_v50 = vcombine.low %v12238_v46, %v12248_v0  ;;  %v1329_v12 = vrot.slane %v1327_v7, 4  ;;  %v1332_v31 = vrot.slane %v1330_v8, 5  ;;  %v8874_v25 = vrot.slane %v11578_v59, 9  ;;  %v11022_v16 = vld [vmem:[#allocation2 + $0x40] sm:$0xff] }
  0xce   : > { %v1319_v38 = vor.u32 %v1318_v18, %v1315_v55  ;;  %v9643_v58 = vpack.c.bf16 %v11020_v60, %v11019_v5  ;;  %v1338_v24 = vrot.slane %v1336_v47, 5  ;;  %v9644_v0 = vpack.c.bf16 %v11022_v16, %v11021_v29  ;;  %v12329_v29 = vld [vmem:[%s16572_s1 + $0x78] sm:$0xff]  }
  0xcf   : > { %17044 = vst [vmem:[#allocation134_spill] sm:$0xff] %v12252_v50  ;;  %10254 = vmatprep.mubr.msk.bf16.mxu0 %vm472_vm0, %v12252_v50  ;;  %v1333_v13 = vor.u32 %v1332_v31, %v1329_v12  ;;  %v8875_v43 = vrot.slane %v11586_v62, 9  ;;  %v17045_v18 = vrot.slane %v11571_v53, 5  ;;  %v12267_v59 = vsel %vm11500_vm6, %v8874_v25, %v1867_v61  ;;  %v12639_v50 = vld [vmem:[#allocation2 + $0x260] sm:$0xff] }
  0xd0   : > { %v1320_v7 = vrot.slane %v1319_v38, 4  ;;  %10334 = vmatprep.mubr.msk.bf16.mxu1 %vm472_vm0, %v9643_v58  ;;  %v1871_v31 = vrot.slane %v11591_v3, 5  ;;  %v12275_v62 = vcombine.low %v11623_v49, %v12267_v59  ;;  %v8876_v53 = vrot.slane %v11638_v1, 9  ;;  %v12287_v58 = vld [vmem:[#allocation2 + $0x80] sm:$0xff] }
  0xd1   : > { %v12263_v52 = vsel %vm11500_vm6, %v8872_v44, %v17045_v18  ;;  %v1334_v12 = vrot.slane %v1333_v13, 4  ;;  %v10994_v44 = vld [vmem:[%s16572_s1 + $0x50] sm:$0xff]   ;;  %v1875_v3 = vrot.slane %v11640_v4, 5  ;;  %v8877_v47 = vrot.slane %v11658_v2, 9  ;;  %v11024_v2 = vld [vmem:[#allocation2 + $0x60] sm:$0xff] }
  0xd2   : > { %v8903_v55 = vcombine.low %v11567_v48, %v12263_v52  ;;  %17046 = vst [vmem:[#allocation135_spill] sm:$0xff] %v12275_v62  ;;  %v12283_v38 = vsel %vm11597_vm8, %v1320_v7, %v1324_v36  ;;  %v1879_v1 = vrot.slane %v11660_v10, 5  ;;  %v8878_v5 = vrot.slane %v11694_v45, 9  ;;  %v11023_v4 = vld [vmem:[#allocation2 + $0x50] sm:$0xff] }
  0xd3   : > { %v12291_v48 = vsel %vm11597_vm8, %v1334_v12, %v1338_v24  ;;  %10335 = vmatmul.mubr.msk.bf16.vlgmr.msra.gmra.mxu1 %vm472_vm0, %v9644_v0  ;;  %v1883_v25 = vrot.slane %v11696_v57, 5  ;;  %v9645_v61 = vpack.c.bf16 %v11024_v2, %v11023_v4  ;;  %v8879_v36 = vrot.slane %v11514_v26, 9  ;;  %v11025_v57 = vld [vmem:[#allocation2 + $0x70] sm:$0xff]  ;;  %v17055_v4 = vld [vmem:[#allocation73_spill] sm:$0xff] }
  0xd4   : > { %v12299_v8 = vcombine.low %v12283_v38, %v12291_v48  ;;  %10403 = vmatpush3.bf16.msra.mxu1 %v11894_v23  ;;  %v12305_v0 = vsel %vm11500_vm6, %v8875_v43, %v1871_v31  ;;  %v12309_v10 = vsel %vm11500_vm6, %v8876_v53, %v1875_v3  ;;  %v12313_v45 = vsel %vm11500_vm6, %v8877_v47, %v1879_v1  ;;  %v17053_v1 = vld [vmem:[#allocation26_spill] sm:$0xff] }
  0xd5   : > { %v9646_v60 = vpack.c.bf16 %v12287_v58, %v11025_v57  ;;  %10404 = vmatprep.subr.bf16.mxu1 %v10994_v44  ;;  %v12320_v26 = vsel %vm11500_vm6, %v8878_v5, %v1883_v25  ;;  %10338 = vmatprep.mubr.msk.bf16.mxu1 %vm472_vm0, %v9645_v61  ;;  %v1887_v23 = vrot.slane %v11516_v27, 5  ;;  %v8880_v13 = vrot.slane %v11748_v9, 9  ;;  %v17056_v61 = vld [vmem:[#allocation79_spill] sm:$0xff]  ;;  %v17057_v57 = vld [vmem:[#allocation80_spill] sm:$0xff] }
  0xd6   : > { %17047 = vst [vmem:[#allocation136_spill] sm:$0xff] %v12299_v8  ;;  %10255 = vmatmul.mubr.msk.bf16.gmra.mxu0 %vm472_vm0, %v12299_v8  ;;  %v1891_v24 = vrot.slane %v11752_v30, 5  ;;  %v8881_v16 = vrot.slane %v11791_v28, 9  ;;  %v1895_v43 = vrot.slane %v11798_v17, 5  ;;  %v8882_v7 = vrot.slane %v11802_v42, 9 }
  0xd7   : > { %10298 = vmatprep.mubr.msk.bf16.mxu0 %vm472_vm0, %v8903_v55  ;;  %v1899_v18 = vrot.slane %v11806_v56, 5  ;;  %v12338_v27 = vsel %vm11500_vm6, %v8879_v36, %v1887_v23  ;;  %v9647_v30 = vpack.c.bf16 %v11768_v54, %v11699_v21  ;;  %v8883_v42 = vrot.slane %v11836_v19, 9  ;;  %v17058_v23 = vld [vmem:[#allocation81_spill] sm:$0xff] }
  0xd8   : > { %10405 = vmatpush3.bf16.msra.mxu1 %v10994_v44  ;;  %v12344_v9 = vsel %vm11500_vm6, %v8880_v13, %v1891_v24  ;;  %v12348_v28 = vsel %vm11500_vm6, %v8881_v16, %v1895_v43  ;;  %v12358_v21 = vcombine.low %v12305_v0, %v12309_v10  ;;  %v12362_v54 = vcombine.low %v12313_v45, %v12320_v26  ;;  %v17059_v24 = vld [vmem:[#allocation61_spill] sm:$0xff]  ;;  %v17060_v16 = vld [vmem:[#allocation54_spill] sm:$0xff]  ;;  %v17061_v43 = vld [vmem:[#allocation56_spill] sm:$0xff] }
  0xd9   : > { %v12352_v17 = vsel %vm11500_vm6, %v8882_v7, %v1899_v18  ;;  %10474 = vmatprep.subr.bf16.mxu1 %v12329_v29  ;;  %v1903_v56 = vrot.slane %v11841_v40, 5  ;;  %v8885_v31 = vrot.slane %v11911_v11, 9  ;;  %v1911_v12 = vrot.slane %v11914_v39, 5  ;;  %v10993_v39 = vld [vmem:[%s16572_s1 + $0x40] sm:$0xff]  }
  0xda   : > { %17048 = vst [vmem:[#allocation137_spill] sm:$0xff] %v12358_v21  ;;  %17049 = vst [vmem:[#allocation138_spill] sm:$0xff] %v12362_v54  ;;  %v8886_v19 = vrot.slane %v11918_v41, 9  ;;  %v1915_v55 = vrot.slane %v11920_v35, 5  ;;  %v8907_v53 = vcombine.low %v12338_v27, %v12344_v9  ;;  %v12374_v44 = vcombine.low %v12348_v28, %v12352_v17  ;;  %v17062_v27 = vld [vmem:[#allocation82_spill] sm:$0xff] }
  0xdb   : > { %10339 = vmatmul.mubr.msk.bf16.gmra.mxu1 %vm472_vm0, %v9646_v60  ;;  %v9648_v40 = vpack.c.bf16 %v11810_v34, %v11775_v51  ;;  %v8884_v11 = vrot.slane %v11845_v32, 9  ;;  %v12385_v41 = vsel %vm11500_vm6, %v8883_v42, %v1903_v56  ;;  %v1907_v35 = vrot.slane %v11847_v63, 5  ;;  %v17052_v34 = vld [vmem:[#allocation25_spill] sm:$0xff]  ;;  %v17054_v63 = vld [vmem:[#allocation72_spill] sm:$0xff] }
  0xdc   : > { %17050 = vst [vmem:[#allocation139_spill] sm:$0xff] %v12374_v44  ;;  %10342 = vmatprep.mubr.msk.bf16.mxu1 %vm472_vm0, %v9647_v30  ;;  %v12390_v3 = vsel %vm11500_vm6, %v8885_v31, %v1911_v12  ;;  %v12394_v47 = vsel %vm11500_vm6, %v8886_v19, %v1915_v55  ;;  %v8887_v32 = vrot.slane %v17052_v34, 9  ;;  %v1919_v5 = vrot.slane %v17053_v1, 5  ;;  %v17063_v42 = vld [vmem:[#allocation76_spill] sm:$0xff]  ;;  %v12424_v12 = vld [vmem:[%s16572_s1 + $0x68] sm:$0xff]  }
  0xdd   : > { %v12400_v51 = vcombine.low %v12390_v3, %v12394_v47  ;;  %v8888_v25 = vrot.slane %v17054_v63, 9  ;;  %v1923_v2 = vrot.slane %v17055_v4, 5  ;;  %v8889_v36 = vrot.slane %v17056_v61, 9  ;;  %v17064_v56 = vld [vmem:[#allocation84_spill] sm:$0xff]  ;;  %v17066_v1 = vld [vmem:[#allocation89_spill] sm:$0xff] }
  0xde   : > { %10299 = vmatmul.mubr.msk.bf16.vlgmr.msra.gmra.mxu0 %vm472_vm0, %v12275_v62  ;;  %v1927_v60 = vrot.slane %v17057_v57, 5  ;;  %v8890_v13 = vrot.slane %v17058_v23, 9  ;;  %v9649_v7 = vpack.c.bf16 %v17061_v43, %v17060_v16  ;;  %v12416_v18 = vsel %vm11500_vm6, %v8887_v32, %v1919_v5  ;;  %v17065_v34 = vld [vmem:[#allocation88_spill] sm:$0xff]  ;;  %v17067_v57 = vld [vmem:[#allocation90_spill] sm:$0xff]  ;;  %v17084_v31 = vld [vmem:[#allocation117_spill] sm:$0xff] }
  0xdf   : > { %17051 = vst [vmem:[#allocation140_spill] sm:$0xff] %v12400_v51  ;;  %10302 = vmatprep.mubr.msk.bf16.mxu0 %vm472_vm0, %v12358_v21  ;;  %10367 = vmatpush3.bf16.msra.mxu0 %v17059_v24  ;;  %v1931_v30 = vrot.slane %v17062_v27, 5  ;;  %v12428_v19 = vsel %vm11500_vm6, %v8888_v25, %v1923_v2  ;;  %v8891_v32 = vrot.slane %v17065_v34, 9  ;;  %v1935_v5 = vrot.slane %v17066_v1, 5  ;;  %v12436_v63 = vld [vmem:[#allocation2 + $0x120] sm:$0xff]  ;;  %v17068_v2 = vld [vmem:[#allocation91_spill] sm:$0xff] }
  0xe0   : > { %10368 = vmatprep.subr.bf16.mxu0 %v10993_v39  ;;  %v12432_v55 = vsel %vm11500_vm6, %v8889_v36, %v1927_v60  ;;  %v8892_v25 = vrot.slane %v17067_v57, 9  ;;  %v1939_v23 = vrot.slane %v17068_v2, 5  ;;  %v17070_v24 = vld [vmem:[#allocation94_spill] sm:$0xff]  ;;  %v17073_v34 = vld [vmem:[#allocation100_spill] sm:$0xff]  ;;  %v17074_v57 = vld [vmem:[#allocation85_spill] sm:$0xff] }
  0xe1   : > { %v12442_v61 = vsel %vm11500_vm6, %v8890_v13, %v1931_v30  ;;  %v12453_v60 = vsel %vm11500_vm6, %v8891_v32, %v1935_v5  ;;  %v8893_v16 = vrot.slane %v17070_v24, 9  ;;  %v17071_v43 = vld [vmem:[#allocation98_spill] sm:$0xff]  ;;  %v1947_v1 = vrot.slane %v17073_v34, 5  ;;  %v17075_v2 = vld [vmem:[#allocation87_spill] sm:$0xff] }
  0xe2   : > { %v12449_v36 = vcombine.low %v12432_v55, %v12442_v61  ;;  %v1943_v27 = vrot.slane %v17071_v43, 5  ;;  %v12460_v13 = vsel %vm11500_vm6, %v8892_v25, %v1939_v23  ;;  %v9653_v4 = vpack.c.bf16 %v17075_v2, %v17074_v57  ;;  %v17079_v24 = vld [vmem:[#allocation107_spill] sm:$0xff]  ;;  %v17083_v2 = vld [vmem:[#allocation116_spill] sm:$0xff] }
  0xe3   : > { %10343 = vmatmul.mubr.msk.bf16.gmra.mxu1 %vm472_vm0, %v9648_v40  ;;  %10369 = vmatpush3.bf16.msra.mxu0 %v10993_v39  ;;  %v17072_v40 = vld [vmem:[#allocation99_spill] sm:$0xff]  ;;  %v12469_v32 = vsel %vm11500_vm6, %v8884_v11, %v1907_v35  ;;  %v17076_v39 = vld [vmem:[#allocation60_spill] sm:$0xff]  ;;  %v12475_v5 = vcombine.low %v12453_v60, %v12460_v13  ;;  %v17078_v11 = vld [vmem:[#allocation106_spill] sm:$0xff]  ;;  %v1951_v43 = vrot.slane %v17079_v24, 5 }
  0xe4   : > { %17069 = vst [vmem:[#allocation25_spill] sm:$0xff] %v12449_v36  ;;  %10346 = vmatprep.mubr.msk.bf16.mxu1 %vm472_vm0, %v9649_v7  ;;  %v8894_v30 = vrot.slane %v17072_v40, 9  ;;  %10438 = vmatprep.subr.bf16.mxu0 %v12424_v12  ;;  %v9650_v7 = vpack.c.bf16 %v12436_v63, %v17076_v39  ;;  %v12479_v25 = vsel %vm11500_vm6, %v8893_v16, %v1943_v27  ;;  %v8895_v35 = vrot.slane %v17078_v11, 9  ;;  %v17080_v40 = vld [vmem:[#allocation108_spill] sm:$0xff]  ;;  %v17082_v16 = vld [vmem:[#allocation109_spill] sm:$0xff]  ;;  %v17087_v24 = vld [vmem:[#allocation118_spill] sm:$0xff] }
  0xe5   : > { %17077 = vst [vmem:[#allocation26_spill] sm:$0xff] %v12475_v5  ;;  %v8896_v34 = vrot.slane %v17080_v40, 9  ;;  %v1955_v27 = vrot.slane %v17082_v16, 5  ;;  %v8897_v39 = vrot.slane %v17083_v2, 9  ;;  %v8898_v40 = vrot.slane %v17087_v24, 9 }
  0xe6   : > { %10303 = vmatmul.mubr.msk.bf16.gmra.mxu0 %vm472_vm0, %v12362_v54  ;;  %v12485_v23 = vsel %vm11500_vm6, %v8894_v30, %v1947_v1  ;;  %v1959_v54 = vrot.slane %v17084_v31, 5  ;;  %v17085_v30 = vld [vmem:[#allocation68_spill] sm:$0xff]  ;;  %v17086_v1 = vld [vmem:[#allocation74_spill] sm:$0xff]  ;;  %v12502_v11 = vsel %vm11500_vm6, %v8895_v35, %v1951_v43  ;;  %v12508_v8 = vcombine.low %v12385_v41, %v12469_v32  ;;  %v17106_v35 = vld [vmem:[#allocation121_spill] sm:$0xff] }
  0xe7   : > { %10306 = vmatprep.mubr.msk.bf16.mxu0 %vm472_vm0, %v8907_v53  ;;  %v12493_v57 = vcombine.low %v12479_v25, %v12485_v23  ;;  %v9651_v21 = vpack.c.bf16 %v17086_v1, %v17085_v30  ;;  %v17088_v53 = vld [vmem:[#allocation119_spill] sm:$0xff]  ;;  %v12512_v16 = vsel %vm11500_vm6, %v8896_v34, %v1955_v27  ;;  %v8899_v2 = vrot.slane %v12159_v6, 9 }
  0xe8   : > { %v1963_v62 = vrot.slane %v17088_v53, 5  ;;  %17089 = vst [vmem:[#allocation73_spill] sm:$0xff] %v12508_v8  ;;  %v12516_v31 = vsel %vm11500_vm6, %v8897_v39, %v1959_v54  ;;  %v1967_v30 = vrot.slane %v12178_v15, 5  ;;  %v17090_v1 = vld [vmem:[#allocation123_spill] sm:$0xff]  ;;  %v1971_v54 = vrot.slane %v12184_v33, 5  ;;  %v17091_v15 = vld [vmem:[#allocation130_spill] sm:$0xff] }
  0xe9   : > { %17081 = vst [vmem:[#allocation72_spill] sm:$0xff] %v12493_v57  ;;  %v8900_v24 = vrot.slane %v17090_v1, 9  ;;  %v8901_v6 = vrot.slane %v12215_v14, 9  ;;  %v1975_v27 = vrot.slane %v12217_v37, 5  ;;  %v8902_v39 = vrot.slane %v17091_v15, 9  ;;  %v12573_v1 = vld [vmem:[#allocation2 + $0x1c0] sm:$0xff] }
  0xea   : > { %v12523_v43 = vsel %vm11500_vm6, %v8898_v40, %v1963_v62  ;;  %v12538_v62 = vsel %vm11500_vm6, %v8899_v2, %v1967_v30  ;;  %v17092_v40 = vld [vmem:[#allocation131_spill] sm:$0xff]  ;;  %v17095_v30 = vpack.c.bf16 %v17064_v56, %v17063_v42  ;;  %17096 = vst [vmem:[#allocation81_spill] sm:$0xff] %v12573_v1  ;;  %v12589_v15 = vld [vmem:[#allocation2 + $0x1d0] sm:$0xff]  ;;  %v17104_v56 = vld [vmem:[#allocation125_spill] sm:$0xff] }
  0xeb   : > { %10347 = vmatmul.mubr.msk.bf16.gmra.mxu1 %vm472_vm0, %v9650_v7  ;;  %v12530_v34 = vcombine.low %v12516_v31, %v12523_v43  ;;  %v1979_v7 = vrot.slane %v17092_v40, 5  ;;  %v12544_v53 = vsel %vm11500_vm6, %v8900_v24, %v1971_v54  ;;  %v12548_v33 = vsel %vm11500_vm6, %v8901_v6, %v1975_v27  ;;  %v17100_v54 = vld [vmem:[#allocation110_spill] sm:$0xff]  ;;  %v662_v27 = vld [vmem:[#allocation2 + $0x1c8] sm:$0x3]  ;;  %17101 = vst [vmem:[#allocation61_spill] sm:$0xff] %v12589_v15 }
  0xec   : > { %10350 = vmatprep.mubr.msk.bf16.mxu1 %vm472_vm0, %v9651_v21  ;;  %v12554_v14 = vcombine.low %v12538_v62, %v12544_v53  ;;  %v9017_v21 = vcombine.low %v12263_v52, %v11623_v49  ;;  %v17097_v49 = vcombine.low %v12416_v18, %v12428_v19  ;;  %v17098_v52 = vld [vmem:[#allocation93_spill] sm:$0xff]  ;;  %v12596_v40 = vpack.c.bf16 %v12573_v1, %v12573_v1 }
  0xed   : > { %v12558_v37 = vsel %vm11500_vm6, %v8902_v39, %v1979_v7  ;;  %v9654_v24 = vpack.c.bf16 %v12573_v1, %v17098_v52  ;;  %v664_v39 = vld [vmem:[#allocation2 + $0x1d8] sm:$0x3]  ;;  %v12598_v7 = vpack.c.bf16 %v662_v27, %v662_v27  ;;  %v17110_v42 = vld [vmem:[#allocation133_spill] sm:$0xff] }
  0xee   : > { %10307 = vmatmul.mubr.msk.bf16.gmra.mxu0 %vm472_vm0, %v12374_v44  ;;  %17093 = vst [vmem:[#allocation79_spill] sm:$0xff] %v12554_v14  ;;  %v12566_v2 = vcombine.low %v12548_v33, %v12558_v37  ;;  %v9015_v52 = vrot.slane %v12596_v40, 9  ;;  %v17108_v44 = vld [vmem:[#allocation127_spill] sm:$0xff] }
  0xef   : > { %10310 = vmatprep.mubr.msk.bf16.mxu0 %vm472_vm0, %v12508_v8 }
  0xf0   : > { %17094 = vst [vmem:[#allocation80_spill] sm:$0xff] %v12566_v2 }
  0xf3   : > { %10351 = vmatmul.mubr.msk.bf16.gmra.mxu1 %vm472_vm0, %v17095_v30  ;;  %v12603_v30 = vpack.c.bf16 %v12589_v15, %v12589_v15  ;;  %v12637_v15 = vld [vmem:[#allocation2 + $0x270] sm:$0xff] }
  0xf4   : > { %10354 = vmatprep.mubr.msk.bf16.mxu1 %vm472_vm0, %v9653_v4  ;;  %v17099_v4 = vld [vmem:[#allocation102_spill] sm:$0xff]  ;;  %17111 = vst [vmem:[#allocation56_spill] sm:$0xff] %v12637_v15 }
  0xf5   : > { %v9655_v6 = vpack.c.bf16 %v17100_v54, %v17099_v4  ;;  %v2922_v4 = vrot.slane %v12598_v7, 5  ;;  %v17102_v54 = vld [vmem:[#allocation112_spill] sm:$0xff] }
  0xf6   : > { %10311 = vmatmul.mubr.msk.bf16.gmra.mxu0 %vm472_vm0, %v12400_v51  ;;  %v17107_v51 = vld [vmem:[#allocation124_spill] sm:$0xff] }
  0xf7   : > { %10314 = vmatprep.mubr.msk.bf16.mxu0 %vm472_vm0, %v17097_v49  ;;  %v12605_v49 = vpack.c.bf16 %v664_v39, %v664_v39  ;;  %v17105_v39 = vld [vmem:[#allocation122_spill] sm:$0xff]  ;;  %v9657_v8 = vpack.c.bf16 %v17107_v51, %v17106_v35  ;;  %v682_v35 = vld [vmem:[#allocation2 + $0x268] sm:$0x3] }
  0xf9   : > { %v3745_v18 = vrot.slane %v12605_v49, 5 }
  0xfb   : > { %10355 = vmatmul.mubr.msk.bf16.gmra.mxu1 %vm472_vm0, %v9654_v24  ;;  %v9105_v24 = vrot.slane %v12603_v30, 9 }
  0xfc   : > { %10358 = vmatprep.mubr.msk.bf16.mxu1 %vm472_vm0, %v9655_v6  ;;  %v17103_v6 = vld [vmem:[#allocation114_spill] sm:$0xff] }
  0xfd   : > { %v9656_v27 = vpack.c.bf16 %v17103_v6, %v17102_v54  ;;  %v12629_v54 = vsel %vm11500_vm6, %v9015_v52, %v2922_v4  ;;  %v12633_v6 = vsel %vm11500_vm6, %v9105_v24, %v3745_v18  ;;  %v12646_v52 = vpack.c.bf16 %v12639_v50, %v12639_v50 }
  0xfe   : > { %10315 = vmatmul.mubr.msk.bf16.gmra.mxu0 %vm472_vm0, %v12449_v36  ;;  %17109 = vst [vmem:[#allocation54_spill] sm:$0xff] %v12633_v6  ;;  %v12649_v18 = vpack.c.bf16 %v682_v35, %v682_v35  ;;  %v12653_v4 = vpack.c.bf16 %v12637_v15, %v12637_v15  ;;  %v17112_v35 = vcombine.low %v12502_v11, %v12512_v16  ;;  %v17113_v6 = vld [vmem:[#allocation126_spill] sm:$0xff] }
  0xff   : > { %10318 = vmatprep.mubr.msk.bf16.mxu0 %vm472_vm0, %v12475_v5  ;;  %v684_v5 = vld [vmem:[#allocation2 + $0x278] sm:$0x3]  ;;  %v9016_v36 = vrot.slane %v12646_v52, 9  ;;  %v9658_v15 = vpack.c.bf16 %v12639_v50, %v17113_v6  ;;  %v9659_v11 = vpack.c.bf16 %v12287_v58, %v12287_v58  ;;  %v9018_v6 = vcombine.low %v12267_v59, %v12305_v0  ;;  %v17115_v0 = vld [vmem:[#allocation28_spill] sm:$0xff] }
 0x100   : > { %v12657_v51 = vpack.c.bf16 %v684_v5, %v684_v5 }
 0x101   : > { %v9013_v1 = vrot.slane %v9659_v11, 9 }
 0x102   : > { %v3749_v5 = vrot.slane %v12657_v51, 5 }
 0x103   : > { %10359 = vmatmul.mubr.msk.bf16.gmra.mxu1 %vm472_vm0, %v9656_v27  ;;  %v2926_v27 = vrot.slane %v12649_v18, 5 }
 0x104   : > { %10362 = vmatprep.mubr.msk.bf16.mxu1 %vm472_vm0, %v9657_v8  ;;  %v9106_v8 = vrot.slane %v12653_v4, 9 }
 0x105   : > { %v12673_v24 = vsel %vm11500_vm6, %v9016_v36, %v2926_v27  ;;  %v2580_v27 = vshrl.u32 %v9659_v11, 16 }
 0x106   : > { %10319 = vmatmul.mubr.msk.bf16.gmra.mxu0 %vm472_vm0, %v12493_v57  ;;  %v12677_v57 = vsel %vm11500_vm6, %v9106_v8, %v3749_v5  ;;  %v2583_v8 = vshll.u32 %v9659_v11, 16  ;;  %v9019_v5 = vcombine.low %v12309_v10, %v12313_v45  ;;  %v17116_v10 = vld [vmem:[#allocation29_spill] sm:$0xff] }
 0x107   : > { %10322 = vmatprep.mubr.msk.bf16.mxu0 %vm472_vm0, %v17112_v35  ;;  %17114 = vst [vmem:[#allocation82_spill] sm:$0xff] %v12677_v57  ;;  %v622_v35 = vld [vmem:[#allocation2 + $0x88] sm:$0x3]  ;;  %v17117_v45 = vcombine.low %v17115_v0, %v17116_v10 }
 0x108   : > { %v9660_v36 = vpack.c.bf16 %v622_v35, %v622_v35  ;;  %v2582_v35 = vrot.slane %v2580_v27, 4  ;;  %v2585_v57 = vrot.slane %v2583_v8, 5  ;;  %v12715_v8 = vld [vmem:[#allocation2 + $0x90] sm:$0xff] }
 0x10a   : > { %v2586_v11 = vor.u32 %v2585_v57, %v2582_v35  ;;  %v642_v57 = vld [vmem:[#allocation2 + $0x128] sm:$0x3] }
 0x10b   : > { %10363 = vmatmul.mubr.msk.bf16.gmra.mxu1 %vm472_vm0, %v9658_v15  ;;  %v2914_v15 = vrot.slane %v9660_v36, 5 }
 0x10c   : > { %10406 = vmatprep.mubr.msk.bf16.mxu1 %vm472_vm0, %v9017_v21  ;;  %v10998_v21 = vld [vmem:[%s16572_s1 + $0x70] sm:$0xff]   ;;  %v2587_v0 = vrot.slane %v2586_v11, 4  ;;  %v9662_v11 = vpack.c.bf16 %v642_v57, %v642_v57  ;;  %v17125_v57 = vld [vmem:[#allocation55_spill] sm:$0xff] }
 0x10d   : > { %v12700_v59 = vsel %vm11500_vm6, %v9013_v1, %v2914_v15  ;;  %v9021_v1 = vcombine.low %v12344_v9, %v12348_v28  ;;  %v17119_v15 = vld [vmem:[#allocation48_spill] sm:$0xff]  ;;  %v624_v9 = vld [vmem:[#allocation2 + $0x98] sm:$0x3]  ;;  %v12726_v28 = vpack.c.bf16 %v12715_v8, %v12715_v8 }
 0x10e   : > { %10323 = vmatmul.mubr.msk.bf16.gmra.mxu0 %vm472_vm0, %v12530_v34  ;;  %v9020_v27 = vcombine.low %v12320_v26, %v12700_v59  ;;  %v10997_v26 = vld [vmem:[%s16572_s1 + $0x60] sm:$0xff]  }
 0x10f   : > { %10326 = vmatprep.mubr.msk.bf16.mxu0 %vm472_vm0, %v12554_v14 }
 0x113   : > { %10407 = vmatmul.mubr.msk.bf16.vlgmr.msra.gmra.mxu1 %vm472_vm0, %v9018_v6  ;;  %v2589_v6 = vshll.u32 %v9660_v36, 16  ;;  %v17120_v36 = vld [vmem:[#allocation32_spill] sm:$0xff] }
 0x114   : > { %10410 = vmatprep.mubr.msk.bf16.mxu1 %vm472_vm0, %v9019_v5  ;;  %10475 = vmatpush3.bf16.msra.mxu1 %v12329_v29  ;;  %v9661_v29 = vpack.c.bf16 %v12436_v63, %v12436_v63  ;;  %v17118_v5 = vld [vmem:[#allocation50_spill] sm:$0xff] }
 0x115   : > { %10476 = vmatprep.subr.bf16.mxu1 %v10998_v21  ;;  %v2591_v10 = vrot.slane %v2589_v6, 5 }
 0x116   : > { %10327 = vmatmul.mubr.msk.bf16.gmra.mxu0 %vm472_vm0, %v12566_v2  ;;  %v8981_v2 = vcombine.low %v17119_v15, %v17118_v5  ;;  %v2594_v6 = vshrl.u32 %v9661_v29, 16  ;;  %v9103_v5 = vrot.slane %v12726_v28, 9  ;;  %v12741_v15 = vpack.c.bf16 %v624_v9, %v624_v9 }
 0x117   : > { %10370 = vmatprep.mubr.msk.bf16.mxu0 %vm472_vm0, %v17117_v45  ;;  %v9022_v45 = vcombine.low %v12352_v17, %v12385_v41  ;;  %v2918_v17 = vrot.slane %v9662_v11, 5  ;;  %v12748_v41 = vld [vmem:[%s16572_s1 + $0x88] sm:$0xff]  }
 0x118   : > { %10477 = vmatpush3.bf16.msra.mxu1 %v10998_v21  ;;  %v17121_v21 = vld [vmem:[#allocation37_spill] sm:$0xff] }
 0x119   : > { %v17122_v35 = vcombine.low %v17120_v36, %v17121_v21  ;;  %v9023_v36 = vcombine.low %v12469_v32, %v12390_v3  ;;  %v9014_v21 = vrot.slane %v9661_v29, 9 }
 0x11b   : > { %10411 = vmatmul.mubr.msk.bf16.gmra.mxu1 %vm472_vm0, %v9020_v27  ;;  %v12737_v27 = vsel %vm11597_vm8, %v2587_v0, %v2591_v10  ;;  %v17123_v0 = vld [vmem:[#allocation51_spill] sm:$0xff]  ;;  %v17124_v10 = vld [vmem:[#allocation62_spill] sm:$0xff] }
 0x11c   : > { %10414 = vmatprep.mubr.msk.bf16.mxu1 %vm472_vm0, %v9021_v1  ;;  %v2597_v1 = vshll.u32 %v9661_v29, 16  ;;  %v8983_v9 = vcombine.low %v17125_v57, %v17124_v10  ;;  %v12763_v29 = vsel %vm11500_vm6, %v9014_v21, %v2918_v17  ;;  %v17128_v21 = vld [vmem:[#allocation75_spill] sm:$0xff]  ;;  %v17129_v17 = vld [vmem:[#allocation70_spill] sm:$0xff] }
 0x11d   : > { %v8985_v10 = vcombine.low %v17129_v17, %v17128_v21  ;;  %v17134_v21 = vcombine.low %v12442_v61, %v12453_v60  ;;  %v2617_v60 = vshll.u32 %v12598_v7, 16  ;;  %v2622_v7 = vshrl.u32 %v12646_v52, 16 }
 0x11e   : > { %10371 = vmatmul.mubr.msk.bf16.vlgmr.msra.gmra.mxu0 %vm472_vm0, %v17122_v35  ;;  %v2596_v35 = vrot.slane %v2594_v6, 4  ;;  %v2599_v3 = vrot.slane %v2597_v1, 5  ;;  %v9024_v6 = vcombine.low %v12394_v47, %v12763_v29  ;;  %v17126_v1 = vld [vmem:[#allocation69_spill] sm:$0xff] }
 0x11f   : > { %10374 = vmatprep.mubr.msk.bf16.mxu0 %vm472_vm0, %v8981_v2  ;;  %10439 = vmatpush3.bf16.msra.mxu0 %v12424_v12  ;;  %v3737_v2 = vrot.slane %v12741_v15, 5  ;;  %v8982_v12 = vcombine.low %v17123_v0, %v12737_v27 }
 0x120   : > { %10440 = vmatprep.subr.bf16.mxu0 %v10997_v26 }
 0x121   : > { %v12758_v32 = vsel %vm11500_vm6, %v9103_v5, %v3737_v2  ;;  %v17127_v5 = vld [vmem:[#allocation65_spill] sm:$0xff]  ;;  %v12774_v2 = vld [vmem:[#allocation2 + $0x130] sm:$0xff] }
 0x122   : > { %v12785_v47 = vpack.c.bf16 %v12774_v2, %v12774_v2 }
 0x123   : > { %10415 = vmatmul.mubr.msk.bf16.gmra.mxu1 %vm472_vm0, %v9022_v45  ;;  %10441 = vmatpush3.bf16.msra.mxu0 %v10997_v26  ;;  %v2600_v26 = vor.u32 %v2599_v3, %v2596_v35  ;;  %v2603_v45 = vshll.u32 %v9662_v11, 16  ;;  %v644_v11 = vld [vmem:[#allocation2 + $0x138] sm:$0x3]  ;;  %v2611_v3 = vshll.u32 %v12596_v40, 16 }
 0x124   : > { %10418 = vmatprep.mubr.msk.bf16.mxu1 %vm472_vm0, %v9023_v36  ;;  %10510 = vmatprep.subr.bf16.mxu0 %v12748_v41  ;;  %v8984_v36 = vcombine.low %v17127_v5, %v17126_v1  ;;  %v17132_v1 = vld [vmem:[#allocation95_spill] sm:$0xff]  ;;  %v17133_v5 = vld [vmem:[#allocation86_spill] sm:$0xff] }
 0x125   : > { %v2601_v57 = vrot.slane %v2600_v26, 4  ;;  %v2605_v14 = vrot.slane %v2603_v45, 5  ;;  %v17131_v45 = vld [vmem:[#allocation77_spill] sm:$0xff]  ;;  %v2613_v17 = vrot.slane %v2611_v3, 5 }
 0x126   : > { %10375 = vmatmul.mubr.msk.bf16.gmra.mxu0 %vm472_vm0, %v8982_v12  ;;  %v17130_v12 = vcombine.low %v12428_v19, %v12432_v55  ;;  %v9104_v19 = vrot.slane %v12785_v47, 9  ;;  %v12796_v55 = vpack.c.bf16 %v644_v11, %v644_v11  ;;  %v17136_v11 = vld [vmem:[#allocation101_spill] sm:$0xff] }
 0x127   : > { %10378 = vmatprep.mubr.msk.bf16.mxu0 %vm472_vm0, %v8983_v9  ;;  %v2608_v9 = vshrl.u32 %v12596_v40, 16  ;;  %v12792_v35 = vsel %vm11597_vm8, %v2601_v57, %v2605_v14 }
 0x128   : > { %v3741_v26 = vrot.slane %v12796_v55, 5 }
 0x129   : > { %v2610_v14 = vrot.slane %v2608_v9, 4  ;;  %v17137_v9 = vld [vmem:[#allocation96_spill] sm:$0xff] }
 0x12a   : > { %v12809_v40 = vsel %vm11500_vm6, %v9104_v19, %v3741_v26  ;;  %v8988_v3 = vcombine.low %v17137_v9, %v17136_v11  ;;  %v17138_v19 = vld [vmem:[#allocation111_spill] sm:$0xff]  ;;  %v3451_v11 = vshrl.u32 %v12726_v28, 16  ;;  %v3454_v9 = vshll.u32 %v12726_v28, 16 }
 0x12b   : > { %10419 = vmatmul.mubr.msk.bf16.gmra.mxu1 %vm472_vm0, %v9024_v6  ;;  %v8986_v6 = vcombine.low %v17131_v45, %v12792_v35  ;;  %v2614_v61 = vor.u32 %v2613_v17, %v2610_v14  ;;  %v2619_v45 = vrot.slane %v2617_v60, 5  ;;  %v2624_v17 = vrot.slane %v2622_v7, 4 }
 0x12c   : > { %10422 = vmatprep.mubr.msk.bf16.mxu1 %vm472_vm0, %v17130_v12  ;;  %v9028_v12 = vcombine.low %v12485_v23, %v12629_v54  ;;  %v17143_v60 = vcombine.low %v12544_v53, %v12548_v33  ;;  %v2631_v33 = vshll.u32 %v12649_v18, 16  ;;  %v3460_v18 = vshll.u32 %v12741_v15, 16 }
 0x12d   : > { %v2615_v26 = vrot.slane %v2614_v61, 4 }
 0x12e   : > { %10379 = vmatmul.mubr.msk.bf16.gmra.mxu0 %vm472_vm0, %v8984_v36  ;;  %v8987_v36 = vcombine.low %v17133_v5, %v17132_v1  ;;  %v2625_v1 = vshll.u32 %v12646_v52, 16 }
 0x12f   : > { %10382 = vmatprep.mubr.msk.bf16.mxu0 %vm472_vm0, %v8985_v10  ;;  %v17135_v10 = vcombine.low %v12460_v13, %v12479_v25  ;;  %v17139_v13 = vld [vmem:[#allocation103_spill] sm:$0xff]  ;;  %v12835_v23 = vsel %vm11597_vm8, %v2615_v26, %v2619_v45  ;;  %v3453_v45 = vrot.slane %v3451_v11, 4  ;;  %v17148_v11 = vld [vmem:[#allocation49_spill] sm:$0xff] }
 0x130   : > { %v8989_v25 = vcombine.low %v17139_v13, %v17138_v19  ;;  %v17144_v19 = vcombine.low %v17105_v39, %v17104_v56  ;;  %v9032_v13 = vcombine.low %v12558_v37, %v12673_v24  ;;  %v17145_v56 = vld [vmem:[#allocation33_spill] sm:$0xff] }
 0x133   : > { %10423 = vmatmul.mubr.msk.bf16.gmra.mxu1 %vm472_vm0, %v17134_v21 }
 0x134   : > { %10426 = vmatprep.mubr.msk.bf16.mxu1 %vm472_vm0, %v17135_v10  ;;  %v2627_v10 = vrot.slane %v2625_v1, 5 }
 0x136   : > { %10383 = vmatmul.mubr.msk.bf16.gmra.mxu0 %vm472_vm0, %v8986_v6  ;;  %v17140_v6 = vcombine.low %v12512_v16, %v12516_v31  ;;  %v17142_v31 = vcombine.low %v12523_v43, %v12538_v62  ;;  %v2628_v53 = vor.u32 %v2627_v10, %v2624_v17 }
 0x137   : > { %10386 = vmatprep.mubr.msk.bf16.mxu0 %vm472_vm0, %v8987_v36  ;;  %v17141_v36 = vld [vmem:[#allocation113_spill] sm:$0xff] }
 0x138   : > { %v8990_v21 = vcombine.low %v17141_v36, %v12835_v23  ;;  %v2633_v36 = vrot.slane %v2631_v33, 5 }
 0x13b   : > { %10427 = vmatmul.mubr.msk.bf16.gmra.mxu1 %vm472_vm0, %v9028_v12  ;;  %v10264_v5 = vpop.f32.mrf.mxu1 }
 0x13c   : > { %10430 = vmatprep.mubr.msk.bf16.mxu1 %vm472_vm0, %v17140_v6  ;;  %v3456_v6 = vrot.slane %v3454_v9, 5 }
 0x13d   : > { %v10228_v14 = vpop.f32.mrf.mxu0  ;;  %v1723_v16 = vpop.f32.mrf.mxu1 }
 0x13e   : > { %10387 = vmatmul.mubr.msk.bf16.gmra.mxu0 %vm472_vm0, %v8988_v3  ;;  %v12845_v61 = vadd.f32 %v10264_v5, %v10228_v14  ;;  %v2629_v5 = vrot.slane %v2628_v53, 4  ;;  %v3457_v39 = vor.u32 %v3456_v6, %v3453_v45 }
 0x13f   : > { %10390 = vmatprep.mubr.msk.bf16.mxu0 %vm472_vm0, %v8989_v25  ;;  %v1486_v52 = vpop.f32.mrf.mxu0  ;;  %v10265_v12 = vpop.f32.mrf.mxu1 }
 0x140   : > { %v12853_v3 = vadd.f32 %v1723_v16, %v1486_v52  ;;  %v17147_v16 = vcombine.low %v17110_v42, %v12283_v38  ;;  %v3458_v15 = vrot.slane %v3457_v39, 4  ;;  %v17149_v42 = vld [vmem:[#allocation52_spill] sm:$0xff] }
 0x141   : > { %v10229_v43 = vpop.f32.mrf.mxu0  ;;  %v1726_v62 = vpop.f32.mrf.mxu1 }
 0x142   : > { %v12863_v25 = vadd.f32 %v10265_v12, %v10229_v43 }
 0x143   : > { %10431 = vmatmul.mubr.msk.bf16.gmra.mxu1 %vm472_vm0, %v17142_v31  ;;  %v1489_v28 = vpop.f32.mrf.mxu0  ;;  %v10268_v26 = vpop.f32.mrf.mxu1  ;;  %v12881_v31 = vsel %vm11597_vm8, %v2629_v5, %v2633_v36 }
 0x144   : > { %10434 = vmatprep.mubr.msk.bf16.mxu1 %vm472_vm0, %v17143_v60  ;;  %v12865_v7 = vadd.f32 %v1726_v62, %v1489_v28  ;;  %v3462_v60 = vrot.slane %v3460_v18, 5  ;;  %v17150_v28 = vld [vmem:[#allocation30_spill] sm:$0xff] }
 0x145   : > { %v1739_v1 = vpop.f32.mrf.mxu1 }
 0x146   : > { %10391 = vmatmul.mubr.msk.bf16.gmra.mxu0 %vm472_vm0, %v8990_v21  ;;  %v17146_v21 = vcombine.low %v17108_v44, %v12238_v46  ;;  %v8994_v46 = vcombine.low %v12291_v48, %v12881_v31  ;;  %v3463_v9 = vsel %vm11597_vm8, %v3458_v15, %v3462_v60  ;;  %v3468_v48 = vshll.u32 %v12785_v47, 16  ;;  %v17153_v15 = vld [vmem:[#allocation46_spill] sm:$0xff] }
 0x147   : > { %10394 = vmatprep.mubr.msk.bf16.mxu0 %vm472_vm0, %v17144_v19  ;;  %v10269_v37 = vpop.f32.mrf.mxu1  ;;  %v3465_v19 = vshrl.u32 %v12785_v47, 16  ;;  %v17151_v47 = vld [vmem:[#allocation66_spill] sm:$0xff] }
 0x149   : > { %v1742_v14 = vpop.f32.mrf.mxu1  ;;  %v3467_v6 = vrot.slane %v3465_v19, 4  ;;  %v3482_v19 = vshll.u32 %v12603_v30, 16 }
 0x14b   : > { %10435 = vmatmul.mubr.msk.bf16.gmra.mxu1 %vm472_vm0, %v9032_v13 }
 0x14c   : > { %10478 = vmatprep.mubr.msk.bf16.mxu1 %vm472_vm0, %v17145_v56 }
 0x14e   : > { %10395 = vmatmul.mubr.msk.bf16.gmra.mxu0 %vm472_vm0, %v17146_v21 }
 0x14f   : > { %10398 = vmatprep.mubr.msk.bf16.mxu0 %vm472_vm0, %v17147_v16  ;;  %v10232_v17 = vpop.f32.mrf.mxu0 }
 0x150   : > { %v12883_v10 = vadd.f32 %v10268_v26, %v10232_v17  ;;  %v9081_v26 = vcombine.low %v12737_v27, %v3463_v9  ;;  %v11000_v27 = vld [vmem:[%s16572_s1 + $0x80] sm:$0xff]  }
 0x151   : > { %v1502_v52 = vpop.f32.mrf.mxu0  ;;  %v10272_v12 = vpop.f32.mrf.mxu1 }
 0x152   : > { %v12887_v44 = vadd.f32 %v1739_v1, %v1502_v52  ;;  %v3470_v1 = vrot.slane %v3468_v48, 5 }
 0x153   : > { %10479 = vmatmul.mubr.msk.bf16.vlgmr.msra.gmra.mxu1 %vm472_vm0, %v17148_v11  ;;  %v10233_v38 = vpop.f32.mrf.mxu0  ;;  %v1755_v62 = vpop.f32.mrf.mxu1 }
 0x154   : > { %10482 = vmatprep.mubr.msk.bf16.mxu1 %vm472_vm0, %v17149_v42  ;;  %v12895_v43 = vadd.f32 %v10269_v37, %v10233_v38  ;;  %v3471_v18 = vor.u32 %v3470_v1, %v3467_v6  ;;  %v3474_v37 = vshll.u32 %v12796_v55, 16  ;;  %v9667_v38 = vpack.c.bf16 %v12715_v8, %v12287_v58  ;;  %v17154_v42 = vld [vmem:[#allocation71_spill] sm:$0xff] }
 0x155   : > { %v1505_v53 = vpop.f32.mrf.mxu0  ;;  %v10273_v13 = vpop.f32.mrf.mxu1 }
 0x156   : > { %10399 = vmatmul.mubr.msk.bf16.gmra.mxu0 %vm472_vm0, %v8994_v46  ;;  %v12900_v33 = vadd.f32 %v1742_v14, %v1505_v53  ;;  %v17152_v14 = vld [vmem:[#allocation34_spill] sm:$0xff]  ;;  %v3472_v55 = vrot.slane %v3471_v18, 4  ;;  %v3476_v46 = vrot.slane %v3474_v37, 5  ;;  %v3488_v18 = vshll.u32 %v12605_v49, 16 }
 0x157   : > { %10442 = vmatprep.mubr.msk.bf16.mxu0 %vm472_vm0, %v17150_v28  ;;  %v1758_v45 = vpop.f32.mrf.mxu1 }
 0x158   : > { %v3477_v48 = vsel %vm11597_vm8, %v3472_v55, %v3476_v46  ;;  %v17160_v46 = vld [vmem:[#allocation105_spill] sm:$0xff] }
 0x159   : > { %v10236_v5 = vpop.f32.mrf.mxu0  ;;  %v9082_v8 = vcombine.low %v12792_v35, %v3477_v48  ;;  %v17162_v48 = vld [vmem:[#allocation83_spill] sm:$0xff] }
 0x15a   : > { %v12906_v36 = vadd.f32 %v10272_v12, %v10236_v5 }
 0x15b   : > { %10483 = vmatmul.mubr.msk.bf16.gmra.mxu1 %vm472_vm0, %v9081_v26  ;;  %v1518_v56 = vpop.f32.mrf.mxu0  ;;  %v10276_v39 = vpop.f32.mrf.mxu1 }
 0x15c   : > { %10486 = vmatprep.mubr.msk.bf16.mxu1 %vm472_vm0, %v17151_v47  ;;  %v12914_v21 = vadd.f32 %v1755_v62, %v1518_v56  ;;  %v3479_v62 = vshrl.u32 %v12603_v30, 16 }
 0x15d   : > { %v10237_v16 = vpop.f32.mrf.mxu0  ;;  %v1771_v17 = vpop.f32.mrf.mxu1 }
 0x15e   : > { %10443 = vmatmul.mubr.msk.bf16.vlgmr.msra.gmra.mxu0 %vm472_vm0, %v17152_v14  ;;  %v12920_v60 = vadd.f32 %v10273_v13, %v10237_v16  ;;  %v17156_v13 = vld [vmem:[#allocation53_spill] sm:$0xff]  ;;  %v3481_v26 = vrot.slane %v3479_v62, 4  ;;  %v17159_v14 = vld [vmem:[#allocation67_spill] sm:$0xff] }
 0x15f   : > { %10446 = vmatprep.mubr.msk.bf16.mxu0 %vm472_vm0, %v17153_v15  ;;  %10511 = vmatpush3.bf16.msra.mxu0 %v12748_v41  ;;  %v1521_v52 = vpop.f32.mrf.mxu0  ;;  %v10277_v12 = vpop.f32.mrf.mxu1  ;;  %v17155_v41 = vld [vmem:[#allocation78_spill] sm:$0xff]  ;;  %v3490_v15 = vrot.slane %v3488_v18, 5  ;;  %v17164_v18 = vld [vmem:[#allocation92_spill] sm:$0xff] }
 0x160   : > { %10512 = vmatprep.subr.bf16.mxu0 %v11000_v27  ;;  %v12923_v11 = vadd.f32 %v1758_v45, %v1521_v52  ;;  %v3484_v45 = vrot.slane %v3482_v19, 5  ;;  %v9668_v52 = vpack.c.bf16 %v12774_v2, %v12436_v63  ;;  %v17161_v19 = vld [vmem:[#allocation115_spill] sm:$0xff] }
 0x161   : > { %v1774_v9 = vpop.f32.mrf.mxu1 }
 0x162   : > { %v3485_v56 = vor.u32 %v3484_v45, %v3481_v26 }
 0x163   : > { %10487 = vmatmul.mubr.msk.bf16.gmra.mxu1 %vm472_vm0, %v17154_v42  ;;  %10513 = vmatpush3.bf16.msra.mxu0 %v11000_v27  ;;  %v17158_v27 = vld [vmem:[#allocation59_spill] sm:$0xff]  ;;  %v3493_v42 = vshrl.u32 %v12653_v4, 16 }
 0x164   : > { %10490 = vmatprep.mubr.msk.bf16.mxu1 %vm472_vm0, %v17155_v41 }
 0x165   : > { %v10240_v53 = vpop.f32.mrf.mxu0 }
 0x166   : > { %10447 = vmatmul.mubr.msk.bf16.gmra.mxu0 %vm472_vm0, %v9667_v38  ;;  %v12938_v58 = vadd.f32 %v10276_v39, %v10240_v53  ;;  %v10280_v28 = vpop.f32.mrf.mxu1  ;;  %v17157_v39 = vld [vmem:[#allocation97_spill] sm:$0xff] }
 0x167   : > { %10450 = vmatprep.mubr.msk.bf16.mxu0 %vm472_vm0, %v17156_v13  ;;  %v1534_v30 = vpop.f32.mrf.mxu0 }
 0x168   : > { %v12941_v6 = vadd.f32 %v1771_v17, %v1534_v30  ;;  %v1787_v47 = vpop.f32.mrf.mxu1  ;;  %v3486_v17 = vrot.slane %v3485_v56, 4 }
 0x169   : > { %v10241_v1 = vpop.f32.mrf.mxu0 }
 0x16a   : > { %v12944_v5 = vadd.f32 %v10277_v12, %v10241_v1  ;;  %v10281_v16 = vpop.f32.mrf.mxu1  ;;  %v3491_v38 = vsel %vm11597_vm8, %v3486_v17, %v3490_v15  ;;  %v3502_v1 = vshll.u32 %v12657_v51, 16 }
 0x16b   : > { %10491 = vmatmul.mubr.msk.bf16.gmra.mxu1 %vm472_vm0, %v9082_v8  ;;  %v1537_v37 = vpop.f32.mrf.mxu0  ;;  %v9083_v41 = vcombine.low %v12835_v23, %v3491_v38  ;;  %v3495_v8 = vrot.slane %v3493_v42, 4 }
 0x16c   : > { %10494 = vmatprep.mubr.msk.bf16.mxu1 %vm472_vm0, %v17157_v39  ;;  %v12949_v35 = vadd.f32 %v1774_v9, %v1537_v37  ;;  %v12961_v12 = vpop.f32.mrf.mxu1  ;;  %v3496_v9 = vshll.u32 %v12653_v4, 16  ;;  %v17165_v39 = vld [vmem:[#allocation104_spill] sm:$0xff]  ;;  %v3504_v17 = vrot.slane %v3502_v1, 5 }
 0x16e   : > { %10451 = vmatmul.mubr.msk.bf16.gmra.mxu0 %vm472_vm0, %v17158_v27 }
 0x16f   : > { %10454 = vmatprep.mubr.msk.bf16.mxu0 %vm472_vm0, %v17159_v14 }
 0x171   : > { %v10244_v55 = vpop.f32.mrf.mxu0 }
 0x172   : > { %v12957_v49 = vadd.f32 %v10280_v28, %v10244_v55  ;;  %v3498_v28 = vrot.slane %v3496_v9, 5  ;;  %v17166_v55 = vld [vmem:[#allocation81_spill] sm:$0xff]  ;;  %v17168_v9 = vld [vmem:[#allocation134_spill] sm:$0xff] }
 0x173   : > { %10495 = vmatmul.mubr.msk.bf16.gmra.mxu1 %vm472_vm0, %v17160_v46  ;;  %v1550_v62 = vpop.f32.mrf.mxu0  ;;  %v17167_v46 = vld [vmem:[#allocation61_spill] sm:$0xff] }
 0x174   : > { %10498 = vmatprep.mubr.msk.bf16.mxu1 %vm472_vm0, %v17161_v19  ;;  %v12969_v63 = vadd.f32 %v1787_v47, %v1550_v62  ;;  %v3499_v30 = vor.u32 %v3498_v28, %v3495_v8  ;;  %v17163_v47 = vld [vmem:[#allocation129_spill] sm:$0xff]  ;;  %v9669_v38 = vpack.c.bf16 %v17167_v46, %v17166_v55 }
 0x175   : > { %v10245_v2 = vpop.f32.mrf.mxu0 }
 0x176   : > { %10455 = vmatmul.mubr.msk.bf16.gmra.mxu0 %vm472_vm0, %v9668_v52  ;;  %v12975_v53 = vadd.f32 %v10281_v16, %v10245_v2  ;;  %v10284_v13 = vpop.f32.mrf.mxu1  ;;  %v3500_v16 = vrot.slane %v3499_v30, 4  ;;  %v17169_v2 = vld [vmem:[#allocation136_spill] sm:$0xff] }
 0x177   : > { %10458 = vmatprep.mubr.msk.bf16.mxu0 %vm472_vm0, %v17162_v48  ;;  %v12977_v4 = vpop.f32.mrf.mxu0 }
 0x178   : > { %v1803_v26 = vpop.f32.mrf.mxu1  ;;  %v3505_v19 = vsel %vm11597_vm8, %v3500_v16, %v3504_v17  ;;  %v17173_v17 = vld [vmem:[#allocation56_spill] sm:$0xff] }
 0x179   : > { %v9084_v48 = vcombine.low %v12881_v31, %v3505_v19 }
 0x17a   : > { %v10285_v45 = vpop.f32.mrf.mxu1 }
 0x17b   : > { %10499 = vmatmul.mubr.msk.bf16.gmra.mxu1 %vm472_vm0, %v9083_v41 }
 0x17c   : > { %10502 = vmatprep.mubr.msk.bf16.mxu1 %vm472_vm0, %v17163_v47  ;;  %v10248_v23 = vpop.f32.mrf.mxu0  ;;  %v12983_v56 = vpop.f32.mrf.mxu1 }
 0x17d   : > { %v12987_v37 = vadd.f32 %v10284_v13, %v10248_v23  ;;  %v17170_v13 = vld [vmem:[#allocation120_spill] sm:$0xff] }
 0x17e   : > { %10459 = vmatmul.mubr.msk.bf16.gmra.mxu0 %vm472_vm0, %v17164_v18  ;;  %v1566_v27 = vpop.f32.mrf.mxu0  ;;  %v10288_v14 = vpop.f32.mrf.mxu1  ;;  %v17171_v23 = vld [vmem:[#allocation128_spill] sm:$0xff] }
 0x17f   : > { %10462 = vmatprep.mubr.msk.bf16.mxu0 %vm472_vm0, %v17165_v39  ;;  %v12991_v15 = vadd.f32 %v1803_v26, %v1566_v27  ;;  %v17172_v39 = vld [vmem:[#allocation132_spill] sm:$0xff] }
 0x180   : > { %v10249_v51 = vpop.f32.mrf.mxu0  ;;  %v1819_v52 = vpop.f32.mrf.mxu1 }
 0x181   : > { %v12995_v42 = vadd.f32 %v10285_v45, %v10249_v51  ;;  %v9670_v51 = vpack.c.bf16 %v17173_v17, %v12639_v50  ;;  %v17176_v17 = vld [vmem:[#allocation138_spill] sm:$0xff] }
 0x182   : > { %v10289_v62 = vpop.f32.mrf.mxu1  ;;  %v13004_v41 = vpop.f32.mrf.mxu0 }
 0x183   : > { %10503 = vmatmul.mubr.msk.bf16.gmra.mxu1 %vm472_vm0, %v17168_v9  ;;  %v17174_v9 = vld [vmem:[#allocation135_spill] sm:$0xff] }
 0x184   : > { %10506 = vmatprep.mubr.msk.bf16.mxu1 %vm472_vm0, %v17169_v2  ;;  %v13009_v8 = vpop.f32.mrf.mxu1 }
 0x186   : > { %10463 = vmatmul.mubr.msk.bf16.gmra.mxu0 %vm472_vm0, %v9669_v38 }
 0x187   : > { %10466 = vmatprep.mubr.msk.bf16.mxu0 %vm472_vm0, %v17170_v13 }
 0x189   : > { %v10252_v28 = vpop.f32.mrf.mxu0 }
 0x18a   : > { %v13011_v26 = vadd.f32 %v10288_v14, %v10252_v28 }
 0x18b   : > { %v10292_v45 = vpop.f32.mrf.mxu1  ;;  %10507 = vmatmul.mubr.msk.bf16.gmra.mxu1 %vm472_vm0, %v9084_v48  ;;  %v1582_v30 = vpop.f32.mrf.mxu0 }
 0x18c   : > { %v13014_v1 = vadd.f32 %v1819_v52, %v1582_v30 }
 0x18d   : > { %v1835_v47 = vpop.f32.mrf.mxu1  ;;  %v10253_v18 = vpop.f32.mrf.mxu0 }
 0x18e   : > { %10467 = vmatmul.mubr.msk.bf16.gmra.mxu0 %vm472_vm0, %v17171_v23  ;;  %v13018_v31 = vadd.f32 %v10289_v62, %v10253_v18 }
 0x18f   : > { %10470 = vmatprep.mubr.msk.bf16.mxu0 %vm472_vm0, %v17172_v39  ;;  %v10293_v27 = vpop.f32.mrf.mxu1  ;;  %v13024_v14 = vpop.f32.mrf.mxu0  ;;  %v17175_v39 = vld [vmem:[#allocation137_spill] sm:$0xff] }
 0x191   : > { %v13022_v16 = vpop.f32.mrf.mxu1 }
 0x193   : > { %v10336_v52 = vpop.f32.mrf.mxu1 }
 0x195   : > { %v2408_v55 = vpop.f32.mrf.mxu1 }
 0x196   : > { %v10256_v46 = vpop.f32.mrf.mxu0  ;;  %10471 = vmatmul.mubr.msk.bf16.gmra.mxu0 %vm472_vm0, %v9670_v51 }
 0x197   : > { %v13029_v38 = vadd.f32 %v10292_v45, %v10256_v46  ;;  %10514 = vmatprep.mubr.msk.bf16.mxu0 %vm472_vm0, %v17174_v9  ;;  %v10337_v62 = vpop.f32.mrf.mxu1 }
 0x198   : > { %v1598_v19 = vpop.f32.mrf.mxu0 }
 0x199   : > { %v13033_v2 = vadd.f32 %v1835_v47, %v1598_v19  ;;  %v13035_v48 = vpop.f32.mrf.mxu1 }
 0x19a   : > { %v10257_v13 = vpop.f32.mrf.mxu0 }
 0x19b   : > { %v13037_v28 = vadd.f32 %v10293_v27, %v10257_v13  ;;  %v10340_v50 = vpop.f32.mrf.mxu1 }
 0x19c   : > { %v13039_v30 = vpop.f32.mrf.mxu0 }
 0x19d   : > { %v2424_v23 = vpop.f32.mrf.mxu1 }
 0x19e   : > { %v10300_v18 = vpop.f32.mrf.mxu0  ;;  %10515 = vmatmul.mubr.msk.bf16.vlgmr.msra.gmra.mxu0 %vm472_vm0, %v17175_v39 }
 0x19f   : > { %v2256_v45 = vadd.f32 %v10300_v18, %v12845_v61  ;;  %10518 = vmatprep.mubr.msk.bf16.mxu0 %vm472_vm0, %v17176_v17  ;;  %v10341_v47 = vpop.f32.mrf.mxu1 }
 0x1a0   : > { %v2127_v51 = vpop.f32.mrf.mxu0 }
 0x1a1   : > { %v2254_v46 = vadd.f32 %v2127_v51, %v12853_v3  ;;  %v13047_v9 = vadd.f32 %v10336_v52, %v2256_v45  ;;  %v13049_v27 = vpop.f32.mrf.mxu1  ;;  %v17177_v3 = vcombine.low %v12700_v59, %v12758_v32  ;;  %v17178_v45 = vld [vmem:[#allocation139_spill] sm:$0xff] }
 0x1a2   : > { %v10301_v19 = vpop.f32.mrf.mxu0 }
 0x1a3   : > { %v2257_v13 = vadd.f32 %v10301_v19, %v12863_v25  ;;  %v13052_v57 = vadd.f32 %v2408_v55, %v2254_v46  ;;  %v10344_v0 = vpop.f32.mrf.mxu1 }
 0x1a4   : > { %v2130_v39 = vpop.f32.mrf.mxu0 }
 0x1a5   : > { %v13055_v61 = vadd.f32 %v2130_v39, %v12865_v7  ;;  %v13057_v18 = vadd.f32 %v10337_v62, %v2257_v13  ;;  %v2440_v17 = vpop.f32.mrf.mxu1 }
 0x1a6   : > { %v10304_v22 = vpop.f32.mrf.mxu0  ;;  %10519 = vmatmul.mubr.msk.bf16.gmra.mxu0 %vm472_vm0, %v17177_v3 }
 0x1a7   : > { %v2260_v52 = vadd.f32 %v10304_v22, %v12883_v10  ;;  %10522 = vmatprep.mubr.msk.bf16.mxu0 %vm472_vm0, %v17178_v45  ;;  %v10345_v25 = vpop.f32.mrf.mxu1  ;;  %v17179_v45 = vld [vmem:[#allocation73_spill] sm:$0xff] }
 0x1a8   : > { %v2143_v55 = vpop.f32.mrf.mxu0 }
 0x1a9   : > { %v2258_v51 = vadd.f32 %v2143_v55, %v12887_v44  ;;  %v13067_v7 = vadd.f32 %v10340_v50, %v2260_v52  ;;  %v13069_v62 = vpop.f32.mrf.mxu1  ;;  %v17180_v50 = vld [vmem:[#allocation140_spill] sm:$0xff] }
 0x1aa   : > { %v10305_v46 = vpop.f32.mrf.mxu0 }
 0x1ab   : > { %v2261_v19 = vadd.f32 %v10305_v46, %v12895_v43  ;;  %v13072_v13 = vadd.f32 %v2424_v23, %v2258_v51  ;;  %v10348_v59 = vpop.f32.mrf.mxu1 }
 0x1ac   : > { %v2146_v32 = vpop.f32.mrf.mxu0 }
 0x1ad   : > { %v13075_v22 = vadd.f32 %v2146_v32, %v12900_v33  ;;  %v13077_v10 = vadd.f32 %v10341_v47, %v2261_v19  ;;  %v2456_v39 = vpop.f32.mrf.mxu1 }
 0x1ae   : > { %v10308_v3 = vpop.f32.mrf.mxu0  ;;  %10523 = vmatmul.mubr.msk.bf16.gmra.mxu0 %vm472_vm0, %v17179_v45 }
 0x1af   : > { %v2264_v44 = vadd.f32 %v10308_v3, %v12906_v36  ;;  %10526 = vmatprep.mubr.msk.bf16.mxu0 %vm472_vm0, %v17180_v50  ;;  %v10349_v43 = vpop.f32.mrf.mxu1 }
 0x1b0   : > { %v2159_v23 = vpop.f32.mrf.mxu0 }
 0x1b1   : > { %v2262_v52 = vadd.f32 %v2159_v23, %v12914_v21  ;;  %v13085_v55 = vadd.f32 %v10344_v0, %v2264_v44  ;;  %v13087_v33 = vpop.f32.mrf.mxu1  ;;  %v17181_v0 = vcombine.low %v12763_v29, %v12809_v40  ;;  %v17182_v44 = vld [vmem:[#allocation25_spill] sm:$0xff] }
 0x1b2   : > { %v10309_v47 = vpop.f32.mrf.mxu0 }
 0x1b3   : > { %v2265_v51 = vadd.f32 %v10309_v47, %v12920_v60  ;;  %v13090_v46 = vadd.f32 %v2440_v17, %v2262_v52  ;;  %v10352_v19 = vpop.f32.mrf.mxu1 }
 0x1b4   : > { %v2162_v32 = vpop.f32.mrf.mxu0 }
 0x1b5   : > { %v13093_v36 = vadd.f32 %v2162_v32, %v12923_v11  ;;  %v13095_v3 = vadd.f32 %v10345_v25, %v2265_v51  ;;  %v2472_v45 = vpop.f32.mrf.mxu1 }
 0x1b6   : > { %v10312_v50 = vpop.f32.mrf.mxu0  ;;  %10527 = vmatmul.mubr.msk.bf16.gmra.mxu0 %vm472_vm0, %v17181_v0 }
 0x1b7   : > { %v2268_v21 = vadd.f32 %v10312_v50, %v12938_v58  ;;  %10530 = vmatprep.mubr.msk.bf16.mxu0 %vm472_vm0, %v17182_v44  ;;  %v10353_v60 = vpop.f32.mrf.mxu1  ;;  %v17183_v44 = vld [vmem:[#allocation26_spill] sm:$0xff] }
 0x1b8   : > { %v2175_v17 = vpop.f32.mrf.mxu0 }
 0x1b9   : > { %v2266_v23 = vadd.f32 %v2175_v17, %v12941_v6  ;;  %v13105_v11 = vadd.f32 %v10348_v59, %v2268_v21  ;;  %v13107_v25 = vpop.f32.mrf.mxu1  ;;  %v17184_v59 = vld [vmem:[#allocation72_spill] sm:$0xff] }
 0x1ba   : > { %v10313_v52 = vpop.f32.mrf.mxu0 }
 0x1bb   : > { %v2269_v47 = vadd.f32 %v10313_v52, %v12944_v5  ;;  %v13110_v51 = vadd.f32 %v2456_v39, %v2266_v23  ;;  %v10356_v29 = vpop.f32.mrf.mxu1 }
 0x1bc   : > { %v2178_v40 = vpop.f32.mrf.mxu0 }
 0x1bd   : > { %v13113_v58 = vadd.f32 %v2178_v40, %v12949_v35  ;;  %v13115_v32 = vadd.f32 %v10349_v43, %v2269_v47  ;;  %v2488_v50 = vpop.f32.mrf.mxu1 }
 0x1be   : > { %v10316_v0 = vpop.f32.mrf.mxu0  ;;  %10531 = vmatmul.mubr.msk.bf16.gmra.mxu0 %vm472_vm0, %v17183_v44 }
 0x1bf   : > { %v2272_v6 = vadd.f32 %v10316_v0, %v12957_v49  ;;  %10534 = vmatprep.mubr.msk.bf16.mxu0 %vm472_vm0, %v17184_v59  ;;  %v10357_v5 = vpop.f32.mrf.mxu1  ;;  %v17185_v59 = vld [vmem:[#allocation54_spill] sm:$0xff] }
 0x1c0   : > { %v2191_v39 = vpop.f32.mrf.mxu0  ;;  %v17186_v20 = vcombine.low %v12629_v54, %v17185_v59 }
 0x1c1   : > { %v2270_v21 = vadd.f32 %v2191_v39, %v12969_v63  ;;  %v13123_v17 = vadd.f32 %v10352_v19, %v2272_v6  ;;  %v13125_v35 = vpop.f32.mrf.mxu1 }
 0x1c2   : > { %v10317_v43 = vpop.f32.mrf.mxu0 }
 0x1c3   : > { %v2273_v23 = vadd.f32 %v10317_v43, %v12975_v53  ;;  %v13128_v52 = vadd.f32 %v2472_v45, %v2270_v21  ;;  %v10360_v47 = vpop.f32.mrf.mxu1 }
 0x1c4   : > { %v13130_v40 = vpop.f32.mrf.mxu0 }
 0x1c5   : > { %v13132_v49 = vadd.f32 %v10353_v60, %v2273_v23  ;;  %v2504_v0 = vpop.f32.mrf.mxu1 }
 0x1c6   : > { %v10320_v44 = vpop.f32.mrf.mxu0  ;;  %10535 = vmatmul.mubr.msk.bf16.gmra.mxu0 %vm472_vm0, %v17186_v20 }
 0x1c7   : > { %v2276_v63 = vadd.f32 %v10320_v44, %v12987_v37  ;;  %10538 = vmatprep.mubr.msk.bf16.mxu0 %vm472_vm0, %v12530_v34  ;;  %v10361_v53 = vpop.f32.mrf.mxu1  ;;  %v17187_v44 = vld [vmem:[#allocation79_spill] sm:$0xff] }
 0x1c8   : > { %v2207_v19 = vpop.f32.mrf.mxu0 }
 0x1c9   : > { %v2274_v45 = vadd.f32 %v2207_v19, %v12991_v15  ;;  %v13142_v6 = vadd.f32 %v10356_v29, %v2276_v63  ;;  %v13144_v60 = vpop.f32.mrf.mxu1  ;;  %v17188_v29 = vld [vmem:[#allocation80_spill] sm:$0xff] }
 0x1ca   : > { %v10321_v39 = vpop.f32.mrf.mxu0 }
 0x1cb   : > { %v2277_v21 = vadd.f32 %v10321_v39, %v12995_v42  ;;  %v13147_v43 = vadd.f32 %v2488_v50, %v2274_v45  ;;  %v10364_v54 = vpop.f32.mrf.mxu1 }
 0x1cc   : > { %v13149_v20 = vpop.f32.mrf.mxu0 }
 0x1cd   : > { %v13151_v37 = vadd.f32 %v10357_v5, %v2277_v21  ;;  %v2520_v23 = vpop.f32.mrf.mxu1 }
 0x1ce   : > { %v10324_v34 = vpop.f32.mrf.mxu0  ;;  %10539 = vmatmul.mubr.msk.bf16.gmra.mxu0 %vm472_vm0, %v17187_v44 }
 0x1cf   : > { %v2280_v15 = vadd.f32 %v10324_v34, %v13011_v26  ;;  %10542 = vmatprep.mubr.msk.bf16.mxu0 %vm472_vm0, %v17188_v29  ;;  %v10365_v59 = vpop.f32.mrf.mxu1 }
 0x1d0   : > { %v2223_v63 = vpop.f32.mrf.mxu0 }
 0x1d1   : > { %v2278_v42 = vadd.f32 %v2223_v63, %v13014_v1  ;;  %v13159_v50 = vadd.f32 %v10360_v47, %v2280_v15  ;;  %v13161_v19 = vpop.f32.mrf.mxu1  ;;  %v17191_v1 = vld [vmem:[#allocation82_spill] sm:$0xff] }
 0x1d2   : > { %v10325_v5 = vpop.f32.mrf.mxu0  ;;  %v17192_v47 = vcombine.low %v12673_v24, %v17191_v1 }
 0x1d3   : > { %v2281_v45 = vadd.f32 %v10325_v5, %v13018_v31  ;;  %v13164_v39 = vadd.f32 %v2504_v0, %v2278_v42  ;;  %v13166_v21 = vpop.f32.mrf.mxu1 }
 0x1d4   : > { %17189 = vst [vmem:[#allocation76_spill] sm:$0xff] %v13166_v21  ;;  %v13168_v44 = vpop.f32.mrf.mxu0 }
 0x1d5   : > { %v13170_v26 = vadd.f32 %v10361_v53, %v2281_v45  ;;  %v13172_v34 = vpop.f32.mrf.mxu1 }
 0x1d6   : > { %17190 = vst [vmem:[#allocation84_spill] sm:$0xff] %v13172_v34  ;;  %v10328_v29 = vpop.f32.mrf.mxu0  ;;  %10543 = vmatmul.mubr.msk.bf16.gmra.mxu0 %vm472_vm0, %v17192_v47 }
 0x1d7   : > { %v2284_v15 = vadd.f32 %v10328_v29, %v13029_v38  ;;  %v13179_v63 = vpop.f32.mrf.mxu1 }
 0x1d8   : > { %v2239_v31 = vpop.f32.mrf.mxu0 }
 0x1d9   : > { %v2282_v0 = vadd.f32 %v2239_v31, %v13033_v2  ;;  %v13182_v42 = vadd.f32 %v10364_v54, %v2284_v15  ;;  %v13184_v5 = vpop.f32.mrf.mxu1 }
 0x1da   : > { %v10329_v53 = vpop.f32.mrf.mxu0 }
 0x1db   : > { %v2285_v45 = vadd.f32 %v10329_v53, %v13037_v28  ;;  %v13187_v34 = vadd.f32 %v2520_v23, %v2282_v0  ;;  %v13189_v21 = vpop.f32.mrf.mxu1 }
 0x1dc   : > { %v13191_v24 = vpop.f32.mrf.mxu0 }
 0x1dd   : > { %v13193_v1 = vadd.f32 %v10365_v59, %v2285_v45  ;;  %v13195_v38 = vpop.f32.mrf.mxu1  ;;  %v17198_v45 = vmov 0.0  }
 0x1de   : > { %17193 = vst [vmem:[#allocation88_spill] sm:$0xff] %v13195_v38  ;;  %v10372_v29 = vpop.f32.mrf.mxu0  ;;  %4116 = vst.msk [vmem:[#allocation3] sm:$0xff] %vm4115_vm9, %v17198_v45 }
 0x1df   : > { %v13198_v2 = vadd.f32 %v10372_v29, %v13047_v9  ;;  %v13200_v54 = vpop.f32.mrf.mxu1  ;;  %4119 = vst.msk [vmem:[#allocation3 + $0xa0] sm:$0xff] %vm4115_vm9, %v17198_v45  ;;  %4121 = vst.msk [vmem:[#allocation3 + $0x140] sm:$0xff] %vm4115_vm9, %v17198_v45  ;;  %v11001_v29 = vld [vmem:[%s16574_s3 + $0x8] sm:$0xff]  }
 0x1e0   : > { %17194 = vst [vmem:[#allocation89_spill] sm:$0xff] %v13200_v54  ;;  %v2753_v47 = vpop.f32.mrf.mxu0  ;;  %4123 = vst.msk [vmem:[#allocation3 + $0x1e0] sm:$0xff] %vm4115_vm9, %v17198_v45  ;;  %10546 = vmatprep.subr.bf16.mxu1 %v11001_v29 }
 0x1e1   : > { %v13203_v15 = vadd.f32 %v2753_v47, %v13052_v57  ;;  %v13205_v28 = vpop.f32.mrf.mxu1  ;;  %4126 = vst.msk [vmem:[#allocation3 + $0x90] sm:$0xff] %vm4115_vm9, %v17198_v45  ;;  %4128 = vst.msk [vmem:[#allocation3 + $0x130] sm:$0xff] %vm4115_vm9, %v17198_v45  ;;  %10547 = vmatpush3.bf16.msra.mxu1 %v11001_v29 }
 0x1e2   : > { %17195 = vst [vmem:[#allocation90_spill] sm:$0xff] %v13205_v28  ;;  %v10373_v23 = vpop.f32.mrf.mxu0  ;;  %4130 = vst.msk [vmem:[#allocation3 + $0x1d0] sm:$0xff] %vm4115_vm9, %v17198_v45 }
 0x1e3   : > { %v13208_v31 = vadd.f32 %v10373_v23, %v13057_v18  ;;  %v13210_v59 = vpop.f32.mrf.mxu1  ;;  %4132 = vst.msk [vmem:[#allocation3 + $0x270] sm:$0xff] %vm4115_vm9, %v17198_v45 }
 0x1e4   : > { %17196 = vst [vmem:[#allocation91_spill] sm:$0xff] %v13210_v59  ;;  %v13212_v0 = vpop.f32.mrf.mxu0  ;;  %4135 = vst.msk [vmem:[#allocation3] sm:$0x1] %vm4134_vm10, %v17198_v45 }
 0x1e5   : > { %v13214_v53 = vpop.f32.mrf.mxu1  ;;  %4136 = vst.msk [vmem:[#allocation3 + $0x10] sm:$0x1] %vm4134_vm10, %v17198_v45  ;;  %4137 = vst.msk [vmem:[#allocation3 + $0x20] sm:$0x1] %vm4134_vm10, %v17198_v45 }
 0x1e6   : > { %17197 = vst [vmem:[#allocation94_spill] sm:$0xff] %v13214_v53  ;;  %v10376_v9 = vpop.f32.mrf.mxu0  ;;  %4138 = vst.msk [vmem:[#allocation3 + $0x30] sm:$0x1] %vm4134_vm10, %v17198_v45 }
 0x1e7   : > { %v13233_v57 = vadd.f32 %v10376_v9, %v13067_v7  ;;  %v13235_v18 = vpop.f32.mrf.mxu1  ;;  %4139 = vst.msk [vmem:[#allocation3 + $0x40] sm:$0x1] %vm4134_vm10, %v17198_v45  ;;  %4140 = vst.msk [vmem:[#allocation3 + $0x50] sm:$0x1] %vm4134_vm10, %v17198_v45 }
 0x1e8   : > { %17199 = vst [vmem:[#allocation98_spill] sm:$0xff] %v13235_v18  ;;  %4141 = vst.msk [vmem:[#allocation3 + $0x60] sm:$0x1] %vm4134_vm10, %v17198_v45  ;;  %v2769_v7 = vpop.f32.mrf.mxu0 }
 0x1e9   : > { %4142 = vst.msk [vmem:[#allocation3 + $0x70] sm:$0x1] %vm4134_vm10, %v17198_v45  ;;  %4143 = vst.msk [vmem:[#allocation3 + $0x80] sm:$0x1] %vm4134_vm10, %v17198_v45  ;;  %v13385_v47 = vadd.f32 %v2769_v7, %v13072_v13  ;;  %v13387_v23 = vpop.f32.mrf.mxu1 }
 0x1ea   : > { %4144 = vst.msk [vmem:[#allocation3 + $0x90] sm:$0x1] %vm4134_vm10, %v17198_v45  ;;  %4145 = vst.msk [vmem:[#allocation3 + $0xa0] sm:$0x1] %vm4134_vm10, %v17198_v45  ;;  %v10377_v13 = vpop.f32.mrf.mxu0 }
 0x1eb   : > { %4146 = vst.msk [vmem:[#allocation3 + $0xb0] sm:$0x1] %vm4134_vm10, %v17198_v45  ;;  %4147 = vst.msk [vmem:[#allocation3 + $0xc0] sm:$0x1] %vm4134_vm10, %v17198_v45  ;;  %v13414_v9 = vadd.f32 %v10377_v13, %v13077_v10  ;;  %v13416_v7 = vpop.f32.mrf.mxu1  ;;  %v11002_v10 = vld [vmem:[%s16574_s3] sm:$0xff]  }
 0x1ec   : > { %4148 = vst.msk [vmem:[#allocation3 + $0xd0] sm:$0x1] %vm4134_vm10, %v17198_v45  ;;  %4149 = vst.msk [vmem:[#allocation3 + $0xe0] sm:$0x1] %vm4134_vm10, %v17198_v45  ;;  %10580 = vmatprep.subr.bf16.mxu0 %v11002_v10 }
 0x1ed   : > { %4150 = vst.msk [vmem:[#allocation3 + $0xf0] sm:$0x1] %vm4134_vm10, %v17198_v45  ;;  %4151 = vst.msk [vmem:[#allocation3 + $0x100] sm:$0x1] %vm4134_vm10, %v17198_v45  ;;  %v13420_v18 = vpop.f32.mrf.mxu1  ;;  %10581 = vmatpush3.bf16.msra.mxu0 %v11002_v10 }
 0x1ee   : > { %4152 = vst.msk [vmem:[#allocation3 + $0x110] sm:$0x1] %vm4134_vm10, %v17198_v45  ;;  %4153 = vst.msk [vmem:[#allocation3 + $0x120] sm:$0x1] %vm4134_vm10, %v17198_v45 }
 0x1ef   : > { %4154 = vst.msk [vmem:[#allocation3 + $0x130] sm:$0x1] %vm4134_vm10, %v17198_v45  ;;  %4155 = vst.msk [vmem:[#allocation3 + $0x140] sm:$0x1] %vm4134_vm10, %v17198_v45  ;;  %v13425_v28 = vpop.f32.mrf.mxu1 }
 0x1f0   : > { %4156 = vst.msk [vmem:[#allocation3 + $0x150] sm:$0x1] %vm4134_vm10, %v17198_v45  ;;  %4157 = vst.msk [vmem:[#allocation3 + $0x160] sm:$0x1] %vm4134_vm10, %v17198_v45 }
 0x1f1   : > { %4158 = vst.msk [vmem:[#allocation3 + $0x170] sm:$0x1] %vm4134_vm10, %v17198_v45  ;;  %4159 = vst.msk [vmem:[#allocation3 + $0x180] sm:$0x1] %vm4134_vm10, %v17198_v45 }
 0x1f2   : > { %4160 = vst.msk [vmem:[#allocation3 + $0x190] sm:$0x1] %vm4134_vm10, %v17198_v45  ;;  %4161 = vst.msk [vmem:[#allocation3 + $0x1a0] sm:$0x1] %vm4134_vm10, %v17198_v45 }
 0x1f3   : > { %4162 = vst.msk [vmem:[#allocation3 + $0x1b0] sm:$0x1] %vm4134_vm10, %v17198_v45  ;;  %4163 = vst.msk [vmem:[#allocation3 + $0x1c0] sm:$0x1] %vm4134_vm10, %v17198_v45 }
 0x1f4   : > { %4164 = vst.msk [vmem:[#allocation3 + $0x1d0] sm:$0x1] %vm4134_vm10, %v17198_v45  ;;  %4165 = vst.msk [vmem:[#allocation3 + $0x1e0] sm:$0x1] %vm4134_vm10, %v17198_v45 }
 0x1f5   : > { %4166 = vst.msk [vmem:[#allocation3 + $0x1f0] sm:$0x1] %vm4134_vm10, %v17198_v45  ;;  %4167 = vst.msk [vmem:[#allocation3 + $0x200] sm:$0x1] %vm4134_vm10, %v17198_v45 }
 0x1f6   : > { %4168 = vst.msk [vmem:[#allocation3 + $0x210] sm:$0x1] %vm4134_vm10, %v17198_v45  ;;  %4169 = vst.msk [vmem:[#allocation3 + $0x220] sm:$0x1] %vm4134_vm10, %v17198_v45 }
 0x1f7   : > { %4170 = vst.msk [vmem:[#allocation3 + $0x230] sm:$0x1] %vm4134_vm10, %v17198_v45  ;;  %4171 = vst.msk [vmem:[#allocation3 + $0x240] sm:$0x1] %vm4134_vm10, %v17198_v45 }
 0x1f8   : > { %4172 = vst.msk [vmem:[#allocation3 + $0x250] sm:$0x1] %vm4134_vm10, %v17198_v45  ;;  %4173 = vst.msk [vmem:[#allocation3 + $0x260] sm:$0x1] %vm4134_vm10, %v17198_v45 }
 0x1f9   : > { %4174 = vst.msk [vmem:[#allocation3 + $0x270] sm:$0x1] %vm4134_vm10, %v17198_v45  ;;  %4176 = vst.msk [vmem:[#allocation3 + $0x19] sm:$0x1] %vm4134_vm10, %v17198_v45 }
 0x1fa   : > { %4177 = vst.msk [vmem:[#allocation3 + $0x29] sm:$0x1] %vm4134_vm10, %v17198_v45  ;;  %4178 = vst.msk [vmem:[#allocation3 + $0x39] sm:$0x1] %vm4134_vm10, %v17198_v45 }
 0x1fb   : > { %4179 = vst.msk [vmem:[#allocation3 + $0x49] sm:$0x1] %vm4134_vm10, %v17198_v45  ;;  %4180 = vst.msk [vmem:[#allocation3 + $0x59] sm:$0x1] %vm4134_vm10, %v17198_v45 }
 0x1fc   : > { %4181 = vst.msk [vmem:[#allocation3 + $0x69] sm:$0x1] %vm4134_vm10, %v17198_v45  ;;  %4182 = vst.msk [vmem:[#allocation3 + $0x79] sm:$0x1] %vm4134_vm10, %v17198_v45 }
 0x1fd   : > { %4183 = vst.msk [vmem:[#allocation3 + $0x89] sm:$0x1] %vm4134_vm10, %v17198_v45  ;;  %4186 = vst.msk [vmem:[#allocation3 + $0xb9] sm:$0x1] %vm4134_vm10, %v17198_v45 }
 0x1fe   : > { %4187 = vst.msk [vmem:[#allocation3 + $0xc9] sm:$0x1] %vm4134_vm10, %v17198_v45  ;;  %4188 = vst.msk [vmem:[#allocation3 + $0xd9] sm:$0x1] %vm4134_vm10, %v17198_v45 }
 0x1ff   : > { %4189 = vst.msk [vmem:[#allocation3 + $0xe9] sm:$0x1] %vm4134_vm10, %v17198_v45  ;;  %4190 = vst.msk [vmem:[#allocation3 + $0xf9] sm:$0x1] %vm4134_vm10, %v17198_v45 }
 0x200   : > { %4191 = vst.msk [vmem:[#allocation3 + $0x109] sm:$0x1] %vm4134_vm10, %v17198_v45  ;;  %4192 = vst.msk [vmem:[#allocation3 + $0x119] sm:$0x1] %vm4134_vm10, %v17198_v45 }
 0x201   : > { %4193 = vst.msk [vmem:[#allocation3 + $0x129] sm:$0x1] %vm4134_vm10, %v17198_v45  ;;  %4196 = vst.msk [vmem:[#allocation3 + $0x159] sm:$0x1] %vm4134_vm10, %v17198_v45 }
 0x202   : > { %4197 = vst.msk [vmem:[#allocation3 + $0x169] sm:$0x1] %vm4134_vm10, %v17198_v45  ;;  %4198 = vst.msk [vmem:[#allocation3 + $0x179] sm:$0x1] %vm4134_vm10, %v17198_v45 }
 0x203   : > { %4199 = vst.msk [vmem:[#allocation3 + $0x189] sm:$0x1] %vm4134_vm10, %v17198_v45  ;;  %4200 = vst.msk [vmem:[#allocation3 + $0x199] sm:$0x1] %vm4134_vm10, %v17198_v45 }
 0x204   : > { %4201 = vst.msk [vmem:[#allocation3 + $0x1a9] sm:$0x1] %vm4134_vm10, %v17198_v45  ;;  %4202 = vst.msk [vmem:[#allocation3 + $0x1b9] sm:$0x1] %vm4134_vm10, %v17198_v45 }
 0x205   : > { %4203 = vst.msk [vmem:[#allocation3 + $0x1c9] sm:$0x1] %vm4134_vm10, %v17198_v45  ;;  %4206 = vst.msk [vmem:[#allocation3 + $0x1f9] sm:$0x1] %vm4134_vm10, %v17198_v45 }
 0x206   : > { %4207 = vst.msk [vmem:[#allocation3 + $0x209] sm:$0x1] %vm4134_vm10, %v17198_v45  ;;  %4208 = vst.msk [vmem:[#allocation3 + $0x219] sm:$0x1] %vm4134_vm10, %v17198_v45 }
 0x207   : > { %4209 = vst.msk [vmem:[#allocation3 + $0x229] sm:$0x1] %vm4134_vm10, %v17198_v45  ;;  %4210 = vst.msk [vmem:[#allocation3 + $0x239] sm:$0x1] %vm4134_vm10, %v17198_v45 }
 0x208   : > { %4211 = vst.msk [vmem:[#allocation3 + $0x249] sm:$0x1] %vm4134_vm10, %v17198_v45  ;;  %4212 = vst.msk [vmem:[#allocation3 + $0x259] sm:$0x1] %vm4134_vm10, %v17198_v45 }
 0x209   : > { %4213 = vst.msk [vmem:[#allocation3 + $0x269] sm:$0x1] %vm4134_vm10, %v17198_v45  ;;  %17200 = vst [vmem:[#allocation99_spill] sm:$0xff] %v13387_v23  ;;  %v13418_v23 = vpop.f32.mrf.mxu0 }
 0x20a   : > { %4118 = vst.msk [vmem:[#allocation3 + $0x8] sm:$0x3] %vm4117_vm11, %v17198_v45  ;;  %4120 = vst.msk [vmem:[#allocation3 + $0xa8] sm:$0x3] %vm4117_vm11, %v17198_v45 }
 0x20b   : > { %4122 = vst.msk [vmem:[#allocation3 + $0x148] sm:$0x3] %vm4117_vm11, %v17198_v45  ;;  %4124 = vst.msk [vmem:[#allocation3 + $0x1e8] sm:$0x3] %vm4117_vm11, %v17198_v45  ;;  %v10380_v53 = vpop.f32.mrf.mxu0 }
 0x20c   : > { %4127 = vst.msk [vmem:[#allocation3 + $0x98] sm:$0x3] %vm4117_vm11, %v17198_v45  ;;  %4129 = vst.msk [vmem:[#allocation3 + $0x138] sm:$0x3] %vm4117_vm11, %v17198_v45  ;;  %v13423_v59 = vadd.f32 %v10380_v53, %v13085_v55 }
 0x20d   : > { %4131 = vst.msk [vmem:[#allocation3 + $0x1d8] sm:$0x3] %vm4117_vm11, %v17198_v45  ;;  %4133 = vst.msk [vmem:[#allocation3 + $0x278] sm:$0x3] %vm4117_vm11, %v17198_v45  ;;  %v2785_v54 = vpop.f32.mrf.mxu0 }
 0x20e   : > { %4175 = vst.msk [vmem:[#allocation3 + $0x9] sm:$0x1] %vm4134_vm10, %v17198_v45  ;;  %4184 = vst.msk [vmem:[#allocation3 + $0x99] sm:$0x1] %vm4134_vm10, %v17198_v45  ;;  %v13428_v38 = vadd.f32 %v2785_v54, %v13090_v46 }
 0x20f   : > { %4185 = vst.msk [vmem:[#allocation3 + $0xa9] sm:$0x1] %vm4134_vm10, %v17198_v45  ;;  %4194 = vst.msk [vmem:[#allocation3 + $0x139] sm:$0x1] %vm4134_vm10, %v17198_v45  ;;  %v10381_v29 = vpop.f32.mrf.mxu0 }
 0x210   : > { %4195 = vst.msk [vmem:[#allocation3 + $0x149] sm:$0x1] %vm4134_vm10, %v17198_v45  ;;  %4204 = vst.msk [vmem:[#allocation3 + $0x1d9] sm:$0x1] %vm4134_vm10, %v17198_v45  ;;  %v13436_v13 = vadd.f32 %v10381_v29, %v13095_v3 }
 0x211   : > { %4205 = vst.msk [vmem:[#allocation3 + $0x1e9] sm:$0x1] %vm4134_vm10, %v17198_v45  ;;  %4214 = vst.msk [vmem:[#allocation3 + $0x279] sm:$0x1] %vm4134_vm10, %v17198_v45  ;;  %v13430_v45 = vpop.f32.mrf.mxu1  ;;  %v13440_v55 = vpop.f32.mrf.mxu0 }
 0x212   : > { %17201 = vst [vmem:[#allocation100_spill] sm:$0xff] %v13414_v9  ;;  %17202 = vst [vmem:[#allocation85_spill] sm:$0xff] %v13416_v7 }
 0x213   : > { %17203 = vst [vmem:[#allocation87_spill] sm:$0xff] %v13420_v18  ;;  %17204 = vst [vmem:[#allocation60_spill] sm:$0xff] %v13423_v59  ;;  %v13438_v18 = vpop.f32.mrf.mxu1  ;;  %v10384_v46 = vpop.f32.mrf.mxu0 }
 0x214   : > { %17205 = vst [vmem:[#allocation106_spill] sm:$0xff] %v13425_v28  ;;  %17206 = vst [vmem:[#allocation107_spill] sm:$0xff] %v13428_v38  ;;  %v13445_v54 = vadd.f32 %v10384_v46, %v13105_v11 }
 0x215   : > { %17207 = vst [vmem:[#allocation108_spill] sm:$0xff] %v13430_v45  ;;  %17208 = vst [vmem:[#allocation109_spill] sm:$0xff] %v13436_v13  ;;  %v13442_v53 = vpop.f32.mrf.mxu1  ;;  %v2801_v28 = vpop.f32.mrf.mxu0 }
 0x216   : > { %17209 = vst [vmem:[#allocation116_spill] sm:$0xff] %v13438_v18  ;;  %17210 = vst [vmem:[#allocation117_spill] sm:$0xff] %v13442_v53  ;;  %v13450_v7 = vadd.f32 %v2801_v28, %v13110_v51 }
 0x217   : > { %17211 = vst [vmem:[#allocation68_spill] sm:$0xff] %v13445_v54  ;;  %v13447_v45 = vpop.f32.mrf.mxu1  ;;  %v10385_v29 = vpop.f32.mrf.mxu0 }
 0x218   : > { %17212 = vst [vmem:[#allocation74_spill] sm:$0xff] %v13447_v45  ;;  %17213 = vst [vmem:[#allocation118_spill] sm:$0xff] %v13450_v7  ;;  %v13455_v18 = vadd.f32 %v10385_v29, %v13115_v32 }
 0x219   : > { %v13452_v3 = vpop.f32.mrf.mxu1  ;;  %v13457_v10 = vpop.f32.mrf.mxu0 }
 0x21a   : > { %17214 = vst [vmem:[#allocation119_spill] sm:$0xff] %v13452_v3  ;;  %17215 = vst [vmem:[#allocation123_spill] sm:$0xff] %v13455_v18 }
 0x21b   : > { %v10428_v13 = vpop.f32.mrf.mxu1  ;;  %17216 = vst [vmem:[#allocation130_spill] sm:$0xff] %v13457_v10  ;;  %v10388_v38 = vpop.f32.mrf.mxu0 }
 0x21c   : > { %v13460_v11 = vadd.f32 %v10388_v38, %v13123_v17 }
 0x21d   : > { %v3126_v53 = vpop.f32.mrf.mxu1  ;;  %v2817_v45 = vpop.f32.mrf.mxu0 }
 0x21e   : > { %17217 = vst [vmem:[#allocation131_spill] sm:$0xff] %v13460_v11  ;;  %v13463_v54 = vadd.f32 %v2817_v45, %v13128_v52 }
 0x21f   : > { %v10429_v46 = vpop.f32.mrf.mxu1  ;;  %v10389_v28 = vpop.f32.mrf.mxu0 }
 0x220   : > { %17218 = vst [vmem:[#allocation93_spill] sm:$0xff] %v13463_v54  ;;  %v13468_v3 = vadd.f32 %v10389_v28, %v13132_v49 }
 0x221   : > { %v13465_v51 = vpop.f32.mrf.mxu1  ;;  %v13470_v29 = vpop.f32.mrf.mxu0 }
 0x222   : > { %17219 = vst [vmem:[#allocation102_spill] sm:$0xff] %v13465_v51  ;;  %17220 = vst [vmem:[#allocation110_spill] sm:$0xff] %v13468_v3 }
 0x223   : > { %v10432_v32 = vpop.f32.mrf.mxu1  ;;  %17221 = vst [vmem:[#allocation112_spill] sm:$0xff] %v13470_v29  ;;  %v10392_v7 = vpop.f32.mrf.mxu0 }
 0x224   : > { %v2902_v59 = vadd.f32 %v10392_v7, %v13142_v6 }
 0x225   : > { %v3142_v18 = vpop.f32.mrf.mxu1  ;;  %v2833_v38 = vpop.f32.mrf.mxu0 }
 0x226   : > { %v2900_v11 = vadd.f32 %v2833_v38, %v13147_v43  ;;  %v13474_v10 = vadd.f32 %v10428_v13, %v2902_v59 }
 0x227   : > { %v10433_v17 = vpop.f32.mrf.mxu1  ;;  %v10393_v45 = vpop.f32.mrf.mxu0 }
 0x228   : > { %v2903_v51 = vadd.f32 %v10393_v45, %v13151_v37  ;;  %v13479_v49 = vadd.f32 %v3126_v53, %v2900_v11 }
 0x229   : > { %v13476_v52 = vpop.f32.mrf.mxu1  ;;  %v13481_v3 = vpop.f32.mrf.mxu0 }
 0x22a   : > { %v13483_v54 = vadd.f32 %v10429_v46, %v2903_v51 }
 0x22b   : > { %v10436_v28 = vpop.f32.mrf.mxu1  ;;  %v10396_v6 = vpop.f32.mrf.mxu0 }
 0x22c   : > { %v2906_v7 = vadd.f32 %v10396_v6, %v13159_v50 }
 0x22d   : > { %v3158_v29 = vpop.f32.mrf.mxu1  ;;  %v2849_v43 = vpop.f32.mrf.mxu0 }
 0x22e   : > { %v2904_v59 = vadd.f32 %v2849_v43, %v13164_v39  ;;  %v13487_v13 = vadd.f32 %v10432_v32, %v2906_v7 }
 0x22f   : > { %v10437_v9 = vpop.f32.mrf.mxu1  ;;  %v10397_v37 = vpop.f32.mrf.mxu0 }
 0x230   : > { %v2907_v53 = vadd.f32 %v10397_v37, %v13170_v26  ;;  %v13492_v11 = vadd.f32 %v3142_v18, %v2904_v59 }
 0x231   : > { %v13489_v38 = vpop.f32.mrf.mxu1  ;;  %v13496_v46 = vpop.f32.mrf.mxu0 }
 0x232   : > { %17222 = vst [vmem:[#allocation114_spill] sm:$0xff] %v13489_v38  ;;  %v13498_v51 = vadd.f32 %v10433_v17, %v2907_v53 }
 0x233   : > { %v13494_v45 = vpop.f32.mrf.mxu1  ;;  %v10400_v6 = vpop.f32.mrf.mxu0 }
 0x234   : > { %17223 = vst [vmem:[#allocation125_spill] sm:$0xff] %v13494_v45  ;;  %v2910_v39 = vadd.f32 %v10400_v6, %v13182_v42  ;;  %v13571_v45 = vld [vmem:[#allocation3] sm:$0xff] }
 0x235   : > { %v13500_v50 = vpop.f32.mrf.mxu1  ;;  %v2865_v7 = vpop.f32.mrf.mxu0  ;;  %17249 = vst [vmem:[#allocation103_spill] sm:$0xff] %v13571_v45 }
 0x236   : > { %17224 = vst [vmem:[#allocation122_spill] sm:$0xff] %v13500_v50  ;;  %v2908_v43 = vadd.f32 %v2865_v7, %v13187_v34  ;;  %v13506_v38 = vadd.f32 %v10436_v28, %v2910_v39 }
 0x237   : > { %v13503_v32 = vpop.f32.mrf.mxu1  ;;  %v10401_v18 = vpop.f32.mrf.mxu0 }
 0x238   : > { %17225 = vst [vmem:[#allocation121_spill] sm:$0xff] %v13503_v32  ;;  %17226 = vst [vmem:[#allocation124_spill] sm:$0xff] %v13506_v38  ;;  %v2911_v59 = vadd.f32 %v10401_v18, %v13193_v1  ;;  %v13511_v37 = vadd.f32 %v3158_v29, %v2908_v43 }
 0x239   : > { %v13508_v26 = vpop.f32.mrf.mxu1  ;;  %v13515_v53 = vpop.f32.mrf.mxu0 }
 0x23a   : > { %17227 = vst [vmem:[#allocation127_spill] sm:$0xff] %v13508_v26  ;;  %17228 = vst [vmem:[#allocation133_spill] sm:$0xff] %v13511_v37  ;;  %v13517_v50 = vadd.f32 %v10437_v9, %v2911_v59 }
 0x23b   : > { %v13513_v17 = vpop.f32.mrf.mxu1  ;;  %v13521_v6 = vpop.f32.mrf.mxu0 }
 0x23c   : > { %17229 = vst [vmem:[#allocation126_spill] sm:$0xff] %v13513_v17  ;;  %17230 = vst [vmem:[#allocation28_spill] sm:$0xff] %v13517_v50 }
 0x23d   : > { %v13519_v42 = vpop.f32.mrf.mxu1  ;;  %v13525_v28 = vpop.f32.mrf.mxu0 }
 0x23e   : > { %17231 = vst [vmem:[#allocation29_spill] sm:$0xff] %v13519_v42 }
 0x23f   : > { %v13523_v34 = vpop.f32.mrf.mxu1  ;;  %v13529_v7 = vpop.f32.mrf.mxu0 }
 0x240   : > { %17232 = vst [vmem:[#allocation50_spill] sm:$0xff] %v13523_v34 }
 0x241   : > { %v13527_v39 = vpop.f32.mrf.mxu1  ;;  %v13533_v29 = vpop.f32.mrf.mxu0 }
 0x242   : > { %17233 = vst [vmem:[#allocation48_spill] sm:$0xff] %v13527_v39 }
 0x243   : > { %v13531_v1 = vpop.f32.mrf.mxu1  ;;  %v13537_v9 = vpop.f32.mrf.mxu0 }
 0x244   : > { %17234 = vst [vmem:[#allocation32_spill] sm:$0xff] %v13531_v1 }
 0x245   : > { %v13535_v43 = vpop.f32.mrf.mxu1  ;;  %v13541_v59 = vpop.f32.mrf.mxu0 }
 0x246   : > { %17235 = vst [vmem:[#allocation37_spill] sm:$0xff] %v13535_v43 }
 0x247   : > { %v13539_v18 = vpop.f32.mrf.mxu1  ;;  %v13545_v37 = vpop.f32.mrf.mxu0 }
 0x248   : > { %17236 = vst [vmem:[#allocation51_spill] sm:$0xff] %v13539_v18 }
 0x249   : > { %v13543_v50 = vpop.f32.mrf.mxu1  ;;  %v13549_v39 = vpop.f32.mrf.mxu0 }
 0x24a   : > { %17237 = vst [vmem:[#allocation62_spill] sm:$0xff] %v13543_v50 }
 0x24b   : > { %v13547_v34 = vpop.f32.mrf.mxu1  ;;  %v13553_v1 = vpop.f32.mrf.mxu0 }
 0x24c   : > { %17238 = vst [vmem:[#allocation55_spill] sm:$0xff] %v13547_v34  ;;  %17240 = vst [vmem:[#allocation65_spill] sm:$0xff] %v13553_v1 }
 0x24d   : > { %v13551_v38 = vpop.f32.mrf.mxu1  ;;  %v13557_v43 = vpop.f32.mrf.mxu0 }
 0x24e   : > { %17239 = vst [vmem:[#allocation69_spill] sm:$0xff] %v13551_v38  ;;  %17242 = vst [vmem:[#allocation70_spill] sm:$0xff] %v13557_v43 }
 0x24f   : > { %v13555_v42 = vpop.f32.mrf.mxu1  ;;  %v13561_v18 = vpop.f32.mrf.mxu0 }
 0x250   : > { %17241 = vst [vmem:[#allocation75_spill] sm:$0xff] %v13555_v42  ;;  %17244 = vst [vmem:[#allocation95_spill] sm:$0xff] %v13561_v18  ;;  %v13579_v42 = vpack.c.bf16 %v13571_v45, %v13571_v45  ;;  %v1823_v45 = vadd.f32 %v13009_v8, %v13024_v14  ;;  %v2536_v8 = vadd.f32 %v13035_v48, %v13055_v61 }
 0x251   : > { %v13559_v17 = vpop.f32.mrf.mxu1  ;;  %v13565_v50 = vpop.f32.mrf.mxu0  ;;  %v2548_v48 = vadd.f32 %v13087_v33, %v13113_v58  ;;  %v17261_v58 = vld [vmem:[#allocation76_spill] sm:$0xff] }
 0x252   : > { %17243 = vst [vmem:[#allocation77_spill] sm:$0xff] %v13559_v17  ;;  %17246 = vst [vmem:[#allocation101_spill] sm:$0xff] %v13565_v50  ;;  %v1791_v50 = vadd.f32 %v12961_v12, %v12977_v4  ;;  %v4249_v12 = vld [vmem:[#allocation3 + $0x8] sm:$0x3] }
 0x253   : > { %v13563_v26 = vpop.f32.mrf.mxu1  ;;  %v13569_v34 = vpop.f32.mrf.mxu0  ;;  %17252 = vst [vmem:[#allocation49_spill] sm:$0xff] %v13579_v42 }
 0x254   : > { %17245 = vst [vmem:[#allocation86_spill] sm:$0xff] %v13563_v26  ;;  %17248 = vst [vmem:[#allocation111_spill] sm:$0xff] %v13569_v34  ;;  %v4534_v34 = vshll.u32 %v13579_v42, 16 }
 0x255   : > { %v13567_v32 = vpop.f32.mrf.mxu1  ;;  %v13575_v1 = vpop.f32.mrf.mxu0 }
 0x256   : > { %17247 = vst [vmem:[#allocation96_spill] sm:$0xff] %v13567_v32  ;;  %17251 = vst [vmem:[#allocation33_spill] sm:$0xff] %v13575_v1  ;;  %v4531_v32 = vshrl.u32 %v13579_v42, 16  ;;  %v1807_v1 = vadd.f32 %v12983_v56, %v13004_v41  ;;  %v2271_v42 = vadd.f32 %v13130_v40, %v1791_v50  ;;  %v4536_v41 = vrot.slane %v4534_v34, 5 }
 0x257   : > { %v13573_v38 = vpop.f32.mrf.mxu1  ;;  %v13581_v17 = vpop.f32.mrf.mxu0  ;;  %v3179_v34 = vadd.f32 %v13189_v21, %v13233_v57  ;;  %v17269_v21 = vld [vmem:[#allocation130_spill] sm:$0xff] }
 0x258   : > { %17250 = vst [vmem:[#allocation113_spill] sm:$0xff] %v13573_v38  ;;  %17253 = vst [vmem:[#allocation52_spill] sm:$0xff] %v13581_v17  ;;  %v2275_v4 = vadd.f32 %v13149_v20, %v1807_v1  ;;  %v4533_v56 = vrot.slane %v4531_v32, 4  ;;  %v13621_v20 = vpack.c.bf16 %v4249_v12, %v4249_v12  ;;  %v2552_v61 = vadd.f32 %v13107_v25, %v2271_v42  ;;  %v17262_v42 = vld [vmem:[#allocation84_spill] sm:$0xff] }
 0x259   : > { %v13583_v18 = vpop.f32.mrf.mxu1  ;;  %v13585_v26 = vpop.f32.mrf.mxu0  ;;  %v17263_v1 = vld [vmem:[#allocation88_spill] sm:$0xff]  ;;  %v2893_v57 = vadd.f32 %v17269_v21, %v2548_v48 }
 0x25a   : > { %17254 = vst [vmem:[#allocation30_spill] sm:$0xff] %v13583_v18  ;;  %17255 = vst [vmem:[#allocation66_spill] sm:$0xff] %v13585_v26  ;;  %v13599_v18 = vld [vmem:[#allocation3 + $0xa0] sm:$0xff]  ;;  %v1839_v26 = vadd.f32 %v13022_v16, %v13039_v30  ;;  %v2540_v30 = vadd.f32 %v13049_v27, %v13075_v22  ;;  %v2556_v50 = vadd.f32 %v13125_v35, %v2275_v4  ;;  %v4540_v32 = vshll.u32 %v13621_v20, 16 }
 0x25b   : > { %v13591_v38 = vpop.f32.mrf.mxu0  ;;  %v13597_v17 = vpop.f32.mrf.mxu1  ;;  %17258 = vst [vmem:[#allocation71_spill] sm:$0xff] %v13599_v18  ;;  %v13615_v16 = vpack.c.bf16 %v13599_v18, %v13599_v18  ;;  %17260 = vst [vmem:[#allocation53_spill] sm:$0xff] %v13621_v20  ;;  %v4537_v22 = vor.u32 %v4536_v41, %v4533_v56  ;;  %v3173_v35 = vadd.f32 %v17262_v42, %v13203_v15  ;;  %v17264_v15 = vld [vmem:[#allocation100_spill] sm:$0xff]  ;;  %v17265_v56 = vld [vmem:[#allocation89_spill] sm:$0xff] }
 0x25c   : > { %17256 = vst [vmem:[#allocation34_spill] sm:$0xff] %v13591_v38  ;;  %17257 = vst [vmem:[#allocation46_spill] sm:$0xff] %v13597_v17  ;;  %v2279_v38 = vadd.f32 %v13168_v44, %v1823_v45  ;;  %v2283_v14 = vadd.f32 %v13191_v24, %v1839_v26  ;;  %v2544_v44 = vadd.f32 %v13069_v62, %v13093_v36  ;;  %v17273_v42 = vld [vmem:[#allocation107_spill] sm:$0xff]  ;;  %v17293_v18 = vld [vmem:[#allocation93_spill] sm:$0xff] }
 0x25d   : > { %v13604_v43 = vpop.f32.mrf.mxu0  ;;  %17259 = vst [vmem:[#allocation78_spill] sm:$0xff] %v13615_v16  ;;  %v13619_v40 = vpop.f32.mrf.mxu1  ;;  %v2881_v24 = vadd.f32 %v13212_v0, %v2536_v8  ;;  %v2885_v62 = vadd.f32 %v13418_v23, %v2540_v30  ;;  %v4643_v33 = vshrl.u32 %v13615_v16, 16  ;;  %v4646_v25 = vshll.u32 %v13615_v16, 16  ;;  %v17268_v8 = vld [vmem:[#allocation90_spill] sm:$0xff] }
 0x25e   : > { %v2560_v27 = vadd.f32 %v13144_v60, %v2279_v38  ;;  %v2564_v26 = vadd.f32 %v13161_v19, %v2283_v14  ;;  %v3175_v0 = vadd.f32 %v17261_v58, %v13198_v2  ;;  %v3176_v60 = vadd.f32 %v13179_v63, %v13208_v31  ;;  %v17287_v16 = vld [vmem:[#allocation106_spill] sm:$0xff] }
 0x25f   : > { %v13611_v17 = vpop.f32.mrf.mxu0  ;;  %v13647_v19 = vpop.f32.mrf.mxu1  ;;  %v3174_v23 = vadd.f32 %v13184_v5, %v2881_v24  ;;  %v3177_v12 = vadd.f32 %v17263_v1, %v13385_v47  ;;  %v2889_v2 = vadd.f32 %v13440_v55, %v2544_v44  ;;  %v3180_v41 = vadd.f32 %v17265_v56, %v17264_v15  ;;  %v4269_v5 = vld [vmem:[#allocation3 + $0xa8] sm:$0x3]  ;;  %v13666_v55 = vld [vmem:[#allocation3 + $0x140] sm:$0xff] }
 0x260   : > { %v13660_v31 = vrot.slane %v4537_v22, 4  ;;  %v3178_v14 = vadd.f32 %v17268_v8, %v2885_v62  ;;  %v4645_v47 = vrot.slane %v4643_v33, 4  ;;  %v4648_v24 = vrot.slane %v4646_v25, 5  ;;  %17270 = vst [vmem:[#allocation67_spill] sm:$0xff] %v13666_v55  ;;  %v17271_v44 = vld [vmem:[#allocation60_spill] sm:$0xff]  ;;  %v17275_v22 = vld [vmem:[#allocation109_spill] sm:$0xff] }
 0x261   : > { %v13629_v45 = vpop.f32.mrf.mxu0  ;;  %v13681_v48 = vpop.f32.mrf.mxu1  ;;  %v13686_v33 = vld [vmem:[%s16574_s3 + $0x10] sm:$0xff]   ;;  %v17279_v25 = vld [vmem:[#allocation99_spill] sm:$0xff]  ;;  %v17280_v56 = vld [vmem:[#allocation68_spill] sm:$0xff] }
 0x262   : > { %17266 = vst [vmem:[#allocation97_spill] sm:$0xff] %v13660_v31  ;;  %17277 = vst [vmem:[#allocation105_spill] sm:$0xff] %v13681_v48  ;;  %v13689_v15 = vadd.f32 %v17279_v25, %v2889_v2  ;;  %v17281_v8 = vld [vmem:[#allocation85_spill] sm:$0xff]  ;;  %10614 = vmatprep.subr.bf16.mxu1 %v13686_v33 }
 0x263   : > { %v10464_v36 = vpop.f32.mrf.mxu0  ;;  %17278 = vst [vmem:[#allocation115_spill] sm:$0xff] %v13686_v33  ;;  %v13693_v21 = vadd.f32 %v17281_v8, %v17280_v56  ;;  %v17291_v8 = vld [vmem:[#allocation131_spill] sm:$0xff]  ;;  %v17294_v48 = vld [vmem:[#allocation117_spill] sm:$0xff]  ;;  %v2901_v33 = vadd.f32 %v13481_v3, %v2556_v50  ;;  %v3409_v50 = vadd.f32 %v13529_v7, %v3176_v60  ;;  %v3413_v60 = vadd.f32 %v13545_v37, %v3180_v41 }
 0x264   : > { %v13645_v38 = vadd.f32 %v10464_v36, %v13474_v10  ;;  %v13662_v10 = vrot.slane %v4540_v32, 5  ;;  %v17272_v36 = vld [vmem:[#allocation91_spill] sm:$0xff]  ;;  %v17276_v32 = vld [vmem:[#allocation98_spill] sm:$0xff]  ;;  %v13727_v25 = vadd.f32 %v17294_v48, %v17293_v18  ;;  %v3408_v18 = vadd.f32 %v13521_v6, %v3175_v0 }
 0x265   : > { %v3359_v4 = vpop.f32.mrf.mxu0  ;;  %v3183_v58 = vadd.f32 %v17272_v36, %v17271_v44  ;;  %v17282_v44 = vld [vmem:[#allocation112_spill] sm:$0xff]  ;;  %v17298_v6 = vld [vmem:[#allocation102_spill] sm:$0xff] }
 0x266   : > { %v13658_v63 = vadd.f32 %v3359_v4, %v13479_v49  ;;  %17267 = vst [vmem:[#allocation59_spill] sm:$0xff] %v13662_v10  ;;  %v17274_v49 = vld [vmem:[#allocation94_spill] sm:$0xff]  ;;  %v13676_v4 = vadd.f32 %v17276_v32, %v17275_v22  ;;  %v2897_v36 = vadd.f32 %v17282_v44, %v2552_v61  ;;  %v17286_v32 = vld [vmem:[#allocation123_spill] sm:$0xff]  ;;  %v13714_v61 = vpack.c.bf16 %v13666_v55, %v13666_v55  ;;  %v17292_v44 = vld [vmem:[#allocation116_spill] sm:$0xff] }
 0x267   : > { %v10465_v30 = vpop.f32.mrf.mxu0  ;;  %v13672_v1 = vadd.f32 %v17274_v49, %v17273_v42  ;;  %v17285_v49 = vld [vmem:[#allocation87_spill] sm:$0xff]  ;;  %v13706_v20 = vadd.f32 %v17287_v16, %v17286_v32  ;;  %v17295_v10 = vld [vmem:[#allocation110_spill] sm:$0xff] }
 0x268   : > { %v13679_v62 = vadd.f32 %v10465_v30, %v13483_v54  ;;  %v13698_v54 = vpack.c.bf16 %v4269_v5, %v4269_v5  ;;  %v17284_v30 = vld [vmem:[#allocation118_spill] sm:$0xff]  ;;  %17289 = vst [vmem:[#allocation129_spill] sm:$0xff] %v13714_v61  ;;  %v17290_v5 = vld [vmem:[#allocation108_spill] sm:$0xff]  ;;  %v4755_v3 = vshrl.u32 %v13714_v61, 16 }
 0x269   : > { %v13696_v42 = vpop.f32.mrf.mxu0  ;;  %v13702_v22 = vadd.f32 %v17285_v49, %v17284_v30  ;;  %v13718_v56 = vadd.f32 %v17290_v5, %v2893_v57  ;;  %v13722_v30 = vadd.f32 %v17292_v44, %v17291_v8  ;;  %v4649_v49 = vor.u32 %v4648_v24, %v4645_v47  ;;  %v17296_v55 = vld [vmem:[#allocation74_spill] sm:$0xff]  ;;  %v13737_v5 = vpop.f32.mrf.mxu1  ;;  %v17297_v8 = vld [vmem:[#allocation119_spill] sm:$0xff] }
 0x26a   : > { %17283 = vst [vmem:[#allocation83_spill] sm:$0xff] %v13698_v54  ;;  %v4652_v32 = vshll.u32 %v13698_v54, 16  ;;  %v13731_v31 = vadd.f32 %v17296_v55, %v17295_v10  ;;  %v13740_v44 = vadd.f32 %v17297_v8, %v2897_v36  ;;  %v2905_v47 = vadd.f32 %v13496_v46, %v2560_v27  ;;  %v4308_v8 = vld [vmem:[#allocation3 + $0x1e0] sm:$0xff] }
 0x26b   : > { %v10468_v16 = vpop.f32.mrf.mxu0  ;;  %v2909_v24 = vadd.f32 %v13515_v53, %v2564_v26  ;;  %v3406_v10 = vadd.f32 %v13525_v28, %v3173_v35  ;;  %v3407_v36 = vadd.f32 %v13533_v29, %v3174_v23  ;;  %v13753_v46 = vrot.slane %v4649_v49, 4  ;;  %v13765_v0 = vpop.f32.mrf.mxu1  ;;  %v17299_v29 = vld [vmem:[#allocation114_spill] sm:$0xff] }
 0x26c   : > { %v13735_v57 = vadd.f32 %v10468_v16, %v13487_v13  ;;  %v4758_v13 = vshll.u32 %v13714_v61, 16  ;;  %v13755_v53 = vrot.slane %v4652_v32, 5  ;;  %v13758_v27 = vadd.f32 %v17298_v6, %v2901_v33 }
 0x26d   : > { %v3375_v48 = vpop.f32.mrf.mxu0  ;;  %v3412_v28 = vadd.f32 %v13537_v9, %v3179_v34  ;;  %v13768_v7 = vadd.f32 %v13476_v52, %v2905_v47  ;;  %v13771_v35 = vadd.f32 %v17299_v29, %v2909_v24  ;;  %v3411_v23 = vadd.f32 %v13549_v39, %v3178_v14  ;;  %v4289_v9 = vld [vmem:[#allocation3 + $0x148] sm:$0x3]  ;;  %v17303_v47 = vld [vmem:[#allocation127_spill] sm:$0xff]  ;;  %v17305_v14 = vld [vmem:[#allocation126_spill] sm:$0xff] }
 0x26e   : > { %v13747_v55 = vadd.f32 %v3375_v48, %v13492_v11  ;;  %v3410_v11 = vadd.f32 %v13541_v59, %v3177_v12  ;;  %v17300_v34 = vld [vmem:[#allocation125_spill] sm:$0xff]  ;;  %v17301_v12 = vld [vmem:[#allocation122_spill] sm:$0xff]  ;;  %v4757_v49 = vrot.slane %v4755_v3, 4  ;;  %v4760_v32 = vrot.slane %v4758_v13, 5  ;;  %v13796_v13 = vpop.f32.mrf.mxu1 }
 0x26f   : > { %v10469_v16 = vpop.f32.mrf.mxu0  ;;  %v3705_v59 = vadd.f32 %v17300_v34, %v3408_v18  ;;  %v17302_v48 = vld [vmem:[#allocation121_spill] sm:$0xff]  ;;  %v13783_v24 = vadd.f32 %v17303_v47, %v3407_v36  ;;  %v13791_v18 = vadd.f32 %v17305_v14, %v3412_v28  ;;  %v13801_v36 = vpack.c.bf16 %v4289_v9, %v4289_v9  ;;  %v17310_v34 = vld [vmem:[#allocation48_spill] sm:$0xff] }
 0x270   : > { %v13763_v26 = vadd.f32 %v10469_v16, %v13498_v51  ;;  %v3703_v51 = vadd.f32 %v17301_v12, %v3406_v10  ;;  %v13780_v52 = vadd.f32 %v17302_v48, %v3409_v50  ;;  %v17304_v16 = vld [vmem:[#allocation65_spill] sm:$0xff]  ;;  %v17307_v50 = vld [vmem:[#allocation124_spill] sm:$0xff]  ;;  %v13807_v12 = vadd.f32 %v17310_v34, %v3411_v23  ;;  %v17311_v48 = vld [vmem:[#allocation70_spill] sm:$0xff] }
 0x271   : > { %v13775_v33 = vpop.f32.mrf.mxu0  ;;  %v3416_v37 = vadd.f32 %v17304_v16, %v3183_v58  ;;  %v17306_v10 = vld [vmem:[#allocation29_spill] sm:$0xff]  ;;  %17308 = vst [vmem:[#allocation92_spill] sm:$0xff] %v13801_v36  ;;  %v17309_v58 = vld [vmem:[#allocation50_spill] sm:$0xff]  ;;  %v3414_v28 = vadd.f32 %v17311_v48, %v13672_v1  ;;  %v13811_v16 = vpack.c.bf16 %v4308_v8, %v4308_v8  ;;  %v4761_v9 = vor.u32 %v4760_v32, %v4757_v49  ;;  %v17317_v1 = vld [vmem:[#allocation111_spill] sm:$0xff] }
 0x272   : > { %v13794_v3 = vadd.f32 %v17306_v10, %v3410_v11  ;;  %v13804_v29 = vadd.f32 %v17309_v58, %v3413_v60  ;;  %v17313_v11 = vld [vmem:[#allocation95_spill] sm:$0xff]  ;;  %v17314_v10 = vld [vmem:[#allocation133_spill] sm:$0xff]  ;;  %v17315_v60 = vld [vmem:[#allocation32_spill] sm:$0xff]  ;;  %v3420_v48 = vadd.f32 %v17317_v1, %v13693_v21 }
 0x273   : > { %v10472_v41 = vpop.f32.mrf.mxu0  ;;  %17312 = vst [vmem:[#allocation104_spill] sm:$0xff] %v13811_v16  ;;  %v3417_v14 = vadd.f32 %v17313_v11, %v13676_v4  ;;  %v13820_v58 = vadd.f32 %v17315_v60, %v3416_v37  ;;  %v17316_v23 = vld [vmem:[#allocation101_spill] sm:$0xff]  ;;  %v17319_v4 = vld [vmem:[#allocation52_spill] sm:$0xff]  ;;  %v17320_v49 = vld [vmem:[#allocation66_spill] sm:$0xff] }
 0x274   : > { %v13799_v6 = vadd.f32 %v10472_v41, %v17307_v50  ;;  %v4764_v50 = vshll.u32 %v13801_v36, 16  ;;  %v3415_v34 = vadd.f32 %v17316_v23, %v13689_v15  ;;  %v17318_v8 = vld [vmem:[#allocation33_spill] sm:$0xff]  ;;  %v3419_v32 = vadd.f32 %v17320_v49, %v13718_v56  ;;  %v17321_v11 = vld [vmem:[#allocation34_spill] sm:$0xff]  ;;  %v17322_v60 = vld [vmem:[#allocation28_spill] sm:$0xff] }
 0x275   : > { %v3391_v47 = vpop.f32.mrf.mxu0  ;;  %v3418_v39 = vadd.f32 %v17318_v8, %v13702_v22  ;;  %v3424_v37 = vadd.f32 %v17321_v11, %v13722_v30  ;;  %v17323_v23 = vld [vmem:[#allocation37_spill] sm:$0xff]  ;;  %v3422_v22 = vadd.f32 %v13604_v43, %v13727_v25  ;;  %v4870_v56 = vshll.u32 %v13811_v16, 16  ;;  %v17324_v8 = vld [vmem:[#allocation51_spill] sm:$0xff] }
 0x276   : > { %v13816_v41 = vadd.f32 %v3391_v47, %v17314_v10  ;;  %v3421_v47 = vadd.f32 %v17319_v4, %v13706_v20  ;;  %v13834_v10 = vpop.f32.mrf.mxu1  ;;  %v13840_v21 = vadd.f32 %v17323_v23, %v3414_v28  ;;  %v4867_v20 = vshrl.u32 %v13811_v16, 16  ;;  %v17325_v28 = vld [vmem:[#allocation62_spill] sm:$0xff]  ;;  %v17326_v43 = vld [vmem:[#allocation55_spill] sm:$0xff] }
 0x277   : > { %v10473_v61 = vpop.f32.mrf.mxu0  ;;  %v13849_v4 = vadd.f32 %v17324_v8, %v3417_v14  ;;  %v3425_v30 = vadd.f32 %v13611_v17, %v13731_v31  ;;  %v13855_v49 = vrot.slane %v4764_v50, 5  ;;  %v13858_v11 = vadd.f32 %v17325_v28, %v3415_v34  ;;  %v13871_v17 = vld [vmem:[%s16573_s2] ss:$0 sm:$0xff]  ;;  %v17328_v31 = vld [vmem:[#allocation75_spill] sm:$0xff]  ;;  %v17329_v50 = vld [vmem:[#allocation77_spill] sm:$0xff] }
 0x278   : > { %v13837_v15 = vadd.f32 %v10473_v61, %v17322_v60  ;;  %v13853_v61 = vrot.slane %v4761_v9, 4  ;;  %v13861_v25 = vadd.f32 %v17326_v43, %v3420_v48  ;;  %v17327_v60 = vld [vmem:[#allocation69_spill] sm:$0xff]  ;;  %v3423_v14 = vadd.f32 %v13629_v45, %v13740_v44  ;;  %v17330_v48 = vld [vmem:[#allocation86_spill] sm:$0xff]  ;;  %v17331_v45 = vld [vmem:[#allocation96_spill] sm:$0xff] }
 0x279   : > { %v13844_v1 = vpop.f32.mrf.mxu0  ;;  %v13864_v23 = vadd.f32 %v17327_v60, %v3418_v39  ;;  %v13874_v9 = vadd.f32 %v17328_v31, %v3421_v47  ;;  %v13877_v34 = vadd.f32 %v17329_v50, %v3419_v32  ;;  %v13880_v28 = vadd.f32 %v17330_v48, %v3424_v37  ;;  %v13882_v39 = vpop.f32.mrf.mxu1  ;;  %v4309_v60 = vld [vmem:[#allocation3 + $0x1e8] sm:$0x3]  ;;  %v13892_v32 = vld [vmem:[%s16574_s3 + $0x18] sm:$0xff]  }
 0x27a   : > { %v13885_v44 = vadd.f32 %v17331_v45, %v3422_v22  ;;  %v3427_v16 = vadd.f32 %v13696_v42, %v13758_v27  ;;  %v4869_v54 = vrot.slane %v4867_v20, 4  ;;  %v4872_v47 = vrot.slane %v4870_v56, 5  ;;  %v17332_v37 = vld [vmem:[#allocation113_spill] sm:$0xff]  ;;  %v17333_v42 = vld [vmem:[#allocation30_spill] sm:$0xff]  ;;  %10648 = vmatprep.subr.bf16.mxu0 %v13892_v32 }
 0x27b   : > { %v10516_v8 = vpop.f32.mrf.mxu0  ;;  %v13895_v31 = vadd.f32 %v17332_v37, %v3425_v30  ;;  %v13903_v27 = vadd.f32 %v17333_v42, %v3423_v14  ;;  %v17334_v20 = vld [vmem:[#allocation46_spill] sm:$0xff]  ;;  %v13911_v50 = vadd.f32 %v13619_v40, %v13658_v63  ;;  %v13913_v48 = vpack.c.bf16 %v4309_v60, %v4309_v60  ;;  %v17336_v45 = vld [vmem:[#allocation105_spill] sm:$0xff] }
 0x27c   : > { %v3950_v43 = vadd.f32 %v10516_v8, %v3705_v59  ;;  %v13907_v56 = vadd.f32 %v17334_v20, %v13645_v38  ;;  %v13920_v38 = vadd.f32 %v13647_v19, %v13679_v62  ;;  %v13923_v37 = vadd.f32 %v17336_v45, %v3427_v16 }
 0x27d   : > { %v3821_v36 = vpop.f32.mrf.mxu0  ;;  %17335 = vst [vmem:[#allocation81_spill] sm:$0xff] %v13913_v48  ;;  %v4873_v63 = vor.u32 %v4872_v47, %v4869_v54  ;;  %v4876_v60 = vshll.u32 %v13913_v48, 16  ;;  %v13933_v19 = vadd.f32 %v13765_v0, %v13747_v55  ;;  %v3431_v62 = vadd.f32 %v13775_v33, %v13768_v7  ;;  %v17337_v7 = vld [vmem:[#allocation49_spill] sm:$0xff] }
 0x27e   : > { %v3989_v59 = vadd.f32 %v13871_v17, %v3950_v43  ;;  %v3948_v8 = vadd.f32 %v3821_v36, %v3703_v51  ;;  %v3688_v51 = vpop.f32.mrf.mxu1  ;;  %v3435_v45 = vadd.f32 %v13844_v1, %v13771_v35 }
 0x27f   : > { %v10517_v30 = vpop.f32.mrf.mxu0  ;;  %v13942_v55 = vrot.slane %v4873_v63, 4  ;;  %v13944_v0 = vrot.slane %v4876_v60, 5 }
 0x280   : > { %vm4021_vm12 = vcmp.ge.f32.partialorder %v3989_v59, 0.0  ;;  %v4053_v36 = vmul.f32 0.05, %v3989_v59  ;;  %v3987_v43 = vadd.f32 %v13871_v17, %v3948_v8  ;;  %v3951_v14 = vadd.f32 %v10517_v30, %v13780_v52  ;;  %v10509_v16 = vpop.f32.mrf.mxu1 }
 0x281   : > { %v3824_v40 = vpop.f32.mrf.mxu0  ;;  %v13929_v8 = vadd.f32 %v13737_v5, %v13735_v57 }
 0x282   : > { %v4085_v42 = vsel %vm4021_vm12, %v3989_v59, %v4053_v36  ;;  %vm4019_vm13 = vcmp.ge.f32.partialorder %v3987_v43, 0.0  ;;  %v4051_v20 = vmul.f32 0.05, %v3987_v43  ;;  %v3990_v22 = vadd.f32 %v13871_v17, %v3951_v14  ;;  %v3691_v60 = vpop.f32.mrf.mxu1 }
 0x283   : > { %4218 = vst.msk [vmem:[#allocation3 + $0x31] sm:$0xff] %vm4115_vm9, %v4085_v42  ;;  %v3949_v54 = vadd.f32 %v3824_v40, %v13783_v24  ;;  %v10520_v52 = vpop.f32.mrf.mxu0  ;;  %v13949_v24 = vadd.f32 %v13796_v13, %v13763_v26  ;;  %v13954_v14 = vadd.f32 %v13834_v10, %v3431_v62  ;;  %v13966_v10 = vadd.f32 %v3688_v51, %v13816_v41 }
 0x284   : > { %v4083_v47 = vsel %vm4019_vm13, %v3987_v43, %v4051_v20  ;;  %vm4022_vm14 = vcmp.ge.f32.partialorder %v3990_v22, 0.0  ;;  %v4054_v59 = vmul.f32 0.05, %v3990_v22  ;;  %v3954_v30 = vadd.f32 %v10520_v52, %v13791_v18 }
 0x285   : > { %4216 = vst.msk [vmem:[#allocation3 + $0x11] sm:$0xff] %vm4115_vm9, %v4083_v47  ;;  %v3988_v57 = vadd.f32 %v13871_v17, %v3949_v54  ;;  %v3837_v5 = vpop.f32.mrf.mxu0  ;;  %v13977_v41 = vadd.f32 %v10509_v16, %v13837_v15 }
 0x286   : > { %v4086_v36 = vsel %vm4022_vm14, %v3990_v22, %v4054_v59  ;;  %v3993_v43 = vadd.f32 %v13871_v17, %v3954_v30  ;;  %v3952_v18 = vadd.f32 %v3837_v5, %v13794_v3  ;;  %v13963_v3 = vadd.f32 %v13882_v39, %v13799_v6 }
 0x287   : > { %4219 = vst.msk [vmem:[#allocation3 + $0x41] sm:$0xff] %vm4115_vm9, %v4086_v36  ;;  %vm4020_vm15 = vcmp.ge.f32.partialorder %v3988_v57, 0.0  ;;  %v4052_v40 = vmul.f32 0.05, %v3988_v57  ;;  %v10521_v63 = vpop.f32.mrf.mxu0  ;;  %v13979_v39 = vadd.f32 %v3691_v60, %v3435_v45 }
 0x288   : > { %vm4025_vm1 = vcmp.ge.f32.partialorder %v3993_v43, 0.0  ;;  %v4057_v26 = vmul.f32 0.05, %v3993_v43  ;;  %v3991_v13 = vadd.f32 %v13871_v17, %v3952_v18  ;;  %v3955_v22 = vadd.f32 %v10521_v63, %v13804_v29 }
 0x289   : > { %v4084_v35 = vsel %vm4020_vm15, %v3988_v57, %v4052_v40  ;;  %v3840_v1 = vpop.f32.mrf.mxu0 }
 0x28a   : > { %4217 = vst.msk [vmem:[#allocation3 + $0x21] sm:$0xff] %vm4115_vm9, %v4084_v35  ;;  %v4089_v20 = vsel %vm4025_vm1, %v3993_v43, %v4057_v26  ;;  %vm4023_vm2 = vcmp.ge.f32.partialorder %v3991_v13, 0.0  ;;  %v4055_v62 = vmul.f32 0.05, %v3991_v13  ;;  %v3994_v29 = vadd.f32 %v13871_v17, %v3955_v22  ;;  %v13974_v54 = vld [vmem:[#allocation3 + $0x30] sm:$0xff] }
 0x28b   : > { %v4255_v6 = vld [vmem:[#allocation3 + $0x38] sm:$0x3]  ;;  %4222 = vst.msk [vmem:[#allocation3 + $0x71] sm:$0xff] %vm4115_vm9, %v4089_v20  ;;  %v3953_v51 = vadd.f32 %v3840_v1, %v13807_v12  ;;  %v10524_v52 = vpop.f32.mrf.mxu0  ;;  %v13985_v47 = vpack.c.bf16 %v13974_v54, %v13974_v54 }
 0x28c   : > { %v4087_v59 = vsel %vm4023_vm2, %v3991_v13, %v4055_v62  ;;  %vm4026_vm3 = vcmp.ge.f32.partialorder %v3994_v29, 0.0  ;;  %v4058_v30 = vmul.f32 0.05, %v3994_v29  ;;  %v3958_v57 = vadd.f32 %v10524_v52, %v13820_v58  ;;  %v4250_v5 = vld [vmem:[#allocation3 + $0x10] sm:$0xff]  ;;  %v4251_v36 = vld [vmem:[#allocation3 + $0x18] sm:$0x3] }
 0x28d   : > { %4220 = vst.msk [vmem:[#allocation3 + $0x51] sm:$0xff] %vm4115_vm9, %v4087_v59  ;;  %v3992_v15 = vadd.f32 %v13871_v17, %v3953_v51  ;;  %v3853_v16 = vpop.f32.mrf.mxu0  ;;  %v13990_v43 = vpack.c.bf16 %v4250_v5, %v4250_v5  ;;  %v17338_v12 = vld [vmem:[#allocation103_spill] sm:$0xff]  ;;  %v13993_v45 = vpack.c.bf16 %v4255_v6, %v4255_v6  ;;  %v13999_v58 = vpack.c.bf16 %v4251_v36, %v4251_v36 }
 0x28e   : > { %v9743_v18 = vpack.c.bf16 %v4250_v5, %v17338_v12  ;;  %v4090_v40 = vsel %vm4026_vm3, %v3994_v29, %v4058_v30  ;;  %v3997_v63 = vadd.f32 %v13871_v17, %v3958_v57  ;;  %v3956_v60 = vadd.f32 %v3853_v16, %v13840_v21  ;;  %v13997_v26 = vld [vmem:[#allocation3 + $0x40] sm:$0xff] }
 0x28f   : > { %4223 = vst.msk [vmem:[#allocation3 + $0x81] sm:$0xff] %vm4115_vm9, %v4090_v40  ;;  %vm4024_vm4 = vcmp.ge.f32.partialorder %v3992_v15, 0.0  ;;  %v4056_v13 = vmul.f32 0.05, %v3992_v15  ;;  %v10525_v22 = vpop.f32.mrf.mxu0  ;;  %v4573_v1 = vshrl.u32 %v13985_v47, 16  ;;  %v14012_v52 = vpack.c.bf16 %v13997_v26, %v13997_v26 }
 0x290   : > { %10582 = vmatprep.mubr.msk.bf16.mxu0 %vm4115_vm9, %v9743_v18  ;;  %vm4029_vm5 = vcmp.ge.f32.partialorder %v3997_v63, 0.0  ;;  %v4061_v20 = vmul.f32 0.05, %v3997_v63  ;;  %v3995_v21 = vadd.f32 %v13871_v17, %v3956_v60  ;;  %v3959_v62 = vadd.f32 %v10525_v22, %v13849_v4 }
 0x291   : > { %v4088_v29 = vsel %vm4024_vm4, %v3992_v15, %v4056_v13  ;;  %v3856_v6 = vpop.f32.mrf.mxu0  ;;  %v14008_v51 = vld [vmem:[#allocation3 + $0x20] sm:$0xff]  ;;  %v4545_v59 = vshrl.u32 %v13990_v43, 16  ;;  %v4548_v30 = vshll.u32 %v13990_v43, 16  ;;  %v4554_v18 = vshll.u32 %v13999_v58, 16 }
 0x292   : > { %4221 = vst.msk [vmem:[#allocation3 + $0x61] sm:$0xff] %vm4115_vm9, %v4088_v29  ;;  %v4093_v57 = vsel %vm4029_vm5, %v3997_v63, %v4061_v20  ;;  %vm4027_vm7 = vcmp.ge.f32.partialorder %v3995_v21, 0.0  ;;  %v4059_v5 = vmul.f32 0.05, %v3995_v21  ;;  %v3998_v36 = vadd.f32 %v13871_v17, %v3959_v62 }
 0x293   : > { %4226 = vst.msk [vmem:[#allocation3 + $0xd1] sm:$0xff] %vm4115_vm9, %v4093_v57  ;;  %v3957_v4 = vadd.f32 %v3856_v6, %v13858_v11  ;;  %v10528_v15 = vpop.f32.mrf.mxu0  ;;  %v14022_v16 = vpack.c.bf16 %v13974_v54, %v14008_v51  ;;  %v4547_v12 = vrot.slane %v4545_v59, 4  ;;  %v14030_v11 = vpack.c.bf16 %v14008_v51, %v14008_v51  ;;  %v4253_v57 = vld [vmem:[#allocation3 + $0x28] sm:$0x3] }
 0x294   : > { %v4091_v40 = vsel %vm4027_vm7, %v3995_v21, %v4059_v5  ;;  %vm4030_vm10 = vcmp.ge.f32.partialorder %v3998_v36, 0.0  ;;  %v4062_v60 = vmul.f32 0.05, %v3998_v36  ;;  %v3962_v63 = vadd.f32 %v10528_v15, %v13861_v25  ;;  %v4258_v13 = vld [vmem:[#allocation3 + $0x50] sm:$0xff] }
 0x295   : > { %17339 = vst [vmem:[#allocation61_spill] sm:$0xff] %v14022_v16  ;;  %4224 = vst.msk [vmem:[#allocation3 + $0xb1] sm:$0xff] %vm4115_vm9, %v4091_v40  ;;  %v3996_v22 = vadd.f32 %v13871_v17, %v3957_v4  ;;  %10583 = vmatmul.mubr.msk.bf16.vlgmr.msra.gmra.mxu0 %vm4115_vm9, %v14022_v16  ;;  %v3869_v20 = vpop.f32.mrf.mxu0  ;;  %v14035_v62 = vpack.c.bf16 %v4258_v13, %v13997_v26  ;;  %v4550_v21 = vrot.slane %v4548_v30, 5  ;;  %v4556_v30 = vrot.slane %v4554_v18, 5 }
 0x296   : > { %v4094_v29 = vsel %vm4030_vm10, %v3998_v36, %v4062_v60  ;;  %v4001_v25 = vadd.f32 %v13871_v17, %v3962_v63  ;;  %v3960_v6 = vadd.f32 %v3869_v20, %v13864_v23  ;;  %v14039_v59 = vpack.c.bf16 %v4258_v13, %v4258_v13  ;;  %10649 = vmatpush3.bf16.msra.mxu0 %v13892_v32  ;;  %v4262_v60 = vld [vmem:[#allocation3 + $0x70] sm:$0xff] }
 0x297   : > { %17340 = vst [vmem:[#allocation134_spill] sm:$0xff] %v14035_v62  ;;  %4227 = vst.msk [vmem:[#allocation3 + $0xe1] sm:$0xff] %vm4115_vm9, %v4094_v29  ;;  %vm4028_vm11 = vcmp.ge.f32.partialorder %v3996_v22, 0.0  ;;  %v4060_v5 = vmul.f32 0.05, %v3996_v22  ;;  %v10529_v4 = vpop.f32.mrf.mxu0  ;;  %10586 = vmatprep.mubr.msk.bf16.mxu0 %vm4115_vm9, %v14035_v62  ;;  %v4551_v15 = vor.u32 %v4550_v21, %v4547_v12  ;;  %v14049_v29 = vpack.c.bf16 %v4253_v57, %v4253_v57 }
 0x298   : > { %vm4033_vm12 = vcmp.ge.f32.partialorder %v4001_v25, 0.0  ;;  %v4065_v36 = vmul.f32 0.05, %v4001_v25  ;;  %v3999_v40 = vadd.f32 %v13871_v17, %v3960_v6  ;;  %v3963_v23 = vadd.f32 %v10529_v4, %v13874_v9 }
 0x299   : > { %v4092_v63 = vsel %vm4028_vm11, %v3996_v22, %v4060_v5  ;;  %v3872_v13 = vpop.f32.mrf.mxu0  ;;  %v4552_v32 = vrot.slane %v4551_v15, 4  ;;  %v14047_v20 = vld [vmem:[#allocation3 + $0x60] sm:$0xff]  ;;  %v4559_v33 = vshrl.u32 %v14030_v11, 16  ;;  %v14060_v57 = vpack.c.bf16 %v4262_v60, %v4262_v60  ;;  %v17344_v15 = vld [vmem:[#allocation97_spill] sm:$0xff] }
 0x29a   : > { %4225 = vst.msk [vmem:[#allocation3 + $0xc1] sm:$0xff] %vm4115_vm9, %v4092_v63  ;;  %v4097_v12 = vsel %vm4033_vm12, %v4001_v25, %v4065_v36  ;;  %vm4031_vm13 = vcmp.ge.f32.partialorder %v3999_v40, 0.0  ;;  %v4063_v18 = vmul.f32 0.05, %v3999_v40  ;;  %v4002_v21 = vadd.f32 %v13871_v17, %v3963_v23  ;;  %v17345_v36 = vld [vmem:[#allocation59_spill] sm:$0xff] }
 0x29b   : > { %4230 = vst.msk [vmem:[#allocation3 + $0x111] sm:$0xff] %vm4115_vm9, %v4097_v12  ;;  %v3961_v9 = vadd.f32 %v3872_v13, %v13877_v34  ;;  %v14058_v22 = vsel %vm11597_vm8, %v4552_v32, %v4556_v30  ;;  %v10532_v6 = vpop.f32.mrf.mxu0  ;;  %17342 = vst [vmem:[#allocation120_spill] sm:$0xff] %v14060_v57  ;;  %v14063_v5 = vpack.c.bf16 %v4262_v60, %v14047_v20  ;;  %v4562_v13 = vshll.u32 %v14030_v11, 16 }
 0x29c   : > { %17341 = vst [vmem:[#allocation136_spill] sm:$0xff] %v14058_v22  ;;  %v4095_v4 = vsel %vm4031_vm13, %v3999_v40, %v4063_v18  ;;  %vm4034_vm14 = vcmp.ge.f32.partialorder %v4002_v21, 0.0  ;;  %v4066_v25 = vmul.f32 0.05, %v4002_v21  ;;  %v17346_v23 = vsel %vm11597_vm8, %v17344_v15, %v17345_v36 }
 0x29d   : > { %17343 = vst [vmem:[#allocation128_spill] sm:$0xff] %v14063_v5  ;;  %v9194_v34 = vcombine.low %v17346_v23, %v14058_v22  ;;  %4228 = vst.msk [vmem:[#allocation3 + $0xf1] sm:$0xff] %vm4115_vm9, %v4095_v4  ;;  %v4000_v30 = vadd.f32 %v13871_v17, %v3961_v9  ;;  %v3966_v63 = vadd.f32 %v10532_v6, %v13880_v28  ;;  %10587 = vmatmul.mubr.msk.bf16.gmra.mxu0 %vm4115_vm9, %v14063_v5  ;;  %v3885_v60 = vpop.f32.mrf.mxu0 }
 0x29e   : > { %v4561_v40 = vrot.slane %v4559_v33, 4  ;;  %v4098_v32 = vsel %vm4034_vm14, %v4002_v21, %v4066_v25  ;;  %v14080_v12 = vpack.c.bf16 %v14047_v20, %v14047_v20  ;;  %v3964_v18 = vadd.f32 %v3885_v60, %v13885_v44  ;;  %v4257_v44 = vld [vmem:[#allocation3 + $0x48] sm:$0x3] }
 0x29f   : > { %10548 = vmatprep.mubr.msk.bf16.mxu1 %vm4115_vm9, %v9194_v34  ;;  %v4568_v9 = vshll.u32 %v14049_v29, 16  ;;  %4231 = vst.msk [vmem:[#allocation3 + $0x121] sm:$0xff] %vm4115_vm9, %v4098_v32  ;;  %vm4032_vm15 = vcmp.ge.f32.partialorder %v4000_v30, 0.0  ;;  %v4064_v28 = vmul.f32 0.05, %v4000_v30  ;;  %v4005_v6 = vadd.f32 %v13871_v17, %v3966_v63  ;;  %v10533_v4 = vpop.f32.mrf.mxu0  ;;  %v14091_v32 = vld [vmem:[#allocation3 + $0xb0] sm:$0xff] }
 0x2a0   : > { %v4564_v33 = vrot.slane %v4562_v13, 5  ;;  %v4003_v21 = vadd.f32 %v13871_v17, %v3964_v18  ;;  %v4575_v25 = vrot.slane %v4573_v1, 4  ;;  %v4576_v15 = vshll.u32 %v13985_v47, 16  ;;  %v4259_v63 = vld [vmem:[#allocation3 + $0x58] sm:$0x3] }
 0x2a1   : > { %v4582_v36 = vshll.u32 %v13993_v45, 16  ;;  %v4096_v23 = vsel %vm4032_vm15, %v4000_v30, %v4064_v28  ;;  %vm4037_vm1 = vcmp.ge.f32.partialorder %v4005_v6, 0.0  ;;  %v4069_v34 = vmul.f32 0.05, %v4005_v6  ;;  %v3888_v35 = vpop.f32.mrf.mxu0 }
 0x2a2   : > { %v4565_v60 = vor.u32 %v4564_v33, %v4561_v40  ;;  %4229 = vst.msk [vmem:[#allocation3 + $0x101] sm:$0xff] %vm4115_vm9, %v4096_v23  ;;  %vm4035_vm2 = vcmp.ge.f32.partialorder %v4003_v21, 0.0  ;;  %v4067_v13 = vmul.f32 0.05, %v4003_v21  ;;  %v4570_v18 = vrot.slane %v4568_v9, 5  ;;  %v17347_v40 = vld [vmem:[#allocation71_spill] sm:$0xff] }
 0x2a3   : > { %v4578_v42 = vrot.slane %v4576_v15, 5  ;;  %v4101_v1 = vsel %vm4037_vm1, %v4005_v6, %v4069_v34  ;;  %v4584_v62 = vrot.slane %v4582_v36, 5  ;;  %v3967_v16 = vadd.f32 %v10533_v4, %v13895_v31  ;;  %v10536_v48 = vpop.f32.mrf.mxu0  ;;  %v14117_v23 = vld [vmem:[#allocation3 + $0xc0] sm:$0xff] }
 0x2a4   : > { %v4566_v5 = vrot.slane %v4565_v60, 4  ;;  %4234 = vst.msk [vmem:[#allocation3 + $0x171] sm:$0xff] %vm4115_vm9, %v4101_v1  ;;  %v4099_v30 = vsel %vm4035_vm2, %v4003_v21, %v4067_v13  ;;  %v9747_v33 = vpack.c.bf16 %v14091_v32, %v17347_v40  ;;  %v3965_v22 = vadd.f32 %v3888_v35, %v13903_v27  ;;  %v4261_v40 = vld [vmem:[#allocation3 + $0x68] sm:$0x3] }
 0x2a5   : > { %v4579_v28 = vor.u32 %v4578_v42, %v4575_v25  ;;  %4232 = vst.msk [vmem:[#allocation3 + $0x151] sm:$0xff] %vm4115_vm9, %v4099_v30  ;;  %v4006_v6 = vadd.f32 %v13871_v17, %v3967_v16  ;;  %v14105_v15 = vpack.c.bf16 %v4257_v44, %v4257_v44  ;;  %v14107_v31 = vpack.c.bf16 %v4259_v63, %v4259_v63  ;;  %v3901_v34 = vpop.f32.mrf.mxu0 }
 0x2a6   : > { %v14102_v9 = vsel %vm11597_vm8, %v4566_v5, %v4570_v18  ;;  %10590 = vmatprep.mubr.msk.bf16.mxu0 %vm4115_vm9, %v9747_v33  ;;  %v4004_v42 = vadd.f32 %v13871_v17, %v3965_v22  ;;  %v4587_v27 = vshrl.u32 %v14012_v52, 16  ;;  %v4590_v35 = vshll.u32 %v14012_v52, 16  ;;  %v4263_v18 = vld [vmem:[#allocation3 + $0x78] sm:$0x3] }
 0x2a7   : > { %17348 = vst [vmem:[#allocation132_spill] sm:$0xff] %v14102_v9  ;;  %v4580_v4 = vrot.slane %v4579_v28, 4  ;;  %vm4038_vm3 = vcmp.ge.f32.partialorder %v4006_v6, 0.0  ;;  %v4070_v21 = vmul.f32 0.05, %v4006_v6  ;;  %v4596_v5 = vshll.u32 %v14105_v15, 16 }
 0x2a8   : > { %v4601_v25 = vshrl.u32 %v14039_v59, 16  ;;  %vm4036_vm4 = vcmp.ge.f32.partialorder %v4004_v42, 0.0  ;;  %v4068_v36 = vmul.f32 0.05, %v4004_v42  ;;  %v4589_v44 = vrot.slane %v4587_v27, 4  ;;  %v14133_v27 = vld [vmem:[#allocation3 + $0xd0] sm:$0xff] }
 0x2a9   : > { %v4585_v16 = vsel %vm11597_vm8, %v4580_v4, %v4584_v62  ;;  %v4102_v60 = vsel %vm4038_vm3, %v4006_v6, %v4070_v21  ;;  %v14124_v63 = vpack.c.bf16 %v14091_v32, %v14091_v32  ;;  %v4592_v13 = vrot.slane %v4590_v35, 5  ;;  %17351 = vst [vmem:[#allocation137_spill] sm:$0xff] %v14133_v27 }
 0x2aa   : > { %v14120_v22 = vcombine.low %v14102_v9, %v4585_v16  ;;  %4235 = vst.msk [vmem:[#allocation3 + $0x181] sm:$0xff] %vm4115_vm9, %v4102_v60  ;;  %v4100_v1 = vsel %vm4036_vm4, %v4004_v42, %v4068_v36  ;;  %v4603_v62 = vrot.slane %v4601_v25, 4  ;;  %v4604_v30 = vshll.u32 %v14039_v59, 16  ;;  %v10537_v60 = vpop.f32.mrf.mxu0 }
 0x2ab   : > { %17350 = vst [vmem:[#allocation135_spill] sm:$0xff] %v14124_v63  ;;  %v4610_v28 = vshll.u32 %v14107_v31, 16  ;;  %4233 = vst.msk [vmem:[#allocation3 + $0x161] sm:$0xff] %vm4115_vm9, %v4100_v1  ;;  %v4593_v33 = vor.u32 %v4592_v13, %v4589_v44  ;;  %v4598_v6 = vrot.slane %v4596_v5, 5  ;;  %v3970_v4 = vadd.f32 %v10536_v48, %v13907_v56  ;;  %v17354_v1 = vld [vmem:[#allocation115_spill] sm:$0xff] }
 0x2ac   : > { %17349 = vst [vmem:[#allocation56_spill] sm:$0xff] %v14120_v22  ;;  %10549 = vmatmul.mubr.msk.bf16.vlgmr.msra.gmra.mxu1 %vm4115_vm9, %v14120_v22  ;;  %v14137_v42 = vpack.c.bf16 %v14117_v23, %v14117_v23  ;;  %v4606_v35 = vrot.slane %v4604_v30, 5  ;;  %v14141_v25 = vpack.c.bf16 %v14133_v27, %v14117_v23  ;;  %v3968_v36 = vadd.f32 %v3901_v34, %v13911_v50  ;;  %v14169_v22 = vld [vmem:[#allocation3 + $0xe0] sm:$0xff] }
 0x2ad   : > { %v4612_v21 = vrot.slane %v4610_v28, 5  ;;  %10615 = vmatpush3.bf16.msra.mxu1 %v17354_v1  ;;  %v4594_v5 = vrot.slane %v4593_v33, 4  ;;  %v4009_v56 = vadd.f32 %v13871_v17, %v3970_v4  ;;  %v14146_v48 = vpack.c.bf16 %v4261_v40, %v4261_v40 }
 0x2ae   : > { %17352 = vst [vmem:[#allocation138_spill] sm:$0xff] %v14137_v42  ;;  %17353 = vst [vmem:[#allocation139_spill] sm:$0xff] %v14141_v25  ;;  %v14148_v44 = vpack.c.bf16 %v4263_v18, %v4263_v18  ;;  %v4607_v13 = vor.u32 %v4606_v35, %v4603_v62  ;;  %10591 = vmatmul.mubr.msk.bf16.gmra.mxu0 %vm4115_vm9, %v14141_v25  ;;  %v4007_v30 = vadd.f32 %v13871_v17, %v3968_v36  ;;  %v3904_v35 = vpop.f32.mrf.mxu0  ;;  %v14163_v36 = vld [vmem:[%s16574_s3 + $0x20] sm:$0xff]  }
 0x2af   : > { %v4615_v28 = vshrl.u32 %v14080_v12, 16  ;;  %v4618_v50 = vshll.u32 %v14080_v12, 16  ;;  %v4599_v34 = vsel %vm11597_vm8, %v4594_v5, %v4598_v6  ;;  %vm4041_vm5 = vcmp.ge.f32.partialorder %v4009_v56, 0.0  ;;  %17356 = vst [vmem:[#allocation140_spill] sm:$0xff] %v14163_v36  ;;  %10682 = vmatprep.subr.bf16.mxu1 %v14163_v36 }
 0x2b0   : > { %v4073_v33 = vmul.f32 0.05, %v4009_v56  ;;  %v4624_v40 = vshll.u32 %v14146_v48, 16  ;;  %v4608_v4 = vrot.slane %v4607_v13, 4  ;;  %v14158_v18 = vcombine.low %v4585_v16, %v4599_v34 }
 0x2b1   : > { %vm4039_vm7 = vcmp.ge.f32.partialorder %v4007_v30, 0.0  ;;  %v4071_v62 = vmul.f32 0.05, %v4007_v30  ;;  %v14167_v25 = vpack.c.bf16 %v14133_v27, %v14133_v27  ;;  %v4617_v6 = vrot.slane %v4615_v28, 4  ;;  %v10540_v27 = vpop.f32.mrf.mxu0 }
 0x2b2   : > { %17355 = vst [vmem:[#allocation73_spill] sm:$0xff] %v14158_v18  ;;  %v4105_v1 = vsel %vm4041_vm5, %v4009_v56, %v4073_v33  ;;  %v4620_v5 = vrot.slane %v4618_v50, 5  ;;  %v14173_v16 = vsel %vm11597_vm8, %v4608_v4, %v4612_v21  ;;  %v4629_v18 = vshrl.u32 %v14060_v57, 16  ;;  %v14178_v56 = vld [vmem:[#allocation3 + $0xf0] sm:$0xff]  ;;  %v4271_v4 = vld [vmem:[#allocation3 + $0xb8] sm:$0x3] }
 0x2b3   : > { %17357 = vst [vmem:[#allocation25_spill] sm:$0xff] %v14167_v25  ;;  %17358 = vst [vmem:[#allocation26_spill] sm:$0xff] %v14173_v16  ;;  %v4103_v13 = vsel %vm4039_vm7, %v4007_v30, %v4071_v62  ;;  %v4632_v9 = vshll.u32 %v14060_v57, 16  ;;  %v14182_v28 = vcombine.low %v4599_v34, %v14173_v16  ;;  %v4638_v21 = vshll.u32 %v14148_v44, 16 }
 0x2b4   : > { %4238 = vst.msk [vmem:[#allocation3 + $0x1b1] sm:$0xff] %vm4115_vm9, %v4105_v1  ;;  %4236 = vst.msk [vmem:[#allocation3 + $0x191] sm:$0xff] %vm4115_vm9, %v4103_v13  ;;  %v4621_v50 = vor.u32 %v4620_v5, %v4617_v6  ;;  %v3971_v33 = vadd.f32 %v10537_v60, %v13920_v38  ;;  %v4626_v30 = vrot.slane %v4624_v40, 5  ;;  %v4631_v62 = vrot.slane %v4629_v18, 4 }
 0x2b5   : > { %17359 = vst [vmem:[#allocation72_spill] sm:$0xff] %v14182_v28  ;;  %v4634_v1 = vrot.slane %v4632_v9, 5  ;;  %v14189_v57 = vpack.c.bf16 %v14169_v22, %v14169_v22  ;;  %10552 = vmatprep.mubr.msk.bf16.mxu1 %vm4115_vm9, %v14182_v28  ;;  %v4640_v16 = vrot.slane %v4638_v21, 5  ;;  %v14196_v5 = vpack.c.bf16 %v14178_v56, %v14169_v22  ;;  %v14209_v21 = vld [vmem:[#allocation3 + $0x100] sm:$0xff] }
 0x2b6   : > { %v4622_v34 = vrot.slane %v4621_v50, 4  ;;  %v4010_v6 = vadd.f32 %v13871_v17, %v3971_v33  ;;  %v3969_v60 = vadd.f32 %v3904_v35, %v13923_v37  ;;  %v14199_v9 = vpack.c.bf16 %v4271_v4, %v4271_v4 }
 0x2b7   : > { %17360 = vst [vmem:[#allocation54_spill] sm:$0xff] %v14189_v57  ;;  %17361 = vst [vmem:[#allocation79_spill] sm:$0xff] %v14196_v5  ;;  %v4635_v38 = vor.u32 %v4634_v1, %v4631_v62  ;;  %v4657_v40 = vshrl.u32 %v14124_v63, 16  ;;  %10594 = vmatprep.mubr.msk.bf16.mxu0 %vm4115_vm9, %v14196_v5  ;;  %v4660_v50 = vshll.u32 %v14124_v63, 16  ;;  %v3917_v62 = vpop.f32.mrf.mxu0  ;;  %v3974_v28 = vadd.f32 %v10540_v27, %v13929_v8  ;;  %v4273_v5 = vld [vmem:[#allocation3 + $0xc8] sm:$0x3] }
 0x2b8   : > { %17362 = vst [vmem:[#allocation80_spill] sm:$0xff] %v14199_v9  ;;  %v14204_v18 = vsel %vm11597_vm8, %v4622_v34, %v4626_v30  ;;  %vm4042_vm10 = vcmp.ge.f32.partialorder %v4010_v6, 0.0  ;;  %v4074_v13 = vmul.f32 0.05, %v4010_v6  ;;  %v4008_v37 = vadd.f32 %v13871_v17, %v3969_v60 }
 0x2b9   : > { %17363 = vst [vmem:[#allocation82_spill] sm:$0xff] %v14204_v18  ;;  %v4636_v33 = vrot.slane %v4635_v38, 4  ;;  %v4659_v35 = vrot.slane %v4657_v40, 4  ;;  %v4666_v4 = vshll.u32 %v14199_v9, 16  ;;  %v14215_v30 = vpack.c.bf16 %v14178_v56, %v14178_v56  ;;  %v10541_v63 = vpop.f32.mrf.mxu0 }
 0x2ba   : > { %v4106_v1 = vsel %vm4042_vm10, %v4010_v6, %v4074_v13  ;;  %v4662_v34 = vrot.slane %v4660_v50, 5  ;;  %vm4040_vm11 = vcmp.ge.f32.partialorder %v4008_v37, 0.0  ;;  %v4072_v38 = vmul.f32 0.05, %v4008_v37  ;;  %v4275_v6 = vld [vmem:[#allocation3 + $0xd8] sm:$0x3] }
 0x2bb   : > { %17364 = vst [vmem:[#allocation76_spill] sm:$0xff] %v14215_v30  ;;  %v14220_v36 = vsel %vm11597_vm8, %v4636_v33, %v4640_v16  ;;  %4239 = vst.msk [vmem:[#allocation3 + $0x1c1] sm:$0xff] %vm4115_vm9, %v4106_v1  ;;  %v14225_v60 = vpack.c.bf16 %v14209_v21, %v14209_v21  ;;  %v4668_v8 = vrot.slane %v4666_v4, 5  ;;  %v4013_v27 = vadd.f32 %v13871_v17, %v3974_v28  ;;  %v14232_v50 = vld [vmem:[#allocation3 + $0x110] sm:$0xff] }
 0x2bc   : > { %17365 = vst [vmem:[#allocation84_spill] sm:$0xff] %v14220_v36  ;;  %v14229_v40 = vcombine.low %v14204_v18, %v14220_v36  ;;  %v4663_v13 = vor.u32 %v4662_v34, %v4659_v35  ;;  %17367 = vst [vmem:[#allocation100_spill] sm:$0xff] %v14232_v50  ;;  %v4104_v16 = vsel %vm4040_vm11, %v4008_v37, %v4072_v38  ;;  %vm11100_vm11 = vmmov 0  }
 0x2bd   : > { %v14236_v33 = vpack.c.bf16 %v14232_v50, %v14209_v21  ;;  %v3972_v1 = vadd.f32 %v3917_v62, %v13933_v19  ;;  %v14239_v9 = vpack.c.bf16 %v4273_v5, %v4273_v5  ;;  %4237 = vst.msk [vmem:[#allocation3 + $0x1a1] sm:$0xff] %vm4115_vm9, %v4104_v16  ;;  %vm4045_vm12 = vcmp.ge.f32.partialorder %v4013_v27, 0.0  ;;  %v4277_v16 = vld [vmem:[#allocation3 + $0xe8] sm:$0x3] }
 0x2be   : > { %17366 = vst [vmem:[#allocation88_spill] sm:$0xff] %v14229_v40  ;;  %10553 = vmatmul.mubr.msk.bf16.gmra.mxu1 %vm4115_vm9, %v14229_v40  ;;  %v4664_v35 = vrot.slane %v4663_v13, 4  ;;  %v4077_v28 = vmul.f32 0.05, %v4013_v27  ;;  %v14244_v4 = vpack.c.bf16 %v4275_v6, %v4275_v6  ;;  %v4671_v19 = vshrl.u32 %v14137_v42, 16 }
 0x2bf   : > { %17368 = vst [vmem:[#allocation89_spill] sm:$0xff] %v14236_v33  ;;  %17369 = vst [vmem:[#allocation90_spill] sm:$0xff] %v14239_v9  ;;  %10595 = vmatmul.mubr.msk.bf16.gmra.mxu0 %vm4115_vm9, %v14236_v33  ;;  %v4011_v37 = vadd.f32 %v13871_v17, %v3972_v1  ;;  %v4674_v5 = vshll.u32 %v14137_v42, 16  ;;  %v4680_v62 = vshll.u32 %v14239_v9, 16  ;;  %v4685_v13 = vshrl.u32 %v14167_v25, 16 }
 0x2c0   : > { %17370 = vst [vmem:[#allocation130_spill] sm:$0xff] %v14244_v4  ;;  %v14254_v34 = vsel %vm11597_vm8, %v4664_v35, %v4668_v8  ;;  %v4109_v38 = vsel %vm4045_vm12, %v4013_v27, %v4077_v28  ;;  %v4688_v6 = vshll.u32 %v14167_v25, 16  ;;  %v17372_v1 = vsel %vm11597_vm8, %v13753_v46, %v13755_v53  ;;  %v14265_v8 = vld [vmem:[#allocation3 + $0x150] sm:$0xff]  ;;  %v3920_v27 = vpop.f32.mrf.mxu0  ;;  %v4279_v9 = vld [vmem:[#allocation3 + $0xf8] sm:$0x3]  ;;  %v14274_v46 = vld [vmem:[%s16574_s3 + $0x28] sm:$0xff]  }
 0x2c1   : > { %17371 = vst [vmem:[#allocation60_spill] sm:$0xff] %v14254_v34  ;;  %v9198_v33 = vcombine.low %v17372_v1, %v14254_v34  ;;  %4242 = vst.msk [vmem:[#allocation3 + $0x211] sm:$0xff] %vm4115_vm9, %v4109_v38  ;;  %vm4043_vm13 = vcmp.ge.f32.partialorder %v4011_v37, 0.0  ;;  %v4075_v40 = vmul.f32 0.05, %v4011_v37  ;;  %v4673_v36 = vrot.slane %v4671_v19, 4  ;;  %10716 = vmatprep.subr.bf16.mxu0 %v14274_v46 }
 0x2c2   : > { %v14269_v35 = vpack.c.bf16 %v14232_v50, %v14232_v50  ;;  %v4676_v28 = vrot.slane %v4674_v5, 5  ;;  %v4687_v18 = vrot.slane %v4685_v13, 4  ;;  %v4690_v25 = vrot.slane %v4688_v6, 5  ;;  %v17373_v13 = vld [vmem:[#allocation67_spill] sm:$0xff] }
 0x2c3   : > { %10556 = vmatprep.mubr.msk.bf16.mxu1 %vm4115_vm9, %v9198_v33  ;;  %v4107_v53 = vsel %vm4043_vm13, %v4011_v37, %v4075_v40  ;;  %v4682_v19 = vrot.slane %v4680_v62, 5  ;;  %v4694_v38 = vshll.u32 %v14244_v4, 16  ;;  %v3975_v1 = vadd.f32 %v10541_v63, %v13949_v24 }
 0x2c4   : > { %4240 = vst.msk [vmem:[#allocation3 + $0x1f1] sm:$0xff] %vm4115_vm9, %v4107_v53  ;;  %v4677_v34 = vor.u32 %v4676_v28, %v4673_v36  ;;  %v4691_v5 = vor.u32 %v4690_v25, %v4687_v18  ;;  %v9751_v6 = vpack.c.bf16 %v14265_v8, %v17373_v13  ;;  %v3973_v42 = vadd.f32 %v3920_v27, %v13954_v14  ;;  %v10544_v36 = vpop.f32.mrf.mxu0 }
 0x2c5   : > { %v4696_v50 = vrot.slane %v4694_v38, 5  ;;  %v4014_v33 = vadd.f32 %v13871_v17, %v3975_v1  ;;  %v14285_v40 = vpack.c.bf16 %v4277_v16, %v4277_v16  ;;  %v14287_v37 = vpack.c.bf16 %v4279_v9, %v4279_v9  ;;  %v14303_v1 = vld [vmem:[#allocation3 + $0x160] sm:$0xff] }
 0x2c6   : > { %v4678_v62 = vrot.slane %v4677_v34, 4  ;;  %v4692_v24 = vrot.slane %v4691_v5, 4  ;;  %10598 = vmatprep.mubr.msk.bf16.mxu0 %vm4115_vm9, %v9751_v6  ;;  %v4012_v63 = vadd.f32 %v13871_v17, %v3973_v42  ;;  %v4699_v25 = vshrl.u32 %v14189_v57, 16  ;;  %v3933_v6 = vpop.f32.mrf.mxu0 }
 0x2c7   : > { %17374 = vst [vmem:[#allocation91_spill] sm:$0xff] %v14285_v40  ;;  %17375 = vst [vmem:[#allocation107_spill] sm:$0xff] %v14287_v37  ;;  %vm4046_vm14 = vcmp.ge.f32.partialorder %v4014_v33, 0.0  ;;  %v4078_v14 = vmul.f32 0.05, %v4014_v33  ;;  %v4702_v18 = vshll.u32 %v14189_v57, 16  ;;  %v14308_v5 = vpack.c.bf16 %v14265_v8, %v14265_v8 }
 0x2c8   : > { %v4708_v27 = vshll.u32 %v14285_v40, 16  ;;  %v14296_v16 = vsel %vm11597_vm8, %v4678_v62, %v4682_v19  ;;  %v4697_v9 = vsel %vm11597_vm8, %v4692_v24, %v4696_v50  ;;  %vm4044_vm15 = vcmp.ge.f32.partialorder %v4012_v63, 0.0  ;;  %v4283_v62 = vld [vmem:[#allocation3 + $0x118] sm:$0x3] }
 0x2c9   : > { %17376 = vst [vmem:[#allocation94_spill] sm:$0xff] %v14296_v16  ;;  %v4076_v34 = vmul.f32 0.05, %v4012_v63  ;;  %v14301_v42 = vcombine.low %v14296_v16, %v4697_v9  ;;  %v4110_v28 = vsel %vm4046_vm14, %v4014_v33, %v4078_v14  ;;  %v4701_v53 = vrot.slane %v4699_v25, 4  ;;  %17378 = vst [vmem:[#allocation98_spill] sm:$0xff] %v14308_v5 }
 0x2ca   : > { %v4704_v38 = vrot.slane %v4702_v18, 5  ;;  %4243 = vst.msk [vmem:[#allocation3 + $0x221] sm:$0xff] %vm4115_vm9, %v4110_v28  ;;  %v4713_v13 = vshrl.u32 %v14215_v30, 16  ;;  %v4716_v50 = vshll.u32 %v14215_v30, 16  ;;  %v4710_v24 = vrot.slane %v4708_v27, 5  ;;  %v14317_v18 = vld [vmem:[#allocation3 + $0x170] sm:$0xff] }
 0x2cb   : > { %17377 = vst [vmem:[#allocation109_spill] sm:$0xff] %v14301_v42  ;;  %v4108_v19 = vsel %vm4044_vm15, %v4012_v63, %v4076_v34  ;;  %10557 = vmatmul.mubr.msk.bf16.gmra.mxu1 %vm4115_vm9, %v14301_v42  ;;  %v4722_v25 = vshll.u32 %v14287_v37, 16  ;;  %v3978_v14 = vadd.f32 %v10544_v36, %v13963_v3  ;;  %17379 = vst [vmem:[#allocation99_spill] sm:$0xff] %v14317_v18  ;;  %v4281_v63 = vld [vmem:[#allocation3 + $0x108] sm:$0x3]  ;;  %vm8436_vm14 = vcmask 1041408  }
 0x2cc   : > { %4241 = vst.msk [vmem:[#allocation3 + $0x201] sm:$0xff] %vm4115_vm9, %v4108_v19  ;;  %v4705_v33 = vor.u32 %v4704_v38, %v4701_v53  ;;  %v4715_v34 = vrot.slane %v4713_v13, 4  ;;  %v4718_v28 = vrot.slane %v4716_v50, 5  ;;  %v14321_v16 = vpack.c.bf16 %v14303_v1, %v14303_v1  ;;  %v4291_v57 = vld [vmem:[#allocation3 + $0x158] sm:$0x3] }
 0x2cd   : > { %v14325_v42 = vpack.c.bf16 %v14317_v18, %v14303_v1  ;;  %v4724_v53 = vrot.slane %v4722_v25, 5  ;;  %v4017_v27 = vadd.f32 %v13871_v17, %v3978_v14  ;;  %v3976_v38 = vadd.f32 %v3933_v6, %v13966_v10  ;;  %v10545_v14 = vpop.f32.mrf.mxu0 }
 0x2ce   : > { %17380 = vst [vmem:[#allocation68_spill] sm:$0xff] %v14321_v16  ;;  %v4706_v19 = vrot.slane %v4705_v33, 4  ;;  %v4719_v3 = vor.u32 %v4718_v28, %v4715_v34  ;;  %v14331_v36 = vpack.c.bf16 %v4281_v63, %v4281_v63  ;;  %v14333_v13 = vpack.c.bf16 %v4283_v62, %v4283_v62 }
 0x2cf   : > { %17381 = vst [vmem:[#allocation85_spill] sm:$0xff] %v14325_v42  ;;  %10599 = vmatmul.mubr.msk.bf16.gmra.mxu0 %vm4115_vm9, %v14325_v42  ;;  %v4727_v50 = vshrl.u32 %v14225_v60, 16  ;;  %vm4049_vm1 = vcmp.ge.f32.partialorder %v4017_v27, 0.0  ;;  %v4081_v33 = vmul.f32 0.05, %v4017_v27  ;;  %v4015_v25 = vadd.f32 %v13871_v17, %v3976_v38  ;;  %v14350_v38 = vld [vmem:[#allocation3 + $0x180] sm:$0xff] }
 0x2d0   : > { %v4711_v40 = vsel %vm11597_vm8, %v4706_v19, %v4710_v24  ;;  %v4720_v37 = vrot.slane %v4719_v3, 4  ;;  %v4730_v34 = vshll.u32 %v14225_v60, 16  ;;  %v4736_v28 = vshll.u32 %v14331_v36, 16  ;;  %17384 = vst [vmem:[#allocation87_spill] sm:$0xff] %v14350_v38  ;;  %v14352_v3 = vld [vmem:[#allocation3 + $0x190] sm:$0xff] }
 0x2d1   : > { %v14339_v10 = vcombine.low %v4697_v9, %v4711_v40  ;;  %v4729_v6 = vrot.slane %v4727_v50, 4  ;;  %v4113_v63 = vsel %vm4049_vm1, %v4017_v27, %v4081_v33  ;;  %vm4047_vm2 = vcmp.ge.f32.partialorder %v4015_v25, 0.0  ;;  %v3936_v33 = vpop.f32.mrf.mxu0 }
 0x2d2   : > { %v4079_v62 = vmul.f32 0.05, %v4015_v25  ;;  %v14345_v42 = vsel %vm11597_vm8, %v4720_v37, %v4724_v53  ;;  %4246 = vst.msk [vmem:[#allocation3 + $0x251] sm:$0xff] %vm4115_vm9, %v4113_v63  ;;  %v4732_v24 = vrot.slane %v4730_v34, 5  ;;  %v4741_v19 = vshrl.u32 %v14269_v35, 16 }
 0x2d3   : > { %17382 = vst [vmem:[#allocation112_spill] sm:$0xff] %v14339_v10  ;;  %17383 = vst [vmem:[#allocation118_spill] sm:$0xff] %v14345_v42  ;;  %v4744_v9 = vshll.u32 %v14269_v35, 16  ;;  %v14355_v27 = vcombine.low %v4711_v40, %v14345_v42  ;;  %v14359_v50 = vpack.c.bf16 %v14317_v18, %v14317_v18  ;;  %v4750_v53 = vshll.u32 %v14333_v13, 16 }
 0x2d4   : > { %v4111_v37 = vsel %vm4047_vm2, %v4015_v25, %v4079_v62  ;;  %v4733_v34 = vor.u32 %v4732_v24, %v4729_v6  ;;  %v4743_v63 = vrot.slane %v4741_v19, 4  ;;  %v3979_v30 = vadd.f32 %v10545_v14, %v13977_v41 }
 0x2d5   : > { %17385 = vst [vmem:[#allocation123_spill] sm:$0xff] %v14355_v27  ;;  %17386 = vst [vmem:[#allocation106_spill] sm:$0xff] %v14359_v50  ;;  %v4746_v10 = vrot.slane %v4744_v9, 5  ;;  %10560 = vmatprep.mubr.msk.bf16.mxu1 %vm4115_vm9, %v14355_v27  ;;  %v4738_v40 = vrot.slane %v4736_v28, 5  ;;  %v4752_v42 = vrot.slane %v4750_v53, 5  ;;  %v14368_v18 = vpack.c.bf16 %v14350_v38, %v14350_v38 }
 0x2d6   : > { %4244 = vst.msk [vmem:[#allocation3 + $0x231] sm:$0xff] %vm4115_vm9, %v4111_v37  ;;  %v14372_v25 = vpack.c.bf16 %v14352_v3, %v14350_v38  ;;  %v4734_v62 = vrot.slane %v4733_v34, 4  ;;  %v4018_v24 = vadd.f32 %v13871_v17, %v3979_v30  ;;  %v3977_v41 = vadd.f32 %v3936_v33, %v13979_v39  ;;  %v14386_v37 = vld [vmem:[#allocation3 + $0x1a0] sm:$0xff]  ;;  %v4295_v53 = vld [vmem:[#allocation3 + $0x178] sm:$0x3] }
 0x2d7   : > { %v4747_v6 = vor.u32 %v4746_v10, %v4743_v63  ;;  %v14378_v14 = vpack.c.bf16 %v14352_v3, %v14352_v3  ;;  %v14382_v28 = vpack.c.bf16 %v4291_v57, %v4291_v57  ;;  %v4769_v19 = vshrl.u32 %v14308_v5, 16  ;;  %v4293_v27 = vld [vmem:[#allocation3 + $0x168] sm:$0x3] }
 0x2d8   : > { %17387 = vst [vmem:[#allocation27_spill] sm:$0xff] %v14372_v25  ;;  %10602 = vmatprep.mubr.msk.bf16.mxu0 %vm4115_vm9, %v14372_v25  ;;  %v4772_v9 = vshll.u32 %v14308_v5, 16  ;;  %v14390_v30 = vsel %vm11597_vm8, %v4734_v62, %v4738_v40  ;;  %vm4050_vm3 = vcmp.ge.f32.partialorder %v4018_v24, 0.0  ;;  %v4082_v10 = vmul.f32 0.05, %v4018_v24  ;;  %v14394_v25 = vld [vmem:[#allocation3 + $0x1b0] sm:$0xff] }
 0x2d9   : > { %17388 = vst [vmem:[#allocation108_spill] sm:$0xff] %v14382_v28  ;;  %17389 = vst [vmem:[#allocation131_spill] sm:$0xff] %v14390_v30  ;;  %v4748_v39 = vrot.slane %v4747_v6, 4  ;;  %v4016_v33 = vadd.f32 %v13871_v17, %v3977_v41  ;;  %v4771_v34 = vrot.slane %v4769_v19, 4  ;;  %v4778_v57 = vshll.u32 %v14382_v28, 16  ;;  %v11026_v28 = vld [vmem:[#allocation3 + $0x1e0] sm:$0xff] }
 0x2da   : > { %v4774_v63 = vrot.slane %v4772_v9, 5  ;;  %17390 = vst [vmem:[#allocation116_spill] sm:$0xff] %v14394_v25  ;;  %v4114_v5 = vsel %vm4050_vm3, %v4018_v24, %v4082_v10  ;;  %v14402_v40 = vpack.c.bf16 %v14386_v37, %v14386_v37  ;;  %v14406_v62 = vpack.c.bf16 %v14394_v25, %v14386_v37 }
 0x2db   : > { %v14398_v38 = vsel %vm11597_vm8, %v4748_v39, %v4752_v42  ;;  %4247 = vst.msk [vmem:[#allocation3 + $0x261] sm:$0xff] %vm4115_vm9, %v4114_v5  ;;  %vm4048_vm4 = vcmp.ge.f32.partialorder %v4016_v33, 0.0  ;;  %v4080_v6 = vmul.f32 0.05, %v4016_v33  ;;  %v4780_v42 = vrot.slane %v4778_v57, 5 }
 0x2dc   : > { %17391 = vst [vmem:[#allocation93_spill] sm:$0xff] %v14398_v38  ;;  %17392 = vst [vmem:[#allocation117_spill] sm:$0xff] %v14402_v40  ;;  %v14410_v17 = vcombine.low %v14390_v30, %v14398_v38  ;;  %v4775_v41 = vor.u32 %v4774_v63, %v4771_v34  ;;  %10603 = vmatmul.mubr.msk.bf16.gmra.mxu0 %vm4115_vm9, %v14406_v62  ;;  %v14415_v24 = vpack.c.bf16 %v4293_v27, %v4293_v27  ;;  %v4297_v39 = vld [vmem:[#allocation3 + $0x188] sm:$0x3]  ;;  %v4299_v63 = vld [vmem:[#allocation3 + $0x198] sm:$0x3] }
 0x2dd   : > { %17393 = vst [vmem:[#allocation110_spill] sm:$0xff] %v14406_v62  ;;  %v14417_v19 = vpack.c.bf16 %v4295_v53, %v4295_v53  ;;  %v4783_v9 = vshrl.u32 %v14321_v16, 16  ;;  %v4112_v10 = vsel %vm4048_vm4, %v4016_v33, %v4080_v6  ;;  %v4786_v5 = vshll.u32 %v14321_v16, 16  ;;  %v14428_v30 = vld [vmem:[#allocation3 + $0x1f0] sm:$0xff] }
 0x2de   : > { %17394 = vst [vmem:[#allocation74_spill] sm:$0xff] %v14410_v17  ;;  %17395 = vst [vmem:[#allocation119_spill] sm:$0xff] %v14415_v24  ;;  %10561 = vmatmul.mubr.msk.bf16.gmra.mxu1 %vm4115_vm9, %v14410_v17  ;;  %v4776_v38 = vrot.slane %v4775_v41, 4  ;;  %v4797_v34 = vshrl.u32 %v14359_v50, 16  ;;  %v4792_v27 = vshll.u32 %v14415_v24, 16  ;;  %v4800_v53 = vshll.u32 %v14359_v50, 16 }
 0x2df   : > { %17396 = vst [vmem:[#allocation102_spill] sm:$0xff] %v14417_v19  ;;  %4245 = vst.msk [vmem:[#allocation3 + $0x241] sm:$0xff] %vm4115_vm9, %v4112_v10  ;;  %v4785_v57 = vrot.slane %v4783_v9, 4  ;;  %v4806_v62 = vshll.u32 %v14417_v19, 16  ;;  %v14436_v6 = vpack.c.bf16 %v14394_v25, %v14394_v25  ;;  %v4788_v41 = vrot.slane %v4786_v5, 5 }
 0x2e0   : > { %17397 = vst [vmem:[#allocation114_spill] sm:$0xff] %v14428_v30  ;;  %v14432_v33 = vsel %vm11597_vm8, %v4776_v38, %v4780_v42  ;;  %v4799_v17 = vrot.slane %v4797_v34, 4  ;;  %v17400_v9 = vsel %vm11597_vm8, %v13853_v61, %v13855_v49  ;;  %v4794_v19 = vrot.slane %v4792_v27, 5 }
 0x2e1   : > { %17398 = vst [vmem:[#allocation125_spill] sm:$0xff] %v14432_v33  ;;  %17399 = vst [vmem:[#allocation122_spill] sm:$0xff] %v14436_v6  ;;  %v9202_v10 = vcombine.low %v17400_v9, %v14432_v33  ;;  %v4802_v50 = vrot.slane %v4800_v53, 5  ;;  %v4808_v24 = vrot.slane %v4806_v62, 5  ;;  %v4789_v16 = vor.u32 %v4788_v41, %v4785_v57  ;;  %v4301_v53 = vld [vmem:[#allocation3 + $0x1a8] sm:$0x3] }
 0x2e2   : > { %v9755_v38 = vpack.c.bf16 %v14428_v30, %v11026_v28  ;;  %v14445_v42 = vpack.c.bf16 %v4297_v39, %v4297_v39  ;;  %v14447_v25 = vpack.c.bf16 %v4299_v63, %v4299_v63  ;;  %v4811_v34 = vshrl.u32 %v14368_v18, 16  ;;  %v14457_v63 = vld [vmem:[#allocation3 + $0x200] sm:$0xff] }
 0x2e3   : > { %10564 = vmatprep.mubr.msk.bf16.mxu1 %vm4115_vm9, %v9202_v10  ;;  %v4803_v5 = vor.u32 %v4802_v50, %v4799_v17  ;;  %v4814_v4 = vshll.u32 %v14368_v18, 16  ;;  %v4825_v61 = vshrl.u32 %v14378_v14, 16  ;;  %v4790_v49 = vrot.slane %v4789_v16, 4  ;;  %17402 = vst [vmem:[#allocation127_spill] sm:$0xff] %v14457_v63 }
 0x2e4   : > { %17401 = vst [vmem:[#allocation121_spill] sm:$0xff] %v14447_v25  ;;  %10606 = vmatprep.mubr.msk.bf16.mxu0 %vm4115_vm9, %v9755_v38  ;;  %v4820_v62 = vshll.u32 %v14445_v42, 16  ;;  %v4828_v28 = vshll.u32 %v14378_v14, 16  ;;  %v4834_v39 = vshll.u32 %v14447_v25, 16  ;;  %v4813_v27 = vrot.slane %v4811_v34, 4  ;;  %v14469_v34 = vld [vmem:[#allocation3 + $0x210] sm:$0xff] }
 0x2e5   : > { %v4804_v57 = vrot.slane %v4803_v5, 4  ;;  %v4816_v50 = vrot.slane %v4814_v4, 5  ;;  %v4827_v17 = vrot.slane %v4825_v61, 4  ;;  %v14461_v41 = vsel %vm11597_vm8, %v4790_v49, %v4794_v19  ;;  %v4303_v38 = vld [vmem:[#allocation3 + $0x1b8] sm:$0x3]  ;;  %17405 = vst [vmem:[#allocation29_spill] sm:$0xff] %v14469_v34 }
 0x2e6   : > { %17403 = vst [vmem:[#allocation65_spill] sm:$0xff] %v14461_v41  ;;  %v14465_v16 = vpack.c.bf16 %v14428_v30, %v14428_v30  ;;  %v4822_v9 = vrot.slane %v4820_v62, 5  ;;  %v4830_v10 = vrot.slane %v4828_v28, 5  ;;  %v4836_v5 = vrot.slane %v4834_v39, 5  ;;  %v14498_v30 = vld [vmem:[#allocation3 + $0x220] sm:$0xff] }
 0x2e7   : > { %v4809_v33 = vsel %vm11597_vm8, %v4804_v57, %v4808_v24  ;;  %v4817_v25 = vor.u32 %v4816_v50, %v4813_v27  ;;  %v14473_v4 = vpack.c.bf16 %v14457_v63, %v14457_v63  ;;  %v14480_v49 = vpack.c.bf16 %v14469_v34, %v14457_v63  ;;  %17411 = vst [vmem:[#allocation133_spill] sm:$0xff] %v14498_v30 }
 0x2e8   : > { %17404 = vst [vmem:[#allocation126_spill] sm:$0xff] %v14465_v16  ;;  %v14476_v19 = vcombine.low %v14461_v41, %v4809_v33  ;;  %v4831_v61 = vor.u32 %v4830_v10, %v4827_v17  ;;  %v14482_v62 = vpack.c.bf16 %v4301_v53, %v4301_v53  ;;  %v14484_v24 = vpack.c.bf16 %v4303_v38, %v4303_v38 }
 0x2e9   : > { %17406 = vst [vmem:[#allocation124_spill] sm:$0xff] %v14473_v4  ;;  %17408 = vst [vmem:[#allocation48_spill] sm:$0xff] %v14480_v49  ;;  %v4818_v28 = vrot.slane %v4817_v25, 4  ;;  %v4839_v39 = vshrl.u32 %v14402_v40, 16  ;;  %v4842_v57 = vshll.u32 %v14402_v40, 16  ;;  %10607 = vmatmul.mubr.msk.bf16.gmra.mxu0 %vm4115_vm9, %v14480_v49  ;;  %v4853_v17 = vshrl.u32 %v14436_v6, 16 }
 0x2ea   : > { %17407 = vst [vmem:[#allocation50_spill] sm:$0xff] %v14476_v19  ;;  %17409 = vst [vmem:[#allocation70_spill] sm:$0xff] %v14482_v62  ;;  %10565 = vmatmul.mubr.msk.bf16.gmra.mxu1 %vm4115_vm9, %v14476_v19  ;;  %v4832_v27 = vrot.slane %v4831_v61, 4  ;;  %v4848_v50 = vshll.u32 %v14482_v62, 16  ;;  %v4856_v53 = vshll.u32 %v14436_v6, 16  ;;  %v4862_v63 = vshll.u32 %v14484_v24, 16 }
 0x2eb   : > { %17410 = vst [vmem:[#allocation95_spill] sm:$0xff] %v14484_v24  ;;  %v4311_v25 = vld [vmem:[#allocation3 + $0x1f8] sm:$0x3]  ;;  %v4823_v10 = vsel %vm11597_vm8, %v4818_v28, %v4822_v9  ;;  %v4841_v38 = vrot.slane %v4839_v39, 4  ;;  %v4844_v41 = vrot.slane %v4842_v57, 5  ;;  %v14500_v61 = vld [vmem:[#allocation3 + $0x230] sm:$0xff]  ;;  %v14510_v6 = vpack.c.bf16 %v14469_v34, %v14469_v34 }
 0x2ec   : > { %17412 = vst [vmem:[#allocation32_spill] sm:$0xff] %v14500_v61  ;;  %v14504_v49 = vsel %vm11597_vm8, %v4832_v27, %v4836_v5  ;;  %v14506_v19 = vcombine.low %v4809_v33, %v4823_v10  ;;  %v4855_v62 = vrot.slane %v4853_v17, 4  ;;  %v4850_v39 = vrot.slane %v4848_v50, 5  ;;  %v14515_v24 = vld [vmem:[#allocation3 + $0x240] sm:$0xff]  ;;  %v4315_v17 = vld [vmem:[#allocation3 + $0x218] sm:$0x3] }
 0x2ed   : > { %17413 = vst [vmem:[#allocation101_spill] sm:$0xff] %v14504_v49  ;;  %17415 = vst [vmem:[#allocation33_spill] sm:$0xff] %v14510_v6  ;;  %v14513_v9 = vcombine.low %v4823_v10, %v14504_v49  ;;  %v4845_v28 = vor.u32 %v4844_v41, %v4841_v38  ;;  %v4858_v57 = vrot.slane %v4856_v53, 5  ;;  %v4864_v40 = vrot.slane %v4862_v63, 5  ;;  %v14531_v10 = vld [vmem:[#allocation3 + $0x250] sm:$0xff] }
 0x2ee   : > { %17414 = vst [vmem:[#allocation111_spill] sm:$0xff] %v14506_v19  ;;  %17417 = vst [vmem:[#allocation66_spill] sm:$0xff] %v14515_v24  ;;  %v14519_v5 = vpack.c.bf16 %v14498_v30, %v14498_v30  ;;  %v14523_v33 = vpack.c.bf16 %v14500_v61, %v14498_v30  ;;  %v14525_v27 = vpack.c.bf16 %v4311_v25, %v4311_v25  ;;  %v4881_v53 = vshrl.u32 %v14465_v16, 16  ;;  %v4313_v38 = vld [vmem:[#allocation3 + $0x208] sm:$0x3]  ;;  %v11027_v30 = vld [vmem:[#allocation3 + $0x10] sm:$0xff] }
 0x2ef   : > { %17416 = vst [vmem:[#allocation52_spill] sm:$0xff] %v14513_v9  ;;  %10568 = vmatprep.mubr.msk.bf16.mxu1 %vm4115_vm9, %v14513_v9  ;;  %v4846_v41 = vrot.slane %v4845_v28, 4  ;;  %v4859_v50 = vor.u32 %v4858_v57, %v4855_v62  ;;  %v4884_v63 = vshll.u32 %v14465_v16, 16  ;;  %17420 = vst [vmem:[#allocation37_spill] sm:$0xff] %v14531_v10  ;;  %v14535_v19 = vpack.c.bf16 %v14500_v61, %v14500_v61 }
 0x2f0   : > { %17418 = vst [vmem:[#allocation34_spill] sm:$0xff] %v14523_v33  ;;  %17419 = vst [vmem:[#allocation28_spill] sm:$0xff] %v14525_v27  ;;  %10610 = vmatprep.mubr.msk.bf16.mxu0 %vm4115_vm9, %v14523_v33  ;;  %v4890_v25 = vshll.u32 %v14525_v27, 16  ;;  %v14542_v28 = vpack.c.bf16 %v14515_v24, %v14515_v24  ;;  %v14546_v62 = vpack.c.bf16 %v14531_v10, %v14515_v24  ;;  %v4883_v49 = vrot.slane %v4881_v53, 4 }
 0x2f1   : > { %v14550_v57 = vsel %vm11597_vm8, %v4846_v41, %v4850_v39  ;;  %v4860_v9 = vrot.slane %v4859_v50, 4  ;;  %v4886_v61 = vrot.slane %v4884_v63, 5  ;;  %v14554_v33 = vpack.c.bf16 %v14531_v10, %v14531_v10  ;;  %v4317_v63 = vld [vmem:[#allocation3 + $0x228] sm:$0x3] }
 0x2f2   : > { %17421 = vst [vmem:[#allocation51_spill] sm:$0xff] %v14546_v62  ;;  %17422 = vst [vmem:[#allocation62_spill] sm:$0xff] %v14550_v57  ;;  %10611 = vmatmul.mubr.msk.bf16.gmra.mxu0 %vm4115_vm9, %v14546_v62  ;;  %v9759_v34 = vpack.c.bf16 %v14008_v51, %v11027_v30  ;;  %v14559_v27 = vpack.c.bf16 %v4313_v38, %v4313_v38  ;;  %v14561_v24 = vpack.c.bf16 %v4315_v17, %v4315_v17  ;;  %vm8432_vm15 = vcmask 15360  }
 0x2f3   : > { %v14565_v39 = vsel %vm11597_vm8, %v4860_v9, %v4864_v40  ;;  %v4887_v41 = vor.u32 %v4886_v61, %v4883_v49  ;;  %v4895_v50 = vshrl.u32 %v14473_v4, 16  ;;  %v4898_v53 = vshll.u32 %v14473_v4, 16  ;;  %v4319_v40 = vld [vmem:[#allocation3 + $0x238] sm:$0x3] }
 0x2f4   : > { %17423 = vst [vmem:[#allocation55_spill] sm:$0xff] %v14559_v27  ;;  %17424 = vst [vmem:[#allocation69_spill] sm:$0xff] %v14565_v39  ;;  %v14571_v62 = vcombine.low %v14550_v57, %v14565_v39  ;;  %10650 = vmatprep.mubr.msk.bf16.mxu0 %vm4115_vm9, %v9759_v34  ;;  %v4904_v51 = vshll.u32 %v14559_v27, 16  ;;  %v4909_v30 = vshrl.u32 %v14510_v6, 16  ;;  %v4912_v17 = vshll.u32 %v14510_v6, 16 }
 0x2f5   : > { %v4888_v9 = vrot.slane %v4887_v41, 4  ;;  %v4892_v49 = vrot.slane %v4890_v25, 5  ;;  %v4897_v61 = vrot.slane %v4895_v50, 4  ;;  %v4900_v38 = vrot.slane %v4898_v53, 5 }
 0x2f6   : > { %17425 = vst [vmem:[#allocation75_spill] sm:$0xff] %v14571_v62  ;;  %10569 = vmatmul.mubr.msk.bf16.gmra.mxu1 %vm4115_vm9, %v14571_v62  ;;  %v4911_v10 = vrot.slane %v4909_v30, 4  ;;  %v4914_v4 = vrot.slane %v4912_v17, 5  ;;  %v4918_v39 = vshll.u32 %v14561_v24, 16  ;;  %v14580_v57 = vpack.c.bf16 %v4317_v63, %v4317_v63 }
 0x2f7   : > { %v14584_v34 = vsel %vm11597_vm8, %v4888_v9, %v4892_v49  ;;  %v4901_v27 = vor.u32 %v4900_v38, %v4897_v61  ;;  %v4906_v6 = vrot.slane %v4904_v51, 5  ;;  %v14586_v16 = vpack.c.bf16 %v4319_v40, %v4319_v40  ;;  %v4323_v40 = vld [vmem:[#allocation3 + $0x258] sm:$0x3] }
 0x2f8   : > { %v17426_v25 = vsel %vm11597_vm8, %v13942_v55, %v13944_v0  ;;  %v4915_v50 = vor.u32 %v4914_v4, %v4911_v10  ;;  %v4923_v53 = vshrl.u32 %v14519_v5, 16  ;;  %v4926_v63 = vshll.u32 %v14519_v5, 16  ;;  %v4321_v4 = vld [vmem:[#allocation3 + $0x248] sm:$0x3] }
 0x2f9   : > { %v9206_v41 = vcombine.low %v17426_v25, %v14584_v34  ;;  %v4902_v30 = vrot.slane %v4901_v27, 4  ;;  %v4932_v17 = vshll.u32 %v14580_v57, 16  ;;  %v4937_v9 = vshrl.u32 %v14535_v19, 16 }
 0x2fa   : > { %v4940_v51 = vshll.u32 %v14535_v19, 16  ;;  %v4916_v49 = vrot.slane %v4915_v50, 4  ;;  %v4920_v61 = vrot.slane %v4918_v39, 5  ;;  %v4925_v38 = vrot.slane %v4923_v53, 4  ;;  %v11028_v53 = vld [vmem:[#allocation3 + $0x50] sm:$0xff] }
 0x2fb   : > { %10572 = vmatprep.mubr.msk.bf16.mxu1 %vm4115_vm9, %v9206_v41  ;;  %v4928_v55 = vrot.slane %v4926_v63, 5  ;;  %v17427_v0 = vpack.c.bf16 %v13997_v26, %v13974_v54  ;;  %v14606_v27 = vsel %vm11597_vm8, %v4902_v30, %v4906_v6  ;;  %v4939_v10 = vrot.slane %v4937_v9, 4 }
 0x2fc   : > { %v4942_v25 = vrot.slane %v4940_v51, 5  ;;  %v4946_v62 = vshll.u32 %v14586_v16, 16  ;;  %v4921_v39 = vsel %vm11597_vm8, %v4916_v49, %v4920_v61  ;;  %v4934_v50 = vrot.slane %v4932_v17, 5 }
 0x2fd   : > { %10651 = vmatmul.mubr.msk.bf16.vlgmr.msra.gmra.mxu0 %vm4115_vm9, %v17427_v0  ;;  %v4929_v41 = vor.u32 %v4928_v55, %v4925_v38  ;;  %v9761_v54 = vpack.c.bf16 %v14047_v20, %v11028_v53  ;;  %v14614_v26 = vcombine.low %v14606_v27, %v4921_v39  ;;  %v14616_v6 = vpack.c.bf16 %v4321_v4, %v4321_v4 }
 0x2fe   : > { %10717 = vmatpush3.bf16.msra.mxu0 %v14274_v46  ;;  %v4943_v63 = vor.u32 %v4942_v25, %v4939_v10  ;;  %v14618_v30 = vpack.c.bf16 %v4323_v40, %v4323_v40  ;;  %v4951_v46 = vshrl.u32 %v14542_v28, 16  ;;  %v4954_v51 = vshll.u32 %v14542_v28, 16  ;;  %v14630_v10 = vld [vmem:[#allocation3 + $0x80] sm:$0xff] }
 0x2ff   : > { %17428 = vst [vmem:[#allocation77_spill] sm:$0xff] %v14614_v26  ;;  %v4930_v9 = vrot.slane %v4929_v41, 4  ;;  %10654 = vmatprep.mubr.msk.bf16.mxu0 %vm4115_vm9, %v9761_v54  ;;  %v4965_v17 = vshrl.u32 %v14554_v33, 16  ;;  %10573 = vmatmul.mubr.msk.bf16.gmra.mxu1 %vm4115_vm9, %v14614_v26  ;;  %v4948_v49 = vrot.slane %v4946_v62, 5  ;;  %v4960_v61 = vshll.u32 %v14616_v6, 16  ;;  %v17431_v26 = vld [vmem:[#allocation53_spill] sm:$0xff] }
 0x300   : > { %v4944_v20 = vrot.slane %v4943_v63, 4  ;;  %v4968_v38 = vshll.u32 %v14554_v33, 16  ;;  %v4953_v55 = vrot.slane %v4951_v46, 4  ;;  %v4956_v0 = vrot.slane %v4954_v51, 5 }
 0x301   : > { %v4935_v40 = vsel %vm11597_vm8, %v4930_v9, %v4934_v50  ;;  %v4967_v4 = vrot.slane %v4965_v17, 4  ;;  %v4974_v62 = vshll.u32 %v14618_v30, 16  ;;  %v5476_v50 = vrot.slane %v17431_v26, 5  ;;  %v11029_v17 = vld [vmem:[#allocation3 + $0x70] sm:$0xff] }
 0x302   : > { %v14634_v25 = vsel %vm11597_vm8, %v4944_v20, %v4948_v49  ;;  %v14636_v41 = vcombine.low %v4921_v39, %v4935_v40  ;;  %v4970_v53 = vrot.slane %v4968_v38, 5  ;;  %v4957_v63 = vor.u32 %v4956_v0, %v4953_v55  ;;  %v14649_v39 = vld [vmem:[%s16574_s3 + $0x38] sm:$0xff]  }
 0x303   : > { %v14640_v54 = vcombine.low %v4935_v40, %v14634_v25  ;;  %v9261_v9 = vrot.slane %v13990_v43, 9  ;;  %v5480_v51 = vrot.slane %v13999_v58, 5  ;;  %v9762_v20 = vpack.c.bf16 %v14630_v10, %v11029_v17  ;;  %10784 = vmatprep.subr.bf16.mxu0 %v14649_v39  ;;  %v17436_v17 = vld [vmem:[#allocation137_spill] sm:$0xff] }
 0x304   : > { %17429 = vst [vmem:[#allocation86_spill] sm:$0xff] %v14636_v41  ;;  %v4971_v46 = vor.u32 %v4970_v53, %v4967_v4  ;;  %v4958_v49 = vrot.slane %v4957_v63, 4  ;;  %v4962_v38 = vrot.slane %v4960_v61, 5  ;;  %v9763_v26 = vpack.c.bf16 %v14117_v23, %v14091_v32 }
 0x305   : > { %17430 = vst [vmem:[#allocation96_spill] sm:$0xff] %v14640_v54  ;;  %10576 = vmatprep.mubr.msk.bf16.mxu1 %vm4115_vm9, %v14640_v54  ;;  %v4976_v40 = vrot.slane %v4974_v62, 5  ;;  %10655 = vmatmul.mubr.msk.bf16.gmra.mxu0 %vm4115_vm9, %v9762_v20  ;;  %v9262_v58 = vrot.slane %v14030_v11, 9  ;;  %v5484_v55 = vrot.slane %v14049_v29, 5  ;;  %v17432_v4 = vrot.slane %v17337_v7, 9 }
 0x306   : > { %v4972_v43 = vrot.slane %v4971_v46, 4  ;;  %v14661_v0 = vsel %vm11597_vm8, %v4958_v49, %v4962_v38  ;;  %v14669_v32 = vsel %vm11500_vm6, %v9261_v9, %v5480_v51  ;;  %10658 = vmatprep.mubr.msk.bf16.mxu0 %vm4115_vm9, %v9763_v26  ;;  %v9263_v23 = vrot.slane %v13985_v47, 9  ;;  %v17438_v26 = vld [vmem:[#allocation78_spill] sm:$0xff] }
 0x307   : > { %v5477_v53 = vsel %vm11500_vm6, %v17432_v4, %v5476_v50  ;;  %v5488_v7 = vrot.slane %v13993_v45, 5  ;;  %v14685_v63 = vsel %vm11500_vm6, %v9262_v58, %v5484_v55  ;;  %v9265_v50 = vrot.slane %v14039_v59, 9  ;;  %v17441_v58 = vld [vmem:[#allocation80_spill] sm:$0xff] }
 0x308   : > { %v14674_v11 = vsel %vm11597_vm8, %v4972_v43, %v4976_v40  ;;  %v9292_v62 = vcombine.low %v5477_v53, %v14669_v32  ;;  %v5496_v9 = vrot.slane %v14107_v31, 5  ;;  %v9264_v46 = vrot.slane %v14012_v52, 9  ;;  %v17437_v31 = vld [vmem:[#allocation120_spill] sm:$0xff]  ;;  %v17439_v43 = vld [vmem:[#allocation83_spill] sm:$0xff] }
 0x309   : > { %17434 = vst [vmem:[#allocation113_spill] sm:$0xff] %v14674_v11  ;;  %v14678_v29 = vcombine.low %v14661_v0, %v14674_v11  ;;  %v5492_v51 = vrot.slane %v14105_v15, 5  ;;  %v9266_v47 = vrot.slane %v14080_v12, 9  ;;  %v5500_v45 = vrot.slane %v14146_v48, 5  ;;  %v17440_v40 = vld [vmem:[#allocation135_spill] sm:$0xff] }
 0x30a   : > { %v9764_v20 = vpack.c.bf16 %v14169_v22, %v17436_v17  ;;  %v9765_v59 = vpack.c.bf16 %v14209_v21, %v14178_v56  ;;  %v9267_v49 = vrot.slane %v17437_v31, 9  ;;  %v5504_v38 = vrot.slane %v14148_v44, 5  ;;  %v14720_v56 = vld [vmem:[#allocation3 + $0x120] sm:$0xff]  ;;  %v17447_v31 = vld [vmem:[#allocation90_spill] sm:$0xff] }
 0x30b   : > { %17435 = vst [vmem:[#allocation30_spill] sm:$0xff] %v14678_v29  ;;  %10577 = vmatmul.mubr.msk.bf16.gmra.mxu1 %vm4115_vm9, %v14678_v29  ;;  %v9268_v52 = vrot.slane %v17438_v26, 9  ;;  %v5508_v15 = vrot.slane %v17439_v43, 5  ;;  %v9269_v12 = vrot.slane %v17440_v40, 9  ;;  %v5512_v48 = vrot.slane %v17441_v58, 5  ;;  %v17449_v43 = vld [vmem:[#allocation140_spill] sm:$0xff] }
 0x30c   : > { %10616 = vmatprep.mubr.msk.bf16.mxu1 %vm4115_vm9, %v9292_v62  ;;  %v14708_v55 = vsel %vm11500_vm6, %v9265_v50, %v5496_v9  ;;  %v14713_v22 = vsel %vm11500_vm6, %v9263_v23, %v5488_v7  ;;  %v14718_v44 = vsel %vm11500_vm6, %v9266_v47, %v5500_v45  ;;  %v14728_v4 = vsel %vm11500_vm6, %v9264_v46, %v5492_v51  ;;  %v14747_v50 = vld [vmem:[%s16574_s3 + $0x30] sm:$0xff]   ;;  %v17445_v46 = vld [vmem:[#allocation100_spill] sm:$0xff] }
 0x30d   : > { %10659 = vmatmul.mubr.msk.bf16.gmra.mxu0 %vm4115_vm9, %v9764_v20  ;;  %v14724_v21 = vcombine.low %v14685_v63, %v14713_v22  ;;  %v14732_v53 = vcombine.low %v14728_v4, %v14708_v55  ;;  %v14736_v23 = vsel %vm11500_vm6, %v9267_v49, %v5504_v38  ;;  %v5509_v7 = vsel %vm11500_vm6, %v9268_v52, %v5508_v15  ;;  %v17446_v20 = vld [vmem:[#allocation138_spill] sm:$0xff] }
 0x30e   : > { %10662 = vmatprep.mubr.msk.bf16.mxu0 %vm4115_vm9, %v9765_v59  ;;  %v14742_v62 = vsel %vm11500_vm6, %v9269_v12, %v5512_v48  ;;  %v14751_v9 = vcombine.low %v14718_v44, %v14736_v23  ;;  %v9766_v51 = vpack.c.bf16 %v14720_v56, %v17445_v46  ;;  %v9769_v47 = vpack.c.bf16 %v14386_v37, %v14352_v3  ;;  %v17448_v3 = vld [vmem:[#allocation25_spill] sm:$0xff]  ;;  %v17452_v12 = vld [vmem:[#allocation108_spill] sm:$0xff]  ;;  %v17453_v48 = vld [vmem:[#allocation54_spill] sm:$0xff] }
 0x30f   : > { %17442 = vst [vmem:[#allocation46_spill] sm:$0xff] %v14724_v21  ;;  %17443 = vst [vmem:[#allocation105_spill] sm:$0xff] %v14732_v53  ;;  %v9274_v45 = vrot.slane %v14225_v60, 9  ;;  %v9767_v17 = vpack.c.bf16 %v14303_v1, %v14265_v8  ;;  %v9270_v59 = vrot.slane %v17446_v20, 9  ;;  %v5516_v49 = vrot.slane %v17447_v31, 5  ;;  %v17450_v8 = vld [vmem:[#allocation130_spill] sm:$0xff] }
 0x310   : > { %17444 = vst [vmem:[#allocation49_spill] sm:$0xff] %v14751_v9  ;;  %v5532_v38 = vrot.slane %v14331_v36, 5  ;;  %v9296_v26 = vcombine.low %v5509_v7, %v14742_v62  ;;  %v9271_v37 = vrot.slane %v17448_v3, 9  ;;  %v9275_v60 = vrot.slane %v14269_v35, 9  ;;  %v17451_v36 = vld [vmem:[#allocation98_spill] sm:$0xff]  ;;  %v17454_v7 = vld [vmem:[#allocation76_spill] sm:$0xff] }
 0x311   : > { %v5536_v52 = vrot.slane %v14333_v13, 5  ;;  %v5520_v1 = vrot.slane %v17450_v8, 5  ;;  %v9277_v40 = vrot.slane %v17451_v36, 9  ;;  %v5544_v58 = vrot.slane %v17452_v12, 5  ;;  %v17455_v46 = vld [vmem:[#allocation107_spill] sm:$0xff]  ;;  %v17460_v12 = vld [vmem:[#allocation106_spill] sm:$0xff] }
 0x312   : > { %v14775_v15 = vsel %vm11500_vm6, %v9274_v45, %v5532_v38  ;;  %v9272_v35 = vrot.slane %v17453_v48, 9  ;;  %v9273_v13 = vrot.slane %v17454_v7, 9  ;;  %v5528_v20 = vrot.slane %v17455_v46, 5  ;;  %v17456_v45 = vld [vmem:[#allocation91_spill] sm:$0xff]  ;;  %v17461_v48 = vld [vmem:[#allocation102_spill] sm:$0xff] }
 0x313   : > { %10617 = vmatmul.mubr.msk.bf16.vlgmr.msra.gmra.mxu1 %vm4115_vm9, %v14724_v21  ;;  %v14786_v31 = vsel %vm11500_vm6, %v9275_v60, %v5536_v52  ;;  %v5524_v38 = vrot.slane %v17456_v45, 5  ;;  %v14801_v36 = vsel %vm11500_vm6, %v9270_v59, %v5516_v49  ;;  %v17459_v60 = vld [vmem:[#allocation119_spill] sm:$0xff]  ;;  %v5552_v7 = vrot.slane %v17461_v48, 5 }
 0x314   : > { %10620 = vmatprep.mubr.msk.bf16.mxu1 %vm4115_vm9, %v14732_v53  ;;  %10683 = vmatpush3.bf16.msra.mxu1 %v17449_v43  ;;  %v14792_v3 = vcombine.low %v14775_v15, %v14786_v31  ;;  %v17458_v43 = vld [vmem:[#allocation68_spill] sm:$0xff]  ;;  %v5548_v52 = vrot.slane %v17459_v60, 5  ;;  %v9280_v46 = vrot.slane %v14368_v18, 9  ;;  %v5556_v45 = vrot.slane %v14445_v42, 5  ;;  %v17463_v59 = vld [vmem:[#allocation99_spill] sm:$0xff] }
 0x315   : > { %10750 = vmatprep.subr.bf16.mxu1 %v14747_v50  ;;  %10663 = vmatmul.mubr.msk.bf16.gmra.mxu0 %vm4115_vm9, %v9766_v51  ;;  %v14796_v51 = vsel %vm11500_vm6, %v9277_v40, %v5544_v58  ;;  %v9278_v8 = vrot.slane %v17458_v43, 9  ;;  %v9281_v53 = vrot.slane %v14378_v14, 9  ;;  %v17462_v40 = vld [vmem:[#allocation121_spill] sm:$0xff]  ;;  %v14812_v43 = vsel %vm11500_vm6, %v9273_v13, %v5528_v20  ;;  %v17464_v49 = vld [vmem:[#allocation87_spill] sm:$0xff] }
 0x316   : > { %10666 = vmatprep.mubr.msk.bf16.mxu0 %vm4115_vm9, %v9767_v17  ;;  %17457 = vst [vmem:[#allocation103_spill] sm:$0xff] %v14792_v3  ;;  %v9279_v17 = vrot.slane %v17460_v12, 9  ;;  %v5560_v58 = vrot.slane %v17462_v40, 5  ;;  %v9768_v21 = vpack.c.bf16 %v17464_v49, %v17463_v59  ;;  %v14832_v42 = vsel %vm11500_vm6, %v9280_v46, %v5556_v45  ;;  %v17466_v20 = vld [vmem:[#allocation117_spill] sm:$0xff] }
 0x317   : > { %v14818_v60 = vsel %vm11500_vm6, %v9278_v8, %v5548_v52  ;;  %v9282_v8 = vrot.slane %v17466_v20, 9  ;;  %v14850_v45 = vsel %vm11500_vm6, %v9271_v37, %v5520_v1  ;;  %v14860_v49 = vsel %vm11500_vm6, %v9272_v35, %v5524_v38  ;;  %v17473_v37 = vld [vmem:[#allocation28_spill] sm:$0xff]  ;;  %v17480_v12 = vld [vmem:[#allocation33_spill] sm:$0xff] }
 0x318   : > { %v14822_v18 = vsel %vm11500_vm6, %v9279_v17, %v5552_v7  ;;  %v14836_v13 = vsel %vm11500_vm6, %v9281_v53, %v5560_v58  ;;  %v17468_v17 = vld [vmem:[#allocation70_spill] sm:$0xff]  ;;  %v17470_v53 = vld [vmem:[#allocation95_spill] sm:$0xff]  ;;  %v5576_v1 = vrot.slane %v17473_v37, 5  ;;  %v5584_v54 = vrot.slane %v14561_v24, 5 }
 0x319   : > { %v14828_v14 = vcombine.low %v14818_v60, %v14822_v18  ;;  %v14842_v52 = vcombine.low %v14832_v42, %v14836_v13  ;;  %v5564_v48 = vrot.slane %v17468_v17, 5  ;;  %v17469_v7 = vld [vmem:[#allocation122_spill] sm:$0xff]  ;;  %v5568_v40 = vrot.slane %v17470_v53, 5  ;;  %v17479_v37 = vld [vmem:[#allocation55_spill] sm:$0xff] }
 0x31a   : > { %v9283_v46 = vrot.slane %v17469_v7, 9  ;;  %v17471_v58 = vld [vmem:[#allocation126_spill] sm:$0xff]  ;;  %v14870_v17 = vcombine.low %v14860_v49, %v14812_v43  ;;  %v17475_v7 = vld [vmem:[#allocation129_spill] sm:$0xff]  ;;  %v9409_v61 = vcombine.low %v14812_v43, %v14775_v15 }
 0x31b   : > { %10621 = vmatmul.mubr.msk.bf16.gmra.mxu1 %vm4115_vm9, %v14751_v9  ;;  %17465 = vst [vmem:[#allocation97_spill] sm:$0xff] %v14828_v14  ;;  %17467 = vst [vmem:[#allocation59_spill] sm:$0xff] %v14842_v52  ;;  %v9285_v59 = vrot.slane %v17471_v58, 9  ;;  %v14865_v20 = vsel %vm11500_vm6, %v9282_v8, %v5564_v48  ;;  %v9276_v53 = vrot.slane %v17475_v7, 9  ;;  %v14874_v58 = vld [vmem:[#allocation3 + $0x1c0] sm:$0xff]  ;;  %v9287_v7 = vrot.slane %v17480_v12, 9 }
 0x31c   : > { %10624 = vmatprep.mubr.msk.bf16.mxu1 %vm4115_vm9, %v9296_v26  ;;  %v14856_v26 = vcombine.low %v14801_v36, %v14850_v45  ;;  %17474 = vst [vmem:[#allocation115_spill] sm:$0xff] %v14870_v17  ;;  %17476 = vst [vmem:[#allocation67_spill] sm:$0xff] %v14874_v58  ;;  %v14878_v35 = vsel %vm11500_vm6, %v9283_v46, %v5568_v40  ;;  %v17481_v9 = vld [vmem:[#allocation92_spill] sm:$0xff]  ;;  %v9288_v46 = vrot.slane %v14519_v5, 9  ;;  %v5588_v40 = vrot.slane %v14580_v57, 5 }
 0x31d   : > { %10667 = vmatmul.mubr.msk.bf16.gmra.mxu0 %vm4115_vm9, %v9768_v21  ;;  %v17477_v21 = vld [vmem:[#allocation124_spill] sm:$0xff]  ;;  %v14883_v8 = vcombine.low %v14865_v20, %v14878_v35  ;;  %v14887_v48 = vsel %vm11500_vm6, %v9285_v59, %v5576_v1  ;;  %v5540_v29 = vrot.slane %v17481_v9, 5  ;;  %v9289_v59 = vrot.slane %v14535_v19, 9 }
 0x31e   : > { %17472 = vst [vmem:[#allocation71_spill] sm:$0xff] %v14856_v26  ;;  %10670 = vmatprep.mubr.msk.bf16.mxu0 %vm4115_vm9, %v9769_v47  ;;  %v9286_v38 = vrot.slane %v17477_v21, 9  ;;  %v5580_v47 = vrot.slane %v17479_v37, 5  ;;  %v17482_v21 = vld [vmem:[#allocation116_spill] sm:$0xff]  ;;  %v5592_v1 = vrot.slane %v14586_v16, 5  ;;  %v14907_v24 = vsel %vm11500_vm6, %v9287_v7, %v5584_v54 }
 0x31f   : > { %17478 = vst [vmem:[#allocation53_spill] sm:$0xff] %v14883_v8  ;;  %v9770_v11 = vpack.c.bf16 %v14874_v58, %v17482_v21  ;;  %v14911_v5 = vsel %vm11500_vm6, %v9288_v46, %v5588_v40  ;;  %v9290_v57 = vrot.slane %v14542_v28, 9  ;;  %v5596_v9 = vrot.slane %v14616_v6, 5  ;;  %v17485_v28 = vld [vmem:[#allocation127_spill] sm:$0xff] }
 0x320   : > { %v14899_v41 = vsel %vm11500_vm6, %v9286_v38, %v5580_v47  ;;  %v14923_v19 = vsel %vm11500_vm6, %v9289_v59, %v5592_v1  ;;  %v9291_v12 = vrot.slane %v14554_v33, 9  ;;  %v17484_v38 = vld [vmem:[#allocation114_spill] sm:$0xff]  ;;  %v5600_v7 = vrot.slane %v14618_v30, 5  ;;  %v17489_v1 = vld [vmem:[#allocation32_spill] sm:$0xff] }
 0x321   : > { %v14919_v16 = vcombine.low %v14899_v41, %v14907_v24  ;;  %v9771_v37 = vpack.c.bf16 %v17485_v28, %v17484_v38  ;;  %v14932_v6 = vcombine.low %v14911_v5, %v14923_v19  ;;  %v14936_v47 = vsel %vm11500_vm6, %v9290_v57, %v5596_v9  ;;  %v17490_v57 = vld [vmem:[#allocation66_spill] sm:$0xff]  ;;  %v14969_v28 = vld [vmem:[#allocation3 + $0x260] sm:$0xff] }
 0x322   : > { %v5541_v46 = vsel %vm11500_vm6, %v9276_v53, %v5540_v29  ;;  %v14945_v33 = vsel %vm11500_vm6, %v9291_v12, %v5600_v7  ;;  %v17487_v29 = vld [vmem:[#allocation29_spill] sm:$0xff]  ;;  %v9773_v9 = vpack.c.bf16 %v17490_v57, %v17489_v1  ;;  %17491 = vst [vmem:[#allocation120_spill] sm:$0xff] %v14969_v28  ;;  %v17493_v7 = vld [vmem:[#allocation104_spill] sm:$0xff]  ;;  %v4287_v12 = vld [vmem:[#allocation3 + $0x138] sm:$0x3]  ;;  %v15036_v30 = vpack.c.bf16 %v14969_v28, %v14969_v28 }
 0x323   : > { %10625 = vmatmul.mubr.msk.bf16.gmra.mxu1 %vm4115_vm9, %v14856_v26  ;;  %17483 = vst [vmem:[#allocation16_spill] sm:$0xff] %v14919_v16  ;;  %17486 = vst [vmem:[#allocation137_spill] sm:$0xff] %v14932_v6  ;;  %v14949_v40 = vcombine.low %v14936_v47, %v14945_v33  ;;  %v9300_v21 = vcombine.low %v5541_v46, %v14796_v51  ;;  %v17488_v53 = vld [vmem:[#allocation133_spill] sm:$0xff]  ;;  %v9284_v46 = vrot.slane %v17493_v7, 9  ;;  %v17558_v2 = vld [vmem:[#allocation67_spill] sm:$0xff] }
 0x324   : > { %10628 = vmatprep.mubr.msk.bf16.mxu1 %vm4115_vm9, %v14870_v17  ;;  %v9772_v59 = vpack.c.bf16 %v17488_v53, %v17487_v29  ;;  %v14981_v53 = vcombine.low %v14634_v25, %v14661_v0  ;;  %v14995_v25 = vpack.c.bf16 %v14630_v10, %v14630_v10 }
 0x325   : > { %10671 = vmatmul.mubr.msk.bf16.gmra.mxu0 %vm4115_vm9, %v9770_v11  ;;  %v15032_v11 = vld [vmem:[#allocation3 + $0x1d0] sm:$0xff] }
 0x326   : > { %10674 = vmatprep.mubr.msk.bf16.mxu0 %vm4115_vm9, %v9771_v37  ;;  %v14973_v37 = vcombine.low %v14584_v34, %v14606_v27  ;;  %17495 = vst [vmem:[#allocation83_spill] sm:$0xff] %v14981_v53  ;;  %v9403_v34 = vcombine.low %v14669_v32, %v14685_v63  ;;  %v4265_v27 = vld [vmem:[#allocation3 + $0x88] sm:$0x3]  ;;  %v9404_v32 = vcombine.low %v14713_v22, %v14728_v4  ;;  %v15017_v22 = vld [vmem:[#allocation3 + $0x130] sm:$0xff]  ;;  %17498 = vst [vmem:[#allocation80_spill] sm:$0xff] %v15032_v11 }
 0x327   : > { %v14997_v0 = vpack.c.bf16 %v4265_v27, %v4265_v27  ;;  %v4305_v63 = vld [vmem:[#allocation3 + $0x1c8] sm:$0x3]  ;;  %17497 = vst [vmem:[#allocation135_spill] sm:$0xff] %v15017_v22  ;;  %v15021_v4 = vpack.c.bf16 %v14874_v58, %v14874_v58  ;;  %v6185_v58 = vshrl.u32 %v14995_v25, 16 }
 0x328   : > { %17492 = vst [vmem:[#allocation78_spill] sm:$0xff] %v14973_v37 }
 0x32b   : > { %10629 = vmatmul.mubr.msk.bf16.gmra.mxu1 %vm4115_vm9, %v14792_v3 }
 0x32c   : > { %10632 = vmatprep.mubr.msk.bf16.mxu1 %vm4115_vm9, %v9300_v21  ;;  %v17494_v21 = vld [vmem:[#allocation81_spill] sm:$0xff] }
 0x32d   : > { %10675 = vmatmul.mubr.msk.bf16.gmra.mxu0 %vm4115_vm9, %v9772_v59  ;;  %v5572_v29 = vrot.slane %v17494_v21, 5  ;;  %v17496_v59 = vld [vmem:[#allocation37_spill] sm:$0xff] }
 0x32e   : > { %10678 = vmatprep.mubr.msk.bf16.mxu0 %vm4115_vm9, %v9773_v9  ;;  %v9774_v1 = vpack.c.bf16 %v14969_v28, %v17496_v59  ;;  %v14999_v9 = vld [vmem:[#allocation3 + $0x90] sm:$0xff]  ;;  %v4285_v21 = vld [vmem:[#allocation3 + $0x128] sm:$0x3]  ;;  %v9399_v59 = vrot.slane %v14995_v25, 9 }
 0x32f   : > { %v5573_v57 = vsel %vm11500_vm6, %v9284_v46, %v5572_v29  ;;  %v4267_v46 = vld [vmem:[#allocation3 + $0x98] sm:$0x3]  ;;  %v15008_v29 = vpack.c.bf16 %v14720_v56, %v14720_v56  ;;  %v15015_v27 = vpack.c.bf16 %v14999_v9, %v14999_v9  ;;  %v15025_v38 = vpack.c.bf16 %v4285_v21, %v4285_v21  ;;  %v15046_v21 = vld [vmem:[#allocation3 + $0x270] sm:$0xff] }
 0x330   : > { %v9304_v7 = vcombine.low %v5573_v57, %v14887_v48  ;;  %v9405_v57 = vcombine.low %v14708_v55, %v14718_v44  ;;  %v15030_v54 = vpack.c.bf16 %v4267_v46, %v4267_v46  ;;  %v15044_v55 = vpack.c.bf16 %v15017_v22, %v15017_v22  ;;  %v4307_v44 = vld [vmem:[#allocation3 + $0x1d8] sm:$0x3]  ;;  %17499 = vst [vmem:[#allocation100_spill] sm:$0xff] %v15046_v21 }
 0x331   : > { %v4327_v46 = vld [vmem:[#allocation3 + $0x278] sm:$0x3]  ;;  %v15063_v17 = vpack.c.bf16 %v4307_v44, %v4307_v44 }
 0x332   : > { %v15074_v28 = vpack.c.bf16 %v4327_v46, %v4327_v46 }
 0x333   : > { %10633 = vmatmul.mubr.msk.bf16.gmra.mxu1 %vm4115_vm9, %v14828_v14  ;;  %v15060_v14 = vpack.c.bf16 %v15032_v11, %v15032_v11  ;;  %v9487_v11 = vrot.slane %v15044_v55, 9 }
 0x334   : > { %10636 = vmatprep.mubr.msk.bf16.mxu1 %vm4115_vm9, %v14842_v52  ;;  %v15056_v52 = vpack.c.bf16 %v4287_v12, %v4287_v12  ;;  %v9402_v12 = vrot.slane %v15036_v30, 9 }
 0x335   : > { %10679 = vmatmul.mubr.msk.bf16.gmra.mxu0 %vm4115_vm9, %v9774_v1  ;;  %v6511_v1 = vrot.slane %v14997_v0, 5 }
 0x336   : > { %10718 = vmatprep.mubr.msk.bf16.mxu0 %vm4115_vm9, %v9403_v34  ;;  %v4325_v34 = vld [vmem:[#allocation3 + $0x268] sm:$0x3] }
 0x33b   : > { %10637 = vmatmul.mubr.msk.bf16.gmra.mxu1 %vm4115_vm9, %v14883_v8  ;;  %v15039_v8 = vpack.c.bf16 %v4325_v34, %v4325_v34  ;;  %v6515_v34 = vrot.slane %v15025_v38, 5 }
 0x33c   : > { %10640 = vmatprep.mubr.msk.bf16.mxu1 %vm4115_vm9, %v9304_v7  ;;  %v15028_v7 = vpack.c.bf16 %v4305_v63, %v4305_v63  ;;  %v9400_v63 = vrot.slane %v15008_v29, 9 }
 0x33d   : > { %10719 = vmatmul.mubr.msk.bf16.vlgmr.msra.gmra.mxu0 %vm4115_vm9, %v9404_v32  ;;  %v15050_v32 = vsel %vm11500_vm6, %v9399_v59, %v6511_v1  ;;  %v15067_v59 = vpack.c.bf16 %v15046_v21, %v15046_v21  ;;  %v7310_v1 = vrot.slane %v15030_v54, 5  ;;  %v6523_v26 = vrot.slane %v15039_v8, 5 }
 0x33e   : > { %10722 = vmatprep.mubr.msk.bf16.mxu0 %vm4115_vm9, %v9405_v57  ;;  %10785 = vmatpush3.bf16.msra.mxu0 %v14649_v39  ;;  %v9486_v57 = vrot.slane %v15015_v27, 9  ;;  %v9401_v39 = vrot.slane %v15021_v4, 9  ;;  %v6519_v3 = vrot.slane %v15028_v7, 5  ;;  %v9406_v44 = vcombine.low %v14736_v23, %v15050_v32 }
 0x33f   : > { %v9407_v21 = vcombine.low %v14742_v62, %v14801_v36  ;;  %v15090_v46 = vsel %vm11500_vm6, %v9400_v63, %v6515_v34  ;;  %v9488_v23 = vrot.slane %v15060_v14, 9  ;;  %v6188_v62 = vshll.u32 %v14995_v25, 16 }
 0x340   : > { %v15100_v36 = vsel %vm11500_vm6, %v9401_v39, %v6519_v3  ;;  %v9489_v63 = vrot.slane %v15067_v59, 9  ;;  %v15107_v34 = vsel %vm11500_vm6, %v9402_v12, %v6523_v26  ;;  %v7322_v25 = vrot.slane %v15074_v28, 5  ;;  %v17500_v12 = vld [vmem:[#allocation132_spill] sm:$0xff] }
 0x341   : > { %v6190_v22 = vrot.slane %v6188_v62, 5  ;;  %v15146_v62 = vld [vmem:[%s16574_s3 + $0x40] sm:$0xff]   ;;  %v9410_v43 = vcombine.low %v14786_v31, %v15090_v46 }
 0x342   : > { %v15124_v26 = vsel %vm11500_vm6, %v9489_v63, %v7322_v25  ;;  %v17503_v63 = vld [vmem:[#allocation82_spill] sm:$0xff]  ;;  %v17518_v3 = vld [vmem:[#allocation112_spill] sm:$0xff] }
 0x343   : > { %10641 = vmatmul.mubr.msk.bf16.gmra.mxu1 %vm4115_vm9, %v14919_v16  ;;  %v15086_v16 = vsel %vm11500_vm6, %v9486_v57, %v7310_v1  ;;  %v7318_v57 = vrot.slane %v15063_v17, 5 }
 0x344   : > { %10644 = vmatprep.mubr.msk.bf16.mxu1 %vm4115_vm9, %v14932_v6  ;;  %v7314_v6 = vrot.slane %v15056_v52, 5 }
 0x345   : > { %10723 = vmatmul.mubr.msk.bf16.gmra.mxu0 %vm4115_vm9, %v9406_v44  ;;  %v15118_v39 = vsel %vm11500_vm6, %v9488_v23, %v7318_v57  ;;  %v17501_v44 = vld [vmem:[#allocation136_spill] sm:$0xff]  ;;  %v9408_v23 = vcombine.low %v14850_v45, %v14860_v49  ;;  %v17504_v45 = vld [vmem:[#allocation26_spill] sm:$0xff] }
 0x346   : > { %10726 = vmatprep.mubr.msk.bf16.mxu0 %vm4115_vm9, %v9407_v21  ;;  %v15111_v1 = vsel %vm11500_vm6, %v9487_v11, %v7314_v6  ;;  %v15128_v6 = vcombine.low %v17501_v44, %v17500_v12  ;;  %v6187_v11 = vrot.slane %v6185_v58, 4  ;;  %v6194_v58 = vshll.u32 %v14997_v0, 16  ;;  %v17506_v12 = vld [vmem:[#allocation73_spill] sm:$0xff]  ;;  %v17535_v21 = vld [vmem:[#allocation88_spill] sm:$0xff] }
 0x347   : > { %v15150_v49 = vcombine.low %v17504_v45, %v17503_v63  ;;  %v6202_v44 = vshll.u32 %v15008_v29, 16 }
 0x348   : > { %17502 = vst [vmem:[#allocation138_spill] sm:$0xff] %v15128_v6  ;;  %v6191_v57 = vor.u32 %v6190_v22, %v6187_v11  ;;  %v6196_v15 = vrot.slane %v6194_v58, 5  ;;  %v6199_v22 = vshrl.u32 %v15008_v29, 16  ;;  %v17507_v11 = vcombine.low %v14796_v51, %v14818_v60 }
 0x349   : > { %17505 = vst [vmem:[#allocation90_spill] sm:$0xff] %v15150_v49  ;;  %v6204_v45 = vrot.slane %v6202_v44, 5  ;;  %v17513_v60 = vcombine.low %v14822_v18, %v14832_v42  ;;  %v9414_v42 = vcombine.low %v14878_v35, %v15100_v36 }
 0x34a   : > { %v6192_v25 = vrot.slane %v6191_v57, 4  ;;  %v17511_v57 = vld [vmem:[#allocation60_spill] sm:$0xff]  ;;  %v6201_v63 = vrot.slane %v6199_v22, 4  ;;  %v6208_v22 = vshll.u32 %v15025_v38, 16  ;;  %v6213_v38 = vshrl.u32 %v15021_v4, 16 }
 0x34b   : > { %10645 = vmatmul.mubr.msk.bf16.gmra.mxu1 %vm4115_vm9, %v14949_v40 }
 0x34c   : > { %10684 = vmatprep.mubr.msk.bf16.mxu1 %vm4115_vm9, %v15128_v6  ;;  %v15162_v0 = vsel %vm11597_vm8, %v6192_v25, %v6196_v15  ;;  %v6205_v29 = vor.u32 %v6204_v45, %v6201_v63  ;;  %v6210_v18 = vrot.slane %v6208_v22, 5  ;;  %v6216_v63 = vshll.u32 %v15021_v4, 16  ;;  %v17523_v22 = vld [vmem:[#allocation125_spill] sm:$0xff] }
 0x34d   : > { %10727 = vmatmul.mubr.msk.bf16.gmra.mxu0 %vm4115_vm9, %v9408_v23  ;;  %v17519_v45 = vcombine.low %v14887_v48, %v14899_v41  ;;  %v17525_v48 = vcombine.low %v14907_v24, %v14911_v5  ;;  %v17527_v5 = vld [vmem:[#allocation62_spill] sm:$0xff] }
 0x34e   : > { %10730 = vmatprep.mubr.msk.bf16.mxu0 %vm4115_vm9, %v9409_v61  ;;  %v17510_v61 = vld [vmem:[#allocation94_spill] sm:$0xff] }
 0x34f   : > { %v15177_v58 = vcombine.low %v17511_v57, %v17510_v61  ;;  %v6206_v57 = vrot.slane %v6205_v29, 4 }
 0x351   : > { %17512 = vst [vmem:[#allocation140_spill] sm:$0xff] %v15177_v58 }
 0x353   : > { %10685 = vmatmul.mubr.msk.bf16.vlgmr.msra.gmra.mxu1 %vm4115_vm9, %v17506_v12 }
 0x354   : > { %10688 = vmatprep.mubr.msk.bf16.mxu1 %vm4115_vm9, %v15150_v49  ;;  %10751 = vmatpush3.bf16.msra.mxu1 %v14747_v50  ;;  %v17508_v50 = vld [vmem:[#allocation84_spill] sm:$0xff] }
 0x355   : > { %10818 = vmatprep.subr.bf16.mxu1 %v15146_v62  ;;  %10731 = vmatmul.mubr.msk.bf16.gmra.mxu0 %vm4115_vm9, %v9410_v43  ;;  %v10584_v31 = vpop.f32.mrf.mxu0  ;;  %v15173_v23 = vcombine.low %v17508_v50, %v15162_v0  ;;  %v17514_v43 = vcombine.low %v14836_v13, %v14865_v20  ;;  %v17516_v50 = vld [vmem:[#allocation118_spill] sm:$0xff]  ;;  %v15208_v20 = vsel %vm11597_vm8, %v6206_v57, %v6210_v18  ;;  %v6218_v57 = vrot.slane %v6216_v63, 5 }
 0x356   : > { %10734 = vmatprep.mubr.msk.bf16.mxu0 %vm4115_vm9, %v17507_v11  ;;  %v17515_v11 = vld [vmem:[#allocation131_spill] sm:$0xff]  ;;  %v6222_v63 = vshll.u32 %v15028_v7, 16 }
 0x357   : > { %17509 = vst [vmem:[#allocation25_spill] sm:$0xff] %v15173_v23  ;;  %v5347_v25 = vpop.f32.mrf.mxu0  ;;  %v15196_v61 = vcombine.low %v17516_v50, %v17515_v11  ;;  %v6215_v50 = vrot.slane %v6213_v38, 4 }
 0x358   : > { %v6224_v7 = vrot.slane %v6222_v63, 5  ;;  %v17531_v63 = vld [vmem:[#allocation56_spill] sm:$0xff] }
 0x359   : > { %v10585_v51 = vpop.f32.mrf.mxu0  ;;  %17517 = vst [vmem:[#allocation130_spill] sm:$0xff] %v15196_v61  ;;  %v6219_v4 = vor.u32 %v6218_v57, %v6215_v50  ;;  %v17528_v50 = vld [vmem:[#allocation101_spill] sm:$0xff] }
 0x35a   : > { %v15252_v57 = vcombine.low %v17528_v50, %v17527_v5  ;;  %v6230_v50 = vshll.u32 %v15036_v30, 16 }
 0x35b   : > { %10689 = vmatmul.mubr.msk.bf16.gmra.mxu1 %vm4115_vm9, %v15173_v23  ;;  %v5350_v15 = vpop.f32.mrf.mxu0 }
 0x35c   : > { %10692 = vmatprep.mubr.msk.bf16.mxu1 %vm4115_vm9, %v15177_v58  ;;  %17529 = vst [vmem:[#allocation54_spill] sm:$0xff] %v15252_v57 }
 0x35d   : > { %10735 = vmatmul.mubr.msk.bf16.gmra.mxu0 %vm4115_vm9, %v17513_v60  ;;  %v15192_v44 = vpop.f32.mrf.mxu0  ;;  %v17520_v60 = vld [vmem:[#allocation93_spill] sm:$0xff] }
 0x35e   : > { %10738 = vmatprep.mubr.msk.bf16.mxu0 %vm4115_vm9, %v17514_v43  ;;  %v15219_v35 = vcombine.low %v17520_v60, %v15208_v20  ;;  %v17522_v43 = vld [vmem:[#allocation65_spill] sm:$0xff]  ;;  %v7032_v60 = vshrl.u32 %v15015_v27, 16 }
 0x35f   : > { %v15204_v13 = vpop.f32.mrf.mxu0  ;;  %v15225_v11 = vcombine.low %v17523_v22, %v17522_v43  ;;  %v7035_v43 = vshll.u32 %v15015_v27, 16  ;;  %v9418_v27 = vcombine.low %v14945_v33, %v15107_v34  ;;  %v17532_v33 = vld [vmem:[#allocation69_spill] sm:$0xff] }
 0x360   : > { %17521 = vst [vmem:[#allocation98_spill] sm:$0xff] %v15219_v35 }
 0x361   : > { %v15221_v29 = vpop.f32.mrf.mxu0  ;;  %17524 = vst [vmem:[#allocation108_spill] sm:$0xff] %v15225_v11 }
 0x363   : > { %10693 = vmatmul.mubr.msk.bf16.gmra.mxu1 %vm4115_vm9, %v17518_v3  ;;  %v15231_v41 = vpop.f32.mrf.mxu0 }
 0x364   : > { %10696 = vmatprep.mubr.msk.bf16.mxu1 %vm4115_vm9, %v15196_v61 }
 0x365   : > { %10739 = vmatmul.mubr.msk.bf16.gmra.mxu0 %vm4115_vm9, %v9414_v42  ;;  %v17526_v42 = vcombine.low %v14923_v19, %v14936_v47  ;;  %v6220_v19 = vrot.slane %v6219_v4, 4 }
 0x366   : > { %10742 = vmatprep.mubr.msk.bf16.mxu0 %vm4115_vm9, %v17519_v45 }
 0x367   : > { %v15266_v4 = vsel %vm11597_vm8, %v6220_v19, %v6224_v7  ;;  %v6232_v19 = vrot.slane %v6230_v50, 5 }
 0x36b   : > { %10697 = vmatmul.mubr.msk.bf16.gmra.mxu1 %vm4115_vm9, %v15219_v35 }
 0x36c   : > { %10700 = vmatprep.mubr.msk.bf16.mxu1 %vm4115_vm9, %v15225_v11  ;;  %v10550_v18 = vpop.f32.mrf.mxu1 }
 0x36d   : > { %10743 = vmatmul.mubr.msk.bf16.gmra.mxu0 %vm4115_vm9, %v17525_v48  ;;  %v15241_v38 = vadd.f32 %v10584_v31, %v10550_v18  ;;  %v17530_v48 = vld [vmem:[#allocation111_spill] sm:$0xff]  ;;  %v7034_v18 = vrot.slane %v7032_v60, 4  ;;  %v15275_v60 = vcombine.low %v17532_v33, %v15266_v4 }
 0x36e   : > { %10746 = vmatprep.mubr.msk.bf16.mxu0 %vm4115_vm9, %v17526_v42  ;;  %v5116_v45 = vpop.f32.mrf.mxu1  ;;  %v15248_v24 = vpop.f32.mrf.mxu0  ;;  %v7037_v42 = vrot.slane %v7035_v43, 5  ;;  %v7041_v43 = vshll.u32 %v15030_v54, 16  ;;  %v6236_v54 = vshll.u32 %v15039_v8, 16 }
 0x36f   : > { %v15246_v22 = vadd.f32 %v5347_v25, %v5116_v45  ;;  %17533 = vst [vmem:[#allocation76_spill] sm:$0xff] %v15275_v60 }
 0x370   : > { %v10551_v47 = vpop.f32.mrf.mxu1  ;;  %v5379_v5 = vpop.f32.mrf.mxu0  ;;  %v7043_v7 = vrot.slane %v7041_v43, 5  ;;  %v7049_v43 = vshll.u32 %v15044_v55, 16 }
 0x371   : > { %v15256_v31 = vadd.f32 %v10585_v51, %v10551_v47  ;;  %v6227_v51 = vshrl.u32 %v15036_v30, 16 }
 0x372   : > { %v5119_v25 = vpop.f32.mrf.mxu1  ;;  %v10593_v47 = vpop.f32.mrf.mxu0 }
 0x373   : > { %10701 = vmatmul.mubr.msk.bf16.gmra.mxu1 %vm4115_vm9, %v17530_v48  ;;  %v15262_v45 = vadd.f32 %v5350_v15, %v5119_v25  ;;  %v7038_v15 = vor.u32 %v7037_v42, %v7034_v18  ;;  %v6229_v25 = vrot.slane %v6227_v51, 4 }
 0x374   : > { %10704 = vmatprep.mubr.msk.bf16.mxu1 %vm4115_vm9, %v15252_v57  ;;  %v17554_v57 = vld [vmem:[#allocation96_spill] sm:$0xff] }
 0x375   : > { %10747 = vmatmul.mubr.msk.bf16.gmra.mxu0 %vm4115_vm9, %v9418_v27  ;;  %v7039_v30 = vrot.slane %v7038_v15, 4  ;;  %v5382_v27 = vpop.f32.mrf.mxu0  ;;  %v6233_v33 = vor.u32 %v6232_v19, %v6229_v25  ;;  %v7046_v15 = vshrl.u32 %v15044_v55, 16  ;;  %v17536_v19 = vld [vmem:[#allocation86_spill] sm:$0xff] }
 0x376   : > { %10786 = vmatprep.mubr.msk.bf16.mxu0 %vm4115_vm9, %v17531_v63  ;;  %v17534_v63 = vld [vmem:[#allocation72_spill] sm:$0xff] }
 0x377   : > { %v7044_v42 = vsel %vm11597_vm8, %v7039_v30, %v7043_v7  ;;  %v7048_v55 = vrot.slane %v7046_v15, 4 }
 0x37b   : > { %10705 = vmatmul.mubr.msk.bf16.gmra.mxu1 %vm4115_vm9, %v15275_v60 }
 0x37c   : > { %10708 = vmatprep.mubr.msk.bf16.mxu1 %vm4115_vm9, %v14973_v37 }
 0x37d   : > { %10787 = vmatmul.mubr.msk.bf16.vlgmr.msra.gmra.mxu0 %vm4115_vm9, %v17534_v63  ;;  %v6234_v63 = vrot.slane %v6233_v33, 4  ;;  %v7051_v33 = vrot.slane %v7049_v43, 5  ;;  %v7055_v43 = vshll.u32 %v15056_v52, 16 }
 0x37e   : > { %10790 = vmatprep.mubr.msk.bf16.mxu0 %vm4115_vm9, %v17535_v21  ;;  %v10554_v18 = vpop.f32.mrf.mxu1  ;;  %v6238_v21 = vrot.slane %v6236_v54, 5 }
 0x37f   : > { %v15290_v51 = vadd.f32 %v15192_v44, %v10554_v18  ;;  %v15292_v50 = vpop.f32.mrf.mxu0  ;;  %v9465_v44 = vcombine.low %v15162_v0, %v7044_v42  ;;  %v17538_v42 = vld [vmem:[#allocation113_spill] sm:$0xff]  ;;  %v7052_v15 = vor.u32 %v7051_v33, %v7048_v55 }
 0x380   : > { %v5132_v25 = vpop.f32.mrf.mxu1  ;;  %v15309_v37 = vsel %vm11597_vm8, %v6234_v63, %v6238_v21  ;;  %v17540_v63 = vld [vmem:[#allocation61_spill] sm:$0xff] }
 0x381   : > { %v15299_v8 = vadd.f32 %v15204_v13, %v5132_v25  ;;  %v5395_v7 = vpop.f32.mrf.mxu0  ;;  %v17537_v25 = vld [vmem:[#allocation109_spill] sm:$0xff] }
 0x382   : > { %v10555_v30 = vpop.f32.mrf.mxu1 }
 0x383   : > { %10709 = vmatmul.mubr.msk.bf16.gmra.mxu1 %vm4115_vm9, %v17536_v19  ;;  %v15305_v18 = vadd.f32 %v15221_v29, %v10555_v30  ;;  %v10597_v0 = vpop.f32.mrf.mxu0  ;;  %v15319_v29 = vcombine.low %v17538_v42, %v15309_v37  ;;  %v7057_v30 = vrot.slane %v7055_v43, 5  ;;  %v17542_v42 = vld [vmem:[#allocation74_spill] sm:$0xff]  ;;  %v7063_v43 = vshll.u32 %v15060_v14, 16 }
 0x384   : > { %10712 = vmatprep.mubr.msk.bf16.mxu1 %vm4115_vm9, %v14981_v53  ;;  %v5135_v13 = vpop.f32.mrf.mxu1 }
 0x385   : > { %10791 = vmatmul.mubr.msk.bf16.gmra.mxu0 %vm4115_vm9, %v9465_v44  ;;  %v15315_v54 = vadd.f32 %v15231_v41, %v5135_v13  ;;  %17539 = vst [vmem:[#allocation107_spill] sm:$0xff] %v15319_v29  ;;  %v5398_v21 = vpop.f32.mrf.mxu0  ;;  %v7053_v44 = vrot.slane %v7052_v15, 4  ;;  %v17541_v41 = vld [vmem:[#allocation123_spill] sm:$0xff]  ;;  %v7060_v15 = vshrl.u32 %v15060_v14, 16  ;;  %v7065_v53 = vrot.slane %v7063_v43, 5  ;;  %v17547_v43 = vld [vmem:[#allocation52_spill] sm:$0xff] }
 0x386   : > { %10794 = vmatprep.mubr.msk.bf16.mxu0 %vm4115_vm9, %v17537_v25 }
 0x387   : > { %v7062_v14 = vrot.slane %v7060_v15, 4 }
 0x38b   : > { %10713 = vmatmul.mubr.msk.bf16.gmra.mxu1 %vm4115_vm9, %v15319_v29  ;;  %v10558_v25 = vpop.f32.mrf.mxu1 }
 0x38c   : > { %10752 = vmatprep.mubr.msk.bf16.mxu1 %vm4115_vm9, %v17540_v63  ;;  %v15329_v13 = vadd.f32 %v15248_v24, %v10558_v25  ;;  %v7058_v63 = vsel %vm11597_vm8, %v7053_v44, %v7057_v30  ;;  %v15342_v24 = vld [vmem:[%s16576_s5] sm:$0xff]  }
 0x38d   : > { %10795 = vmatmul.mubr.msk.bf16.gmra.mxu0 %vm4115_vm9, %v17541_v41  ;;  %v5148_v52 = vpop.f32.mrf.mxu1  ;;  %v9466_v44 = vcombine.low %v15208_v20, %v7058_v63  ;;  %v7069_v20 = vshll.u32 %v15063_v17, 16 }
 0x38e   : > { %10798 = vmatprep.mubr.msk.bf16.mxu0 %vm4115_vm9, %v17542_v42  ;;  %v15333_v55 = vadd.f32 %v5379_v5, %v5148_v52  ;;  %v17543_v42 = vld [vmem:[#allocation134_spill] sm:$0xff]  ;;  %v17544_v52 = vld [vmem:[#allocation128_spill] sm:$0xff] }
 0x38f   : > { %v10600_v33 = vpop.f32.mrf.mxu0  ;;  %v10559_v29 = vpop.f32.mrf.mxu1  ;;  %v7071_v15 = vrot.slane %v7069_v20, 5  ;;  %v17549_v20 = vld [vmem:[#allocation79_spill] sm:$0xff] }
 0x390   : > { %v15344_v25 = vadd.f32 %v10593_v47, %v10559_v29  ;;  %v17545_v29 = vld [vmem:[#allocation50_spill] sm:$0xff] }
 0x391   : > { %v5411_v41 = vpop.f32.mrf.mxu0  ;;  %v5151_v5 = vpop.f32.mrf.mxu1 }
 0x392   : > { %v15351_v30 = vadd.f32 %v5382_v27, %v5151_v5 }
 0x393   : > { %10753 = vmatmul.mubr.msk.bf16.vlgmr.msra.gmra.mxu1 %vm4115_vm9, %v17543_v42  ;;  %v10601_v47 = vpop.f32.mrf.mxu0  ;;  %v9783_v42 = vpack.c.bf16 %v14999_v9, %v14630_v10 }
 0x394   : > { %10756 = vmatprep.mubr.msk.bf16.mxu1 %vm4115_vm9, %v17544_v52  ;;  %10819 = vmatpush3.bf16.msra.mxu1 %v15146_v62  ;;  %v7066_v52 = vor.u32 %v7065_v53, %v7062_v14  ;;  %v17546_v62 = vld [vmem:[#allocation139_spill] sm:$0xff] }
 0x395   : > { %10888 = vmatprep.subr.bf16.mxu1 %v15342_v24  ;;  %10799 = vmatmul.mubr.msk.bf16.gmra.mxu0 %vm4115_vm9, %v9466_v44  ;;  %v15361_v27 = vpop.f32.mrf.mxu0  ;;  %v17548_v44 = vld [vmem:[#allocation75_spill] sm:$0xff] }
 0x396   : > { %10802 = vmatprep.mubr.msk.bf16.mxu0 %vm4115_vm9, %v17545_v29  ;;  %v7067_v63 = vrot.slane %v7066_v52, 4  ;;  %v7074_v29 = vshrl.u32 %v15067_v59, 16 }
 0x398   : > { %v7072_v14 = vsel %vm11597_vm8, %v7067_v63, %v7071_v15  ;;  %v7076_v63 = vrot.slane %v7074_v29, 4  ;;  %v17553_v29 = vld [vmem:[#allocation85_spill] sm:$0xff] }
 0x39b   : > { %10757 = vmatmul.mubr.msk.bf16.gmra.mxu1 %vm4115_vm9, %v9783_v42  ;;  %v7077_v42 = vshll.u32 %v15067_v59, 16 }
 0x39c   : > { %10760 = vmatprep.mubr.msk.bf16.mxu1 %vm4115_vm9, %v17546_v62  ;;  %v10604_v5 = vpop.f32.mrf.mxu0 }
 0x39d   : > { %10803 = vmatmul.mubr.msk.bf16.gmra.mxu0 %vm4115_vm9, %v17547_v43  ;;  %v7079_v15 = vrot.slane %v7077_v42, 5 }
 0x39e   : > { %10806 = vmatprep.mubr.msk.bf16.mxu0 %vm4115_vm9, %v17548_v44  ;;  %v10562_v10 = vpop.f32.mrf.mxu1  ;;  %v5427_v17 = vpop.f32.mrf.mxu0  ;;  %v17550_v44 = vld [vmem:[#allocation89_spill] sm:$0xff] }
 0x39f   : > { %v15371_v53 = vadd.f32 %v15292_v50, %v10562_v10  ;;  %v9467_v10 = vcombine.low %v15266_v4, %v7072_v14 }
 0x3a0   : > { %v5164_v9 = vpop.f32.mrf.mxu1  ;;  %v10605_v43 = vpop.f32.mrf.mxu0 }
 0x3a1   : > { %v15377_v52 = vadd.f32 %v5395_v7, %v5164_v9  ;;  %v17551_v7 = vld [vmem:[#allocation77_spill] sm:$0xff] }
 0x3a2   : > { %v10563_v62 = vpop.f32.mrf.mxu1  ;;  %v15391_v9 = vpop.f32.mrf.mxu0 }
 0x3a3   : > { %10761 = vmatmul.mubr.msk.bf16.gmra.mxu1 %vm4115_vm9, %v17549_v20  ;;  %v15383_v50 = vadd.f32 %v10597_v0, %v10563_v62  ;;  %v17552_v20 = vld [vmem:[#allocation135_spill] sm:$0xff]  ;;  %v7083_v0 = vshll.u32 %v15074_v28, 16  ;;  %v17555_v28 = vld [vmem:[#allocation30_spill] sm:$0xff] }
 0x3a4   : > { %10764 = vmatprep.mubr.msk.bf16.mxu1 %vm4115_vm9, %v17550_v44  ;;  %v5167_v19 = vpop.f32.mrf.mxu1  ;;  %v9784_v60 = vpack.c.bf16 %v17552_v20, %v14720_v56  ;;  %v7080_v44 = vor.u32 %v7079_v15, %v7076_v63  ;;  %v17556_v20 = vld [vmem:[#allocation27_spill] sm:$0xff] }
 0x3a5   : > { %10807 = vmatmul.mubr.msk.bf16.gmra.mxu0 %vm4115_vm9, %v9467_v10  ;;  %v15387_v59 = vadd.f32 %v5398_v21, %v5167_v19  ;;  %v7085_v10 = vrot.slane %v7083_v0, 5  ;;  %v17557_v0 = vld [vmem:[#allocation110_spill] sm:$0xff] }
 0x3a6   : > { %10810 = vmatprep.mubr.msk.bf16.mxu0 %vm4115_vm9, %v17551_v7  ;;  %v7081_v62 = vrot.slane %v7080_v44, 4 }
 0x3a9   : > { %v10608_v14 = vpop.f32.mrf.mxu0 }
 0x3aa   : > { %v10566_v4 = vpop.f32.mrf.mxu1 }
 0x3ab   : > { %10765 = vmatmul.mubr.msk.bf16.gmra.mxu1 %vm4115_vm9, %v9784_v60  ;;  %v15399_v19 = vadd.f32 %v10600_v33, %v10566_v4  ;;  %v5443_v42 = vpop.f32.mrf.mxu0  ;;  %v7086_v33 = vsel %vm11597_vm8, %v7081_v62, %v7085_v10  ;;  %v17559_v62 = vld [vmem:[#allocation80_spill] sm:$0xff] }
 0x3ac   : > { %10768 = vmatprep.mubr.msk.bf16.mxu1 %vm4115_vm9, %v17553_v29  ;;  %v5180_v21 = vpop.f32.mrf.mxu1  ;;  %v9785_v10 = vpack.c.bf16 %v17559_v62, %v17558_v2 }
 0x3ad   : > { %v15401_v7 = vadd.f32 %v5411_v41, %v5180_v21  ;;  %10811 = vmatmul.mubr.msk.bf16.gmra.mxu0 %vm4115_vm9, %v17554_v57  ;;  %v10609_v60 = vpop.f32.mrf.mxu0  ;;  %v9468_v57 = vcombine.low %v15309_v37, %v7086_v33  ;;  %v17561_v37 = vld [vmem:[#allocation48_spill] sm:$0xff] }
 0x3ae   : > { %v10567_v56 = vpop.f32.mrf.mxu1  ;;  %10814 = vmatprep.mubr.msk.bf16.mxu0 %vm4115_vm9, %v17555_v28 }
 0x3af   : > { %v15407_v63 = vadd.f32 %v10601_v47, %v10567_v56  ;;  %v15409_v15 = vpop.f32.mrf.mxu0 }
 0x3b0   : > { %v15415_v41 = vpop.f32.mrf.mxu1 }
 0x3b2   : > { %v10612_v44 = vpop.f32.mrf.mxu0 }
 0x3b3   : > { %10769 = vmatmul.mubr.msk.bf16.gmra.mxu1 %vm4115_vm9, %v17556_v20 }
 0x3b4   : > { %10772 = vmatprep.mubr.msk.bf16.mxu1 %vm4115_vm9, %v17557_v0  ;;  %v5459_v4 = vpop.f32.mrf.mxu0 }
 0x3b5   : > { %10815 = vmatmul.mubr.msk.bf16.gmra.mxu0 %vm4115_vm9, %v9468_v57 }
 0x3b6   : > { %v10570_v47 = vpop.f32.mrf.mxu1  ;;  %v10613_v29 = vpop.f32.mrf.mxu0 }
 0x3b7   : > { %v15421_v21 = vadd.f32 %v10604_v5, %v10570_v47 }
 0x3b8   : > { %v5196_v56 = vpop.f32.mrf.mxu1  ;;  %v15425_v28 = vpop.f32.mrf.mxu0 }
 0x3b9   : > { %17560 = vst [vmem:[#allocation91_spill] sm:$0xff] %v15425_v28  ;;  %v15427_v20 = vadd.f32 %v5427_v17, %v5196_v56  ;;  %v17563_v17 = vld [vmem:[#allocation34_spill] sm:$0xff]  ;;  %v17564_v56 = vld [vmem:[#allocation51_spill] sm:$0xff] }
 0x3ba   : > { %v10571_v0 = vpop.f32.mrf.mxu1 }
 0x3bb   : > { %10773 = vmatmul.mubr.msk.bf16.gmra.mxu1 %vm4115_vm9, %v9785_v10  ;;  %v15432_v33 = vadd.f32 %v10605_v43, %v10571_v0 }
 0x3bc   : > { %10776 = vmatprep.mubr.msk.bf16.mxu1 %vm4115_vm9, %v17561_v37  ;;  %v15434_v57 = vpop.f32.mrf.mxu1 }
 0x3bd   : > { %v10652_v48 = vpop.f32.mrf.mxu0 }
 0x3bf   : > { %v6013_v5 = vpop.f32.mrf.mxu0  ;;  %v10574_v11 = vpop.f32.mrf.mxu1 }
 0x3c0   : > { %v15436_v2 = vadd.f32 %v10608_v14, %v10574_v11  ;;  %v17565_v11 = vld [vmem:[#allocation120_spill] sm:$0xff] }
 0x3c1   : > { %v10653_v47 = vpop.f32.mrf.mxu0  ;;  %v5212_v62 = vpop.f32.mrf.mxu1  ;;  %v17566_v14 = vld [vmem:[#allocation100_spill] sm:$0xff] }
 0x3c2   : > { %v15442_v10 = vadd.f32 %v5443_v42, %v5212_v62  ;;  %v9786_v58 = vpack.c.bf16 %v17566_v14, %v17565_v11  ;;  %v17567_v42 = vld [vmem:[#allocation46_spill] sm:$0xff] }
 0x3c3   : > { %v15438_v35 = vpop.f32.mrf.mxu0  ;;  %10777 = vmatmul.mubr.msk.bf16.gmra.mxu1 %vm4115_vm9, %v17563_v17  ;;  %v10575_v43 = vpop.f32.mrf.mxu1 }
 0x3c4   : > { %17562 = vst [vmem:[#allocation68_spill] sm:$0xff] %v15438_v35  ;;  %10780 = vmatprep.mubr.msk.bf16.mxu1 %vm4115_vm9, %v17564_v56  ;;  %v15446_v0 = vadd.f32 %v10609_v60, %v10575_v43 }
 0x3c5   : > { %v10656_v37 = vpop.f32.mrf.mxu0  ;;  %v15448_v61 = vpop.f32.mrf.mxu1 }
 0x3c7   : > { %v6029_v3 = vpop.f32.mrf.mxu0 }
 0x3c9   : > { %v10657_v23 = vpop.f32.mrf.mxu0 }
 0x3cb   : > { %v10578_v35 = vpop.f32.mrf.mxu1  ;;  %10781 = vmatmul.mubr.msk.bf16.gmra.mxu1 %vm4115_vm9, %v9786_v58  ;;  %v15457_v62 = vpop.f32.mrf.mxu0  ;;  %v17571_v58 = vld [vmem:[#allocation105_spill] sm:$0xff] }
 0x3cc   : > { %v15453_v17 = vadd.f32 %v10612_v44, %v10578_v35  ;;  %10820 = vmatprep.mubr.msk.bf16.mxu1 %vm4115_vm9, %v17567_v42  ;;  %17568 = vst [vmem:[#allocation119_spill] sm:$0xff] %v15457_v62  ;;  %v17572_v44 = vld [vmem:[#allocation49_spill] sm:$0xff] }
 0x3cd   : > { %v5228_v60 = vpop.f32.mrf.mxu1  ;;  %v10660_v43 = vpop.f32.mrf.mxu0 }
 0x3ce   : > { %v15459_v56 = vadd.f32 %v5459_v4, %v5228_v60 }
 0x3cf   : > { %v10579_v49 = vpop.f32.mrf.mxu1  ;;  %v6045_v28 = vpop.f32.mrf.mxu0 }
 0x3d0   : > { %v15461_v12 = vadd.f32 %v10613_v29, %v10579_v49 }
 0x3d1   : > { %v15463_v11 = vpop.f32.mrf.mxu1  ;;  %v10661_v14 = vpop.f32.mrf.mxu0 }
 0x3d2   : > { %17569 = vst [vmem:[#allocation106_spill] sm:$0xff] %v15461_v12  ;;  %17570 = vst [vmem:[#allocation102_spill] sm:$0xff] %v15463_v11 }
 0x3d3   : > { %v10618_v6 = vpop.f32.mrf.mxu1  ;;  %10821 = vmatmul.mubr.msk.bf16.vlgmr.msra.gmra.mxu1 %vm4115_vm9, %v17571_v58  ;;  %v15470_v42 = vpop.f32.mrf.mxu0 }
 0x3d4   : > { %v5869_v35 = vadd.f32 %v10618_v6, %v15241_v38  ;;  %10824 = vmatprep.mubr.msk.bf16.mxu1 %vm4115_vm9, %v17572_v44  ;;  %17573 = vst [vmem:[#allocation121_spill] sm:$0xff] %v15470_v42  ;;  %10889 = vmatpush3.bf16.msra.mxu1 %v15342_v24 }
 0x3d5   : > { %v5740_v4 = vpop.f32.mrf.mxu1  ;;  %v10664_v29 = vpop.f32.mrf.mxu0 }
 0x3d6   : > { %v5867_v49 = vadd.f32 %v5740_v4, %v15246_v22  ;;  %v15474_v60 = vadd.f32 %v10652_v48, %v5869_v35  ;;  %v17574_v22 = vcombine.low %v15050_v32, %v15086_v16  ;;  %v17575_v35 = vld [vmem:[#allocation71_spill] sm:$0xff] }
 0x3d7   : > { %v10619_v62 = vpop.f32.mrf.mxu1  ;;  %v6061_v11 = vpop.f32.mrf.mxu0 }
 0x3d8   : > { %v5870_v12 = vadd.f32 %v10619_v62, %v15256_v31  ;;  %v15477_v58 = vadd.f32 %v6013_v5, %v5867_v49 }
 0x3d9   : > { %v5743_v6 = vpop.f32.mrf.mxu1  ;;  %v10665_v44 = vpop.f32.mrf.mxu0 }
 0x3da   : > { %v15480_v38 = vadd.f32 %v5743_v6, %v15262_v45  ;;  %v15482_v42 = vadd.f32 %v10653_v47, %v5870_v12 }
 0x3db   : > { %v10622_v24 = vpop.f32.mrf.mxu1  ;;  %10825 = vmatmul.mubr.msk.bf16.gmra.mxu1 %vm4115_vm9, %v17574_v22  ;;  %v15491_v31 = vpop.f32.mrf.mxu0 }
 0x3dc   : > { %v5873_v48 = vadd.f32 %v10622_v24, %v15290_v51  ;;  %10828 = vmatprep.mubr.msk.bf16.mxu1 %vm4115_vm9, %v17575_v35  ;;  %v17576_v35 = vld [vmem:[#allocation115_spill] sm:$0xff] }
 0x3dd   : > { %v5756_v5 = vpop.f32.mrf.mxu1  ;;  %v10668_v62 = vpop.f32.mrf.mxu0 }
 0x3de   : > { %v5871_v45 = vadd.f32 %v5756_v5, %v15299_v8  ;;  %v15494_v4 = vadd.f32 %v10656_v37, %v5873_v48  ;;  %v17577_v37 = vld [vmem:[#allocation103_spill] sm:$0xff] }
 0x3df   : > { %v10623_v12 = vpop.f32.mrf.mxu1  ;;  %v15497_v49 = vpop.f32.mrf.mxu0 }
 0x3e0   : > { %v5874_v47 = vadd.f32 %v10623_v12, %v15305_v18  ;;  %v15499_v16 = vadd.f32 %v6029_v3, %v5871_v45 }
 0x3e1   : > { %v5759_v32 = vpop.f32.mrf.mxu1  ;;  %v10669_v6 = vpop.f32.mrf.mxu0 }
 0x3e2   : > { %v15502_v51 = vadd.f32 %v5759_v32, %v15315_v54  ;;  %v15504_v24 = vadd.f32 %v10657_v23, %v5874_v47 }
 0x3e3   : > { %v10626_v22 = vpop.f32.mrf.mxu1  ;;  %10829 = vmatmul.mubr.msk.bf16.gmra.mxu1 %vm4115_vm9, %v17576_v35  ;;  %v15511_v18 = vpop.f32.mrf.mxu0 }
 0x3e4   : > { %v5877_v8 = vadd.f32 %v10626_v22, %v15329_v13  ;;  %10832 = vmatprep.mubr.msk.bf16.mxu1 %vm4115_vm9, %v17577_v37 }
 0x3e5   : > { %v5772_v3 = vpop.f32.mrf.mxu1  ;;  %v10672_v5 = vpop.f32.mrf.mxu0 }
 0x3e6   : > { %v5875_v48 = vadd.f32 %v5772_v3, %v15333_v55  ;;  %v15514_v54 = vadd.f32 %v10660_v43, %v5877_v8  ;;  %v17578_v55 = vcombine.low %v15090_v46, %v15111_v1  ;;  %v17579_v8 = vld [vmem:[#allocation97_spill] sm:$0xff] }
 0x3e7   : > { %v10627_v45 = vpop.f32.mrf.mxu1  ;;  %v6093_v12 = vpop.f32.mrf.mxu0 }
 0x3e8   : > { %v5878_v23 = vadd.f32 %v10627_v45, %v15344_v25  ;;  %v15517_v47 = vadd.f32 %v6045_v28, %v5875_v48 }
 0x3e9   : > { %v5775_v32 = vpop.f32.mrf.mxu1  ;;  %v10673_v22 = vpop.f32.mrf.mxu0 }
 0x3ea   : > { %v15520_v13 = vadd.f32 %v5775_v32, %v15351_v30  ;;  %v15522_v35 = vadd.f32 %v10661_v14, %v5878_v23 }
 0x3eb   : > { %v10630_v37 = vpop.f32.mrf.mxu1  ;;  %10833 = vmatmul.mubr.msk.bf16.gmra.mxu1 %vm4115_vm9, %v17578_v55  ;;  %v6096_v25 = vpop.f32.mrf.mxu0 }
 0x3ec   : > { %v5881_v43 = vadd.f32 %v10630_v37, %v15371_v53  ;;  %10836 = vmatprep.mubr.msk.bf16.mxu1 %vm4115_vm9, %v17579_v8  ;;  %v17580_v8 = vld [vmem:[#allocation59_spill] sm:$0xff] }
 0x3ed   : > { %v5788_v28 = vpop.f32.mrf.mxu1  ;;  %v10676_v30 = vpop.f32.mrf.mxu0 }
 0x3ee   : > { %v5879_v3 = vadd.f32 %v5788_v28, %v15377_v52  ;;  %v15532_v48 = vadd.f32 %v10664_v29, %v5881_v43  ;;  %v17581_v29 = vld [vmem:[#allocation53_spill] sm:$0xff] }
 0x3ef   : > { %v10631_v14 = vpop.f32.mrf.mxu1  ;;  %v6109_v23 = vpop.f32.mrf.mxu0 }
 0x3f0   : > { %v5882_v45 = vadd.f32 %v10631_v14, %v15383_v50  ;;  %v15535_v32 = vadd.f32 %v6061_v11, %v5879_v3 }
 0x3f1   : > { %v5791_v46 = vpop.f32.mrf.mxu1  ;;  %v10677_v53 = vpop.f32.mrf.mxu0 }
 0x3f2   : > { %v15538_v1 = vadd.f32 %v5791_v46, %v15387_v59  ;;  %v15540_v37 = vadd.f32 %v10665_v44, %v5882_v45  ;;  %v5415_v44 = vadd.f32 %v15361_v27, %v15415_v41 }
 0x3f3   : > { %v10634_v55 = vpop.f32.mrf.mxu1  ;;  %10837 = vmatmul.mubr.msk.bf16.gmra.mxu1 %vm4115_vm9, %v17580_v8  ;;  %v6112_v50 = vpop.f32.mrf.mxu0 }
 0x3f4   : > { %v5885_v52 = vadd.f32 %v10634_v55, %v15399_v19  ;;  %10840 = vmatprep.mubr.msk.bf16.mxu1 %vm4115_vm9, %v17581_v29 }
 0x3f5   : > { %v5804_v43 = vpop.f32.mrf.mxu1  ;;  %v10680_v28 = vpop.f32.mrf.mxu0 }
 0x3f6   : > { %v15548_v11 = vadd.f32 %v5804_v43, %v15401_v7  ;;  %v15550_v59 = vadd.f32 %v10668_v62, %v5885_v52  ;;  %v17582_v7 = vcombine.low %v15100_v36, %v15118_v39  ;;  %v17583_v52 = vld [vmem:[#allocation16_spill] sm:$0xff] }
 0x3f7   : > { %v10635_v3 = vpop.f32.mrf.mxu1  ;;  %v6125_v45 = vpop.f32.mrf.mxu0 }
 0x3f8   : > { %v5886_v14 = vadd.f32 %v10635_v3, %v15407_v63 }
 0x3f9   : > { %v5807_v46 = vpop.f32.mrf.mxu1  ;;  %v10681_v55 = vpop.f32.mrf.mxu0 }
 0x3fa   : > { %v15555_v19 = vadd.f32 %v5807_v46, %v5415_v44  ;;  %v15557_v8 = vadd.f32 %v10669_v6, %v5886_v14  ;;  %v5431_v44 = vadd.f32 %v15391_v9, %v15434_v57  ;;  %v11011_v57 = vld [vmem:[%s16577_s6 + $0x8] sm:$0xff]  }
 0x3fb   : > { %v10638_v29 = vpop.f32.mrf.mxu1  ;;  %10841 = vmatmul.mubr.msk.bf16.gmra.mxu1 %vm4115_vm9, %v17582_v7  ;;  %v6128_v27 = vpop.f32.mrf.mxu0  ;;  %10852 = vmatprep.subr.bf16.mxu0 %v11011_v57 }
 0x3fc   : > { %v5889_v62 = vadd.f32 %v10638_v29, %v15421_v21  ;;  %10844 = vmatprep.mubr.msk.bf16.mxu1 %vm4115_vm9, %v17583_v52  ;;  %10853 = vmatpush3.bf16.msra.mxu0 %v11011_v57 }
 0x3fd   : > { %v5820_v63 = vpop.f32.mrf.mxu1  ;;  %v10720_v43 = vpop.f32.mrf.mxu0 }
 0x3fe   : > { %v5887_v41 = vadd.f32 %v5820_v63, %v15427_v20  ;;  %v15567_v3 = vadd.f32 %v10672_v5, %v5889_v62  ;;  %v17584_v20 = vld [vmem:[#allocation137_spill] sm:$0xff] }
 0x3ff   : > { %v10639_v6 = vpop.f32.mrf.mxu1  ;;  %v6635_v39 = vpop.f32.mrf.mxu0 }
 0x400   : > { %v5890_v36 = vadd.f32 %v10639_v6, %v15432_v33  ;;  %v15572_v14 = vadd.f32 %v6093_v12, %v5887_v41 }
 0x401   : > { %v5823_v21 = vpop.f32.mrf.mxu1  ;;  %v15574_v29 = vpop.f32.mrf.mxu0 }
 0x402   : > { %v5888_v46 = vadd.f32 %v5823_v21, %v5431_v44  ;;  %v15576_v7 = vadd.f32 %v10673_v22, %v5890_v36 }
 0x403   : > { %v10642_v52 = vpop.f32.mrf.mxu1  ;;  %10845 = vmatmul.mubr.msk.bf16.gmra.mxu1 %vm4115_vm9, %v17584_v20  ;;  %v15583_v9 = vpop.f32.mrf.mxu0 }
 0x404   : > { %v5893_v5 = vadd.f32 %v10642_v52, %v15436_v2  ;;  %10848 = vmatprep.mubr.msk.bf16.mxu1 %vm4115_vm9, %v14949_v40  ;;  %v15585_v33 = vadd.f32 %v6096_v25, %v5888_v46  ;;  %v5447_v40 = vadd.f32 %v15409_v15, %v15448_v61  ;;  %v17586_v61 = vld [vmem:[#allocation138_spill] sm:$0xff] }
 0x405   : > { %v5836_v12 = vpop.f32.mrf.mxu1  ;;  %v10724_v62 = vpop.f32.mrf.mxu0 }
 0x406   : > { %v5891_v22 = vadd.f32 %v5836_v12, %v15442_v10  ;;  %v15591_v63 = vadd.f32 %v10676_v30, %v5893_v5  ;;  %v17585_v30 = vcombine.low %v15107_v34, %v15124_v26  ;;  %v17587_v12 = vld [vmem:[#allocation102_spill] sm:$0xff]  ;;  %v17588_v34 = vld [vmem:[#allocation91_spill] sm:$0xff] }
 0x407   : > { %v10643_v41 = vpop.f32.mrf.mxu1  ;;  %v6651_v25 = vpop.f32.mrf.mxu0  ;;  %v5463_v26 = vadd.f32 %v17588_v34, %v17587_v12  ;;  %v17592_v34 = vld [vmem:[#allocation68_spill] sm:$0xff] }
 0x408   : > { %v5894_v2 = vadd.f32 %v10643_v41, %v15446_v0  ;;  %v15596_v6 = vadd.f32 %v6109_v23, %v5891_v22  ;;  %v17589_v22 = vld [vmem:[#allocation106_spill] sm:$0xff] }
 0x409   : > { %v5839_v44 = vpop.f32.mrf.mxu1  ;;  %v15598_v21 = vpop.f32.mrf.mxu0 }
 0x40a   : > { %v5892_v36 = vadd.f32 %v5839_v44, %v5447_v40  ;;  %v15600_v46 = vadd.f32 %v10677_v53, %v5894_v2 }
 0x40b   : > { %v10646_v10 = vpop.f32.mrf.mxu1  ;;  %10849 = vmatmul.mubr.msk.bf16.gmra.mxu1 %vm4115_vm9, %v17585_v30  ;;  %v15609_v15 = vpop.f32.mrf.mxu0  ;;  %v17591_v30 = vld [vmem:[#allocation90_spill] sm:$0xff] }
 0x40c   : > { %v5897_v52 = vadd.f32 %v10646_v10, %v15453_v17  ;;  %10890 = vmatprep.mubr.msk.bf16.mxu1 %vm4115_vm9, %v17586_v61  ;;  %v15611_v0 = vadd.f32 %v6112_v50, %v5892_v36 }
 0x40d   : > { %v5852_v23 = vpop.f32.mrf.mxu1  ;;  %v10728_v53 = vpop.f32.mrf.mxu0 }
 0x40e   : > { %v5895_v20 = vadd.f32 %v5852_v23, %v15459_v56  ;;  %v15614_v5 = vadd.f32 %v10680_v28, %v5897_v52  ;;  %v17590_v56 = vld [vmem:[#allocation73_spill] sm:$0xff] }
 0x40f   : > { %v10647_v57 = vpop.f32.mrf.mxu1  ;;  %v6667_v17 = vpop.f32.mrf.mxu0 }
 0x410   : > { %v5898_v41 = vadd.f32 %v10647_v57, %v17589_v22  ;;  %v15619_v40 = vadd.f32 %v6125_v45, %v5895_v20 }
 0x411   : > { %v5855_v2 = vpop.f32.mrf.mxu1  ;;  %v15621_v10 = vpop.f32.mrf.mxu0 }
 0x412   : > { %v5896_v44 = vadd.f32 %v5855_v2, %v5463_v26  ;;  %v15623_v50 = vadd.f32 %v10681_v55, %v5898_v41 }
 0x413   : > { %v10686_v36 = vpop.f32.mrf.mxu1  ;;  %10891 = vmatmul.mubr.msk.bf16.vlgmr.msra.gmra.mxu1 %vm4115_vm9, %v17590_v56  ;;  %v15630_v52 = vpop.f32.mrf.mxu0 }
 0x414   : > { %v6479_v28 = vadd.f32 %v10686_v36, %v15474_v60  ;;  %10894 = vmatprep.mubr.msk.bf16.mxu1 %vm4115_vm9, %v17591_v30  ;;  %v15632_v61 = vadd.f32 %v6128_v27, %v5896_v44  ;;  %v6141_v60 = vadd.f32 %v17592_v34, %v15480_v38  ;;  %v17594_v36 = vld [vmem:[#allocation140_spill] sm:$0xff] }
 0x415   : > { %v6350_v45 = vpop.f32.mrf.mxu1  ;;  %v10732_v20 = vpop.f32.mrf.mxu0 }
 0x416   : > { %v6477_v23 = vadd.f32 %v6350_v45, %v15477_v58  ;;  %v15635_v57 = vadd.f32 %v10720_v43, %v6479_v28  ;;  %v17593_v58 = vld [vmem:[#allocation25_spill] sm:$0xff] }
 0x417   : > { %v10687_v55 = vpop.f32.mrf.mxu1  ;;  %v6683_v26 = vpop.f32.mrf.mxu0 }
 0x418   : > { %v15638_v12 = vadd.f32 %v10687_v55, %v15482_v42  ;;  %v15642_v22 = vadd.f32 %v6635_v39, %v6477_v23  ;;  %v17595_v23 = vld [vmem:[#allocation119_spill] sm:$0xff] }
 0x419   : > { %v6353_v41 = vpop.f32.mrf.mxu1  ;;  %v15646_v27 = vpop.f32.mrf.mxu0  ;;  %v6145_v55 = vadd.f32 %v17595_v23, %v15502_v51 }
 0x41a   : > { %v15644_v2 = vadd.f32 %v6353_v41, %v6141_v60 }
 0x41b   : > { %v10690_v44 = vpop.f32.mrf.mxu1  ;;  %10895 = vmatmul.mubr.msk.bf16.gmra.mxu1 %vm4115_vm9, %v17593_v58  ;;  %v15653_v42 = vpop.f32.mrf.mxu0 }
 0x41c   : > { %v6483_v43 = vadd.f32 %v10690_v44, %v15494_v4  ;;  %10898 = vmatprep.mubr.msk.bf16.mxu1 %vm4115_vm9, %v17594_v36 }
 0x41d   : > { %v6366_v38 = vpop.f32.mrf.mxu1  ;;  %v10736_v56 = vpop.f32.mrf.mxu0 }
 0x41e   : > { %v6481_v39 = vadd.f32 %v6366_v38, %v15499_v16  ;;  %v15656_v28 = vadd.f32 %v10724_v62, %v6483_v43  ;;  %v17597_v16 = vld [vmem:[#allocation112_spill] sm:$0xff]  ;;  %v17598_v43 = vld [vmem:[#allocation130_spill] sm:$0xff] }
 0x41f   : > { %v10691_v30 = vpop.f32.mrf.mxu1  ;;  %v6699_v34 = vpop.f32.mrf.mxu0 }
 0x420   : > { %v15659_v45 = vadd.f32 %v10691_v30, %v15504_v24  ;;  %v15663_v4 = vadd.f32 %v6651_v25, %v6481_v39  ;;  %v11012_v39 = vld [vmem:[%s16577_s6] sm:$0xff]  }
 0x421   : > { %v6369_v60 = vpop.f32.mrf.mxu1  ;;  %v15667_v44 = vpop.f32.mrf.mxu0  ;;  %10854 = vmatprep.subr.bf16.mxu0 %v11012_v39 }
 0x422   : > { %v15665_v41 = vadd.f32 %v6369_v60, %v6145_v55  ;;  %17596 = vst [vmem:[#allocation99_spill] sm:$0xff] %v15667_v44  ;;  %10855 = vmatpush3.bf16.msra.mxu0 %v11012_v39 }
 0x423   : > { %v10694_v58 = vpop.f32.mrf.mxu1  ;;  %10899 = vmatmul.mubr.msk.bf16.gmra.mxu1 %vm4115_vm9, %v17597_v16  ;;  %v15674_v24 = vpop.f32.mrf.mxu0 }
 0x424   : > { %v6487_v62 = vadd.f32 %v10694_v58, %v15514_v54  ;;  %10902 = vmatprep.mubr.msk.bf16.mxu1 %vm4115_vm9, %v17598_v43  ;;  %17599 = vst [vmem:[#allocation87_spill] sm:$0xff] %v15674_v24  ;;  %v17600_v54 = vld [vmem:[#allocation121_spill] sm:$0xff] }
 0x425   : > { %v6382_v51 = vpop.f32.mrf.mxu1  ;;  %v10740_v36 = vpop.f32.mrf.mxu0  ;;  %v6149_v55 = vadd.f32 %v17600_v54, %v15520_v13 }
 0x426   : > { %v6485_v25 = vadd.f32 %v6382_v51, %v15517_v47  ;;  %v15677_v38 = vadd.f32 %v10728_v53, %v6487_v62  ;;  %v17601_v62 = vld [vmem:[#allocation98_spill] sm:$0xff]  ;;  %v17603_v51 = vld [vmem:[#allocation108_spill] sm:$0xff] }
 0x427   : > { %v10695_v30 = vpop.f32.mrf.mxu1  ;;  %v6715_v60 = vpop.f32.mrf.mxu0 }
 0x428   : > { %v15683_v23 = vadd.f32 %v10695_v30, %v15522_v35  ;;  %v15687_v58 = vadd.f32 %v6667_v17, %v6485_v25 }
 0x429   : > { %v6385_v16 = vpop.f32.mrf.mxu1  ;;  %v15693_v43 = vpop.f32.mrf.mxu0 }
 0x42a   : > { %v15689_v47 = vadd.f32 %v6385_v16, %v6149_v55  ;;  %17602 = vst [vmem:[#allocation117_spill] sm:$0xff] %v15693_v43  ;;  %v6153_v55 = vadd.f32 %v15491_v31, %v15538_v1 }
 0x42b   : > { %v10698_v53 = vpop.f32.mrf.mxu1  ;;  %10903 = vmatmul.mubr.msk.bf16.gmra.mxu1 %vm4115_vm9, %v17601_v62  ;;  %v15701_v39 = vpop.f32.mrf.mxu0 }
 0x42c   : > { %v6491_v35 = vadd.f32 %v10698_v53, %v15532_v48  ;;  %10906 = vmatprep.mubr.msk.bf16.mxu1 %vm4115_vm9, %v17603_v51  ;;  %17604 = vst [vmem:[#allocation70_spill] sm:$0xff] %v15701_v39  ;;  %v17605_v51 = vld [vmem:[#allocation111_spill] sm:$0xff] }
 0x42d   : > { %v6398_v13 = vpop.f32.mrf.mxu1 }
 0x42e   : > { %v6489_v17 = vadd.f32 %v6398_v13, %v15535_v32  ;;  %v15699_v25 = vadd.f32 %v10732_v20, %v6491_v35  ;;  %v10744_v32 = vpop.f32.mrf.mxu0  ;;  %v6156_v20 = vadd.f32 %v15497_v49, %v15548_v11  ;;  %v17607_v49 = vld [vmem:[#allocation76_spill] sm:$0xff] }
 0x42f   : > { %v10699_v30 = vpop.f32.mrf.mxu1 }
 0x430   : > { %v15704_v54 = vadd.f32 %v10699_v30, %v15540_v37  ;;  %v15708_v16 = vadd.f32 %v6683_v26, %v6489_v17  ;;  %v17606_v37 = vld [vmem:[#allocation54_spill] sm:$0xff]  ;;  %v6731_v17 = vpop.f32.mrf.mxu0 }
 0x431   : > { %v6401_v48 = vpop.f32.mrf.mxu1 }
 0x432   : > { %v15710_v53 = vadd.f32 %v6401_v48, %v6153_v55  ;;  %v15730_v11 = vpop.f32.mrf.mxu0 }
 0x433   : > { %v10702_v62 = vpop.f32.mrf.mxu1  ;;  %10907 = vmatmul.mubr.msk.bf16.gmra.mxu1 %vm4115_vm9, %v17605_v51  ;;  %17608 = vst [vmem:[#allocation122_spill] sm:$0xff] %v15730_v11 }
 0x434   : > { %v6495_v35 = vadd.f32 %v10702_v62, %v15550_v59  ;;  %10910 = vmatprep.mubr.msk.bf16.mxu1 %vm4115_vm9, %v17606_v37  ;;  %v17609_v62 = vld [vmem:[#allocation78_spill] sm:$0xff] }
 0x435   : > { %v6414_v13 = vpop.f32.mrf.mxu1 }
 0x436   : > { %v6493_v31 = vadd.f32 %v6414_v13, %v6156_v20  ;;  %v15719_v1 = vadd.f32 %v10736_v56, %v6495_v35 }
 0x437   : > { %v10703_v26 = vpop.f32.mrf.mxu1 }
 0x438   : > { %v15722_v30 = vadd.f32 %v10703_v26, %v15557_v8  ;;  %v15724_v55 = vadd.f32 %v6699_v34, %v6493_v31  ;;  %v15738_v34 = vpop.f32.mrf.mxu0 }
 0x439   : > { %v15726_v48 = vpop.f32.mrf.mxu1  ;;  %17610 = vst [vmem:[#allocation95_spill] sm:$0xff] %v15738_v34 }
 0x43b   : > { %v10706_v51 = vpop.f32.mrf.mxu1  ;;  %10911 = vmatmul.mubr.msk.bf16.gmra.mxu1 %vm4115_vm9, %v17607_v49  ;;  %v17613_v49 = vld [vmem:[#allocation86_spill] sm:$0xff] }
 0x43c   : > { %v6499_v59 = vadd.f32 %v10706_v51, %v15567_v3  ;;  %10914 = vmatprep.mubr.msk.bf16.mxu1 %vm4115_vm9, %v17609_v62  ;;  %v10748_v3 = vpop.f32.mrf.mxu0 }
 0x43d   : > { %v6430_v56 = vpop.f32.mrf.mxu1 }
 0x43e   : > { %v6497_v20 = vadd.f32 %v6430_v56, %v15572_v14  ;;  %v15736_v8 = vadd.f32 %v10740_v36, %v6499_v59  ;;  %v17614_v36 = vld [vmem:[#allocation83_spill] sm:$0xff] }
 0x43f   : > { %v10707_v35 = vpop.f32.mrf.mxu1 }
 0x440   : > { %v15741_v37 = vadd.f32 %v10707_v35, %v15576_v7  ;;  %v15743_v13 = vadd.f32 %v6715_v60, %v6497_v20  ;;  %v6747_v60 = vpop.f32.mrf.mxu0 }
 0x441   : > { %v6433_v31 = vpop.f32.mrf.mxu1 }
 0x442   : > { %17611 = vst [vmem:[#allocation126_spill] sm:$0xff] %v15741_v37  ;;  %v15746_v26 = vadd.f32 %v6433_v31, %v15585_v33 }
 0x443   : > { %v10710_v51 = vpop.f32.mrf.mxu1  ;;  %10915 = vmatmul.mubr.msk.bf16.gmra.mxu1 %vm4115_vm9, %v17613_v49  ;;  %v17618_v49 = vld [vmem:[#allocation107_spill] sm:$0xff] }
 0x444   : > { %17612 = vst [vmem:[#allocation28_spill] sm:$0xff] %v15746_v26  ;;  %v6503_v14 = vadd.f32 %v10710_v51, %v15591_v63  ;;  %10918 = vmatprep.mubr.msk.bf16.mxu1 %vm4115_vm9, %v17614_v36  ;;  %v15764_v63 = vpop.f32.mrf.mxu0 }
 0x445   : > { %v6446_v59 = vpop.f32.mrf.mxu1  ;;  %17617 = vst [vmem:[#allocation55_spill] sm:$0xff] %v15764_v63 }
 0x446   : > { %v6501_v7 = vadd.f32 %v6446_v59, %v15596_v6  ;;  %v15754_v62 = vadd.f32 %v10744_v32, %v6503_v14 }
 0x447   : > { %v10711_v56 = vpop.f32.mrf.mxu1 }
 0x448   : > { %v15757_v33 = vadd.f32 %v10711_v56, %v15600_v46  ;;  %v15759_v20 = vadd.f32 %v6731_v17, %v6501_v7  ;;  %v15772_v46 = vpop.f32.mrf.mxu0 }
 0x449   : > { %v6449_v35 = vpop.f32.mrf.mxu1  ;;  %17619 = vst [vmem:[#allocation33_spill] sm:$0xff] %v15772_v46 }
 0x44a   : > { %17615 = vst [vmem:[#allocation129_spill] sm:$0xff] %v15757_v33  ;;  %v15762_v31 = vadd.f32 %v6449_v35, %v15611_v0  ;;  %v15782_v35 = vpop.f32.mrf.mxu0 }
 0x44b   : > { %v10714_v51 = vpop.f32.mrf.mxu1  ;;  %10919 = vmatmul.mubr.msk.bf16.gmra.mxu1 %vm4115_vm9, %v17618_v49 }
 0x44c   : > { %17616 = vst [vmem:[#allocation124_spill] sm:$0xff] %v15762_v31  ;;  %v6507_v6 = vadd.f32 %v10714_v51, %v15614_v5  ;;  %v15790_v49 = vpop.f32.mrf.mxu0 }
 0x44d   : > { %v6462_v32 = vpop.f32.mrf.mxu1 }
 0x44e   : > { %v6505_v14 = vadd.f32 %v6462_v32, %v15619_v40  ;;  %v15770_v36 = vadd.f32 %v10748_v3, %v6507_v6 }
 0x44f   : > { %v10715_v17 = vpop.f32.mrf.mxu1 }
 0x450   : > { %v15775_v59 = vadd.f32 %v10715_v17, %v15623_v50  ;;  %v15777_v0 = vadd.f32 %v6747_v60, %v6505_v14  ;;  %v15794_v60 = vpop.f32.mrf.mxu0 }
 0x451   : > { %v6465_v7 = vpop.f32.mrf.mxu1 }
 0x452   : > { %17620 = vst [vmem:[#allocation92_spill] sm:$0xff] %v15775_v59  ;;  %v15780_v56 = vadd.f32 %v6465_v7, %v15632_v61 }
 0x453   : > { %v10754_v5 = vpop.f32.mrf.mxu1 }
 0x454   : > { %17621 = vst [vmem:[#allocation116_spill] sm:$0xff] %v15780_v56  ;;  %v15785_v51 = vadd.f32 %v10754_v5, %v15635_v57  ;;  %v15802_v57 = vpop.f32.mrf.mxu0 }
 0x455   : > { %v6860_v40 = vpop.f32.mrf.mxu1 }
 0x456   : > { %v15788_v3 = vadd.f32 %v6860_v40, %v15642_v22  ;;  %v15808_v5 = vpop.f32.mrf.mxu0 }
 0x457   : > { %v10755_v50 = vpop.f32.mrf.mxu1 }
 0x459   : > { %v15792_v6 = vpop.f32.mrf.mxu1 }
 0x45b   : > { %v10758_v32 = vpop.f32.mrf.mxu1 }
 0x45c   : > { %v15797_v61 = vadd.f32 %v10758_v32, %v15656_v28  ;;  %v15816_v32 = vpop.f32.mrf.mxu0 }
 0x45d   : > { %v6876_v14 = vpop.f32.mrf.mxu1 }
 0x45e   : > { %v15800_v17 = vadd.f32 %v6876_v14, %v15663_v4  ;;  %v15822_v63 = vpop.f32.mrf.mxu0 }
 0x45f   : > { %v15804_v7 = vpop.f32.mrf.mxu1 }
 0x461   : > { %v15806_v22 = vpop.f32.mrf.mxu1 }
 0x463   : > { %v10762_v40 = vpop.f32.mrf.mxu1 }
 0x464   : > { %v15811_v46 = vadd.f32 %v10762_v40, %v15677_v38  ;;  %v15830_v40 = vpop.f32.mrf.mxu0 }
 0x465   : > { %v6892_v56 = vpop.f32.mrf.mxu1 }
 0x466   : > { %v15814_v28 = vadd.f32 %v6892_v56, %v15687_v58  ;;  %v15836_v11 = vpop.f32.mrf.mxu0 }
 0x467   : > { %v15818_v4 = vpop.f32.mrf.mxu1 }
 0x469   : > { %v15820_v14 = vpop.f32.mrf.mxu1 }
 0x46b   : > { %v10766_v59 = vpop.f32.mrf.mxu1 }
 0x46c   : > { %v15825_v34 = vadd.f32 %v10766_v59, %v15699_v25  ;;  %v15844_v59 = vpop.f32.mrf.mxu0 }
 0x46d   : > { %v6908_v31 = vpop.f32.mrf.mxu1 }
 0x46e   : > { %v15828_v38 = vadd.f32 %v6908_v31, %v15708_v16  ;;  %v15850_v43 = vpop.f32.mrf.mxu0 }
 0x46f   : > { %v15832_v58 = vpop.f32.mrf.mxu1 }
 0x471   : > { %v15834_v56 = vpop.f32.mrf.mxu1 }
 0x473   : > { %v10770_v33 = vpop.f32.mrf.mxu1 }
 0x474   : > { %v15839_v39 = vadd.f32 %v10770_v33, %v15719_v1  ;;  %v15858_v33 = vpop.f32.mrf.mxu0 }
 0x475   : > { %v6924_v26 = vpop.f32.mrf.mxu1 }
 0x476   : > { %17622 = vst [vmem:[#allocation114_spill] sm:$0xff] %v15839_v39  ;;  %v15842_v25 = vadd.f32 %v6924_v26, %v15724_v55 }
 0x477   : > { %v15846_v16 = vpop.f32.mrf.mxu1 }
 0x478   : > { %17623 = vst [vmem:[#allocation127_spill] sm:$0xff] %v15842_v25  ;;  %17624 = vst [vmem:[#allocation29_spill] sm:$0xff] %v15846_v16  ;;  %v15864_v25 = vpop.f32.mrf.mxu0 }
 0x479   : > { %v15848_v31 = vpop.f32.mrf.mxu1 }
 0x47a   : > { %17625 = vst [vmem:[#allocation133_spill] sm:$0xff] %v15848_v31 }
 0x47b   : > { %v10774_v37 = vpop.f32.mrf.mxu1 }
 0x47c   : > { %v15853_v24 = vadd.f32 %v10774_v37, %v15736_v8  ;;  %v15872_v37 = vpop.f32.mrf.mxu0 }
 0x47d   : > { %v6940_v44 = vpop.f32.mrf.mxu1 }
 0x47e   : > { %17626 = vst [vmem:[#allocation32_spill] sm:$0xff] %v15853_v24  ;;  %v15856_v1 = vadd.f32 %v6940_v44, %v15743_v13 }
 0x47f   : > { %v15860_v55 = vpop.f32.mrf.mxu1 }
 0x480   : > { %17627 = vst [vmem:[#allocation66_spill] sm:$0xff] %v15856_v1  ;;  %17628 = vst [vmem:[#allocation104_spill] sm:$0xff] %v15860_v55  ;;  %v15878_v1 = vpop.f32.mrf.mxu0 }
 0x481   : > { %v15862_v26 = vpop.f32.mrf.mxu1 }
 0x482   : > { %17629 = vst [vmem:[#allocation81_spill] sm:$0xff] %v15862_v26 }
 0x483   : > { %v10778_v39 = vpop.f32.mrf.mxu1 }
 0x484   : > { %v15867_v31 = vadd.f32 %v10778_v39, %v15754_v62  ;;  %v15886_v62 = vpop.f32.mrf.mxu0 }
 0x485   : > { %v6956_v16 = vpop.f32.mrf.mxu1 }
 0x486   : > { %17630 = vst [vmem:[#allocation37_spill] sm:$0xff] %v15867_v31  ;;  %v15870_v8 = vadd.f32 %v6956_v16, %v15759_v20  ;;  %v6765_v16 = vadd.f32 %v15574_v29, %v15638_v12  ;;  %v6763_v31 = vadd.f32 %v15583_v9, %v15644_v2  ;;  %v15906_v29 = vld [vmem:[%s16575_s4] ss:$0 sm:$0xff]  ;;  %v6769_v2 = vadd.f32 %v15598_v21, %v15659_v45 }
 0x487   : > { %v15874_v44 = vpop.f32.mrf.mxu1  ;;  %v7282_v21 = vadd.f32 %v15808_v5, %v15797_v61 }
 0x488   : > { %17631 = vst [vmem:[#allocation132_spill] sm:$0xff] %v15870_v8 }
 0x489   : > { %v15876_v13 = vpop.f32.mrf.mxu1 }
 0x48a   : > { %17632 = vst [vmem:[#allocation136_spill] sm:$0xff] %v15876_v13  ;;  %v6990_v13 = vadd.f32 %v10755_v50, %v6765_v16  ;;  %v6767_v16 = vadd.f32 %v15609_v15, %v15665_v41  ;;  %v17636_v15 = vld [vmem:[#allocation11_spill] sm:$0xff] }
 0x48b   : > { %v10782_v24 = vpop.f32.mrf.mxu1 }
 0x48c   : > { %v15881_v26 = vadd.f32 %v10782_v24, %v15770_v36  ;;  %v7278_v24 = vadd.f32 %v15782_v35, %v15785_v51  ;;  %v15898_v36 = vpop.f32.mrf.mxu0  ;;  %v7279_v9 = vadd.f32 %v15794_v60, %v6990_v13  ;;  %v6992_v45 = vadd.f32 %v15806_v22, %v6767_v16  ;;  %v17638_v22 = vld [vmem:[#allocation9_spill] sm:$0xff] }
 0x48d   : > { %v6972_v55 = vpop.f32.mrf.mxu1  ;;  %v6773_v16 = vadd.f32 %v15621_v10, %v15683_v23  ;;  %v7286_v23 = vadd.f32 %v15836_v11, %v15811_v46  ;;  %v17641_v46 = vld [vmem:[#allocation12_spill] sm:$0xff] }
 0x48e   : > { %17633 = vst [vmem:[#allocation82_spill] sm:$0xff] %v15881_v26  ;;  %v15884_v39 = vadd.f32 %v6972_v55, %v15777_v0  ;;  %v6988_v55 = vadd.f32 %v15792_v6, %v6763_v31  ;;  %v7276_v26 = vadd.f32 %v15790_v49, %v15788_v3  ;;  %v15911_v35 = vpop.f32.mrf.mxu0  ;;  %v6994_v49 = vadd.f32 %v15804_v7, %v6769_v2  ;;  %v17635_v7 = vld [vmem:[#allocation10_spill] sm:$0xff] }
 0x48f   : > { %v15888_v20 = vpop.f32.mrf.mxu1 }
 0x490   : > { %17634 = vst [vmem:[#allocation26_spill] sm:$0xff] %v15884_v39  ;;  %v7277_v3 = vadd.f32 %v15802_v57, %v6988_v55  ;;  %v7280_v57 = vadd.f32 %v15816_v32, %v15800_v17  ;;  %v7283_v2 = vadd.f32 %v15822_v63, %v6994_v49  ;;  %v6998_v63 = vadd.f32 %v15818_v4, %v6773_v16 }
 0x491   : > { %v15892_v8 = vpop.f32.mrf.mxu1  ;;  %v6771_v49 = vadd.f32 %v15630_v52, %v15689_v47  ;;  %v7284_v52 = vadd.f32 %v15844_v59, %v15814_v28  ;;  %v17639_v47 = vld [vmem:[#allocation14_spill] sm:$0xff] }
 0x492   : > { %v7287_v11 = vadd.f32 %v15850_v43, %v6998_v63 }
 0x493   : > { %v10822_v0 = vpop.f32.mrf.mxu1 }
 0x494   : > { %v7515_v39 = vadd.f32 %v10822_v0, %v7278_v24 }
 0x495   : > { %v7386_v12 = vpop.f32.mrf.mxu1 }
 0x496   : > { %v7513_v50 = vadd.f32 %v7386_v12, %v7276_v26  ;;  %v7554_v6 = vadd.f32 %v15906_v29, %v7515_v39  ;;  %v15923_v39 = vpop.f32.mrf.mxu0 }
 0x497   : > { %v10823_v51 = vpop.f32.mrf.mxu1 }
 0x498   : > { %v7516_v31 = vadd.f32 %v10823_v51, %v7279_v9  ;;  %v7552_v26 = vadd.f32 %v15906_v29, %v7513_v50  ;;  %v7586_v55 = vsub.f32 %v17635_v7, %v7554_v6  ;;  %v17637_v51 = vld [vmem:[#allocation8_spill] sm:$0xff]  ;;  %v15935_v17 = vpop.f32.mrf.mxu0 }
 0x499   : > { %v7389_v24 = vpop.f32.mrf.mxu1 }
 0x49a   : > { %v7555_v60 = vadd.f32 %v15906_v29, %v7516_v31  ;;  %v7514_v13 = vadd.f32 %v7389_v24, %v7277_v3  ;;  %v7584_v61 = vsub.f32 %v17637_v51, %v7552_v26 }
 0x49b   : > { %v10826_v0 = vpop.f32.mrf.mxu1 }
 0x49c   : > { %v7587_v41 = vsub.f32 %v17636_v15, %v7555_v60  ;;  %v7553_v12 = vadd.f32 %v15906_v29, %v7514_v13  ;;  %v7519_v50 = vadd.f32 %v10826_v0, %v7282_v21  ;;  %v7281_v13 = vadd.f32 %v15830_v40, %v6992_v45  ;;  %v17640_v45 = vld [vmem:[#allocation57_spill] sm:$0xff] }
 0x49d   : > { %v7402_v9 = vpop.f32.mrf.mxu1 }
 0x49e   : > { %v7619_v5 = vpack.c.bf16 %v7587_v41, %v7586_v55  ;;  %v7585_v31 = vsub.f32 %v17638_v22, %v7553_v12  ;;  %v7517_v3 = vadd.f32 %v7402_v9, %v7280_v57  ;;  %v7558_v24 = vadd.f32 %v15906_v29, %v7519_v50  ;;  %v15948_v55 = vpop.f32.mrf.mxu0 }
 0x49f   : > { %v10827_v32 = vpop.f32.mrf.mxu1  ;;  %v6996_v57 = vadd.f32 %v15820_v14, %v6771_v49 }
 0x4a0   : > { %v7618_v6 = vpack.c.bf16 %v7585_v31, %v7584_v61  ;;  %v7520_v60 = vadd.f32 %v10827_v32, %v7283_v2  ;;  %v7556_v21 = vadd.f32 %v15906_v29, %v7517_v3  ;;  %v7590_v4 = vsub.f32 %v17639_v47, %v7558_v24  ;;  %v17642_v61 = vld [vmem:[#allocation13_spill] sm:$0xff]  ;;  %v15961_v28 = vpop.f32.mrf.mxu0 }
 0x4a1   : > { %v7405_v26 = vpop.f32.mrf.mxu1  ;;  %v7285_v24 = vadd.f32 %v15858_v33, %v6996_v57 }
 0x4a2   : > { %v7559_v0 = vadd.f32 %v15906_v29, %v7520_v60  ;;  %v7518_v10 = vadd.f32 %v7405_v26, %v7281_v13  ;;  %10856 = vmatprep.mubr.msk.bf16.mxu0 %vm472_vm0, %v7618_v6  ;;  %v7588_v14 = vsub.f32 %v17641_v46, %v7556_v21  ;;  %v6775_v60 = vadd.f32 %v15653_v42, %v15710_v53  ;;  %v17643_v53 = vld [vmem:[#allocation18_spill] sm:$0xff] }
 0x4a3   : > { %v10830_v40 = vpop.f32.mrf.mxu1  ;;  %10857 = vmatmul.mubr.msk.bf16.vlgmr.msra.gmra.mxu0 %vm472_vm0, %v7619_v5  ;;  %v6777_v5 = vadd.f32 %v15646_v27, %v15704_v54  ;;  %v7290_v54 = vadd.f32 %v15864_v25, %v15825_v34  ;;  %v6157_v26 = vadd.f32 %v15511_v18, %v15555_v19  ;;  %v7288_v42 = vadd.f32 %v15872_v37, %v15828_v38  ;;  %v17647_v38 = vld [vmem:[#allocation99_spill] sm:$0xff] }
 0x4a4   : > { %v7591_v41 = vsub.f32 %v17640_v45, %v7559_v0  ;;  %v7557_v12 = vadd.f32 %v15906_v29, %v7518_v10  ;;  %v7523_v50 = vadd.f32 %v10830_v40, %v7286_v23  ;;  %v7000_v33 = vadd.f32 %v15834_v56, %v6775_v60  ;;  %v17644_v10 = vld [vmem:[#allocation19_spill] sm:$0xff]  ;;  %v17651_v60 = vld [vmem:[#allocation133_spill] sm:$0xff] }
 0x4a5   : > { %v7418_v9 = vpop.f32.mrf.mxu1  ;;  %v7002_v43 = vadd.f32 %v15832_v58, %v6777_v5  ;;  %v15976_v58 = vpop.f32.mrf.mxu0  ;;  %v6494_v25 = vadd.f32 %v15726_v48, %v6157_v26  ;;  %v17645_v56 = vld [vmem:[#allocation15_spill] sm:$0xff]  ;;  %v6781_v37 = vadd.f32 %v17647_v38, %v15722_v30  ;;  %v17650_v30 = vld [vmem:[#allocation114_spill] sm:$0xff] }
 0x4a6   : > { %v7621_v2 = vpack.c.bf16 %v7591_v41, %v7590_v4  ;;  %v7589_v31 = vsub.f32 %v17642_v61, %v7557_v12  ;;  %v7521_v3 = vadd.f32 %v7418_v9, %v7284_v52  ;;  %v7562_v32 = vadd.f32 %v15906_v29, %v7523_v50  ;;  %v17646_v4 = vld [vmem:[#allocation17_spill] sm:$0xff]  ;;  %v17654_v26 = vld [vmem:[#allocation58_spill] sm:$0xff] }
 0x4a7   : > { %v10831_v59 = vpop.f32.mrf.mxu1  ;;  %v7291_v19 = vadd.f32 %v15878_v1, %v7002_v43  ;;  %v15988_v50 = vpop.f32.mrf.mxu0  ;;  %v7289_v48 = vadd.f32 %v15886_v62, %v7000_v33  ;;  %v17652_v62 = vld [vmem:[#allocation127_spill] sm:$0xff] }
 0x4a8   : > { %v7620_v16 = vpack.c.bf16 %v7589_v31, %v7588_v14  ;;  %v7524_v6 = vadd.f32 %v10831_v59, %v7287_v11  ;;  %v7560_v63 = vadd.f32 %v15906_v29, %v7521_v3  ;;  %v7594_v0 = vsub.f32 %v17643_v53, %v7562_v32  ;;  %v17648_v31 = vld [vmem:[#allocation29_spill] sm:$0xff]  ;;  %v17649_v3 = vld [vmem:[#allocation87_spill] sm:$0xff] }
 0x4a9   : > { %v7421_v13 = vpop.f32.mrf.mxu1  ;;  %v7006_v1 = vadd.f32 %v17648_v31, %v6781_v37  ;;  %v6779_v5 = vadd.f32 %v17649_v3, %v6494_v25  ;;  %v10812_v43 = vpop.f32.mrf.mxu0  ;;  %v17656_v25 = vld [vmem:[#allocation21_spill] sm:$0xff] }
 0x4aa   : > { %v7563_v49 = vadd.f32 %v15906_v29, %v7524_v6  ;;  %v7522_v27 = vadd.f32 %v7421_v13, %v7285_v24  ;;  %10860 = vmatprep.mubr.msk.bf16.mxu0 %vm472_vm0, %v7620_v16  ;;  %v7592_v40 = vsub.f32 %v17645_v56, %v7560_v63  ;;  %v7294_v24 = vadd.f32 %v15898_v36, %v17650_v30  ;;  %v17655_v36 = vld [vmem:[#allocation20_spill] sm:$0xff]  ;;  %v17663_v30 = vld [vmem:[#allocation81_spill] sm:$0xff] }
 0x4ab   : > { %v10834_v21 = vpop.f32.mrf.mxu1  ;;  %10861 = vmatmul.mubr.msk.bf16.gmra.mxu0 %vm472_vm0, %v7621_v2  ;;  %v7004_v13 = vadd.f32 %v17651_v60, %v6779_v5  ;;  %v17664_v60 = vld [vmem:[#allocation66_spill] sm:$0xff] }
 0x4ac   : > { %v7595_v23 = vsub.f32 %v17644_v10, %v7563_v49  ;;  %v7561_v57 = vadd.f32 %v15906_v29, %v7522_v27  ;;  %v7527_v34 = vadd.f32 %v10834_v21, %v7290_v54  ;;  %v7292_v49 = vadd.f32 %v15911_v35, %v17652_v62  ;;  %v17653_v27 = vld [vmem:[#allocation22_spill] sm:$0xff] }
 0x4ad   : > { %v7434_v18 = vpop.f32.mrf.mxu1 }
 0x4ae   : > { %v7623_v52 = vpack.c.bf16 %v7595_v23, %v7594_v0  ;;  %v7593_v41 = vsub.f32 %v17646_v4, %v7561_v57  ;;  %v7525_v12 = vadd.f32 %v7434_v18, %v7288_v42  ;;  %v7566_v14 = vadd.f32 %v15906_v29, %v7527_v34 }
 0x4af   : > { %v10835_v9 = vpop.f32.mrf.mxu1  ;;  %v7295_v23 = vadd.f32 %v15923_v39, %v7006_v1  ;;  %v17660_v39 = vld [vmem:[#allocation28_spill] sm:$0xff] }
 0x4b0   : > { %v7622_v11 = vpack.c.bf16 %v7593_v41, %v7592_v40  ;;  %v7528_v2 = vadd.f32 %v10835_v9, %v7291_v19  ;;  %v7564_v16 = vadd.f32 %v15906_v29, %v7525_v12  ;;  %v7598_v54 = vsub.f32 %v17653_v27, %v7566_v14  ;;  %v7245_v40 = vpop.f32.mrf.mxu0  ;;  %v17658_v41 = vld [vmem:[#allocation117_spill] sm:$0xff]  ;;  %v17659_v14 = vld [vmem:[#allocation104_spill] sm:$0xff] }
 0x4b1   : > { %v7437_v59 = vpop.f32.mrf.mxu1 }
 0x4b2   : > { %v7567_v32 = vadd.f32 %v15906_v29, %v7528_v2  ;;  %v7526_v6 = vadd.f32 %v7437_v59, %v7289_v48  ;;  %10864 = vmatprep.mubr.msk.bf16.mxu0 %vm472_vm0, %v7622_v11  ;;  %v7596_v57 = vsub.f32 %v17655_v36, %v7564_v16  ;;  %v7293_v11 = vadd.f32 %v15935_v17, %v7004_v13  ;;  %v17661_v48 = vld [vmem:[#allocation70_spill] sm:$0xff]  ;;  %v17662_v16 = vld [vmem:[#allocation32_spill] sm:$0xff] }
 0x4b3   : > { %v10838_v63 = vpop.f32.mrf.mxu1  ;;  %10865 = vmatmul.mubr.msk.bf16.gmra.mxu0 %vm472_vm0, %v7623_v52  ;;  %v17657_v52 = vld [vmem:[#allocation126_spill] sm:$0xff]  ;;  %v6783_v31 = vadd.f32 %v17661_v48, %v17660_v39  ;;  %v7296_v13 = vadd.f32 %v15961_v28, %v17664_v60 }
 0x4b4   : > { %v7599_v33 = vsub.f32 %v17654_v26, %v7567_v32  ;;  %v7565_v21 = vadd.f32 %v15906_v29, %v7526_v6  ;;  %v7531_v42 = vadd.f32 %v10838_v63, %v7294_v24  ;;  %v6785_v35 = vadd.f32 %v17658_v41, %v17657_v52  ;;  %v10813_v6 = vpop.f32.mrf.mxu0  ;;  %v17665_v63 = vld [vmem:[#allocation31_spill] sm:$0xff]  ;;  %v17669_v41 = vld [vmem:[#allocation129_spill] sm:$0xff] }
 0x4b5   : > { %v7450_v0 = vpop.f32.mrf.mxu1  ;;  %v7298_v32 = vadd.f32 %v15948_v55, %v17662_v16  ;;  %v7008_v24 = vadd.f32 %v17663_v30, %v6783_v31  ;;  %v17667_v55 = vld [vmem:[#allocation23_spill] sm:$0xff] }
 0x4b6   : > { %v7625_v34 = vpack.c.bf16 %v7599_v33, %v7598_v54  ;;  %v7597_v18 = vsub.f32 %v17656_v25, %v7565_v21  ;;  %v7529_v19 = vadd.f32 %v7450_v0, %v7292_v49  ;;  %v7570_v37 = vadd.f32 %v15906_v29, %v7531_v42  ;;  %v17666_v49 = vld [vmem:[#allocation35_spill] sm:$0xff] }
 0x4b7   : > { %v10839_v12 = vpop.f32.mrf.mxu1  ;;  %v7010_v2 = vadd.f32 %v17659_v14, %v6785_v35  ;;  %v17670_v35 = vld [vmem:[#allocation122_spill] sm:$0xff] }
 0x4b8   : > { %v7624_v38 = vpack.c.bf16 %v7597_v18, %v7596_v57  ;;  %v7532_v9 = vadd.f32 %v10839_v12, %v7295_v23  ;;  %v7568_v3 = vadd.f32 %v15906_v29, %v7529_v19  ;;  %v7602_v62 = vsub.f32 %v17665_v63, %v7570_v37  ;;  %v17668_v18 = vld [vmem:[#allocation24_spill] sm:$0xff] }
 0x4b9   : > { %v7453_v1 = vpop.f32.mrf.mxu1  ;;  %v7299_v0 = vadd.f32 %v15976_v58, %v7010_v2  ;;  %v6789_v28 = vadd.f32 %v17670_v35, %v17669_v41  ;;  %v17671_v58 = vld [vmem:[#allocation124_spill] sm:$0xff]  ;;  %v17672_v2 = vld [vmem:[#allocation95_spill] sm:$0xff] }
 0x4ba   : > { %v7571_v5 = vadd.f32 %v15906_v29, %v7532_v9  ;;  %v7530_v59 = vadd.f32 %v7453_v1, %v7293_v11  ;;  %10868 = vmatprep.mubr.msk.bf16.mxu0 %vm472_vm0, %v7624_v38  ;;  %v7600_v23 = vsub.f32 %v17667_v55, %v7568_v3  ;;  %v7297_v11 = vadd.f32 %v15988_v50, %v7008_v24  ;;  %v17676_v24 = vld [vmem:[#allocation39_spill] sm:$0xff] }
 0x4bb   : > { %v10842_v17 = vpop.f32.mrf.mxu1  ;;  %10869 = vmatmul.mubr.msk.bf16.gmra.mxu0 %vm472_vm0, %v7625_v34  ;;  %v7248_v34 = vpop.f32.mrf.mxu0  ;;  %v7014_v14 = vadd.f32 %v15874_v44, %v6789_v28  ;;  %v6787_v39 = vadd.f32 %v17672_v2, %v17671_v58  ;;  %v17675_v44 = vld [vmem:[#allocation132_spill] sm:$0xff] }
 0x4bc   : > { %v7603_v54 = vsub.f32 %v17666_v49, %v7571_v5  ;;  %v7569_v33 = vadd.f32 %v15906_v29, %v7530_v59  ;;  %v7535_v21 = vadd.f32 %v10842_v17, %v7298_v32  ;;  %v17673_v5 = vld [vmem:[#allocation37_spill] sm:$0xff]  ;;  %v17674_v32 = vld [vmem:[#allocation136_spill] sm:$0xff]  ;;  %v7300_v50 = vadd.f32 %v7245_v40, %v17675_v44 }
 0x4bd   : > { %v7466_v42 = vpop.f32.mrf.mxu1  ;;  %v7302_v59 = vadd.f32 %v10812_v43, %v17673_v5  ;;  %v10816_v16 = vpop.f32.mrf.mxu0  ;;  %v7012_v30 = vadd.f32 %v17674_v32, %v6787_v39  ;;  %v17680_v28 = vld [vmem:[#allocation92_spill] sm:$0xff] }
 0x4be   : > { %v7627_v57 = vpack.c.bf16 %v7603_v54, %v7602_v62  ;;  %v7601_v19 = vsub.f32 %v17668_v18, %v7569_v33  ;;  %v7533_v52 = vadd.f32 %v7466_v42, %v7296_v13  ;;  %v7574_v37 = vadd.f32 %v15906_v29, %v7535_v21  ;;  %v17677_v13 = vld [vmem:[#allocation63_spill] sm:$0xff]  ;;  %v17682_v2 = vld [vmem:[#allocation116_spill] sm:$0xff] }
 0x4bf   : > { %v10843_v12 = vpop.f32.mrf.mxu1  ;;  %v7303_v42 = vadd.f32 %v10813_v6, %v7014_v14  ;;  %v7261_v35 = vpop.f32.mrf.mxu0  ;;  %v17683_v6 = vld [vmem:[#allocation33_spill] sm:$0xff] }
 0x4c0   : > { %v7626_v38 = vpack.c.bf16 %v7601_v19, %v7600_v23  ;;  %v7536_v9 = vadd.f32 %v10843_v12, %v7299_v0  ;;  %v7572_v31 = vadd.f32 %v15906_v29, %v7533_v52  ;;  %v7606_v60 = vsub.f32 %v17676_v24, %v7574_v37  ;;  %v17678_v0 = vld [vmem:[#allocation36_spill] sm:$0xff]  ;;  %v17679_v19 = vld [vmem:[#allocation38_spill] sm:$0xff] }
 0x4c1   : > { %v7469_v48 = vpop.f32.mrf.mxu1  ;;  %v6791_v14 = vadd.f32 %v17683_v6, %v17682_v2  ;;  %v17691_v6 = vld [vmem:[#allocation64_spill] sm:$0xff] }
 0x4c2   : > { %v7575_v1 = vadd.f32 %v15906_v29, %v7536_v9  ;;  %v7534_v3 = vadd.f32 %v7469_v48, %v7297_v11  ;;  %10872 = vmatprep.mubr.msk.bf16.mxu0 %vm472_vm0, %v7626_v38  ;;  %v7604_v23 = vsub.f32 %v17678_v0, %v7572_v31  ;;  %v7301_v11 = vadd.f32 %v7248_v34, %v7012_v30  ;;  %v17686_v30 = vld [vmem:[#allocation42_spill] sm:$0xff] }
 0x4c3   : > { %v10846_v17 = vpop.f32.mrf.mxu1  ;;  %10873 = vmatmul.mubr.msk.bf16.gmra.mxu0 %vm472_vm0, %v7627_v57  ;;  %v17681_v57 = vld [vmem:[#allocation55_spill] sm:$0xff]  ;;  %v7016_v32 = vadd.f32 %v15892_v8, %v6791_v14 }
 0x4c4   : > { %v7607_v62 = vsub.f32 %v17677_v13, %v7575_v1  ;;  %v7573_v54 = vadd.f32 %v15906_v29, %v7534_v3  ;;  %v7539_v33 = vadd.f32 %v10846_v17, %v7302_v59  ;;  %v6793_v12 = vadd.f32 %v17681_v57, %v17680_v28  ;;  %v17684_v3 = vld [vmem:[#allocation82_spill] sm:$0xff]  ;;  %v10817_v59 = vpop.f32.mrf.mxu0 }
 0x4c5   : > { %v7482_v21 = vpop.f32.mrf.mxu1  ;;  %v7306_v5 = vadd.f32 %v10816_v16, %v17684_v3  ;;  %v17693_v3 = vld [vmem:[#allocation45_spill] sm:$0xff] }
 0x4c6   : > { %v7629_v43 = vpack.c.bf16 %v7607_v62, %v7606_v60  ;;  %v7605_v52 = vsub.f32 %v17679_v19, %v7573_v54  ;;  %v7537_v41 = vadd.f32 %v7482_v21, %v7300_v50  ;;  %v7578_v37 = vadd.f32 %v15906_v29, %v7539_v33  ;;  %v17687_v50 = vld [vmem:[#allocation43_spill] sm:$0xff]  ;;  %v7264_v28 = vpop.f32.mrf.mxu0 }
 0x4c7   : > { %v10847_v40 = vpop.f32.mrf.mxu1  ;;  %v7018_v58 = vadd.f32 %v15888_v20, %v6793_v12  ;;  %v17685_v20 = vld [vmem:[#allocation26_spill] sm:$0xff] }
 0x4c8   : > { %v7628_v38 = vpack.c.bf16 %v7605_v52, %v7604_v23  ;;  %v7540_v9 = vadd.f32 %v10847_v40, %v7303_v42  ;;  %v7576_v48 = vadd.f32 %v15906_v29, %v7537_v41  ;;  %v7304_v34 = vadd.f32 %v7261_v35, %v17685_v20  ;;  %v17688_v42 = vld [vmem:[#allocation40_spill] sm:$0xff]  ;;  %v17689_v52 = vld [vmem:[#allocation41_spill] sm:$0xff] }
 0x4c9   : > { %v7485_v39 = vpop.f32.mrf.mxu1  ;;  %v7610_v44 = vsub.f32 %v17686_v30, %v7578_v37  ;;  %v7307_v21 = vadd.f32 %v10817_v59, %v7018_v58  ;;  %v7305_v40 = vadd.f32 %v7264_v28, %v7016_v32  ;;  %v17690_v58 = vld [vmem:[#allocation47_spill] sm:$0xff] }
 0x4ca   : > { %v7579_v31 = vadd.f32 %v15906_v29, %v7540_v9  ;;  %v7538_v1 = vadd.f32 %v7485_v39, %v7301_v11  ;;  %10876 = vmatprep.mubr.msk.bf16.mxu0 %vm472_vm0, %v7628_v38  ;;  %v7608_v23 = vsub.f32 %v17688_v42, %v7576_v48  ;;  %v17692_v48 = vld [vmem:[#allocation44_spill] sm:$0xff] }
 0x4cb   : > { %v10850_v17 = vpop.f32.mrf.mxu1  ;;  %10877 = vmatmul.mubr.msk.bf16.gmra.mxu0 %vm472_vm0, %v7629_v43 }
 0x4cc   : > { %v7611_v60 = vsub.f32 %v17687_v50, %v7579_v31  ;;  %v7577_v62 = vadd.f32 %v15906_v29, %v7538_v1  ;;  %v7543_v54 = vadd.f32 %v10850_v17, %v7306_v5 }
 0x4cd   : > { %v7498_v33 = vpop.f32.mrf.mxu1 }
 0x4ce   : > { %v7631_v16 = vpack.c.bf16 %v7611_v60, %v7610_v44  ;;  %v7609_v41 = vsub.f32 %v17689_v52, %v7577_v62  ;;  %v7541_v8 = vadd.f32 %v7498_v33, %v7304_v34  ;;  %v7582_v35 = vadd.f32 %v15906_v29, %v7543_v54 }
 0x4cf   : > { %v10851_v57 = vpop.f32.mrf.mxu1  ;;  %v8065_v54 = vlaneseq }
 0x4d0   : > { %v7630_v43 = vpack.c.bf16 %v7609_v41, %v7608_v23  ;;  %v7544_v12 = vadd.f32 %v10851_v57, %v7307_v21  ;;  %v7580_v37 = vadd.f32 %v15906_v29, %v7541_v8  ;;  %v7614_v2 = vsub.f32 %v17690_v58, %v7582_v35 }
 0x4d1   : > { %v7501_v38 = vpop.f32.mrf.mxu1  ;;  %v8066_v21 = vand.u32 127, %v8065_v54  ;;  %v16098_v23 = vshrl.u32 %v8065_v54, 7  ;;  %v17697_v57 = vmov 0  ;;  %v16900_v35 = vmov 1.0  }
 0x4d2   : > { %v7583_v9 = vadd.f32 %v15906_v29, %v7544_v12  ;;  %v7542_v11 = vadd.f32 %v7501_v38, %v7305_v40  ;;  %10880 = vmatprep.mubr.msk.bf16.mxu0 %vm472_vm0, %v7630_v43  ;;  %v7612_v31 = vsub.f32 %v17692_v48, %v7580_v37 }
 0x4d3   : > { %10881 = vmatmul.mubr.msk.bf16.gmra.mxu0 %vm472_vm0, %v7631_v16  ;;  %v16082_v32 = vpop.f32.mrf.mxu1  ;;  %17696 = vst [vmem:[#allocation60_spill] sm:$0xff] %v16098_v23  ;;  %v8067_v16 = vadd.s32 128, %v8066_v21  ;;  %v8070_v41 = vmul.u32 64, %v16098_v23 }
 0x4d4   : > { %v7615_v14 = vsub.f32 %v17691_v6, %v7583_v9  ;;  %v7581_v39 = vadd.f32 %v15906_v29, %v7542_v11 }
 0x4d5   : > { %v16084_v17 = vpop.f32.mrf.mxu1  ;;  %vm8071_vm6 = vcmp.ge.s32.totalorder %v8066_v21, %v8070_v41  ;;  %v8073_v28 = vadd.s32 64, %v8070_v41  ;;  %vm8072_vm8 = vcmp.ge.s32.totalorder %v8067_v16, %v8070_v41 }
 0x4d6   : > { %v7633_v1 = vpack.c.bf16 %v7615_v14, %v7614_v2  ;;  %v7613_v5 = vsub.f32 %v17693_v3, %v7581_v39  ;;  %17694 = vst [vmem:[#allocation84_spill] sm:$0xff] %v16084_v17 }
 0x4d7   : > { %v16086_v20 = vpop.f32.mrf.mxu1  ;;  %vm8074_vm9 = vcmp.lt.s32.totalorder %v8066_v21, %v8073_v28  ;;  %vm8075_vm5 = vcmp.lt.s32.totalorder %v8067_v16, %v8073_v28 }
 0x4d8   : > { %v7632_v59 = vpack.c.bf16 %v7613_v5, %v7612_v31  ;;  %vm16103_vm7 = vmand %vm8071_vm6, %vm8074_vm9 }
 0x4d9   : > { %v16088_v34 = vpop.f32.mrf.mxu1  ;;  %v17698_v57 = vsel %vm16103_vm7, 4294967295, %v17697_v57  ;;  %vm8077_vm10 = vmand %vm8072_vm8, %vm8075_vm5 }
 0x4da   : > { %10884 = vmatprep.mubr.msk.bf16.mxu0 %vm472_vm0, %v7632_v59  ;;  %17695 = vst [vmem:[#allocation94_spill] sm:$0xff] %v16088_v34  ;;  %17699 = vst [vmem:[#allocation131_spill] sm:$0xff] %v17698_v57  ;;  %9550 = vmatprep.mubr.msk.f32.mxu1 %vm8077_vm10, %v16900_v35 }
 0x4db   : > { %10885 = vmatmul.mubr.msk.bf16.gmra.mxu0 %vm472_vm0, %v7633_v1  ;;  %v16090_v44 = vpop.f32.mrf.mxu1 }
 0x4dc   : > { %9548 = vmatprep.mubr.msk.f32.mxu0 %vm8077_vm10, %v16900_v35 }
 0x4dd   : > { %v16092_v29 = vpop.f32.mrf.mxu1 }
 0x4df   : > { %v10897_v60 = vpop.f32.mrf.mxu1 }
 0x4e1   : > { %v16094_v62 = vpop.f32.mrf.mxu1 }
 0x4e3   : > { %v16096_v33 = vpop.f32.mrf.mxu1 }
 0x4e5   : > { %v16101_v8 = vpop.f32.mrf.mxu1 }
 0x4e7   : > { %v16107_v43 = vpop.f32.mrf.mxu1 }
 0x4e9   : > { %v16111_v12 = vpop.f32.mrf.mxu1 }
 0x4eb   : > { %v10904_v40 = vpop.f32.mrf.mxu1 }
 0x4ed   : > { %v16113_v38 = vpop.f32.mrf.mxu1 }
 0x4ef   : > { %v10905_v37 = vpop.f32.mrf.mxu1 }
 0x4f1   : > { %v7950_v9 = vpop.f32.mrf.mxu1 }
 0x4f3   : > { %v16117_v2 = vpop.f32.mrf.mxu1 }
 0x4f5   : > { %v16123_v31 = vpop.f32.mrf.mxu1 }
 0x4f6   : > { %17701 = vst [vmem:[#allocation93_spill] sm:$0xff] %v16123_v31 }
 0x4f7   : > { %v16129_v59 = vpop.f32.mrf.mxu1 }
 0x4f9   : > { %v16135_v41 = vpop.f32.mrf.mxu1 }
 0x4fa   : > { %17703 = vst [vmem:[#allocation125_spill] sm:$0xff] %v16135_v41 }
 0x4fb   : > { %v16139_v6 = vpop.f32.mrf.mxu1 }
 0x4fd   : > { %v16143_v48 = vpop.f32.mrf.mxu1 }
 0x4ff   : > { %v16145_v52 = vpop.f32.mrf.mxu1 }
 0x563   : > { %v16115_v11 = vpop.f32.mrf.mxu0 }
 0x565   : > { %v16119_v14 = vpop.f32.mrf.mxu0 }
 0x566   : > { %17700 = vst [vmem:[#allocation118_spill] sm:$0xff] %v16119_v14  ;;  %v16164_v14 = vld [vmem:[%s16578_s7] ss:$0 sm:$0xff] }
 0x567   : > { %v16121_v39 = vpop.f32.mrf.mxu0 }
 0x569   : > { %v16125_v1 = vpop.f32.mrf.mxu0 }
 0x56a   : > { %17702 = vst [vmem:[#allocation65_spill] sm:$0xff] %v16125_v1 }
 0x56b   : > { %v16127_v5 = vpop.f32.mrf.mxu0 }
 0x56d   : > { %v16131_v54 = vpop.f32.mrf.mxu0 }
 0x56f   : > { %v10863_v21 = vpop.f32.mrf.mxu0 }
 0x570   : > { %v16133_v16 = vadd.f32 %v10897_v60, %v10863_v21  ;;  %v16147_v60 = vpop.f32.mrf.mxu1 }
 0x571   : > { %v16137_v28 = vpop.f32.mrf.mxu0 }
 0x572   : > { %v10916_v19 = vpop.f32.mrf.mxu1 }
 0x573   : > { %v10866_v35 = vpop.f32.mrf.mxu0 }
 0x574   : > { %v7995_v63 = vpop.f32.mrf.mxu1 }
 0x575   : > { %v16141_v58 = vpop.f32.mrf.mxu0 }
 0x576   : > { %v10917_v26 = vpop.f32.mrf.mxu1 }
 0x577   : > { %v10867_v3 = vpop.f32.mrf.mxu0 }
 0x578   : > { %v7998_v36 = vpop.f32.mrf.mxu1 }
 0x579   : > { %v7767_v50 = vpop.f32.mrf.mxu0 }
 0x57a   : > { %v10920_v4 = vpop.f32.mrf.mxu1 }
 0x57b   : > { %v10870_v30 = vpop.f32.mrf.mxu0 }
 0x57c   : > { %v8011_v47 = vpop.f32.mrf.mxu1  ;;  %v7956_v31 = vadd.f32 %v10904_v40, %v10870_v30 }
 0x57d   : > { %v7780_v42 = vpop.f32.mrf.mxu0 }
 0x57e   : > { %v10921_v15 = vpop.f32.mrf.mxu1 }
 0x57f   : > { %v10871_v13 = vpop.f32.mrf.mxu0 }
 0x580   : > { %v7959_v22 = vadd.f32 %v10905_v37, %v10871_v13  ;;  %v8014_v17 = vpop.f32.mrf.mxu1  ;;  %v17707_v37 = vld [vmem:[#allocation125_spill] sm:$0xff] }
 0x581   : > { %v7783_v21 = vpop.f32.mrf.mxu0 }
 0x582   : > { %v16170_v41 = vadd.f32 %v16164_v14, %v7959_v22  ;;  %v7943_v22 = vadd.f32 %v16107_v43, %v10867_v3  ;;  %v7916_v43 = vadd.f32 %v16092_v29, %v16131_v54  ;;  %v17712_v54 = vld [vmem:[#allocation118_spill] sm:$0xff] }
 0x583   : > { %v16149_v24 = vpop.f32.mrf.mxu0 }
 0x584   : > { %v7972_v29 = vadd.f32 %v16117_v2, %v16149_v24  ;;  %v16284_v40 = vadd.f32 %v16164_v14, %v7916_v43  ;;  %v17708_v2 = vld [vmem:[#allocation65_spill] sm:$0xff] }
 0x585   : > { %v16151_v0 = vpop.f32.mrf.mxu0 }
 0x586   : > { %17704 = vst [vmem:[#allocation62_spill] sm:$0xff] %v16151_v0 }
 0x587   : > { %v16153_v49 = vpop.f32.mrf.mxu0 }
 0x589   : > { %v16155_v18 = vpop.f32.mrf.mxu0 }
 0x58a   : > { %17705 = vst [vmem:[#allocation101_spill] sm:$0xff] %v16155_v18  ;;  %v7951_v18 = vadd.f32 %v7950_v9, %v7783_v21 }
 0x58b   : > { %v10878_v55 = vpop.f32.mrf.mxu0 }
 0x58c   : > { %v16187_v30 = vadd.f32 %v16164_v14, %v7951_v18 }
 0x58d   : > { %v16157_v27 = vpop.f32.mrf.mxu0 }
 0x58f   : > { %v10879_v25 = vpop.f32.mrf.mxu0 }
 0x591   : > { %v16159_v10 = vpop.f32.mrf.mxu0 }
 0x593   : > { %v10882_v53 = vpop.f32.mrf.mxu0 }
 0x595   : > { %v7828_v56 = vpop.f32.mrf.mxu0 }
 0x597   : > { %v10883_v45 = vpop.f32.mrf.mxu0 }
 0x599   : > { %v7831_v61 = vpop.f32.mrf.mxu0 }
 0x59a   : > { %v7999_v18 = vadd.f32 %v7998_v36, %v7831_v61  ;;  %v7932_v61 = vadd.f32 %v16101_v8, %v16141_v58  ;;  %v7991_v36 = vadd.f32 %v16145_v52, %v10879_v25  ;;  %v7924_v25 = vadd.f32 %v16090_v44, %v16127_v5 }
 0x59b   : > { %v10886_v46 = vpop.f32.mrf.mxu0  ;;  %v7983_v8 = vadd.f32 %v16147_v60, %v16159_v10 }
 0x59c   : > { %v8020_v23 = vadd.f32 %v10920_v4, %v10886_v46  ;;  %v7948_v46 = vadd.f32 %v16113_v38, %v7780_v42  ;;  %v8007_v4 = vadd.f32 %v10917_v26, %v10883_v45  ;;  %v7940_v45 = vadd.f32 %v16096_v33, %v10866_v35  ;;  %v17706_v38 = vld [vmem:[#allocation101_spill] sm:$0xff] }
 0x59d   : > { %v7844_v7 = vpop.f32.mrf.mxu0  ;;  %v16235_v52 = vadd.f32 %v16164_v14, %v7932_v61  ;;  %v16239_v58 = vadd.f32 %v16164_v14, %v7991_v36  ;;  %v16258_v10 = vadd.f32 %v16164_v14, %v7924_v25  ;;  %v16266_v35 = vadd.f32 %v16164_v14, %v7983_v8  ;;  %v17717_v36 = vld [vmem:[#allocation60_spill] sm:$0xff] }
 0x59e   : > { %v16173_v13 = vadd.f32 %v16164_v14, %v8020_v23  ;;  %v16196_v26 = vadd.f32 %v16164_v14, %v7948_v46  ;;  %v16200_v42 = vadd.f32 %v16164_v14, %v8007_v4  ;;  %v16213_v33 = vadd.f32 %v16164_v14, %v7940_v45 }
 0x59f   : > { %v10887_v51 = vpop.f32.mrf.mxu0  ;;  %v7967_v9 = vadd.f32 %v17707_v37, %v17706_v38  ;;  %v17714_v4 = vmov 1.0   ;;  %v11099_v45 = vmov 1966171168  }
 0x5a0   : > { %v8023_v57 = vadd.f32 %v10921_v15, %v10887_v51  ;;  %v8012_v15 = vadd.f32 %v8011_v47, %v7844_v7  ;;  %v16177_v51 = vadd.f32 %v16164_v14, %v7956_v31  ;;  %v8004_v7 = vadd.f32 %v10916_v19, %v10882_v53 }
 0x5a1   : > { %v7847_v0 = vpop.f32.mrf.mxu0  ;;  %v16204_v53 = vadd.f32 %v16164_v14, %v7943_v22  ;;  %v7935_v19 = vadd.f32 %v16111_v12, %v7767_v50  ;;  %v16220_v50 = vadd.f32 %v16164_v14, %v7999_v18  ;;  %v16312_v60 = vadd.f32 %v16164_v14, %v7967_v9  ;;  %v8339_v22 = vld [vmem:[%s16579_s8] sm:$0xff] }
 0x5a2   : > { %v16167_v34 = vadd.f32 %v16164_v14, %v8023_v57  ;;  %v8015_v1 = vadd.f32 %v8014_v17, %v7847_v0  ;;  %v16191_v47 = vadd.f32 %v16164_v14, %v8012_v15  ;;  %v16209_v3 = vadd.f32 %v16164_v14, %v8004_v7 }
 0x5a3   : > { %v7996_v17 = vadd.f32 %v7995_v63, %v7828_v56  ;;  %v16224_v23 = vadd.f32 %v16164_v14, %v7935_v19  ;;  %v7988_v56 = vadd.f32 %v16139_v6, %v10878_v55  ;;  %v16246_v55 = vadd.f32 %v16164_v14, %v16133_v16  ;;  %v17713_v16 = vld [vmem:[#allocation84_spill] sm:$0xff] }
 0x5a4   : > { %10145 = vmatprep.subr.mxu0 %v16167_v34  ;;  %v16182_v0 = vadd.f32 %v16164_v14, %v8015_v1  ;;  %v7919_v6 = vadd.f32 %v16094_v62, %v16137_v28  ;;  %v7980_v57 = vadd.f32 %v16143_v48, %v16157_v27  ;;  %v7975_v62 = vadd.f32 %v16129_v59, %v16153_v49  ;;  %v17711_v1 = vld [vmem:[#allocation93_spill] sm:$0xff] }
 0x5a5   : > { %10146 = vmatpush3.msra.mxu0 %v16170_v41  ;;  %v16229_v63 = vadd.f32 %v16164_v14, %v7996_v17  ;;  %v16252_v44 = vadd.f32 %v16164_v14, %v7988_v56  ;;  %v7911_v27 = vadd.f32 %v16086_v20, %v16121_v39  ;;  %v7908_v49 = vadd.f32 %v16082_v32, %v16115_v11  ;;  %v17709_v39 = vld [vmem:[#allocation94_spill] sm:$0xff] }
 0x5a6   : > { %10147 = vmatprep.subr.mxu0 %v16173_v13  ;;  %v16272_v48 = vadd.f32 %v16164_v14, %v7919_v6  ;;  %v16278_v12 = vadd.f32 %v16164_v14, %v7980_v57  ;;  %v16288_v20 = vadd.f32 %v16164_v14, %v7975_v62  ;;  %v7903_v31 = vadd.f32 %v17709_v39, %v17708_v2  ;;  %v17710_v11 = vld [vmem:[#allocation62_spill] sm:$0xff] }
 0x5a7   : > { %10148 = vmatpush3.msra.mxu0 %v16177_v51  ;;  %v16294_v24 = vadd.f32 %v16164_v14, %v7911_v27  ;;  %v16300_v32 = vadd.f32 %v16164_v14, %v7972_v29  ;;  %v7964_v5 = vadd.f32 %v17711_v1, %v17710_v11  ;;  %v16306_v59 = vadd.f32 %v16164_v14, %v7908_v49 }
 0x5a8   : > { %10149 = vmatprep.subr.mxu0 %v16182_v0  ;;  %v7900_v28 = vadd.f32 %v17713_v16, %v17712_v54  ;;  %v16316_v21 = vadd.f32 %v16164_v14, %v7903_v31  ;;  %v17716_v7 = vmov 0.0   ;;  %v8153_v18 = vunpack.c.l.s4 %v11099_v45 }
 0x5a9   : > { %10150 = vmatpush3.msra.mxu0 %v16187_v30  ;;  %v16320_v15 = vadd.f32 %v16164_v14, %v7964_v5  ;;  %v16341_v57 = vsub.s32 0, %v17717_v36 }
 0x5aa   : > { %10151 = vmatprep.subr.mxu0 %v16191_v47  ;;  %v16324_v46 = vadd.f32 %v16164_v14, %v7900_v28  ;;  %v8154_v19 = vunpack.c.0.s8 %v8153_v18 }
 0x5ab   : > { %10152 = vmatpush3.msra.mxu0 %v16196_v26 }
 0x5ac   : > { %10153 = vmatprep.subr.mxu0 %v16200_v42  ;;  %v16334_v14 = vsub.s32 %v8154_v19, %v17717_v36 }
 0x5ad   : > { %10154 = vmatpush3.msra.mxu0 %v16204_v53 }
 0x5ae   : > { %10155 = vmatprep.subr.mxu0 %v16209_v3 }
 0x5af   : > { %10156 = vmatpush3.msra.mxu0 %v16213_v33 }
 0x5b0   : > { %10157 = vmatprep.subr.mxu0 %v16220_v50 }
 0x5b1   : > { %10158 = vmatpush3.msra.mxu0 %v16224_v23 }
 0x5b2   : > { %10159 = vmatprep.subr.mxu0 %v16229_v63 }
 0x5b3   : > { %10160 = vmatpush3.msra.mxu0 %v16235_v52 }
 0x5b4   : > { %10161 = vmatprep.subr.mxu0 %v16239_v58 }
 0x5b5   : > { %10162 = vmatpush3.msra.mxu0 %v16246_v55 }
 0x5b6   : > { %10163 = vmatprep.subr.mxu0 %v16252_v44 }
 0x5b7   : > { %10164 = vmatpush3.msra.mxu0 %v16258_v10 }
 0x5b8   : > { %10165 = vmatprep.subr.mxu0 %v16266_v35 }
 0x5b9   : > { %10166 = vmatpush3.msra.mxu0 %v16272_v48 }
 0x5ba   : > { %10167 = vmatprep.subr.mxu0 %v16278_v12 }
 0x5bb   : > { %10168 = vmatpush3.msra.mxu0 %v16284_v40 }
 0x5bc   : > { %10169 = vmatprep.subr.mxu0 %v16288_v20 }
 0x5bd   : > { %10170 = vmatpush3.msra.mxu0 %v16294_v24 }
 0x5be   : > { %10171 = vmatprep.subr.mxu0 %v16300_v32 }
 0x5bf   : > { %10172 = vmatpush3.msra.mxu0 %v16306_v59 }
 0x5c0   : > { %10173 = vmatprep.subr.mxu0 %v16312_v60 }
 0x5c1   : > { %10174 = vmatpush3.msra.mxu0 %v16316_v21 }
 0x5c2   : > { %10175 = vmatprep.subr.mxu0 %v16320_v15 }
 0x5c3   : > { %10176 = vmatpush3.msra.mxu0 %v16324_v46 }
 0x5c4   : > { %9549 = vmatmul.mubr.msk.f32.vlgmr.msra.gmra.mxu0 %vm16103_vm7, %v17714_v4  ;;  %10922 = vmatprep.subr.mxu0 %v17716_v7 }
 0x5c5   : > { %10930 = vmatprep.mubr.msk.f32.mxu0 %vm11100_vm11, %v17716_v7 }
 0x684   : > { %v10177_v17 = vpop.f32.mrf.mxu0 }
 0x686   : > { %v10178_v61 = vpop.f32.mrf.mxu0 }
 0x687   : > { %v10179_v56 = vadd.f32 %v10178_v61, %v10177_v17 }
 0x689   : > { %v16336_v25 = vmul.f32 0.015625, %v10179_v56 }
 0x68b   : > { %v8158_v8 = vrot.slane %v16336_v25, %v16334_v14 }
 0x68d   : > { %v8159_v6 = vcombine.high %v8158_v8, %v8158_v8  ;;  %v8166_v2 = vrot.slane %v8158_v8, %v16334_v14 }
 0x68f   : > { %v8173_v43 = vrot.slane %v8159_v6, %v16334_v14  ;;  %v8174_v45 = vcombine.high %v8166_v2, %v8166_v2 }
 0x691   : > { %v8175_v62 = vcombine.high %v8173_v43, %v8173_v43  ;;  %v8183_v27 = vrot.slane %v8173_v43, %v16341_v57  ;;  %v8187_v43 = vrot.slane %v8174_v45, %v16341_v57 }
 0x693   : > { %v8191_v29 = vrot.slane %v8175_v62, %v16341_v57  ;;  %v8211_v49 = vsub.f32 %v16170_v41, %v8183_v27  ;;  %v8210_v9 = vsub.f32 %v16177_v51, %v8183_v27  ;;  %v8209_v1 = vsub.f32 %v16187_v30, %v8183_v27 }
 0x694   : > { %v8208_v28 = vsub.f32 %v16196_v26, %v8183_v27  ;;  %v8207_v61 = vsub.f32 %v16204_v53, %v8183_v27  ;;  %v8206_v6 = vsub.f32 %v16213_v33, %v8183_v27  ;;  %v8218_v45 = vsub.f32 %v16252_v44, %v8187_v43 }
 0x695   : > { %v8227_v38 = vsub.f32 %v16167_v34, %v8191_v29  ;;  %v8226_v37 = vsub.f32 %v16173_v13, %v8191_v29  ;;  %v8225_v31 = vsub.f32 %v16182_v0, %v8191_v29  ;;  %v8243_v11 = vmul.f32 %v8211_v49, %v8211_v49 }
 0x696   : > { %v8224_v54 = vsub.f32 %v16191_v47, %v8191_v29  ;;  %v8242_v16 = vmul.f32 %v8210_v9, %v8210_v9  ;;  %v8223_v19 = vsub.f32 %v16200_v42, %v8191_v29  ;;  %v8241_v17 = vmul.f32 %v8209_v1, %v8209_v1 }
 0x697   : > { %v8259_v39 = vmul.f32 %v8227_v38, %v8227_v38  ;;  %v8258_v5 = vmul.f32 %v8226_v37, %v8226_v37  ;;  %v8257_v18 = vmul.f32 %v8225_v31, %v8225_v31  ;;  %v8222_v56 = vsub.f32 %v16209_v3, %v8191_v29 }
 0x698   : > { %v8256_v36 = vmul.f32 %v8224_v54, %v8224_v54  ;;  %v8240_v8 = vmul.f32 %v8208_v28, %v8208_v28  ;;  %v8255_v62 = vmul.f32 %v8223_v19, %v8223_v19  ;;  %v8221_v49 = vsub.f32 %v16220_v50, %v8191_v29 }
 0x699   : > { %10180 = vmatprep.subr.mxu1 %v8259_v39  ;;  %v8179_v38 = vrot.slane %v8166_v2, %v16341_v57  ;;  %v8239_v37 = vmul.f32 %v8207_v61, %v8207_v61  ;;  %v8205_v9 = vsub.f32 %v16224_v23, %v8183_v27  ;;  %v8254_v39 = vmul.f32 %v8222_v56, %v8222_v56 }
 0x69a   : > { %10181 = vmatpush3.msra.mxu1 %v8243_v11  ;;  %v8220_v31 = vsub.f32 %v16229_v63, %v8191_v29  ;;  %v8238_v11 = vmul.f32 %v8206_v6, %v8206_v6  ;;  %v8204_v1 = vsub.f32 %v16235_v52, %v8183_v27  ;;  %v8219_v54 = vsub.f32 %v16239_v58, %v8187_v43 }
 0x69b   : > { %10182 = vmatprep.subr.mxu1 %v8258_v5  ;;  %v8253_v5 = vmul.f32 %v8221_v49, %v8221_v49  ;;  %v8203_v2 = vsub.f32 %v16246_v55, %v8179_v38  ;;  %v8202_v29 = vsub.f32 %v16258_v10, %v8179_v38  ;;  %v8217_v27 = vsub.f32 %v16266_v35, %v8187_v43 }
 0x69c   : > { %10183 = vmatpush3.msra.mxu1 %v8242_v16  ;;  %v8237_v16 = vmul.f32 %v8205_v9, %v8205_v9  ;;  %v8252_v28 = vmul.f32 %v8220_v31, %v8220_v31  ;;  %v8251_v19 = vmul.f32 %v8219_v54, %v8219_v54  ;;  %v8201_v61 = vsub.f32 %v16272_v48, %v8179_v38 }
 0x69d   : > { %10184 = vmatprep.subr.mxu1 %v8257_v18  ;;  %v8236_v18 = vmul.f32 %v8204_v1, %v8204_v1  ;;  %v8216_v56 = vsub.f32 %v16278_v12, %v8187_v43  ;;  %v8200_v6 = vsub.f32 %v16284_v40, %v8179_v38  ;;  %v8215_v49 = vsub.f32 %v16288_v20, %v8187_v43 }
 0x69e   : > { %10185 = vmatpush3.msra.mxu1 %v8241_v17  ;;  %v8235_v17 = vmul.f32 %v8203_v2, %v8203_v2  ;;  %v8199_v9 = vsub.f32 %v16294_v24, %v8179_v38  ;;  %v8214_v31 = vsub.f32 %v16300_v32, %v8187_v43  ;;  %v8198_v1 = vsub.f32 %v16306_v59, %v8179_v38 }
 0x69f   : > { %10186 = vmatprep.subr.mxu1 %v8256_v36  ;;  %v8250_v36 = vmul.f32 %v8218_v45, %v8218_v45  ;;  %v8213_v54 = vsub.f32 %v16312_v60, %v8187_v43  ;;  %v8197_v2 = vsub.f32 %v16316_v21, %v8179_v38  ;;  %v8212_v45 = vsub.f32 %v16320_v15, %v8187_v43  ;;  %v8342_v43 = vld [vmem:[%s16579_s8 + $0x18] sm:$0xff] }
 0x6a0   : > { %10187 = vmatpush3.msra.mxu1 %v8240_v8  ;;  %v8234_v8 = vmul.f32 %v8202_v29, %v8202_v29  ;;  %v8196_v29 = vsub.f32 %v16324_v46, %v8179_v38  ;;  %v8341_v38 = vld [vmem:[%s16579_s8 + $0x10] sm:$0xff]  ;;  %10923 = vmatpush3.msra.mxu0 %v8342_v43 }
 0x6a1   : > { %10188 = vmatprep.subr.mxu1 %v8255_v62  ;;  %v8249_v62 = vmul.f32 %v8217_v27, %v8217_v27  ;;  %v8229_v27 = vmul.f32 %v8197_v2, %v8197_v2  ;;  %10924 = vmatprep.subr.mxu0 %v17716_v7 }
 0x6a2   : > { %10189 = vmatpush3.msra.mxu1 %v8239_v37  ;;  %v8233_v37 = vmul.f32 %v8201_v61, %v8201_v61  ;;  %v8228_v61 = vmul.f32 %v8196_v29, %v8196_v29  ;;  %10925 = vmatpush3.msra.mxu0 %v8341_v38 }
 0x6a3   : > { %10190 = vmatprep.subr.mxu1 %v8254_v39  ;;  %v8248_v39 = vmul.f32 %v8216_v56, %v8216_v56  ;;  %10926 = vmatprep.subr.mxu0 %v17716_v7 }
 0x6a4   : > { %10191 = vmatpush3.msra.mxu1 %v8238_v11  ;;  %v8232_v11 = vmul.f32 %v8200_v6, %v8200_v6 }
 0x6a5   : > { %10192 = vmatprep.subr.mxu1 %v8253_v5  ;;  %v8247_v5 = vmul.f32 %v8215_v49, %v8215_v49 }
 0x6a6   : > { %10193 = vmatpush3.msra.mxu1 %v8237_v16  ;;  %v8231_v16 = vmul.f32 %v8199_v9, %v8199_v9 }
 0x6a7   : > { %10194 = vmatprep.subr.mxu1 %v8252_v28  ;;  %v8246_v28 = vmul.f32 %v8214_v31, %v8214_v31 }
 0x6a8   : > { %10195 = vmatpush3.msra.mxu1 %v8236_v18  ;;  %v8230_v18 = vmul.f32 %v8198_v1, %v8198_v1 }
 0x6a9   : > { %10196 = vmatprep.subr.mxu1 %v8251_v19  ;;  %v8245_v19 = vmul.f32 %v8213_v54, %v8213_v54 }
 0x6aa   : > { %10197 = vmatpush3.msra.mxu1 %v8235_v17  ;;  %v8244_v17 = vmul.f32 %v8212_v45, %v8212_v45 }
 0x6ab   : > { %10198 = vmatprep.subr.mxu1 %v8250_v36 }
 0x6ac   : > { %10199 = vmatpush3.msra.mxu1 %v8234_v8 }
 0x6ad   : > { %10200 = vmatprep.subr.mxu1 %v8249_v62 }
 0x6ae   : > { %10201 = vmatpush3.msra.mxu1 %v8233_v37 }
 0x6af   : > { %10202 = vmatprep.subr.mxu1 %v8248_v39 }
 0x6b0   : > { %10203 = vmatpush3.msra.mxu1 %v8232_v11  ;;  %v9552_v11 = vld [vmem:[%s16580_s9] ss:$0 sm:$0xff] }
 0x6b1   : > { %10204 = vmatprep.subr.mxu1 %v8247_v5 }
 0x6b2   : > { %10205 = vmatpush3.msra.mxu1 %v8231_v16 }
 0x6b3   : > { %10206 = vmatprep.subr.mxu1 %v8246_v28 }
 0x6b4   : > { %10207 = vmatpush3.msra.mxu1 %v8230_v18 }
 0x6b5   : > { %10208 = vmatprep.subr.mxu1 %v8245_v19 }
 0x6b6   : > { %10209 = vmatpush3.msra.mxu1 %v8229_v27 }
 0x6b7   : > { %10210 = vmatprep.subr.mxu1 %v8244_v17 }
 0x6b8   : > { %10211 = vmatpush3.msra.mxu1 %v8228_v61 }
 0x6b9   : > { %9551 = vmatmul.mubr.msk.f32.vlgmr.msra.gmra.mxu1 %vm16103_vm7, %v17714_v4  ;;  %10933 = vmatprep.subr.mxu1 %v17716_v7  ;;  %v8340_v4 = vld [vmem:[%s16579_s8 + $0x8] sm:$0xff] }
 0x6ba   : > { %10935 = vmatprep.mubr.msk.f32.mxu1 %vm11100_vm11, %v17716_v7  ;;  %10927 = vmatpush3.msra.mxu0 %v8340_v4 }
 0x6bb   : > { %10928 = vmatprep.subr.mxu0 %v17716_v7  ;;  %v8424_v7 = vld [vmem:[%s16581_s10] sm:$0x3] }
 0x6bc   : > { %10929 = vmatpush3.msra.mxu0 %v8339_v22  ;;  %10934 = vmatpush3.msk.msra.mxu1 %vm8436_vm14, %v8424_v7 }
 0x779   : > { %v10212_v36 = vpop.f32.mrf.mxu1 }
 0x77b   : > { %v10213_v56 = vpop.f32.mrf.mxu1 }
 0x77c   : > { %v10214_v8 = vadd.f32 %v10213_v56, %v10212_v36 }
 0x77e   : > { %v8330_v6 = vmul.f32 0.015625, %v10214_v8 }
 0x780   : > { %11013 = vrsqrt.f32 %v8330_v6  ;;  %vm8333_vm12 = vcmp.eq.f32.partialorder %v8330_v6, inf  ;;  %v8336_v37 = vand.u32 2147483648, %v8330_v6  ;;  %vm8335_vm13 = vcmp.eq.f32.partialorder %v8330_v6, 0.0 }
 0x78d   : > { %v11014_v62 = vpop.eup %11013 }
 0x78e   : > { %v8332_v49 = vmul.f32 %v11014_v62, %v8330_v6 }
 0x790   : > { %v8334_v9 = vsel %vm8333_vm12, %v8330_v6, %v8332_v49 }
 0x791   : > { %v8337_v39 = vsel %vm8335_vm13, %v8336_v37, %v8334_v9 }
 0x792   : > { %v8338_v31 = vadd.f32 %v8337_v39, %v16336_v25  ;;  %v9554_v25 = vld [vmem:[%s16582_s11] ss:$0 sm:$0xff] }
 0x794   : > { %10931 = vmatmul.mubr.msk.f32.vlgmr.msra.gmra.mxu0 %vm472_vm0, %v8338_v31 }
 0x854   : > { %v8419_v1 = vpop.f32.mrf.mxu0 }
 0x855   : > { %v8420_v5 = vadd.f32 %v9552_v11, %v8419_v1  ;;  %v17722_v1 = vld [vmem:[#allocation11_spill] sm:$0xff] }
 0x856   : > { %v10932_v54 = vpop.f32.mrf.mxu0 }
 0x857   : > { %v8423_v16 = vmax.f32 %v8420_v5, 0.0  ;;  %v17723_v54 = vld [vmem:[#allocation12_spill] sm:$0xff] }
 0x859   : > { %10936 = vmatmul.mubr.msk.f32.vlgmr.msra.gmra.mxu1 %vm8432_vm15, %v8423_v16  ;;  %v17724_v16 = vld [vmem:[#allocation13_spill] sm:$0xff] }
 0x919   : > { %v8506_v2 = vpop.f32.mrf.mxu1 }
 0x91a   : > { %v8507_v28 = vadd.f32 %v9554_v25, %v8506_v2  ;;  %v17725_v25 = vld [vmem:[#allocation14_spill] sm:$0xff]  ;;  %v17726_v2 = vld [vmem:[#allocation57_spill] sm:$0xff] }
 0x91b   : > { %v10937_v45 = vpop.f32.mrf.mxu1 }
 0x91c   : > { %v9557_v18 = vmul.f32 -1.442695, %v8507_v28  ;;  %v17727_v28 = vld [vmem:[#allocation15_spill] sm:$0xff] }
 0x91e   : > { %11015 = vpow2.f32 %v9557_v18  ;;  %v17728_v18 = vld [vmem:[#allocation17_spill] sm:$0xff] }
 0x92b   : > { %v11016_v29 = vpop.eup %11015 }
 0x92c   : > { %v8513_v19 = vadd.f32 1.0, %v11016_v29 }
 0x92e   : > { %11017 = vrcp.f32 %v8513_v19  ;;  %v17729_v19 = vld [vmem:[#allocation18_spill] sm:$0xff] }
 0x93b   : > { %v11018_v27 = vpop.eup %11017 }
 0x93c   : > { %v8523_v17 = vrot.slane %v11018_v27, %v16334_v14 }
 0x93e   : > { %v8524_v61 = vcombine.high %v8523_v17, %v8523_v17  ;;  %v8531_v43 = vrot.slane %v8523_v17, %v16334_v14  ;;  %v17730_v17 = vld [vmem:[#allocation19_spill] sm:$0xff] }
 0x940   : > { %v8538_v38 = vrot.slane %v8524_v61, %v16334_v14  ;;  %v8539_v4 = vcombine.high %v8531_v43, %v8531_v43  ;;  %v8544_v22 = vrot.slane %v8531_v43, %v16341_v57  ;;  %v17731_v43 = vld [vmem:[#allocation20_spill] sm:$0xff] }
 0x942   : > { %v8540_v36 = vcombine.high %v8538_v38, %v8538_v38  ;;  %v8548_v56 = vrot.slane %v8538_v38, %v16341_v57  ;;  %v8552_v8 = vrot.slane %v8539_v4, %v16341_v57  ;;  %v8561_v6 = vmul.f32 %v8544_v22, %v16324_v46  ;;  %v17732_v4 = vld [vmem:[#allocation21_spill] sm:$0xff] }
 0x943   : > { %v8562_v62 = vmul.f32 %v8544_v22, %v16316_v21  ;;  %v8563_v49 = vmul.f32 %v8544_v22, %v16306_v59  ;;  %v8564_v37 = vmul.f32 %v8544_v22, %v16294_v24  ;;  %v8565_v14 = vmul.f32 %v8544_v22, %v16284_v40 }
 0x944   : > { %v8556_v9 = vrot.slane %v8540_v36, %v16341_v57  ;;  %v8566_v39 = vmul.f32 %v8544_v22, %v16272_v48  ;;  %v8567_v31 = vmul.f32 %v8544_v22, %v16258_v10  ;;  %v8568_v7 = vmul.f32 %v8544_v22, %v16246_v55  ;;  %v17733_v36 = vld [vmem:[#allocation22_spill] sm:$0xff] }
 0x945   : > { %v8569_v46 = vmul.f32 %v8548_v56, %v16235_v52  ;;  %v8570_v11 = vmul.f32 %v8548_v56, %v16224_v23  ;;  %v8571_v21 = vmul.f32 %v8548_v56, %v16213_v33  ;;  %v8572_v59 = vmul.f32 %v8548_v56, %v16204_v53 }
 0x946   : > { %v8573_v24 = vmul.f32 %v8548_v56, %v16196_v26  ;;  %v8574_v40 = vmul.f32 %v8548_v56, %v16187_v30  ;;  %v8575_v57 = vmul.f32 %v8548_v56, %v16177_v51  ;;  %v8576_v48 = vmul.f32 %v8548_v56, %v16170_v41 }
 0x947   : > { %v8577_v10 = vmul.f32 %v8552_v8, %v16320_v15  ;;  %v8578_v55 = vmul.f32 %v8552_v8, %v16312_v60  ;;  %v8579_v52 = vmul.f32 %v8552_v8, %v16300_v32  ;;  %v8580_v23 = vmul.f32 %v8552_v8, %v16288_v20  ;;  %v17721_v20 = vld [vmem:[#allocation10_spill] sm:$0xff] }
 0x948   : > { %v8581_v33 = vmul.f32 %v8552_v8, %v16278_v12  ;;  %v8582_v53 = vmul.f32 %v8552_v8, %v16266_v35  ;;  %v8583_v26 = vmul.f32 %v8552_v8, %v16252_v44  ;;  %v8584_v30 = vmul.f32 %v8552_v8, %v16239_v58  ;;  %v17734_v8 = vld [vmem:[#allocation58_spill] sm:$0xff] }
 0x949   : > { %v8585_v51 = vmul.f32 %v8556_v9, %v16229_v63  ;;  %v8586_v41 = vmul.f32 %v8556_v9, %v16220_v50  ;;  %v8587_v15 = vmul.f32 %v8556_v9, %v16209_v3  ;;  %v8588_v60 = vmul.f32 %v8556_v9, %v16200_v42  ;;  %v17719_v63 = vld [vmem:[#allocation8_spill] sm:$0xff]  ;;  %v17720_v42 = vld [vmem:[#allocation9_spill] sm:$0xff] }
 0x94a   : > { %v8589_v12 = vmul.f32 %v8556_v9, %v16191_v47  ;;  %v8590_v44 = vmul.f32 %v8556_v9, %v16182_v0  ;;  %v8591_v58 = vmul.f32 %v8556_v9, %v16173_v13  ;;  %v8592_v50 = vmul.f32 %v8556_v9, %v16167_v34  ;;  %v17737_v9 = vld [vmem:[#allocation31_spill] sm:$0xff] }
 0x94b   : > { %v8593_v3 = vadd.f32 %v8561_v6, %v17719_v63  ;;  %v8594_v35 = vadd.f32 %v8562_v62, %v17720_v42  ;;  %v8595_v32 = vadd.f32 %v8563_v49, %v17721_v20  ;;  %v8596_v5 = vadd.f32 %v8564_v37, %v17722_v1  ;;  %v17735_v62 = vld [vmem:[#allocation23_spill] sm:$0xff]  ;;  %v17736_v37 = vld [vmem:[#allocation24_spill] sm:$0xff]  ;;  %v17748_v63 = vld [vmem:[#allocation45_spill] sm:$0xff] }
 0x94c   : > { %v8597_v47 = vadd.f32 %v8565_v14, %v17723_v54  ;;  %v8598_v0 = vadd.f32 %v8566_v39, %v17724_v16  ;;  %v8599_v13 = vadd.f32 %v8567_v31, %v17725_v25  ;;  %v8600_v34 = vadd.f32 %v8568_v7, %v17726_v2  ;;  %v17738_v31 = vld [vmem:[#allocation35_spill] sm:$0xff] }
 0x94d   : > { %v8601_v45 = vadd.f32 %v8569_v46, %v17727_v28  ;;  %v8602_v29 = vadd.f32 %v8570_v11, %v17728_v18  ;;  %v8603_v27 = vadd.f32 %v8571_v21, %v17729_v19  ;;  %v8604_v61 = vadd.f32 %v8572_v59, %v17730_v17  ;;  %8625 = vst.msk [vmem:[%s16456_s18] sm:$0xff] %vm472_vm0, %v8593_v3  ;;  %v17739_v46 = vld [vmem:[#allocation36_spill] sm:$0xff]  ;;  %v17740_v21 = vld [vmem:[#allocation38_spill] sm:$0xff]  ;;  %v17749_v3 = vld [vmem:[#allocation47_spill] sm:$0xff] }
 0x94e   : > { %8626 = vst.msk [vmem:[%s16456_s18 + $0x8] sm:$0xff] %vm472_vm0, %v8594_v35  ;;  %8627 = vst.msk [vmem:[%s16456_s18 + $0x10] sm:$0xff] %vm472_vm0, %v8595_v32  ;;  %v8605_v38 = vadd.f32 %v8573_v24, %v17731_v43  ;;  %v8606_v22 = vadd.f32 %v8574_v40, %v17732_v4  ;;  %v8607_v56 = vadd.f32 %v8575_v57, %v17733_v36  ;;  %v17741_v24 = vld [vmem:[#allocation39_spill] sm:$0xff] }
 0x94f   : > { %8628 = vst.msk [vmem:[%s16456_s18 + $0x18] sm:$0xff] %vm472_vm0, %v8596_v5  ;;  %v8608_v6 = vadd.f32 %v8576_v48, %v17734_v8  ;;  %8629 = vst.msk [vmem:[%s16456_s18 + $0x20] sm:$0xff] %vm472_vm0, %v8597_v47  ;;  %v8609_v49 = vadd.f32 %v8577_v10, %v17735_v62  ;;  %v8610_v14 = vadd.f32 %v8578_v55, %v17736_v37  ;;  %v17742_v57 = vld [vmem:[#allocation63_spill] sm:$0xff]  ;;  %v17743_v10 = vld [vmem:[#allocation40_spill] sm:$0xff] }
 0x950   : > { %8630 = vst.msk [vmem:[%s16456_s18 + $0x28] sm:$0xff] %vm472_vm0, %v8598_v0  ;;  %8631 = vst.msk [vmem:[%s16456_s18 + $0x30] sm:$0xff] %vm472_vm0, %v8599_v13  ;;  %v8611_v39 = vadd.f32 %v8579_v52, %v17737_v9  ;;  %v8612_v7 = vadd.f32 %v8580_v23, %v17738_v31  ;;  %v8613_v11 = vadd.f32 %v8581_v33, %v17739_v46  ;;  %v17744_v52 = vld [vmem:[#allocation41_spill] sm:$0xff]  ;;  %v17745_v33 = vld [vmem:[#allocation42_spill] sm:$0xff] }
 0x951   : > { %8632 = vst.msk [vmem:[%s16456_s18 + $0x38] sm:$0xff] %vm472_vm0, %v8600_v34  ;;  %8633 = vst.msk [vmem:[%s16456_s18 + $0x40] sm:$0xff] %vm472_vm0, %v8601_v45  ;;  %v8614_v59 = vadd.f32 %v8582_v53, %v17740_v21  ;;  %v8615_v40 = vadd.f32 %v8583_v26, %v17741_v24  ;;  %v8616_v48 = vadd.f32 %v8584_v30, %v17742_v57  ;;  %v17746_v26 = vld [vmem:[#allocation43_spill] sm:$0xff] }
 0x952   : > { %8634 = vst.msk [vmem:[%s16456_s18 + $0x48] sm:$0xff] %vm472_vm0, %v8602_v29  ;;  %8635 = vst.msk [vmem:[%s16456_s18 + $0x50] sm:$0xff] %vm472_vm0, %v8603_v27  ;;  %v8617_v55 = vadd.f32 %v8585_v51, %v17743_v10  ;;  %v8618_v23 = vadd.f32 %v8586_v41, %v17744_v52  ;;  %v8619_v53 = vadd.f32 %v8587_v15, %v17745_v33  ;;  %v17747_v51 = vld [vmem:[#allocation44_spill] sm:$0xff] }
 0x953   : > { %8636 = vst.msk [vmem:[%s16456_s18 + $0x58] sm:$0xff] %vm472_vm0, %v8604_v61  ;;  %8637 = vst.msk [vmem:[%s16456_s18 + $0x60] sm:$0xff] %vm472_vm0, %v8605_v38  ;;  %v8620_v30 = vadd.f32 %v8588_v60, %v17746_v26  ;;  %v8621_v41 = vadd.f32 %v8589_v12, %v17747_v51  ;;  %v8622_v15 = vadd.f32 %v8590_v44, %v17748_v63  ;;  %v17750_v60 = vld [vmem:[#allocation64_spill] sm:$0xff] }
 0x954   : > { %8638 = vst.msk [vmem:[%s16456_s18 + $0x68] sm:$0xff] %vm472_vm0, %v8606_v22  ;;  %8639 = vst.msk [vmem:[%s16456_s18 + $0x70] sm:$0xff] %vm472_vm0, %v8607_v56  ;;  %v8623_v42 = vadd.f32 %v8591_v58, %v17749_v3  ;;  %v8624_v35 = vadd.f32 %v8592_v50, %v17750_v60 }
 0x955   : > { %8640 = vst.msk [vmem:[%s16456_s18 + $0x78] sm:$0xff] %vm472_vm0, %v8608_v6  ;;  %8641 = vst.msk [vmem:[%s16456_s18 + $0x80] sm:$0xff] %vm472_vm0, %v8609_v49 }
 0x956   : > { %8642 = vst.msk [vmem:[%s16456_s18 + $0x88] sm:$0xff] %vm472_vm0, %v8610_v14  ;;  %8643 = vst.msk [vmem:[%s16456_s18 + $0x90] sm:$0xff] %vm472_vm0, %v8611_v39 }
 0x957   : > { %8644 = vst.msk [vmem:[%s16456_s18 + $0x98] sm:$0xff] %vm472_vm0, %v8612_v7  ;;  %8645 = vst.msk [vmem:[%s16456_s18 + $0xa0] sm:$0xff] %vm472_vm0, %v8613_v11 }
 0x958   : > { %8646 = vst.msk [vmem:[%s16456_s18 + $0xa8] sm:$0xff] %vm472_vm0, %v8614_v59  ;;  %8647 = vst.msk [vmem:[%s16456_s18 + $0xb0] sm:$0xff] %vm472_vm0, %v8615_v40 }
 0x959   : > { %8648 = vst.msk [vmem:[%s16456_s18 + $0xb8] sm:$0xff] %vm472_vm0, %v8616_v48  ;;  %8649 = vst.msk [vmem:[%s16456_s18 + $0xc0] sm:$0xff] %vm472_vm0, %v8617_v55 }
 0x95a   : > { %8650 = vst.msk [vmem:[%s16456_s18 + $0xc8] sm:$0xff] %vm472_vm0, %v8618_v23  ;;  %8651 = vst.msk [vmem:[%s16456_s18 + $0xd0] sm:$0xff] %vm472_vm0, %v8619_v53 }
 0x95b   : > { %8652 = vst.msk [vmem:[%s16456_s18 + $0xd8] sm:$0xff] %vm472_vm0, %v8620_v30  ;;  %8653 = vst.msk [vmem:[%s16456_s18 + $0xe0] sm:$0xff] %vm472_vm0, %v8621_v41 }
 0x95c   : > { %8654 = vst.msk [vmem:[%s16456_s18 + $0xe8] sm:$0xff] %vm472_vm0, %v8622_v15  ;;  %8655 = vst.msk [vmem:[%s16456_s18 + $0xf0] sm:$0xff] %vm472_vm0, %v8623_v42 }
 0x95d   : > { %8656 = vst.msk [vmem:[%s16456_s18 + $0xf8] sm:$0xff] %vm472_vm0, %v8624_v35 }
 0x95e PF: > { %s17751_s20 = sld [smem:[#allocation7_spill]]  ;;  %p22_p9 = scmp.ge.s32.totalorder %s11186_s26, 4  }
 0x95f   : > { %s17752_s21 = smov %s11084_s22  ;;  %s17753_s22 = smov %s11088_s23 }
 0x960   : > { %s17755_s24 = smov %s11186_s26  ;;  %24 = sbr.rel (!%p22_p9) target bundleno = 3 (0x3), region = 112 }
 0x964   : > { %s17754_s23 = smov %s17751_s20 }
 0x965   :  { %8681 = vsyncpa [#allocation5], 1 }
 0x966   :  { %8683 = vsyncpa [#allocation5 + $0x1], 1 }

</bundles_post_ra>
